<compile_context>
chip_gen: v7x
topology: tpu7x:2x2x1
jax: 0.10.0
libtpu: 0.0.40
codegen_flags: <defaults>
</compile_context>

<pallas_src>
import functools

import numpy as np

import jax
import jax.numpy as jnp
from jax import lax
from jax.experimental import pallas as pl
from jax.experimental.pallas import tpu as pltpu  # noqa: F401  (TPU backend)

BF16 = jnp.bfloat16
F32 = jnp.float32

# The 4 output phases of a 4x4 / stride-2 transpose conv and the 4 kernel taps
# that can contribute to each phase.
_PHASE_TAPS = []
for _pr in range(2):
    for _ps in range(2):
        _khs = (1, 3) if _pr == 0 else (0, 2)
        _kws = (1, 3) if _ps == 0 else (0, 2)
        _PHASE_TAPS.append([(_kh, _kw) for _kh in _khs for _kw in _kws])


# ------------------- constant 0/1 gather matrices (numpy) -------------------

def _enc_gathers(B, Hi, Wi):
    """(17, B*Ho*Wo, B*Hi*Wi): 16 taps of conv4x4/s2/p1 + the 1x1/s2 residual."""
    Ho, Wo = Hi // 2, Wi // 2
    g = np.zeros((17, B * Ho * Wo, B * Hi * Wi), np.float32)
    for b in range(B):
        for i in range(Ho):
            for j in range(Wo):
                mo = (b * Ho + i) * Wo + j
                for dy in range(4):
                    for dx in range(4):
                        r, c = 2 * i - 1 + dy, 2 * j - 1 + dx
                        if 0 <= r < Hi and 0 <= c < Wi:
                            g[dy * 4 + dx, mo, (b * Hi + r) * Wi + c] = 1.0
                g[16, mo, (b * Hi + 2 * i) * Wi + 2 * j] = 1.0
    return g


def _dec_gathers(B, Hi, Wi):
    """(17, B*2Hi*2Wi, B*Hi*Wi): 16 taps of convT4x4/s2/p1 + 1x1/s2/op1 residual."""
    Ho, Wo = 2 * Hi, 2 * Wi
    g = np.zeros((17, B * Ho * Wo, B * Hi * Wi), np.float32)
    for b in range(B):
        for r in range(Ho):
            for s in range(Wo):
                mo = (b * Ho + r) * Wo + s
                for kh in range(4):
                    for kw in range(4):
                        if (r + 1 - kh) % 2 or (s + 1 - kw) % 2:
                            continue
                        h, w = (r + 1 - kh) // 2, (s + 1 - kw) // 2
                        if 0 <= h < Hi and 0 <= w < Wi:
                            g[kh * 4 + kw, mo, (b * Hi + h) * Wi + w] = 1.0
                if r % 2 == 0 and s % 2 == 0:
                    g[16, mo, (b * Hi + r // 2) * Wi + s // 2] = 1.0
    return g


def _final_gathers_T(B, Hi, Wi):
    """Transposed per-(phase, tap) gathers for the final convT: (16, Mi, Mi)."""
    Mi = B * Hi * Wi
    g = np.zeros((16, Mi, Mi), np.float32)
    for p, taps in enumerate(_PHASE_TAPS):
        pr, ps = p // 2, p % 2
        for q, (kh, kw) in enumerate(taps):
            for b in range(B):
                for i in range(Hi):
                    for j in range(Wi):
                        h = (2 * i + pr + 1 - kh) // 2
                        w = (2 * j + ps + 1 - kw) // 2
                        if 0 <= h < Hi and 0 <= w < Wi:
                            g[p * 4 + q, (b * Hi + h) * Wi + w,
                              (b * Hi + i) * Wi + j] = 1.0
    return g


# -------------------------- weight pre-transforms ---------------------------

def _conv_w(w):      # torch Conv2d (Cout,Cin,kh,kw) -> (kh*kw*Cin, Cout)
    co, ci, kh, kw = w.shape
    return jnp.transpose(w, (2, 3, 1, 0)).reshape(kh * kw * ci, co)


def _convT_w(w):     # torch ConvTranspose2d (Cin,Cout,kh,kw) -> (kh*kw*Cin, Cout)
    ci, co, kh, kw = w.shape
    return jnp.transpose(w, (2, 3, 0, 1)).reshape(kh * kw * ci, co)


def prepare_operands(params, *, batch, image_size, num_layers, latent_dim):
    """Pre-transform weights + build constant gather matrices (ONCE, outside jit)."""
    assert num_layers == 3, "fused kernel is specialised for num_layers=3"
    B = batch
    fs = image_size // 2 ** num_layers
    ops = []

    # encoder block 1 (its im2col patches / residual input are built in glue)
    blk = params["enc_blocks"][0]
    ops += [_conv_w(blk["wc"]).astype(BF16), blk["bc"].reshape(1, -1).astype(F32),
            blk["wr"][:, :, 0, 0].T.astype(BF16), blk["br"].reshape(1, -1).astype(F32)]

    # encoder blocks 2..num_layers: in-kernel gather matmuls
    hi = image_size // 2
    for blk in params["enc_blocks"][1:]:
        ops += [jnp.asarray(_enc_gathers(B, hi, hi), BF16),
                _conv_w(blk["wc"]).astype(BF16), blk["bc"].reshape(1, -1).astype(F32),
                blk["wr"][:, :, 0, 0].T.astype(BF16), blk["br"].reshape(1, -1).astype(F32)]
        hi //= 2

    # encoder FC: torch-NCHW flatten folded into per-spatial-position weights
    C = params["enc_blocks"][-1]["wc"].shape[0]
    S = fs * fs
    sflat = np.zeros((S, B, B * S), np.float32)
    for s in range(S):
        for b in range(B):
            sflat[s, b, b * S + s] = 1.0
    we = params["enc_fc_w"].reshape(latent_dim, C, S)               # [l, c, s]
    ops += [jnp.asarray(sflat, BF16),
            jnp.transpose(we, (2, 1, 0)).astype(BF16),               # (S, C, latent)
            params["enc_fc_b"].reshape(1, -1).astype(F32)]

    # decoder FC + unflatten (scatter matmuls)
    scat = np.transpose(sflat, (0, 2, 1))                            # (S, B*S, B)
    wd = params["dec_fc_w"].reshape(C, S, latent_dim)                # [c, s, l]
    bd = params["dec_fc_b"].reshape(C, S)                            # [c, s]
    ops += [jnp.asarray(scat, BF16),
            jnp.transpose(wd, (1, 2, 0)).astype(BF16),               # (S, latent, C)
            jnp.transpose(bd, (1, 0)).reshape(S, 1, C).astype(F32)]

    # decoder transpose-conv resblocks
    hi = fs
    for blk in params["dec_blocks"]:
        ops += [jnp.asarray(_dec_gathers(B, hi, hi), BF16),
                _convT_w(blk["wc"]).astype(BF16), blk["bc"].reshape(1, -1).astype(F32),
                blk["wr"][:, :, 0, 0].astype(BF16), blk["br"].reshape(1, -1).astype(F32)]
        hi *= 2

    # final convT, computed transposed (lane-dense output)
    wf = params["final_w"]                                           # (Cin, Cout, 4, 4)
    ops += [jnp.asarray(_final_gathers_T(B, hi, hi), BF16),
            jnp.transpose(wf, (2, 3, 1, 0)).reshape(16, wf.shape[1], wf.shape[0]).astype(BF16),
            params["final_b"].reshape(-1, 1).astype(F32)]
    return tuple(ops)


# ------------------------------ fused kernel --------------------------------

def _fused_kernel(n_enc, n_dec, *refs):
    recon_ref, latent_ref = refs[-2], refs[-1]
    it = iter(refs[:-2])

    def nxt():
        return next(it)

    def mm(a, b):
        return jnp.dot(a, b, preferred_element_type=F32)

    def resblock(x, g_ref, wc_ref, bc_ref, wr_ref, br_ref):
        """relu(conv/convT(x) + b) + (residual(x) + b_res), taps via 0/1 matmuls."""
        xb = x.astype(BF16)
        cin = xb.shape[1]
        conv = None
        for t in range(16):
            tap = mm(g_ref[t], xb).astype(BF16)                      # (Mo, Cin)
            part = mm(tap, wc_ref[t * cin:(t + 1) * cin, :])         # (Mo, Cout)
            conv = part if conv is None else conv + part
        conv = conv + bc_ref[...]
        res = mm(mm(g_ref[16], xb).astype(BF16), wr_ref[...]) + br_ref[...]
        return jnp.maximum(conv, 0.0) + res                          # f32

    # ------------------------------ encoder ---------------------------------
    p1, r1 = nxt(), nxt()
    wc1, bc1, wr1, br1 = nxt(), nxt(), nxt(), nxt()
    y = (jnp.maximum(mm(p1[...], wc1[...]) + bc1[...], 0.0)
         + mm(r1[...], wr1[...]) + br1[...])
    for _ in range(n_enc - 1):
        y = resblock(y, nxt(), nxt(), nxt(), nxt(), nxt())

    # flatten (torch NCHW order, folded into the weights) + encoder FC
    sflat, we, be = nxt(), nxt(), nxt()
    S = sflat.shape[0]
    yb = y.astype(BF16)
    lat = be[...]
    for s in range(S):
        lat = lat + mm(mm(sflat[s], yb).astype(BF16), we[s])
    latent_ref[...] = lat.astype(latent_ref.dtype)

    # decoder FC + ReLU + unflatten (scatter matmuls)
    scat, wd, bd = nxt(), nxt(), nxt()
    lb = lat.astype(BF16)
    x = None
    for s in range(S):
        h = jnp.maximum(mm(lb, wd[s]) + bd[s], 0.0)                  # (B, C)
        t = mm(scat[s], h.astype(BF16))                              # (B*S, C)
        x = t if x is None else x + t

    # decoder transpose-conv resblocks
    for _ in range(n_dec):
        x = resblock(x, nxt(), nxt(), nxt(), nxt(), nxt())

    # final convT 4x4/s2/p1, one output phase at a time, lane-dense, + sigmoid
    gtf, wft, bfin = nxt(), nxt(), nxt()
    mi = x.shape[0]
    xT = x.T.astype(BF16)                                            # (Cin, Mi)
    for p, taps in enumerate(_PHASE_TAPS):
        acc = None
        for q, (kh, kw) in enumerate(taps):
            u = mm(xT, gtf[p * 4 + q]).astype(BF16)                  # (Cin, Mi)
            part = mm(wft[kh * 4 + kw], u)                           # (Cout, Mi)
            acc = part if acc is None else acc + part
        recon_ref[:, p * mi:(p + 1) * mi] = jax.nn.sigmoid(acc + bfin[...])


# ------------------------------- wrapper -------------------------------------

def _full_spec(shape):
    shape = tuple(shape)
    return pl.BlockSpec(shape, lambda *_: (0,) * len(shape))


@functools.partial(jax.jit, static_argnames=("n_enc", "n_dec"))
def autoencoder_forward(x_nchw, ops, *, n_enc, n_dec):
    B, cin, H, W = x_nchw.shape
    Ho, Wo = H // 2, W // 2

    # glue: first-layer im2col on the external input (everything downstream of
    # the first conv stays inside the fused kernel / VMEM)
    x = jnp.transpose(x_nchw, (0, 2, 3, 1))                          # NHWC
    xp = jnp.pad(x, ((0, 0), (1, 1), (1, 1), (0, 0)))
    cols = [xp[:, dy:dy + 2 * Ho:2, dx:dx + 2 * Wo:2, :]
            for dy in range(4) for dx in range(4)]
    p1 = jnp.stack(cols, axis=3).reshape(B * Ho * Wo, 16 * cin).astype(BF16)
    r1 = x[:, ::2, ::2, :].reshape(B * Ho * Wo, cin).astype(BF16)

    latent_dim = ops[4 + 5 * (n_enc - 1) + 2].shape[1]
    cout = ops[-1].shape[0]

    args = (p1, r1) + tuple(ops)
    out_shape = (jax.ShapeDtypeStruct((cout, B * H * W), F32),
                 jax.ShapeDtypeStruct((B, latent_dim), F32))
    recon_t, latent = pl.pallas_call(
        functools.partial(_fused_kernel, n_enc, n_dec),
        out_shape=out_shape,
        in_specs=[_full_spec(a.shape) for a in args],
        out_specs=[_full_spec((cout, B * H * W)), _full_spec((B, latent_dim))],
    )(*args)

    # kernel writes reconstruction as a lane-dense (Cout, B*H*W) slab whose
    # columns are ordered (phase_r, phase_c, b, i, j); de-interleave here.
    hi, wi = H // 2, W // 2
    recon = (recon_t.reshape(cout, 2, 2, B, hi, wi)
             .transpose(3, 0, 4, 1, 5, 2)
             .reshape(B, cout, H, W))
    return recon, latent


# ----------------------------- parameter init -------------------------------

def init_params(key, input_channels=3, output_channels=3, image_size=16,
                num_layers=3, latent_dim=32):
    assert image_size % 2 ** num_layers == 0
    final_size = image_size // 2 ** num_layers
    keys = iter(jax.random.split(key, 64))

    def u(shape, fan_in):
        bound = 1.0 / float(fan_in) ** 0.5
        return jax.random.uniform(next(keys), shape, jnp.float32, -bound, bound)

    params = {"enc_blocks": [], "dec_blocks": []}
    channels, cur = 32, input_channels
    for _ in range(num_layers):
        params["enc_blocks"].append({
            "wc": u((channels, cur, 4, 4), cur * 16), "bc": u((channels,), cur * 16),
            "wr": u((channels, cur, 1, 1), cur),      "br": u((channels,), cur),
        })
        cur, channels = channels, channels * 2
    feat = cur * final_size * final_size
    params["enc_fc_w"] = u((latent_dim, feat), feat)
    params["enc_fc_b"] = u((latent_dim,), feat)
    params["dec_fc_w"] = u((feat, latent_dim), latent_dim)
    params["dec_fc_b"] = u((feat,), latent_dim)
    for _ in range(num_layers - 1):
        ch = cur // 2
        params["dec_blocks"].append({
            "wc": u((cur, ch, 4, 4), cur * 16), "bc": u((ch,), cur * 16),
            "wr": u((cur, ch, 1, 1), cur),      "br": u((ch,), cur),
        })
        cur = ch
    params["final_w"] = u((cur, output_channels, 4, 4), cur * 16)
    params["final_b"] = u((output_channels,), cur * 16)
    return params


# ---------------------- plain-XLA reference (sanity check) -------------------

def _torch_conv(x, w, b, stride, pad):
    y = lax.conv_general_dilated(x, w, (stride, stride), ((pad, pad), (pad, pad)),
                                 dimension_numbers=("NCHW", "OIHW", "NCHW"))
    return y + b.reshape(1, -1, 1, 1)


def _torch_convT(x, w, b, stride, pad, outpad):
    wf = jnp.flip(w, (2, 3)).transpose(1, 0, 2, 3)
    k = w.shape[2]
    lo, hi = k - 1 - pad, k - 1 - pad + outpad
    y = lax.conv_general_dilated(x, wf, (1, 1), ((lo, hi), (lo, hi)),
                                 lhs_dilation=(stride, stride),
                                 dimension_numbers=("NCHW", "OIHW", "NCHW"))
    return y + b.reshape(1, -1, 1, 1)


def reference_forward(params, x):
    y = x
    for blk in params["enc_blocks"]:
        idn = _torch_conv(y, blk["wr"], blk["br"], 2, 0)
        y = jnp.maximum(_torch_conv(y, blk["wc"], blk["bc"], 2, 1), 0.0) + idn
    B = y.shape[0]
    flat = y.reshape(B, -1)
    latent = flat @ params["enc_fc_w"].T + params["enc_fc_b"]
    h = jnp.maximum(latent @ params["dec_fc_w"].T + params["dec_fc_b"], 0.0)
    C = params["dec_blocks"][0]["wc"].shape[0]
    fs = int(np.sqrt(h.shape[1] // C))
    y = h.reshape(B, C, fs, fs)
    for blk in params["dec_blocks"]:
        idn = _torch_convT(y, blk["wr"], blk["br"], 2, 0, 1)
        y = jnp.maximum(_torch_convT(y, blk["wc"], blk["bc"], 2, 1, 0), 0.0) + idn
    y = _torch_convT(y, params["final_w"], params["final_b"], 2, 1, 0)
    return jax.nn.sigmoid(y), latent


# ---------------------------------- main -------------------------------------

if __name__ == "__main__":
    key = jax.random.PRNGKey(0)
    pkey, xkey = jax.random.split(key)
    B, IMG, LAYERS, LATENT = 2, 16, 3, 32

    params = init_params(pkey, input_channels=3, output_channels=3,
                         image_size=IMG, num_layers=LAYERS, latent_dim=LATENT)
    x = jax.random.normal(xkey, (B, 3, IMG, IMG), jnp.float32)

    # all weight transforms / gather constants built once, outside jit
    ops = prepare_operands(params, batch=B, image_size=IMG,
                           num_layers=LAYERS, latent_dim=LATENT)

    recon, latent = autoencoder_forward(x, ops, n_enc=LAYERS, n_dec=LAYERS - 1)
    jax.block_until_ready((recon, latent))

    assert recon.shape == (B, 3, IMG, IMG), recon.shape
    assert latent.shape == (B, LATENT), latent.shape
    assert bool(jnp.all(jnp.isfinite(recon))) and bool(jnp.all(jnp.isfinite(latent)))
    assert bool(jnp.all(recon >= 0.0)) and bool(jnp.all(recon <= 1.0))

    # cross-check against a plain-XLA reference of the PyTorch module
    recon_r, latent_r = jax.jit(reference_forward)(params, x)
    lat_err = float(jnp.max(jnp.abs(latent - latent_r)))
    rec_err = float(jnp.max(jnp.abs(recon - recon_r)))
    assert lat_err < 0.15 and rec_err < 0.05, (lat_err, rec_err)

    print("KERNEL_OK")
</pallas_src>

<mosaic_0001>
module attributes {stable_mosaic.version = 11 : i64} {
  func.func @_fused_kernel(%arg0: memref<128x48xbf16, #tpu.memory_space<vmem>>, %arg1: memref<128x3xbf16, #tpu.memory_space<vmem>>, %arg2: memref<48x32xbf16, #tpu.memory_space<vmem>>, %arg3: memref<1x32xf32, #tpu.memory_space<vmem>>, %arg4: memref<3x32xbf16, #tpu.memory_space<vmem>>, %arg5: memref<1x32xf32, #tpu.memory_space<vmem>>, %arg6: memref<17x32x128xbf16, #tpu.memory_space<vmem>>, %arg7: memref<512x64xbf16, #tpu.memory_space<vmem>>, %arg8: memref<1x64xf32, #tpu.memory_space<vmem>>, %arg9: memref<32x64xbf16, #tpu.memory_space<vmem>>, %arg10: memref<1x64xf32, #tpu.memory_space<vmem>>, %arg11: memref<17x8x32xbf16, #tpu.memory_space<vmem>>, %arg12: memref<1024x128xbf16, #tpu.memory_space<vmem>>, %arg13: memref<1x128xf32, #tpu.memory_space<vmem>>, %arg14: memref<64x128xbf16, #tpu.memory_space<vmem>>, %arg15: memref<1x128xf32, #tpu.memory_space<vmem>>, %arg16: memref<4x2x8xbf16, #tpu.memory_space<vmem>>, %arg17: memref<4x128x32xbf16, #tpu.memory_space<vmem>>, %arg18: memref<1x32xf32, #tpu.memory_space<vmem>>, %arg19: memref<4x8x2xbf16, #tpu.memory_space<vmem>>, %arg20: memref<4x32x128xbf16, #tpu.memory_space<vmem>>, %arg21: memref<4x1x128xf32, #tpu.memory_space<vmem>>, %arg22: memref<17x32x8xbf16, #tpu.memory_space<vmem>>, %arg23: memref<2048x64xbf16, #tpu.memory_space<vmem>>, %arg24: memref<1x64xf32, #tpu.memory_space<vmem>>, %arg25: memref<128x64xbf16, #tpu.memory_space<vmem>>, %arg26: memref<1x64xf32, #tpu.memory_space<vmem>>, %arg27: memref<17x128x32xbf16, #tpu.memory_space<vmem>>, %arg28: memref<1024x32xbf16, #tpu.memory_space<vmem>>, %arg29: memref<1x32xf32, #tpu.memory_space<vmem>>, %arg30: memref<64x32xbf16, #tpu.memory_space<vmem>>, %arg31: memref<1x32xf32, #tpu.memory_space<vmem>>, %arg32: memref<16x128x128xbf16, #tpu.memory_space<vmem>>, %arg33: memref<16x3x32xbf16, #tpu.memory_space<vmem>>, %arg34: memref<3x1xf32, #tpu.memory_space<vmem>>, %arg35: memref<3x512xf32, #tpu.memory_space<vmem>>, %arg36: memref<2x32xf32, #tpu.memory_space<vmem>>) attributes {dimension_semantics = [], scalar_prefetch = 0 : i64, scratch_operands = 0 : i64, tpu.core_type = #tpu.core_type<tc>} {
    %c0 = arith.constant 0 : index
    %c0_0 = arith.constant 0 : index
    %0 = vector.load %arg0[%c0, %c0_0] : memref<128x48xbf16, #tpu.memory_space<vmem>>, vector<128x48xbf16>
    %c0_1 = arith.constant 0 : index
    %c0_2 = arith.constant 0 : index
    %1 = vector.load %arg2[%c0_1, %c0_2] : memref<48x32xbf16, #tpu.memory_space<vmem>>, vector<48x32xbf16>
    %cst = arith.constant dense<0.000000e+00> : vector<128x32xf32>
    %2 = tpu.matmul %0, %1, %cst {dimension_numbers = #tpu.dot_dimension_numbers<[1], [0], [0], [1], [0, 0, 1, 1], [], []>} : vector<128x48xbf16>, vector<48x32xbf16>, vector<128x32xf32> -> vector<128x32xf32>
    %c0_3 = arith.constant 0 : index
    %c0_4 = arith.constant 0 : index
    %3 = vector.load %arg3[%c0_3, %c0_4] : memref<1x32xf32, #tpu.memory_space<vmem>>, vector<1x32xf32>
    %4 = vector.broadcast %3 : vector<1x32xf32> to vector<128x32xf32>
    %5 = arith.addf %2, %4 : vector<128x32xf32>
    %cst_5 = arith.constant 0.000000e+00 : f32
    %6 = vector.broadcast %cst_5 : f32 to vector<128x32xf32>
    %7 = arith.maximumf %5, %6 : vector<128x32xf32>
    %c0_6 = arith.constant 0 : index
    %c0_7 = arith.constant 0 : index
    %8 = vector.load %arg1[%c0_6, %c0_7] : memref<128x3xbf16, #tpu.memory_space<vmem>>, vector<128x3xbf16>
    %c0_8 = arith.constant 0 : index
    %c0_9 = arith.constant 0 : index
    %9 = vector.load %arg4[%c0_8, %c0_9] : memref<3x32xbf16, #tpu.memory_space<vmem>>, vector<3x32xbf16>
    %cst_10 = arith.constant dense<0.000000e+00> : vector<128x32xf32>
    %10 = tpu.matmul %8, %9, %cst_10 {dimension_numbers = #tpu.dot_dimension_numbers<[1], [0], [0], [1], [0, 0, 1, 1], [], []>} : vector<128x3xbf16>, vector<3x32xbf16>, vector<128x32xf32> -> vector<128x32xf32>
    %11 = arith.addf %7, %10 : vector<128x32xf32>
    %c0_11 = arith.constant 0 : index
    %c0_12 = arith.constant 0 : index
    %12 = vector.load %arg5[%c0_11, %c0_12] : memref<1x32xf32, #tpu.memory_space<vmem>>, vector<1x32xf32>
    %13 = vector.broadcast %12 : vector<1x32xf32> to vector<128x32xf32>
    %14 = arith.addf %11, %13 : vector<128x32xf32>
    %15 = arith.truncf %14 : vector<128x32xf32> to vector<128x32xbf16>
    %c0_13 = arith.constant 0 : index
    %c0_14 = arith.constant 0 : index
    %c0_15 = arith.constant 0 : index
    %16 = vector.load %arg6[%c0_13, %c0_14, %c0_15] : memref<17x32x128xbf16, #tpu.memory_space<vmem>>, vector<1x32x128xbf16>
    %17 = vector.shape_cast %16 : vector<1x32x128xbf16> to vector<32x128xbf16>
    %cst_16 = arith.constant dense<0.000000e+00> : vector<32x32xf32>
    %18 = tpu.matmul %17, %15, %cst_16 {dimension_numbers = #tpu.dot_dimension_numbers<[1], [0], [0], [1], [0, 0, 1, 1], [], []>} : vector<32x128xbf16>, vector<128x32xbf16>, vector<32x32xf32> -> vector<32x32xf32>
    %19 = arith.truncf %18 : vector<32x32xf32> to vector<32x32xbf16>
    %c0_17 = arith.constant 0 : index
    %c0_18 = arith.constant 0 : index
    %20 = vector.load %arg7[%c0_17, %c0_18] : memref<512x64xbf16, #tpu.memory_space<vmem>>, vector<32x64xbf16>
    %cst_19 = arith.constant dense<0.000000e+00> : vector<32x64xf32>
    %21 = tpu.matmul %19, %20, %cst_19 {dimension_numbers = #tpu.dot_dimension_numbers<[1], [0], [0], [1], [0, 0, 1, 1], [], []>} : vector<32x32xbf16>, vector<32x64xbf16>, vector<32x64xf32> -> vector<32x64xf32>
    %c1 = arith.constant 1 : index
    %c0_20 = arith.constant 0 : index
    %c0_21 = arith.constant 0 : index
    %22 = vector.load %arg6[%c1, %c0_20, %c0_21] : memref<17x32x128xbf16, #tpu.memory_space<vmem>>, vector<1x32x128xbf16>
    %23 = vector.shape_cast %22 : vector<1x32x128xbf16> to vector<32x128xbf16>
    %cst_22 = arith.constant dense<0.000000e+00> : vector<32x32xf32>
    %24 = tpu.matmul %23, %15, %cst_22 {dimension_numbers = #tpu.dot_dimension_numbers<[1], [0], [0], [1], [0, 0, 1, 1], [], []>} : vector<32x128xbf16>, vector<128x32xbf16>, vector<32x32xf32> -> vector<32x32xf32>
    %25 = arith.truncf %24 : vector<32x32xf32> to vector<32x32xbf16>
    %c32 = arith.constant 32 : index
    %c0_23 = arith.constant 0 : index
    %26 = vector.load %arg7[%c32, %c0_23] : memref<512x64xbf16, #tpu.memory_space<vmem>>, vector<32x64xbf16>
    %cst_24 = arith.constant dense<0.000000e+00> : vector<32x64xf32>
    %27 = tpu.matmul %25, %26, %cst_24 {dimension_numbers = #tpu.dot_dimension_numbers<[1], [0], [0], [1], [0, 0, 1, 1], [], []>} : vector<32x32xbf16>, vector<32x64xbf16>, vector<32x64xf32> -> vector<32x64xf32>
    %28 = arith.addf %21, %27 : vector<32x64xf32>
    %c2 = arith.constant 2 : index
    %c0_25 = arith.constant 0 : index
    %c0_26 = arith.constant 0 : index
    %29 = vector.load %arg6[%c2, %c0_25, %c0_26] : memref<17x32x128xbf16, #tpu.memory_space<vmem>>, vector<1x32x128xbf16>
    %30 = vector.shape_cast %29 : vector<1x32x128xbf16> to vector<32x128xbf16>
    %cst_27 = arith.constant dense<0.000000e+00> : vector<32x32xf32>
    %31 = tpu.matmul %30, %15, %cst_27 {dimension_numbers = #tpu.dot_dimension_numbers<[1], [0], [0], [1], [0, 0, 1, 1], [], []>} : vector<32x128xbf16>, vector<128x32xbf16>, vector<32x32xf32> -> vector<32x32xf32>
    %32 = arith.truncf %31 : vector<32x32xf32> to vector<32x32xbf16>
    %c64 = arith.constant 64 : index
    %c0_28 = arith.constant 0 : index
    %33 = vector.load %arg7[%c64, %c0_28] : memref<512x64xbf16, #tpu.memory_space<vmem>>, vector<32x64xbf16>
    %cst_29 = arith.constant dense<0.000000e+00> : vector<32x64xf32>
    %34 = tpu.matmul %32, %33, %cst_29 {dimension_numbers = #tpu.dot_dimension_numbers<[1], [0], [0], [1], [0, 0, 1, 1], [], []>} : vector<32x32xbf16>, vector<32x64xbf16>, vector<32x64xf32> -> vector<32x64xf32>
    %35 = arith.addf %28, %34 : vector<32x64xf32>
    %c3 = arith.constant 3 : index
    %c0_30 = arith.constant 0 : index
    %c0_31 = arith.constant 0 : index
    %36 = vector.load %arg6[%c3, %c0_30, %c0_31] : memref<17x32x128xbf16, #tpu.memory_space<vmem>>, vector<1x32x128xbf16>
    %37 = vector.shape_cast %36 : vector<1x32x128xbf16> to vector<32x128xbf16>
    %cst_32 = arith.constant dense<0.000000e+00> : vector<32x32xf32>
    %38 = tpu.matmul %37, %15, %cst_32 {dimension_numbers = #tpu.dot_dimension_numbers<[1], [0], [0], [1], [0, 0, 1, 1], [], []>} : vector<32x128xbf16>, vector<128x32xbf16>, vector<32x32xf32> -> vector<32x32xf32>
    %39 = arith.truncf %38 : vector<32x32xf32> to vector<32x32xbf16>
    %c96 = arith.constant 96 : index
    %c0_33 = arith.constant 0 : index
    %40 = vector.load %arg7[%c96, %c0_33] : memref<512x64xbf16, #tpu.memory_space<vmem>>, vector<32x64xbf16>
    %cst_34 = arith.constant dense<0.000000e+00> : vector<32x64xf32>
    %41 = tpu.matmul %39, %40, %cst_34 {dimension_numbers = #tpu.dot_dimension_numbers<[1], [0], [0], [1], [0, 0, 1, 1], [], []>} : vector<32x32xbf16>, vector<32x64xbf16>, vector<32x64xf32> -> vector<32x64xf32>
    %42 = arith.addf %35, %41 : vector<32x64xf32>
    %c4 = arith.constant 4 : index
    %c0_35 = arith.constant 0 : index
    %c0_36 = arith.constant 0 : index
    %43 = vector.load %arg6[%c4, %c0_35, %c0_36] : memref<17x32x128xbf16, #tpu.memory_space<vmem>>, vector<1x32x128xbf16>
    %44 = vector.shape_cast %43 : vector<1x32x128xbf16> to vector<32x128xbf16>
    %cst_37 = arith.constant dense<0.000000e+00> : vector<32x32xf32>
    %45 = tpu.matmul %44, %15, %cst_37 {dimension_numbers = #tpu.dot_dimension_numbers<[1], [0], [0], [1], [0, 0, 1, 1], [], []>} : vector<32x128xbf16>, vector<128x32xbf16>, vector<32x32xf32> -> vector<32x32xf32>
    %46 = arith.truncf %45 : vector<32x32xf32> to vector<32x32xbf16>
    %c128 = arith.constant 128 : index
    %c0_38 = arith.constant 0 : index
    %47 = vector.load %arg7[%c128, %c0_38] : memref<512x64xbf16, #tpu.memory_space<vmem>>, vector<32x64xbf16>
    %cst_39 = arith.constant dense<0.000000e+00> : vector<32x64xf32>
    %48 = tpu.matmul %46, %47, %cst_39 {dimension_numbers = #tpu.dot_dimension_numbers<[1], [0], [0], [1], [0, 0, 1, 1], [], []>} : vector<32x32xbf16>, vector<32x64xbf16>, vector<32x64xf32> -> vector<32x64xf32>
    %49 = arith.addf %42, %48 : vector<32x64xf32>
    %c5 = arith.constant 5 : index
    %c0_40 = arith.constant 0 : index
    %c0_41 = arith.constant 0 : index
    %50 = vector.load %arg6[%c5, %c0_40, %c0_41] : memref<17x32x128xbf16, #tpu.memory_space<vmem>>, vector<1x32x128xbf16>
    %51 = vector.shape_cast %50 : vector<1x32x128xbf16> to vector<32x128xbf16>
    %cst_42 = arith.constant dense<0.000000e+00> : vector<32x32xf32>
    %52 = tpu.matmul %51, %15, %cst_42 {dimension_numbers = #tpu.dot_dimension_numbers<[1], [0], [0], [1], [0, 0, 1, 1], [], []>} : vector<32x128xbf16>, vector<128x32xbf16>, vector<32x32xf32> -> vector<32x32xf32>
    %53 = arith.truncf %52 : vector<32x32xf32> to vector<32x32xbf16>
    %c160 = arith.constant 160 : index
    %c0_43 = arith.constant 0 : index
    %54 = vector.load %arg7[%c160, %c0_43] : memref<512x64xbf16, #tpu.memory_space<vmem>>, vector<32x64xbf16>
    %cst_44 = arith.constant dense<0.000000e+00> : vector<32x64xf32>
    %55 = tpu.matmul %53, %54, %cst_44 {dimension_numbers = #tpu.dot_dimension_numbers<[1], [0], [0], [1], [0, 0, 1, 1], [], []>} : vector<32x32xbf16>, vector<32x64xbf16>, vector<32x64xf32> -> vector<32x64xf32>
    %56 = arith.addf %49, %55 : vector<32x64xf32>
    %c6 = arith.constant 6 : index
    %c0_45 = arith.constant 0 : index
    %c0_46 = arith.constant 0 : index
    %57 = vector.load %arg6[%c6, %c0_45, %c0_46] : memref<17x32x128xbf16, #tpu.memory_space<vmem>>, vector<1x32x128xbf16>
    %58 = vector.shape_cast %57 : vector<1x32x128xbf16> to vector<32x128xbf16>
    %cst_47 = arith.constant dense<0.000000e+00> : vector<32x32xf32>
    %59 = tpu.matmul %58, %15, %cst_47 {dimension_numbers = #tpu.dot_dimension_numbers<[1], [0], [0], [1], [0, 0, 1, 1], [], []>} : vector<32x128xbf16>, vector<128x32xbf16>, vector<32x32xf32> -> vector<32x32xf32>
    %60 = arith.truncf %59 : vector<32x32xf32> to vector<32x32xbf16>
    %c192 = arith.constant 192 : index
    %c0_48 = arith.constant 0 : index
    %61 = vector.load %arg7[%c192, %c0_48] : memref<512x64xbf16, #tpu.memory_space<vmem>>, vector<32x64xbf16>
    %cst_49 = arith.constant dense<0.000000e+00> : vector<32x64xf32>
    %62 = tpu.matmul %60, %61, %cst_49 {dimension_numbers = #tpu.dot_dimension_numbers<[1], [0], [0], [1], [0, 0, 1, 1], [], []>} : vector<32x32xbf16>, vector<32x64xbf16>, vector<32x64xf32> -> vector<32x64xf32>
    %63 = arith.addf %56, %62 : vector<32x64xf32>
    %c7 = arith.constant 7 : index
    %c0_50 = arith.constant 0 : index
    %c0_51 = arith.constant 0 : index
    %64 = vector.load %arg6[%c7, %c0_50, %c0_51] : memref<17x32x128xbf16, #tpu.memory_space<vmem>>, vector<1x32x128xbf16>
    %65 = vector.shape_cast %64 : vector<1x32x128xbf16> to vector<32x128xbf16>
    %cst_52 = arith.constant dense<0.000000e+00> : vector<32x32xf32>
    %66 = tpu.matmul %65, %15, %cst_52 {dimension_numbers = #tpu.dot_dimension_numbers<[1], [0], [0], [1], [0, 0, 1, 1], [], []>} : vector<32x128xbf16>, vector<128x32xbf16>, vector<32x32xf32> -> vector<32x32xf32>
    %67 = arith.truncf %66 : vector<32x32xf32> to vector<32x32xbf16>
    %c224 = arith.constant 224 : index
    %c0_53 = arith.constant 0 : index
    %68 = vector.load %arg7[%c224, %c0_53] : memref<512x64xbf16, #tpu.memory_space<vmem>>, vector<32x64xbf16>
    %cst_54 = arith.constant dense<0.000000e+00> : vector<32x64xf32>
    %69 = tpu.matmul %67, %68, %cst_54 {dimension_numbers = #tpu.dot_dimension_numbers<[1], [0], [0], [1], [0, 0, 1, 1], [], []>} : vector<32x32xbf16>, vector<32x64xbf16>, vector<32x64xf32> -> vector<32x64xf32>
    %70 = arith.addf %63, %69 : vector<32x64xf32>
    %c8 = arith.constant 8 : index
    %c0_55 = arith.constant 0 : index
    %c0_56 = arith.constant 0 : index
    %71 = vector.load %arg6[%c8, %c0_55, %c0_56] : memref<17x32x128xbf16, #tpu.memory_space<vmem>>, vector<1x32x128xbf16>
    %72 = vector.shape_cast %71 : vector<1x32x128xbf16> to vector<32x128xbf16>
    %cst_57 = arith.constant dense<0.000000e+00> : vector<32x32xf32>
    %73 = tpu.matmul %72, %15, %cst_57 {dimension_numbers = #tpu.dot_dimension_numbers<[1], [0], [0], [1], [0, 0, 1, 1], [], []>} : vector<32x128xbf16>, vector<128x32xbf16>, vector<32x32xf32> -> vector<32x32xf32>
    %74 = arith.truncf %73 : vector<32x32xf32> to vector<32x32xbf16>
    %c256 = arith.constant 256 : index
    %c0_58 = arith.constant 0 : index
    %75 = vector.load %arg7[%c256, %c0_58] : memref<512x64xbf16, #tpu.memory_space<vmem>>, vector<32x64xbf16>
    %cst_59 = arith.constant dense<0.000000e+00> : vector<32x64xf32>
    %76 = tpu.matmul %74, %75, %cst_59 {dimension_numbers = #tpu.dot_dimension_numbers<[1], [0], [0], [1], [0, 0, 1, 1], [], []>} : vector<32x32xbf16>, vector<32x64xbf16>, vector<32x64xf32> -> vector<32x64xf32>
    %77 = arith.addf %70, %76 : vector<32x64xf32>
    %c9 = arith.constant 9 : index
    %c0_60 = arith.constant 0 : index
    %c0_61 = arith.constant 0 : index
    %78 = vector.load %arg6[%c9, %c0_60, %c0_61] : memref<17x32x128xbf16, #tpu.memory_space<vmem>>, vector<1x32x128xbf16>
    %79 = vector.shape_cast %78 : vector<1x32x128xbf16> to vector<32x128xbf16>
    %cst_62 = arith.constant dense<0.000000e+00> : vector<32x32xf32>
    %80 = tpu.matmul %79, %15, %cst_62 {dimension_numbers = #tpu.dot_dimension_numbers<[1], [0], [0], [1], [0, 0, 1, 1], [], []>} : vector<32x128xbf16>, vector<128x32xbf16>, vector<32x32xf32> -> vector<32x32xf32>
    %81 = arith.truncf %80 : vector<32x32xf32> to vector<32x32xbf16>
    %c288 = arith.constant 288 : index
    %c0_63 = arith.constant 0 : index
    %82 = vector.load %arg7[%c288, %c0_63] : memref<512x64xbf16, #tpu.memory_space<vmem>>, vector<32x64xbf16>
    %cst_64 = arith.constant dense<0.000000e+00> : vector<32x64xf32>
    %83 = tpu.matmul %81, %82, %cst_64 {dimension_numbers = #tpu.dot_dimension_numbers<[1], [0], [0], [1], [0, 0, 1, 1], [], []>} : vector<32x32xbf16>, vector<32x64xbf16>, vector<32x64xf32> -> vector<32x64xf32>
    %84 = arith.addf %77, %83 : vector<32x64xf32>
    %c10 = arith.constant 10 : index
    %c0_65 = arith.constant 0 : index
    %c0_66 = arith.constant 0 : index
    %85 = vector.load %arg6[%c10, %c0_65, %c0_66] : memref<17x32x128xbf16, #tpu.memory_space<vmem>>, vector<1x32x128xbf16>
    %86 = vector.shape_cast %85 : vector<1x32x128xbf16> to vector<32x128xbf16>
    %cst_67 = arith.constant dense<0.000000e+00> : vector<32x32xf32>
    %87 = tpu.matmul %86, %15, %cst_67 {dimension_numbers = #tpu.dot_dimension_numbers<[1], [0], [0], [1], [0, 0, 1, 1], [], []>} : vector<32x128xbf16>, vector<128x32xbf16>, vector<32x32xf32> -> vector<32x32xf32>
    %88 = arith.truncf %87 : vector<32x32xf32> to vector<32x32xbf16>
    %c320 = arith.constant 320 : index
    %c0_68 = arith.constant 0 : index
    %89 = vector.load %arg7[%c320, %c0_68] : memref<512x64xbf16, #tpu.memory_space<vmem>>, vector<32x64xbf16>
    %cst_69 = arith.constant dense<0.000000e+00> : vector<32x64xf32>
    %90 = tpu.matmul %88, %89, %cst_69 {dimension_numbers = #tpu.dot_dimension_numbers<[1], [0], [0], [1], [0, 0, 1, 1], [], []>} : vector<32x32xbf16>, vector<32x64xbf16>, vector<32x64xf32> -> vector<32x64xf32>
    %91 = arith.addf %84, %90 : vector<32x64xf32>
    %c11 = arith.constant 11 : index
    %c0_70 = arith.constant 0 : index
    %c0_71 = arith.constant 0 : index
    %92 = vector.load %arg6[%c11, %c0_70, %c0_71] : memref<17x32x128xbf16, #tpu.memory_space<vmem>>, vector<1x32x128xbf16>
    %93 = vector.shape_cast %92 : vector<1x32x128xbf16> to vector<32x128xbf16>
    %cst_72 = arith.constant dense<0.000000e+00> : vector<32x32xf32>
    %94 = tpu.matmul %93, %15, %cst_72 {dimension_numbers = #tpu.dot_dimension_numbers<[1], [0], [0], [1], [0, 0, 1, 1], [], []>} : vector<32x128xbf16>, vector<128x32xbf16>, vector<32x32xf32> -> vector<32x32xf32>
    %95 = arith.truncf %94 : vector<32x32xf32> to vector<32x32xbf16>
    %c352 = arith.constant 352 : index
    %c0_73 = arith.constant 0 : index
    %96 = vector.load %arg7[%c352, %c0_73] : memref<512x64xbf16, #tpu.memory_space<vmem>>, vector<32x64xbf16>
    %cst_74 = arith.constant dense<0.000000e+00> : vector<32x64xf32>
    %97 = tpu.matmul %95, %96, %cst_74 {dimension_numbers = #tpu.dot_dimension_numbers<[1], [0], [0], [1], [0, 0, 1, 1], [], []>} : vector<32x32xbf16>, vector<32x64xbf16>, vector<32x64xf32> -> vector<32x64xf32>
    %98 = arith.addf %91, %97 : vector<32x64xf32>
    %c12 = arith.constant 12 : index
    %c0_75 = arith.constant 0 : index
    %c0_76 = arith.constant 0 : index
    %99 = vector.load %arg6[%c12, %c0_75, %c0_76] : memref<17x32x128xbf16, #tpu.memory_space<vmem>>, vector<1x32x128xbf16>
    %100 = vector.shape_cast %99 : vector<1x32x128xbf16> to vector<32x128xbf16>
    %cst_77 = arith.constant dense<0.000000e+00> : vector<32x32xf32>
    %101 = tpu.matmul %100, %15, %cst_77 {dimension_numbers = #tpu.dot_dimension_numbers<[1], [0], [0], [1], [0, 0, 1, 1], [], []>} : vector<32x128xbf16>, vector<128x32xbf16>, vector<32x32xf32> -> vector<32x32xf32>
    %102 = arith.truncf %101 : vector<32x32xf32> to vector<32x32xbf16>
    %c384 = arith.constant 384 : index
    %c0_78 = arith.constant 0 : index
    %103 = vector.load %arg7[%c384, %c0_78] : memref<512x64xbf16, #tpu.memory_space<vmem>>, vector<32x64xbf16>
    %cst_79 = arith.constant dense<0.000000e+00> : vector<32x64xf32>
    %104 = tpu.matmul %102, %103, %cst_79 {dimension_numbers = #tpu.dot_dimension_numbers<[1], [0], [0], [1], [0, 0, 1, 1], [], []>} : vector<32x32xbf16>, vector<32x64xbf16>, vector<32x64xf32> -> vector<32x64xf32>
    %105 = arith.addf %98, %104 : vector<32x64xf32>
    %c13 = arith.constant 13 : index
    %c0_80 = arith.constant 0 : index
    %c0_81 = arith.constant 0 : index
    %106 = vector.load %arg6[%c13, %c0_80, %c0_81] : memref<17x32x128xbf16, #tpu.memory_space<vmem>>, vector<1x32x128xbf16>
    %107 = vector.shape_cast %106 : vector<1x32x128xbf16> to vector<32x128xbf16>
    %cst_82 = arith.constant dense<0.000000e+00> : vector<32x32xf32>
    %108 = tpu.matmul %107, %15, %cst_82 {dimension_numbers = #tpu.dot_dimension_numbers<[1], [0], [0], [1], [0, 0, 1, 1], [], []>} : vector<32x128xbf16>, vector<128x32xbf16>, vector<32x32xf32> -> vector<32x32xf32>
    %109 = arith.truncf %108 : vector<32x32xf32> to vector<32x32xbf16>
    %c416 = arith.constant 416 : index
    %c0_83 = arith.constant 0 : index
    %110 = vector.load %arg7[%c416, %c0_83] : memref<512x64xbf16, #tpu.memory_space<vmem>>, vector<32x64xbf16>
    %cst_84 = arith.constant dense<0.000000e+00> : vector<32x64xf32>
    %111 = tpu.matmul %109, %110, %cst_84 {dimension_numbers = #tpu.dot_dimension_numbers<[1], [0], [0], [1], [0, 0, 1, 1], [], []>} : vector<32x32xbf16>, vector<32x64xbf16>, vector<32x64xf32> -> vector<32x64xf32>
    %112 = arith.addf %105, %111 : vector<32x64xf32>
    %c14 = arith.constant 14 : index
    %c0_85 = arith.constant 0 : index
    %c0_86 = arith.constant 0 : index
    %113 = vector.load %arg6[%c14, %c0_85, %c0_86] : memref<17x32x128xbf16, #tpu.memory_space<vmem>>, vector<1x32x128xbf16>
    %114 = vector.shape_cast %113 : vector<1x32x128xbf16> to vector<32x128xbf16>
    %cst_87 = arith.constant dense<0.000000e+00> : vector<32x32xf32>
    %115 = tpu.matmul %114, %15, %cst_87 {dimension_numbers = #tpu.dot_dimension_numbers<[1], [0], [0], [1], [0, 0, 1, 1], [], []>} : vector<32x128xbf16>, vector<128x32xbf16>, vector<32x32xf32> -> vector<32x32xf32>
    %116 = arith.truncf %115 : vector<32x32xf32> to vector<32x32xbf16>
    %c448 = arith.constant 448 : index
    %c0_88 = arith.constant 0 : index
    %117 = vector.load %arg7[%c448, %c0_88] : memref<512x64xbf16, #tpu.memory_space<vmem>>, vector<32x64xbf16>
    %cst_89 = arith.constant dense<0.000000e+00> : vector<32x64xf32>
    %118 = tpu.matmul %116, %117, %cst_89 {dimension_numbers = #tpu.dot_dimension_numbers<[1], [0], [0], [1], [0, 0, 1, 1], [], []>} : vector<32x32xbf16>, vector<32x64xbf16>, vector<32x64xf32> -> vector<32x64xf32>
    %119 = arith.addf %112, %118 : vector<32x64xf32>
    %c15 = arith.constant 15 : index
    %c0_90 = arith.constant 0 : index
    %c0_91 = arith.constant 0 : index
    %120 = vector.load %arg6[%c15, %c0_90, %c0_91] : memref<17x32x128xbf16, #tpu.memory_space<vmem>>, vector<1x32x128xbf16>
    %121 = vector.shape_cast %120 : vector<1x32x128xbf16> to vector<32x128xbf16>
    %cst_92 = arith.constant dense<0.000000e+00> : vector<32x32xf32>
    %122 = tpu.matmul %121, %15, %cst_92 {dimension_numbers = #tpu.dot_dimension_numbers<[1], [0], [0], [1], [0, 0, 1, 1], [], []>} : vector<32x128xbf16>, vector<128x32xbf16>, vector<32x32xf32> -> vector<32x32xf32>
    %123 = arith.truncf %122 : vector<32x32xf32> to vector<32x32xbf16>
    %c480 = arith.constant 480 : index
    %c0_93 = arith.constant 0 : index
    %124 = vector.load %arg7[%c480, %c0_93] : memref<512x64xbf16, #tpu.memory_space<vmem>>, vector<32x64xbf16>
    %cst_94 = arith.constant dense<0.000000e+00> : vector<32x64xf32>
    %125 = tpu.matmul %123, %124, %cst_94 {dimension_numbers = #tpu.dot_dimension_numbers<[1], [0], [0], [1], [0, 0, 1, 1], [], []>} : vector<32x32xbf16>, vector<32x64xbf16>, vector<32x64xf32> -> vector<32x64xf32>
    %126 = arith.addf %119, %125 : vector<32x64xf32>
    %c0_95 = arith.constant 0 : index
    %c0_96 = arith.constant 0 : index
    %127 = vector.load %arg8[%c0_95, %c0_96] : memref<1x64xf32, #tpu.memory_space<vmem>>, vector<1x64xf32>
    %128 = vector.broadcast %127 : vector<1x64xf32> to vector<32x64xf32>
    %129 = arith.addf %126, %128 : vector<32x64xf32>
    %c16 = arith.constant 16 : index
    %c0_97 = arith.constant 0 : index
    %c0_98 = arith.constant 0 : index
    %130 = vector.load %arg6[%c16, %c0_97, %c0_98] : memref<17x32x128xbf16, #tpu.memory_space<vmem>>, vector<1x32x128xbf16>
    %131 = vector.shape_cast %130 : vector<1x32x128xbf16> to vector<32x128xbf16>
    %cst_99 = arith.constant dense<0.000000e+00> : vector<32x32xf32>
    %132 = tpu.matmul %131, %15, %cst_99 {dimension_numbers = #tpu.dot_dimension_numbers<[1], [0], [0], [1], [0, 0, 1, 1], [], []>} : vector<32x128xbf16>, vector<128x32xbf16>, vector<32x32xf32> -> vector<32x32xf32>
    %133 = arith.truncf %132 : vector<32x32xf32> to vector<32x32xbf16>
    %c0_100 = arith.constant 0 : index
    %c0_101 = arith.constant 0 : index
    %134 = vector.load %arg9[%c0_100, %c0_101] : memref<32x64xbf16, #tpu.memory_space<vmem>>, vector<32x64xbf16>
    %cst_102 = arith.constant dense<0.000000e+00> : vector<32x64xf32>
    %135 = tpu.matmul %133, %134, %cst_102 {dimension_numbers = #tpu.dot_dimension_numbers<[1], [0], [0], [1], [0, 0, 1, 1], [], []>} : vector<32x32xbf16>, vector<32x64xbf16>, vector<32x64xf32> -> vector<32x64xf32>
    %c0_103 = arith.constant 0 : index
    %c0_104 = arith.constant 0 : index
    %136 = vector.load %arg10[%c0_103, %c0_104] : memref<1x64xf32, #tpu.memory_space<vmem>>, vector<1x64xf32>
    %137 = vector.broadcast %136 : vector<1x64xf32> to vector<32x64xf32>
    %138 = arith.addf %135, %137 : vector<32x64xf32>
    %cst_105 = arith.constant 0.000000e+00 : f32
    %139 = vector.broadcast %cst_105 : f32 to vector<32x64xf32>
    %140 = arith.maximumf %129, %139 : vector<32x64xf32>
    %141 = arith.addf %140, %138 : vector<32x64xf32>
    %142 = arith.truncf %141 : vector<32x64xf32> to vector<32x64xbf16>
    %c0_106 = arith.constant 0 : index
    %c0_107 = arith.constant 0 : index
    %c0_108 = arith.constant 0 : index
    %143 = vector.load %arg11[%c0_106, %c0_107, %c0_108] : memref<17x8x32xbf16, #tpu.memory_space<vmem>>, vector<1x8x32xbf16>
    %144 = vector.shape_cast %143 : vector<1x8x32xbf16> to vector<8x32xbf16>
    %cst_109 = arith.constant dense<0.000000e+00> : vector<8x64xf32>
    %145 = tpu.matmul %144, %142, %cst_109 {dimension_numbers = #tpu.dot_dimension_numbers<[1], [0], [0], [1], [0, 0, 1, 1], [], []>} : vector<8x32xbf16>, vector<32x64xbf16>, vector<8x64xf32> -> vector<8x64xf32>
    %146 = arith.truncf %145 : vector<8x64xf32> to vector<8x64xbf16>
    %c0_110 = arith.constant 0 : index
    %c0_111 = arith.constant 0 : index
    %147 = vector.load %arg12[%c0_110, %c0_111] : memref<1024x128xbf16, #tpu.memory_space<vmem>>, vector<64x128xbf16>
    %cst_112 = arith.constant dense<0.000000e+00> : vector<8x128xf32>
    %148 = tpu.matmul %146, %147, %cst_112 {dimension_numbers = #tpu.dot_dimension_numbers<[1], [0], [0], [1], [0, 0, 1, 1], [], []>} : vector<8x64xbf16>, vector<64x128xbf16>, vector<8x128xf32> -> vector<8x128xf32>
    %c1_113 = arith.constant 1 : index
    %c0_114 = arith.constant 0 : index
    %c0_115 = arith.constant 0 : index
    %149 = vector.load %arg11[%c1_113, %c0_114, %c0_115] : memref<17x8x32xbf16, #tpu.memory_space<vmem>>, vector<1x8x32xbf16>
    %150 = vector.shape_cast %149 : vector<1x8x32xbf16> to vector<8x32xbf16>
    %cst_116 = arith.constant dense<0.000000e+00> : vector<8x64xf32>
    %151 = tpu.matmul %150, %142, %cst_116 {dimension_numbers = #tpu.dot_dimension_numbers<[1], [0], [0], [1], [0, 0, 1, 1], [], []>} : vector<8x32xbf16>, vector<32x64xbf16>, vector<8x64xf32> -> vector<8x64xf32>
    %152 = arith.truncf %151 : vector<8x64xf32> to vector<8x64xbf16>
    %c64_117 = arith.constant 64 : index
    %c0_118 = arith.constant 0 : index
    %153 = vector.load %arg12[%c64_117, %c0_118] : memref<1024x128xbf16, #tpu.memory_space<vmem>>, vector<64x128xbf16>
    %cst_119 = arith.constant dense<0.000000e+00> : vector<8x128xf32>
    %154 = tpu.matmul %152, %153, %cst_119 {dimension_numbers = #tpu.dot_dimension_numbers<[1], [0], [0], [1], [0, 0, 1, 1], [], []>} : vector<8x64xbf16>, vector<64x128xbf16>, vector<8x128xf32> -> vector<8x128xf32>
    %155 = arith.addf %148, %154 : vector<8x128xf32>
    %c2_120 = arith.constant 2 : index
    %c0_121 = arith.constant 0 : index
    %c0_122 = arith.constant 0 : index
    %156 = vector.load %arg11[%c2_120, %c0_121, %c0_122] : memref<17x8x32xbf16, #tpu.memory_space<vmem>>, vector<1x8x32xbf16>
    %157 = vector.shape_cast %156 : vector<1x8x32xbf16> to vector<8x32xbf16>
    %cst_123 = arith.constant dense<0.000000e+00> : vector<8x64xf32>
    %158 = tpu.matmul %157, %142, %cst_123 {dimension_numbers = #tpu.dot_dimension_numbers<[1], [0], [0], [1], [0, 0, 1, 1], [], []>} : vector<8x32xbf16>, vector<32x64xbf16>, vector<8x64xf32> -> vector<8x64xf32>
    %159 = arith.truncf %158 : vector<8x64xf32> to vector<8x64xbf16>
    %c128_124 = arith.constant 128 : index
    %c0_125 = arith.constant 0 : index
    %160 = vector.load %arg12[%c128_124, %c0_125] : memref<1024x128xbf16, #tpu.memory_space<vmem>>, vector<64x128xbf16>
    %cst_126 = arith.constant dense<0.000000e+00> : vector<8x128xf32>
    %161 = tpu.matmul %159, %160, %cst_126 {dimension_numbers = #tpu.dot_dimension_numbers<[1], [0], [0], [1], [0, 0, 1, 1], [], []>} : vector<8x64xbf16>, vector<64x128xbf16>, vector<8x128xf32> -> vector<8x128xf32>
    %162 = arith.addf %155, %161 : vector<8x128xf32>
    %c3_127 = arith.constant 3 : index
    %c0_128 = arith.constant 0 : index
    %c0_129 = arith.constant 0 : index
    %163 = vector.load %arg11[%c3_127, %c0_128, %c0_129] : memref<17x8x32xbf16, #tpu.memory_space<vmem>>, vector<1x8x32xbf16>
    %164 = vector.shape_cast %163 : vector<1x8x32xbf16> to vector<8x32xbf16>
    %cst_130 = arith.constant dense<0.000000e+00> : vector<8x64xf32>
    %165 = tpu.matmul %164, %142, %cst_130 {dimension_numbers = #tpu.dot_dimension_numbers<[1], [0], [0], [1], [0, 0, 1, 1], [], []>} : vector<8x32xbf16>, vector<32x64xbf16>, vector<8x64xf32> -> vector<8x64xf32>
    %166 = arith.truncf %165 : vector<8x64xf32> to vector<8x64xbf16>
    %c192_131 = arith.constant 192 : index
    %c0_132 = arith.constant 0 : index
    %167 = vector.load %arg12[%c192_131, %c0_132] : memref<1024x128xbf16, #tpu.memory_space<vmem>>, vector<64x128xbf16>
    %cst_133 = arith.constant dense<0.000000e+00> : vector<8x128xf32>
    %168 = tpu.matmul %166, %167, %cst_133 {dimension_numbers = #tpu.dot_dimension_numbers<[1], [0], [0], [1], [0, 0, 1, 1], [], []>} : vector<8x64xbf16>, vector<64x128xbf16>, vector<8x128xf32> -> vector<8x128xf32>
    %169 = arith.addf %162, %168 : vector<8x128xf32>
    %c4_134 = arith.constant 4 : index
    %c0_135 = arith.constant 0 : index
    %c0_136 = arith.constant 0 : index
    %170 = vector.load %arg11[%c4_134, %c0_135, %c0_136] : memref<17x8x32xbf16, #tpu.memory_space<vmem>>, vector<1x8x32xbf16>
    %171 = vector.shape_cast %170 : vector<1x8x32xbf16> to vector<8x32xbf16>
    %cst_137 = arith.constant dense<0.000000e+00> : vector<8x64xf32>
    %172 = tpu.matmul %171, %142, %cst_137 {dimension_numbers = #tpu.dot_dimension_numbers<[1], [0], [0], [1], [0, 0, 1, 1], [], []>} : vector<8x32xbf16>, vector<32x64xbf16>, vector<8x64xf32> -> vector<8x64xf32>
    %173 = arith.truncf %172 : vector<8x64xf32> to vector<8x64xbf16>
    %c256_138 = arith.constant 256 : index
    %c0_139 = arith.constant 0 : index
    %174 = vector.load %arg12[%c256_138, %c0_139] : memref<1024x128xbf16, #tpu.memory_space<vmem>>, vector<64x128xbf16>
    %cst_140 = arith.constant dense<0.000000e+00> : vector<8x128xf32>
    %175 = tpu.matmul %173, %174, %cst_140 {dimension_numbers = #tpu.dot_dimension_numbers<[1], [0], [0], [1], [0, 0, 1, 1], [], []>} : vector<8x64xbf16>, vector<64x128xbf16>, vector<8x128xf32> -> vector<8x128xf32>
    %176 = arith.addf %169, %175 : vector<8x128xf32>
    %c5_141 = arith.constant 5 : index
    %c0_142 = arith.constant 0 : index
    %c0_143 = arith.constant 0 : index
    %177 = vector.load %arg11[%c5_141, %c0_142, %c0_143] : memref<17x8x32xbf16, #tpu.memory_space<vmem>>, vector<1x8x32xbf16>
    %178 = vector.shape_cast %177 : vector<1x8x32xbf16> to vector<8x32xbf16>
    %cst_144 = arith.constant dense<0.000000e+00> : vector<8x64xf32>
    %179 = tpu.matmul %178, %142, %cst_144 {dimension_numbers = #tpu.dot_dimension_numbers<[1], [0], [0], [1], [0, 0, 1, 1], [], []>} : vector<8x32xbf16>, vector<32x64xbf16>, vector<8x64xf32> -> vector<8x64xf32>
    %180 = arith.truncf %179 : vector<8x64xf32> to vector<8x64xbf16>
    %c320_145 = arith.constant 320 : index
    %c0_146 = arith.constant 0 : index
    %181 = vector.load %arg12[%c320_145, %c0_146] : memref<1024x128xbf16, #tpu.memory_space<vmem>>, vector<64x128xbf16>
    %cst_147 = arith.constant dense<0.000000e+00> : vector<8x128xf32>
    %182 = tpu.matmul %180, %181, %cst_147 {dimension_numbers = #tpu.dot_dimension_numbers<[1], [0], [0], [1], [0, 0, 1, 1], [], []>} : vector<8x64xbf16>, vector<64x128xbf16>, vector<8x128xf32> -> vector<8x128xf32>
    %183 = arith.addf %176, %182 : vector<8x128xf32>
    %c6_148 = arith.constant 6 : index
    %c0_149 = arith.constant 0 : index
    %c0_150 = arith.constant 0 : index
    %184 = vector.load %arg11[%c6_148, %c0_149, %c0_150] : memref<17x8x32xbf16, #tpu.memory_space<vmem>>, vector<1x8x32xbf16>
    %185 = vector.shape_cast %184 : vector<1x8x32xbf16> to vector<8x32xbf16>
    %cst_151 = arith.constant dense<0.000000e+00> : vector<8x64xf32>
    %186 = tpu.matmul %185, %142, %cst_151 {dimension_numbers = #tpu.dot_dimension_numbers<[1], [0], [0], [1], [0, 0, 1, 1], [], []>} : vector<8x32xbf16>, vector<32x64xbf16>, vector<8x64xf32> -> vector<8x64xf32>
    %187 = arith.truncf %186 : vector<8x64xf32> to vector<8x64xbf16>
    %c384_152 = arith.constant 384 : index
    %c0_153 = arith.constant 0 : index
    %188 = vector.load %arg12[%c384_152, %c0_153] : memref<1024x128xbf16, #tpu.memory_space<vmem>>, vector<64x128xbf16>
    %cst_154 = arith.constant dense<0.000000e+00> : vector<8x128xf32>
    %189 = tpu.matmul %187, %188, %cst_154 {dimension_numbers = #tpu.dot_dimension_numbers<[1], [0], [0], [1], [0, 0, 1, 1], [], []>} : vector<8x64xbf16>, vector<64x128xbf16>, vector<8x128xf32> -> vector<8x128xf32>
    %190 = arith.addf %183, %189 : vector<8x128xf32>
    %c7_155 = arith.constant 7 : index
    %c0_156 = arith.constant 0 : index
    %c0_157 = arith.constant 0 : index
    %191 = vector.load %arg11[%c7_155, %c0_156, %c0_157] : memref<17x8x32xbf16, #tpu.memory_space<vmem>>, vector<1x8x32xbf16>
    %192 = vector.shape_cast %191 : vector<1x8x32xbf16> to vector<8x32xbf16>
    %cst_158 = arith.constant dense<0.000000e+00> : vector<8x64xf32>
    %193 = tpu.matmul %192, %142, %cst_158 {dimension_numbers = #tpu.dot_dimension_numbers<[1], [0], [0], [1], [0, 0, 1, 1], [], []>} : vector<8x32xbf16>, vector<32x64xbf16>, vector<8x64xf32> -> vector<8x64xf32>
    %194 = arith.truncf %193 : vector<8x64xf32> to vector<8x64xbf16>
    %c448_159 = arith.constant 448 : index
    %c0_160 = arith.constant 0 : index
    %195 = vector.load %arg12[%c448_159, %c0_160] : memref<1024x128xbf16, #tpu.memory_space<vmem>>, vector<64x128xbf16>
    %cst_161 = arith.constant dense<0.000000e+00> : vector<8x128xf32>
    %196 = tpu.matmul %194, %195, %cst_161 {dimension_numbers = #tpu.dot_dimension_numbers<[1], [0], [0], [1], [0, 0, 1, 1], [], []>} : vector<8x64xbf16>, vector<64x128xbf16>, vector<8x128xf32> -> vector<8x128xf32>
    %197 = arith.addf %190, %196 : vector<8x128xf32>
    %c8_162 = arith.constant 8 : index
    %c0_163 = arith.constant 0 : index
    %c0_164 = arith.constant 0 : index
    %198 = vector.load %arg11[%c8_162, %c0_163, %c0_164] : memref<17x8x32xbf16, #tpu.memory_space<vmem>>, vector<1x8x32xbf16>
    %199 = vector.shape_cast %198 : vector<1x8x32xbf16> to vector<8x32xbf16>
    %cst_165 = arith.constant dense<0.000000e+00> : vector<8x64xf32>
    %200 = tpu.matmul %199, %142, %cst_165 {dimension_numbers = #tpu.dot_dimension_numbers<[1], [0], [0], [1], [0, 0, 1, 1], [], []>} : vector<8x32xbf16>, vector<32x64xbf16>, vector<8x64xf32> -> vector<8x64xf32>
    %201 = arith.truncf %200 : vector<8x64xf32> to vector<8x64xbf16>
    %c512 = arith.constant 512 : index
    %c0_166 = arith.constant 0 : index
    %202 = vector.load %arg12[%c512, %c0_166] : memref<1024x128xbf16, #tpu.memory_space<vmem>>, vector<64x128xbf16>
    %cst_167 = arith.constant dense<0.000000e+00> : vector<8x128xf32>
    %203 = tpu.matmul %201, %202, %cst_167 {dimension_numbers = #tpu.dot_dimension_numbers<[1], [0], [0], [1], [0, 0, 1, 1], [], []>} : vector<8x64xbf16>, vector<64x128xbf16>, vector<8x128xf32> -> vector<8x128xf32>
    %204 = arith.addf %197, %203 : vector<8x128xf32>
    %c9_168 = arith.constant 9 : index
    %c0_169 = arith.constant 0 : index
    %c0_170 = arith.constant 0 : index
    %205 = vector.load %arg11[%c9_168, %c0_169, %c0_170] : memref<17x8x32xbf16, #tpu.memory_space<vmem>>, vector<1x8x32xbf16>
    %206 = vector.shape_cast %205 : vector<1x8x32xbf16> to vector<8x32xbf16>
    %cst_171 = arith.constant dense<0.000000e+00> : vector<8x64xf32>
    %207 = tpu.matmul %206, %142, %cst_171 {dimension_numbers = #tpu.dot_dimension_numbers<[1], [0], [0], [1], [0, 0, 1, 1], [], []>} : vector<8x32xbf16>, vector<32x64xbf16>, vector<8x64xf32> -> vector<8x64xf32>
    %208 = arith.truncf %207 : vector<8x64xf32> to vector<8x64xbf16>
    %c576 = arith.constant 576 : index
    %c0_172 = arith.constant 0 : index
    %209 = vector.load %arg12[%c576, %c0_172] : memref<1024x128xbf16, #tpu.memory_space<vmem>>, vector<64x128xbf16>
    %cst_173 = arith.constant dense<0.000000e+00> : vector<8x128xf32>
    %210 = tpu.matmul %208, %209, %cst_173 {dimension_numbers = #tpu.dot_dimension_numbers<[1], [0], [0], [1], [0, 0, 1, 1], [], []>} : vector<8x64xbf16>, vector<64x128xbf16>, vector<8x128xf32> -> vector<8x128xf32>
    %211 = arith.addf %204, %210 : vector<8x128xf32>
    %c10_174 = arith.constant 10 : index
    %c0_175 = arith.constant 0 : index
    %c0_176 = arith.constant 0 : index
    %212 = vector.load %arg11[%c10_174, %c0_175, %c0_176] : memref<17x8x32xbf16, #tpu.memory_space<vmem>>, vector<1x8x32xbf16>
    %213 = vector.shape_cast %212 : vector<1x8x32xbf16> to vector<8x32xbf16>
    %cst_177 = arith.constant dense<0.000000e+00> : vector<8x64xf32>
    %214 = tpu.matmul %213, %142, %cst_177 {dimension_numbers = #tpu.dot_dimension_numbers<[1], [0], [0], [1], [0, 0, 1, 1], [], []>} : vector<8x32xbf16>, vector<32x64xbf16>, vector<8x64xf32> -> vector<8x64xf32>
    %215 = arith.truncf %214 : vector<8x64xf32> to vector<8x64xbf16>
    %c640 = arith.constant 640 : index
    %c0_178 = arith.constant 0 : index
    %216 = vector.load %arg12[%c640, %c0_178] : memref<1024x128xbf16, #tpu.memory_space<vmem>>, vector<64x128xbf16>
    %cst_179 = arith.constant dense<0.000000e+00> : vector<8x128xf32>
    %217 = tpu.matmul %215, %216, %cst_179 {dimension_numbers = #tpu.dot_dimension_numbers<[1], [0], [0], [1], [0, 0, 1, 1], [], []>} : vector<8x64xbf16>, vector<64x128xbf16>, vector<8x128xf32> -> vector<8x128xf32>
    %218 = arith.addf %211, %217 : vector<8x128xf32>
    %c11_180 = arith.constant 11 : index
    %c0_181 = arith.constant 0 : index
    %c0_182 = arith.constant 0 : index
    %219 = vector.load %arg11[%c11_180, %c0_181, %c0_182] : memref<17x8x32xbf16, #tpu.memory_space<vmem>>, vector<1x8x32xbf16>
    %220 = vector.shape_cast %219 : vector<1x8x32xbf16> to vector<8x32xbf16>
    %cst_183 = arith.constant dense<0.000000e+00> : vector<8x64xf32>
    %221 = tpu.matmul %220, %142, %cst_183 {dimension_numbers = #tpu.dot_dimension_numbers<[1], [0], [0], [1], [0, 0, 1, 1], [], []>} : vector<8x32xbf16>, vector<32x64xbf16>, vector<8x64xf32> -> vector<8x64xf32>
    %222 = arith.truncf %221 : vector<8x64xf32> to vector<8x64xbf16>
    %c704 = arith.constant 704 : index
    %c0_184 = arith.constant 0 : index
    %223 = vector.load %arg12[%c704, %c0_184] : memref<1024x128xbf16, #tpu.memory_space<vmem>>, vector<64x128xbf16>
    %cst_185 = arith.constant dense<0.000000e+00> : vector<8x128xf32>
    %224 = tpu.matmul %222, %223, %cst_185 {dimension_numbers = #tpu.dot_dimension_numbers<[1], [0], [0], [1], [0, 0, 1, 1], [], []>} : vector<8x64xbf16>, vector<64x128xbf16>, vector<8x128xf32> -> vector<8x128xf32>
    %225 = arith.addf %218, %224 : vector<8x128xf32>
    %c12_186 = arith.constant 12 : index
    %c0_187 = arith.constant 0 : index
    %c0_188 = arith.constant 0 : index
    %226 = vector.load %arg11[%c12_186, %c0_187, %c0_188] : memref<17x8x32xbf16, #tpu.memory_space<vmem>>, vector<1x8x32xbf16>
    %227 = vector.shape_cast %226 : vector<1x8x32xbf16> to vector<8x32xbf16>
    %cst_189 = arith.constant dense<0.000000e+00> : vector<8x64xf32>
    %228 = tpu.matmul %227, %142, %cst_189 {dimension_numbers = #tpu.dot_dimension_numbers<[1], [0], [0], [1], [0, 0, 1, 1], [], []>} : vector<8x32xbf16>, vector<32x64xbf16>, vector<8x64xf32> -> vector<8x64xf32>
    %229 = arith.truncf %228 : vector<8x64xf32> to vector<8x64xbf16>
    %c768 = arith.constant 768 : index
    %c0_190 = arith.constant 0 : index
    %230 = vector.load %arg12[%c768, %c0_190] : memref<1024x128xbf16, #tpu.memory_space<vmem>>, vector<64x128xbf16>
    %cst_191 = arith.constant dense<0.000000e+00> : vector<8x128xf32>
    %231 = tpu.matmul %229, %230, %cst_191 {dimension_numbers = #tpu.dot_dimension_numbers<[1], [0], [0], [1], [0, 0, 1, 1], [], []>} : vector<8x64xbf16>, vector<64x128xbf16>, vector<8x128xf32> -> vector<8x128xf32>
    %232 = arith.addf %225, %231 : vector<8x128xf32>
    %c13_192 = arith.constant 13 : index
    %c0_193 = arith.constant 0 : index
    %c0_194 = arith.constant 0 : index
    %233 = vector.load %arg11[%c13_192, %c0_193, %c0_194] : memref<17x8x32xbf16, #tpu.memory_space<vmem>>, vector<1x8x32xbf16>
    %234 = vector.shape_cast %233 : vector<1x8x32xbf16> to vector<8x32xbf16>
    %cst_195 = arith.constant dense<0.000000e+00> : vector<8x64xf32>
    %235 = tpu.matmul %234, %142, %cst_195 {dimension_numbers = #tpu.dot_dimension_numbers<[1], [0], [0], [1], [0, 0, 1, 1], [], []>} : vector<8x32xbf16>, vector<32x64xbf16>, vector<8x64xf32> -> vector<8x64xf32>
    %236 = arith.truncf %235 : vector<8x64xf32> to vector<8x64xbf16>
    %c832 = arith.constant 832 : index
    %c0_196 = arith.constant 0 : index
    %237 = vector.load %arg12[%c832, %c0_196] : memref<1024x128xbf16, #tpu.memory_space<vmem>>, vector<64x128xbf16>
    %cst_197 = arith.constant dense<0.000000e+00> : vector<8x128xf32>
    %238 = tpu.matmul %236, %237, %cst_197 {dimension_numbers = #tpu.dot_dimension_numbers<[1], [0], [0], [1], [0, 0, 1, 1], [], []>} : vector<8x64xbf16>, vector<64x128xbf16>, vector<8x128xf32> -> vector<8x128xf32>
    %239 = arith.addf %232, %238 : vector<8x128xf32>
    %c14_198 = arith.constant 14 : index
    %c0_199 = arith.constant 0 : index
    %c0_200 = arith.constant 0 : index
    %240 = vector.load %arg11[%c14_198, %c0_199, %c0_200] : memref<17x8x32xbf16, #tpu.memory_space<vmem>>, vector<1x8x32xbf16>
    %241 = vector.shape_cast %240 : vector<1x8x32xbf16> to vector<8x32xbf16>
    %cst_201 = arith.constant dense<0.000000e+00> : vector<8x64xf32>
    %242 = tpu.matmul %241, %142, %cst_201 {dimension_numbers = #tpu.dot_dimension_numbers<[1], [0], [0], [1], [0, 0, 1, 1], [], []>} : vector<8x32xbf16>, vector<32x64xbf16>, vector<8x64xf32> -> vector<8x64xf32>
    %243 = arith.truncf %242 : vector<8x64xf32> to vector<8x64xbf16>
    %c896 = arith.constant 896 : index
    %c0_202 = arith.constant 0 : index
    %244 = vector.load %arg12[%c896, %c0_202] : memref<1024x128xbf16, #tpu.memory_space<vmem>>, vector<64x128xbf16>
    %cst_203 = arith.constant dense<0.000000e+00> : vector<8x128xf32>
    %245 = tpu.matmul %243, %244, %cst_203 {dimension_numbers = #tpu.dot_dimension_numbers<[1], [0], [0], [1], [0, 0, 1, 1], [], []>} : vector<8x64xbf16>, vector<64x128xbf16>, vector<8x128xf32> -> vector<8x128xf32>
    %246 = arith.addf %239, %245 : vector<8x128xf32>
    %c15_204 = arith.constant 15 : index
    %c0_205 = arith.constant 0 : index
    %c0_206 = arith.constant 0 : index
    %247 = vector.load %arg11[%c15_204, %c0_205, %c0_206] : memref<17x8x32xbf16, #tpu.memory_space<vmem>>, vector<1x8x32xbf16>
    %248 = vector.shape_cast %247 : vector<1x8x32xbf16> to vector<8x32xbf16>
    %cst_207 = arith.constant dense<0.000000e+00> : vector<8x64xf32>
    %249 = tpu.matmul %248, %142, %cst_207 {dimension_numbers = #tpu.dot_dimension_numbers<[1], [0], [0], [1], [0, 0, 1, 1], [], []>} : vector<8x32xbf16>, vector<32x64xbf16>, vector<8x64xf32> -> vector<8x64xf32>
    %250 = arith.truncf %249 : vector<8x64xf32> to vector<8x64xbf16>
    %c960 = arith.constant 960 : index
    %c0_208 = arith.constant 0 : index
    %251 = vector.load %arg12[%c960, %c0_208] : memref<1024x128xbf16, #tpu.memory_space<vmem>>, vector<64x128xbf16>
    %cst_209 = arith.constant dense<0.000000e+00> : vector<8x128xf32>
    %252 = tpu.matmul %250, %251, %cst_209 {dimension_numbers = #tpu.dot_dimension_numbers<[1], [0], [0], [1], [0, 0, 1, 1], [], []>} : vector<8x64xbf16>, vector<64x128xbf16>, vector<8x128xf32> -> vector<8x128xf32>
    %253 = arith.addf %246, %252 : vector<8x128xf32>
    %c0_210 = arith.constant 0 : index
    %c0_211 = arith.constant 0 : index
    %254 = vector.load %arg13[%c0_210, %c0_211] : memref<1x128xf32, #tpu.memory_space<vmem>>, vector<1x128xf32>
    %255 = vector.broadcast %254 : vector<1x128xf32> to vector<8x128xf32>
    %256 = arith.addf %253, %255 : vector<8x128xf32>
    %c16_212 = arith.constant 16 : index
    %c0_213 = arith.constant 0 : index
    %c0_214 = arith.constant 0 : index
    %257 = vector.load %arg11[%c16_212, %c0_213, %c0_214] : memref<17x8x32xbf16, #tpu.memory_space<vmem>>, vector<1x8x32xbf16>
    %258 = vector.shape_cast %257 : vector<1x8x32xbf16> to vector<8x32xbf16>
    %cst_215 = arith.constant dense<0.000000e+00> : vector<8x64xf32>
    %259 = tpu.matmul %258, %142, %cst_215 {dimension_numbers = #tpu.dot_dimension_numbers<[1], [0], [0], [1], [0, 0, 1, 1], [], []>} : vector<8x32xbf16>, vector<32x64xbf16>, vector<8x64xf32> -> vector<8x64xf32>
    %260 = arith.truncf %259 : vector<8x64xf32> to vector<8x64xbf16>
    %c0_216 = arith.constant 0 : index
    %c0_217 = arith.constant 0 : index
    %261 = vector.load %arg14[%c0_216, %c0_217] : memref<64x128xbf16, #tpu.memory_space<vmem>>, vector<64x128xbf16>
    %cst_218 = arith.constant dense<0.000000e+00> : vector<8x128xf32>
    %262 = tpu.matmul %260, %261, %cst_218 {dimension_numbers = #tpu.dot_dimension_numbers<[1], [0], [0], [1], [0, 0, 1, 1], [], []>} : vector<8x64xbf16>, vector<64x128xbf16>, vector<8x128xf32> -> vector<8x128xf32>
    %c0_219 = arith.constant 0 : index
    %c0_220 = arith.constant 0 : index
    %263 = vector.load %arg15[%c0_219, %c0_220] : memref<1x128xf32, #tpu.memory_space<vmem>>, vector<1x128xf32>
    %264 = vector.broadcast %263 : vector<1x128xf32> to vector<8x128xf32>
    %265 = arith.addf %262, %264 : vector<8x128xf32>
    %cst_221 = arith.constant 0.000000e+00 : f32
    %266 = vector.broadcast %cst_221 : f32 to vector<8x128xf32>
    %267 = arith.maximumf %256, %266 : vector<8x128xf32>
    %268 = arith.addf %267, %265 : vector<8x128xf32>
    %269 = arith.truncf %268 : vector<8x128xf32> to vector<8x128xbf16>
    %c0_222 = arith.constant 0 : index
    %c0_223 = arith.constant 0 : index
    %270 = vector.load %arg18[%c0_222, %c0_223] : memref<1x32xf32, #tpu.memory_space<vmem>>, vector<1x32xf32>
    %c0_224 = arith.constant 0 : index
    %c0_225 = arith.constant 0 : index
    %c0_226 = arith.constant 0 : index
    %271 = vector.load %arg16[%c0_224, %c0_225, %c0_226] : memref<4x2x8xbf16, #tpu.memory_space<vmem>>, vector<1x2x8xbf16>
    %272 = vector.shape_cast %271 : vector<1x2x8xbf16> to vector<2x8xbf16>
    %cst_227 = arith.constant dense<0.000000e+00> : vector<2x128xf32>
    %273 = tpu.matmul %272, %269, %cst_227 {dimension_numbers = #tpu.dot_dimension_numbers<[1], [0], [0], [1], [0, 0, 1, 1], [], []>} : vector<2x8xbf16>, vector<8x128xbf16>, vector<2x128xf32> -> vector<2x128xf32>
    %274 = arith.truncf %273 : vector<2x128xf32> to vector<2x128xbf16>
    %c0_228 = arith.constant 0 : index
    %c0_229 = arith.constant 0 : index
    %c0_230 = arith.constant 0 : index
    %275 = vector.load %arg17[%c0_228, %c0_229, %c0_230] : memref<4x128x32xbf16, #tpu.memory_space<vmem>>, vector<1x128x32xbf16>
    %276 = vector.shape_cast %275 : vector<1x128x32xbf16> to vector<128x32xbf16>
    %cst_231 = arith.constant dense<0.000000e+00> : vector<2x32xf32>
    %277 = tpu.matmul %274, %276, %cst_231 {dimension_numbers = #tpu.dot_dimension_numbers<[1], [0], [0], [1], [0, 0, 1, 1], [], []>} : vector<2x128xbf16>, vector<128x32xbf16>, vector<2x32xf32> -> vector<2x32xf32>
    %278 = vector.broadcast %270 : vector<1x32xf32> to vector<2x32xf32>
    %279 = arith.addf %278, %277 : vector<2x32xf32>
    %c1_232 = arith.constant 1 : index
    %c0_233 = arith.constant 0 : index
    %c0_234 = arith.constant 0 : index
    %280 = vector.load %arg16[%c1_232, %c0_233, %c0_234] : memref<4x2x8xbf16, #tpu.memory_space<vmem>>, vector<1x2x8xbf16>
    %281 = vector.shape_cast %280 : vector<1x2x8xbf16> to vector<2x8xbf16>
    %cst_235 = arith.constant dense<0.000000e+00> : vector<2x128xf32>
    %282 = tpu.matmul %281, %269, %cst_235 {dimension_numbers = #tpu.dot_dimension_numbers<[1], [0], [0], [1], [0, 0, 1, 1], [], []>} : vector<2x8xbf16>, vector<8x128xbf16>, vector<2x128xf32> -> vector<2x128xf32>
    %283 = arith.truncf %282 : vector<2x128xf32> to vector<2x128xbf16>
    %c1_236 = arith.constant 1 : index
    %c0_237 = arith.constant 0 : index
    %c0_238 = arith.constant 0 : index
    %284 = vector.load %arg17[%c1_236, %c0_237, %c0_238] : memref<4x128x32xbf16, #tpu.memory_space<vmem>>, vector<1x128x32xbf16>
    %285 = vector.shape_cast %284 : vector<1x128x32xbf16> to vector<128x32xbf16>
    %cst_239 = arith.constant dense<0.000000e+00> : vector<2x32xf32>
    %286 = tpu.matmul %283, %285, %cst_239 {dimension_numbers = #tpu.dot_dimension_numbers<[1], [0], [0], [1], [0, 0, 1, 1], [], []>} : vector<2x128xbf16>, vector<128x32xbf16>, vector<2x32xf32> -> vector<2x32xf32>
    %287 = arith.addf %279, %286 : vector<2x32xf32>
    %c2_240 = arith.constant 2 : index
    %c0_241 = arith.constant 0 : index
    %c0_242 = arith.constant 0 : index
    %288 = vector.load %arg16[%c2_240, %c0_241, %c0_242] : memref<4x2x8xbf16, #tpu.memory_space<vmem>>, vector<1x2x8xbf16>
    %289 = vector.shape_cast %288 : vector<1x2x8xbf16> to vector<2x8xbf16>
    %cst_243 = arith.constant dense<0.000000e+00> : vector<2x128xf32>
    %290 = tpu.matmul %289, %269, %cst_243 {dimension_numbers = #tpu.dot_dimension_numbers<[1], [0], [0], [1], [0, 0, 1, 1], [], []>} : vector<2x8xbf16>, vector<8x128xbf16>, vector<2x128xf32> -> vector<2x128xf32>
    %291 = arith.truncf %290 : vector<2x128xf32> to vector<2x128xbf16>
    %c2_244 = arith.constant 2 : index
    %c0_245 = arith.constant 0 : index
    %c0_246 = arith.constant 0 : index
    %292 = vector.load %arg17[%c2_244, %c0_245, %c0_246] : memref<4x128x32xbf16, #tpu.memory_space<vmem>>, vector<1x128x32xbf16>
    %293 = vector.shape_cast %292 : vector<1x128x32xbf16> to vector<128x32xbf16>
    %cst_247 = arith.constant dense<0.000000e+00> : vector<2x32xf32>
    %294 = tpu.matmul %291, %293, %cst_247 {dimension_numbers = #tpu.dot_dimension_numbers<[1], [0], [0], [1], [0, 0, 1, 1], [], []>} : vector<2x128xbf16>, vector<128x32xbf16>, vector<2x32xf32> -> vector<2x32xf32>
    %295 = arith.addf %287, %294 : vector<2x32xf32>
    %c3_248 = arith.constant 3 : index
    %c0_249 = arith.constant 0 : index
    %c0_250 = arith.constant 0 : index
    %296 = vector.load %arg16[%c3_248, %c0_249, %c0_250] : memref<4x2x8xbf16, #tpu.memory_space<vmem>>, vector<1x2x8xbf16>
    %297 = vector.shape_cast %296 : vector<1x2x8xbf16> to vector<2x8xbf16>
    %cst_251 = arith.constant dense<0.000000e+00> : vector<2x128xf32>
    %298 = tpu.matmul %297, %269, %cst_251 {dimension_numbers = #tpu.dot_dimension_numbers<[1], [0], [0], [1], [0, 0, 1, 1], [], []>} : vector<2x8xbf16>, vector<8x128xbf16>, vector<2x128xf32> -> vector<2x128xf32>
    %299 = arith.truncf %298 : vector<2x128xf32> to vector<2x128xbf16>
    %c3_252 = arith.constant 3 : index
    %c0_253 = arith.constant 0 : index
    %c0_254 = arith.constant 0 : index
    %300 = vector.load %arg17[%c3_252, %c0_253, %c0_254] : memref<4x128x32xbf16, #tpu.memory_space<vmem>>, vector<1x128x32xbf16>
    %301 = vector.shape_cast %300 : vector<1x128x32xbf16> to vector<128x32xbf16>
    %cst_255 = arith.constant dense<0.000000e+00> : vector<2x32xf32>
    %302 = tpu.matmul %299, %301, %cst_255 {dimension_numbers = #tpu.dot_dimension_numbers<[1], [0], [0], [1], [0, 0, 1, 1], [], []>} : vector<2x128xbf16>, vector<128x32xbf16>, vector<2x32xf32> -> vector<2x32xf32>
    %303 = arith.addf %295, %302 : vector<2x32xf32>
    %c0_256 = arith.constant 0 : index
    %c0_257 = arith.constant 0 : index
    %304 = vector.load %arg36[%c0_256, %c0_257] : memref<2x32xf32, #tpu.memory_space<vmem>>, vector<2x32xf32>
    tpu.vector_store %arg36[%c0_256, %c0_257], %303 {strides = array<i32>} : memref<2x32xf32, #tpu.memory_space<vmem>>, vector<2x32xf32>,
    %305 = arith.truncf %303 : vector<2x32xf32> to vector<2x32xbf16>
    %c0_258 = arith.constant 0 : index
    %c0_259 = arith.constant 0 : index
    %c0_260 = arith.constant 0 : index
    %306 = vector.load %arg20[%c0_258, %c0_259, %c0_260] : memref<4x32x128xbf16, #tpu.memory_space<vmem>>, vector<1x32x128xbf16>
    %307 = vector.shape_cast %306 : vector<1x32x128xbf16> to vector<32x128xbf16>
    %cst_261 = arith.constant dense<0.000000e+00> : vector<2x128xf32>
    %308 = tpu.matmul %305, %307, %cst_261 {dimension_numbers = #tpu.dot_dimension_numbers<[1], [0], [0], [1], [0, 0, 1, 1], [], []>} : vector<2x32xbf16>, vector<32x128xbf16>, vector<2x128xf32> -> vector<2x128xf32>
    %c0_262 = arith.constant 0 : index
    %c0_263 = arith.constant 0 : index
    %c0_264 = arith.constant 0 : index
    %309 = vector.load %arg21[%c0_262, %c0_263, %c0_264] : memref<4x1x128xf32, #tpu.memory_space<vmem>>, vector<1x1x128xf32>
    %310 = vector.shape_cast %309 : vector<1x1x128xf32> to vector<1x128xf32>
    %311 = vector.broadcast %310 : vector<1x128xf32> to vector<2x128xf32>
    %312 = arith.addf %308, %311 : vector<2x128xf32>
    %cst_265 = arith.constant 0.000000e+00 : f32
    %313 = vector.broadcast %cst_265 : f32 to vector<2x128xf32>
    %314 = arith.maximumf %312, %313 : vector<2x128xf32>
    %c0_266 = arith.constant 0 : index
    %c0_267 = arith.constant 0 : index
    %c0_268 = arith.constant 0 : index
    %315 = vector.load %arg19[%c0_266, %c0_267, %c0_268] : memref<4x8x2xbf16, #tpu.memory_space<vmem>>, vector<1x8x2xbf16>
    %316 = vector.shape_cast %315 : vector<1x8x2xbf16> to vector<8x2xbf16>
    %317 = arith.truncf %314 : vector<2x128xf32> to vector<2x128xbf16>
    %cst_269 = arith.constant dense<0.000000e+00> : vector<8x128xf32>
    %318 = tpu.matmul %316, %317, %cst_269 {dimension_numbers = #tpu.dot_dimension_numbers<[1], [0], [0], [1], [0, 0, 1, 1], [], []>} : vector<8x2xbf16>, vector<2x128xbf16>, vector<8x128xf32> -> vector<8x128xf32>
    %c1_270 = arith.constant 1 : index
    %c0_271 = arith.constant 0 : index
    %c0_272 = arith.constant 0 : index
    %319 = vector.load %arg20[%c1_270, %c0_271, %c0_272] : memref<4x32x128xbf16, #tpu.memory_space<vmem>>, vector<1x32x128xbf16>
    %320 = vector.shape_cast %319 : vector<1x32x128xbf16> to vector<32x128xbf16>
    %cst_273 = arith.constant dense<0.000000e+00> : vector<2x128xf32>
    %321 = tpu.matmul %305, %320, %cst_273 {dimension_numbers = #tpu.dot_dimension_numbers<[1], [0], [0], [1], [0, 0, 1, 1], [], []>} : vector<2x32xbf16>, vector<32x128xbf16>, vector<2x128xf32> -> vector<2x128xf32>
    %c1_274 = arith.constant 1 : index
    %c0_275 = arith.constant 0 : index
    %c0_276 = arith.constant 0 : index
    %322 = vector.load %arg21[%c1_274, %c0_275, %c0_276] : memref<4x1x128xf32, #tpu.memory_space<vmem>>, vector<1x1x128xf32>
    %323 = vector.shape_cast %322 : vector<1x1x128xf32> to vector<1x128xf32>
    %324 = vector.broadcast %323 : vector<1x128xf32> to vector<2x128xf32>
    %325 = arith.addf %321, %324 : vector<2x128xf32>
    %cst_277 = arith.constant 0.000000e+00 : f32
    %326 = vector.broadcast %cst_277 : f32 to vector<2x128xf32>
    %327 = arith.maximumf %325, %326 : vector<2x128xf32>
    %c1_278 = arith.constant 1 : index
    %c0_279 = arith.constant 0 : index
    %c0_280 = arith.constant 0 : index
    %328 = vector.load %arg19[%c1_278, %c0_279, %c0_280] : memref<4x8x2xbf16, #tpu.memory_space<vmem>>, vector<1x8x2xbf16>
    %329 = vector.shape_cast %328 : vector<1x8x2xbf16> to vector<8x2xbf16>
    %330 = arith.truncf %327 : vector<2x128xf32> to vector<2x128xbf16>
    %cst_281 = arith.constant dense<0.000000e+00> : vector<8x128xf32>
    %331 = tpu.matmul %329, %330, %cst_281 {dimension_numbers = #tpu.dot_dimension_numbers<[1], [0], [0], [1], [0, 0, 1, 1], [], []>} : vector<8x2xbf16>, vector<2x128xbf16>, vector<8x128xf32> -> vector<8x128xf32>
    %332 = arith.addf %318, %331 : vector<8x128xf32>
    %c2_282 = arith.constant 2 : index
    %c0_283 = arith.constant 0 : index
    %c0_284 = arith.constant 0 : index
    %333 = vector.load %arg20[%c2_282, %c0_283, %c0_284] : memref<4x32x128xbf16, #tpu.memory_space<vmem>>, vector<1x32x128xbf16>
    %334 = vector.shape_cast %333 : vector<1x32x128xbf16> to vector<32x128xbf16>
    %cst_285 = arith.constant dense<0.000000e+00> : vector<2x128xf32>
    %335 = tpu.matmul %305, %334, %cst_285 {dimension_numbers = #tpu.dot_dimension_numbers<[1], [0], [0], [1], [0, 0, 1, 1], [], []>} : vector<2x32xbf16>, vector<32x128xbf16>, vector<2x128xf32> -> vector<2x128xf32>
    %c2_286 = arith.constant 2 : index
    %c0_287 = arith.constant 0 : index
    %c0_288 = arith.constant 0 : index
    %336 = vector.load %arg21[%c2_286, %c0_287, %c0_288] : memref<4x1x128xf32, #tpu.memory_space<vmem>>, vector<1x1x128xf32>
    %337 = vector.shape_cast %336 : vector<1x1x128xf32> to vector<1x128xf32>
    %338 = vector.broadcast %337 : vector<1x128xf32> to vector<2x128xf32>
    %339 = arith.addf %335, %338 : vector<2x128xf32>
    %cst_289 = arith.constant 0.000000e+00 : f32
    %340 = vector.broadcast %cst_289 : f32 to vector<2x128xf32>
    %341 = arith.maximumf %339, %340 : vector<2x128xf32>
    %c2_290 = arith.constant 2 : index
    %c0_291 = arith.constant 0 : index
    %c0_292 = arith.constant 0 : index
    %342 = vector.load %arg19[%c2_290, %c0_291, %c0_292] : memref<4x8x2xbf16, #tpu.memory_space<vmem>>, vector<1x8x2xbf16>
    %343 = vector.shape_cast %342 : vector<1x8x2xbf16> to vector<8x2xbf16>
    %344 = arith.truncf %341 : vector<2x128xf32> to vector<2x128xbf16>
    %cst_293 = arith.constant dense<0.000000e+00> : vector<8x128xf32>
    %345 = tpu.matmul %343, %344, %cst_293 {dimension_numbers = #tpu.dot_dimension_numbers<[1], [0], [0], [1], [0, 0, 1, 1], [], []>} : vector<8x2xbf16>, vector<2x128xbf16>, vector<8x128xf32> -> vector<8x128xf32>
    %346 = arith.addf %332, %345 : vector<8x128xf32>
    %c3_294 = arith.constant 3 : index
    %c0_295 = arith.constant 0 : index
    %c0_296 = arith.constant 0 : index
    %347 = vector.load %arg20[%c3_294, %c0_295, %c0_296] : memref<4x32x128xbf16, #tpu.memory_space<vmem>>, vector<1x32x128xbf16>
    %348 = vector.shape_cast %347 : vector<1x32x128xbf16> to vector<32x128xbf16>
    %cst_297 = arith.constant dense<0.000000e+00> : vector<2x128xf32>
    %349 = tpu.matmul %305, %348, %cst_297 {dimension_numbers = #tpu.dot_dimension_numbers<[1], [0], [0], [1], [0, 0, 1, 1], [], []>} : vector<2x32xbf16>, vector<32x128xbf16>, vector<2x128xf32> -> vector<2x128xf32>
    %c3_298 = arith.constant 3 : index
    %c0_299 = arith.constant 0 : index
    %c0_300 = arith.constant 0 : index
    %350 = vector.load %arg21[%c3_298, %c0_299, %c0_300] : memref<4x1x128xf32, #tpu.memory_space<vmem>>, vector<1x1x128xf32>
    %351 = vector.shape_cast %350 : vector<1x1x128xf32> to vector<1x128xf32>
    %352 = vector.broadcast %351 : vector<1x128xf32> to vector<2x128xf32>
    %353 = arith.addf %349, %352 : vector<2x128xf32>
    %cst_301 = arith.constant 0.000000e+00 : f32
    %354 = vector.broadcast %cst_301 : f32 to vector<2x128xf32>
    %355 = arith.maximumf %353, %354 : vector<2x128xf32>
    %c3_302 = arith.constant 3 : index
    %c0_303 = arith.constant 0 : index
    %c0_304 = arith.constant 0 : index
    %356 = vector.load %arg19[%c3_302, %c0_303, %c0_304] : memref<4x8x2xbf16, #tpu.memory_space<vmem>>, vector<1x8x2xbf16>
    %357 = vector.shape_cast %356 : vector<1x8x2xbf16> to vector<8x2xbf16>
    %358 = arith.truncf %355 : vector<2x128xf32> to vector<2x128xbf16>
    %cst_305 = arith.constant dense<0.000000e+00> : vector<8x128xf32>
    %359 = tpu.matmul %357, %358, %cst_305 {dimension_numbers = #tpu.dot_dimension_numbers<[1], [0], [0], [1], [0, 0, 1, 1], [], []>} : vector<8x2xbf16>, vector<2x128xbf16>, vector<8x128xf32> -> vector<8x128xf32>
    %360 = arith.addf %346, %359 : vector<8x128xf32>
    %361 = arith.truncf %360 : vector<8x128xf32> to vector<8x128xbf16>
    %c0_306 = arith.constant 0 : index
    %c0_307 = arith.constant 0 : index
    %c0_308 = arith.constant 0 : index
    %362 = vector.load %arg22[%c0_306, %c0_307, %c0_308] : memref<17x32x8xbf16, #tpu.memory_space<vmem>>, vector<1x32x8xbf16>
    %363 = vector.shape_cast %362 : vector<1x32x8xbf16> to vector<32x8xbf16>
    %cst_309 = arith.constant dense<0.000000e+00> : vector<32x128xf32>
    %364 = tpu.matmul %363, %361, %cst_309 {dimension_numbers = #tpu.dot_dimension_numbers<[1], [0], [0], [1], [0, 0, 1, 1], [], []>} : vector<32x8xbf16>, vector<8x128xbf16>, vector<32x128xf32> -> vector<32x128xf32>
    %365 = arith.truncf %364 : vector<32x128xf32> to vector<32x128xbf16>
    %c0_310 = arith.constant 0 : index
    %c0_311 = arith.constant 0 : index
    %366 = vector.load %arg23[%c0_310, %c0_311] : memref<2048x64xbf16, #tpu.memory_space<vmem>>, vector<128x64xbf16>
    %cst_312 = arith.constant dense<0.000000e+00> : vector<32x64xf32>
    %367 = tpu.matmul %365, %366, %cst_312 {dimension_numbers = #tpu.dot_dimension_numbers<[1], [0], [0], [1], [0, 0, 1, 1], [], []>} : vector<32x128xbf16>, vector<128x64xbf16>, vector<32x64xf32> -> vector<32x64xf32>
    %c1_313 = arith.constant 1 : index
    %c0_314 = arith.constant 0 : index
    %c0_315 = arith.constant 0 : index
    %368 = vector.load %arg22[%c1_313, %c0_314, %c0_315] : memref<17x32x8xbf16, #tpu.memory_space<vmem>>, vector<1x32x8xbf16>
    %369 = vector.shape_cast %368 : vector<1x32x8xbf16> to vector<32x8xbf16>
    %cst_316 = arith.constant dense<0.000000e+00> : vector<32x128xf32>
    %370 = tpu.matmul %369, %361, %cst_316 {dimension_numbers = #tpu.dot_dimension_numbers<[1], [0], [0], [1], [0, 0, 1, 1], [], []>} : vector<32x8xbf16>, vector<8x128xbf16>, vector<32x128xf32> -> vector<32x128xf32>
    %371 = arith.truncf %370 : vector<32x128xf32> to vector<32x128xbf16>
    %c128_317 = arith.constant 128 : index
    %c0_318 = arith.constant 0 : index
    %372 = vector.load %arg23[%c128_317, %c0_318] : memref<2048x64xbf16, #tpu.memory_space<vmem>>, vector<128x64xbf16>
    %cst_319 = arith.constant dense<0.000000e+00> : vector<32x64xf32>
    %373 = tpu.matmul %371, %372, %cst_319 {dimension_numbers = #tpu.dot_dimension_numbers<[1], [0], [0], [1], [0, 0, 1, 1], [], []>} : vector<32x128xbf16>, vector<128x64xbf16>, vector<32x64xf32> -> vector<32x64xf32>
    %374 = arith.addf %367, %373 : vector<32x64xf32>
    %c2_320 = arith.constant 2 : index
    %c0_321 = arith.constant 0 : index
    %c0_322 = arith.constant 0 : index
    %375 = vector.load %arg22[%c2_320, %c0_321, %c0_322] : memref<17x32x8xbf16, #tpu.memory_space<vmem>>, vector<1x32x8xbf16>
    %376 = vector.shape_cast %375 : vector<1x32x8xbf16> to vector<32x8xbf16>
    %cst_323 = arith.constant dense<0.000000e+00> : vector<32x128xf32>
    %377 = tpu.matmul %376, %361, %cst_323 {dimension_numbers = #tpu.dot_dimension_numbers<[1], [0], [0], [1], [0, 0, 1, 1], [], []>} : vector<32x8xbf16>, vector<8x128xbf16>, vector<32x128xf32> -> vector<32x128xf32>
    %378 = arith.truncf %377 : vector<32x128xf32> to vector<32x128xbf16>
    %c256_324 = arith.constant 256 : index
    %c0_325 = arith.constant 0 : index
    %379 = vector.load %arg23[%c256_324, %c0_325] : memref<2048x64xbf16, #tpu.memory_space<vmem>>, vector<128x64xbf16>
    %cst_326 = arith.constant dense<0.000000e+00> : vector<32x64xf32>
    %380 = tpu.matmul %378, %379, %cst_326 {dimension_numbers = #tpu.dot_dimension_numbers<[1], [0], [0], [1], [0, 0, 1, 1], [], []>} : vector<32x128xbf16>, vector<128x64xbf16>, vector<32x64xf32> -> vector<32x64xf32>
    %381 = arith.addf %374, %380 : vector<32x64xf32>
    %c3_327 = arith.constant 3 : index
    %c0_328 = arith.constant 0 : index
    %c0_329 = arith.constant 0 : index
    %382 = vector.load %arg22[%c3_327, %c0_328, %c0_329] : memref<17x32x8xbf16, #tpu.memory_space<vmem>>, vector<1x32x8xbf16>
    %383 = vector.shape_cast %382 : vector<1x32x8xbf16> to vector<32x8xbf16>
    %cst_330 = arith.constant dense<0.000000e+00> : vector<32x128xf32>
    %384 = tpu.matmul %383, %361, %cst_330 {dimension_numbers = #tpu.dot_dimension_numbers<[1], [0], [0], [1], [0, 0, 1, 1], [], []>} : vector<32x8xbf16>, vector<8x128xbf16>, vector<32x128xf32> -> vector<32x128xf32>
    %385 = arith.truncf %384 : vector<32x128xf32> to vector<32x128xbf16>
    %c384_331 = arith.constant 384 : index
    %c0_332 = arith.constant 0 : index
    %386 = vector.load %arg23[%c384_331, %c0_332] : memref<2048x64xbf16, #tpu.memory_space<vmem>>, vector<128x64xbf16>
    %cst_333 = arith.constant dense<0.000000e+00> : vector<32x64xf32>
    %387 = tpu.matmul %385, %386, %cst_333 {dimension_numbers = #tpu.dot_dimension_numbers<[1], [0], [0], [1], [0, 0, 1, 1], [], []>} : vector<32x128xbf16>, vector<128x64xbf16>, vector<32x64xf32> -> vector<32x64xf32>
    %388 = arith.addf %381, %387 : vector<32x64xf32>
    %c4_334 = arith.constant 4 : index
    %c0_335 = arith.constant 0 : index
    %c0_336 = arith.constant 0 : index
    %389 = vector.load %arg22[%c4_334, %c0_335, %c0_336] : memref<17x32x8xbf16, #tpu.memory_space<vmem>>, vector<1x32x8xbf16>
    %390 = vector.shape_cast %389 : vector<1x32x8xbf16> to vector<32x8xbf16>
    %cst_337 = arith.constant dense<0.000000e+00> : vector<32x128xf32>
    %391 = tpu.matmul %390, %361, %cst_337 {dimension_numbers = #tpu.dot_dimension_numbers<[1], [0], [0], [1], [0, 0, 1, 1], [], []>} : vector<32x8xbf16>, vector<8x128xbf16>, vector<32x128xf32> -> vector<32x128xf32>
    %392 = arith.truncf %391 : vector<32x128xf32> to vector<32x128xbf16>
    %c512_338 = arith.constant 512 : index
    %c0_339 = arith.constant 0 : index
    %393 = vector.load %arg23[%c512_338, %c0_339] : memref<2048x64xbf16, #tpu.memory_space<vmem>>, vector<128x64xbf16>
    %cst_340 = arith.constant dense<0.000000e+00> : vector<32x64xf32>
    %394 = tpu.matmul %392, %393, %cst_340 {dimension_numbers = #tpu.dot_dimension_numbers<[1], [0], [0], [1], [0, 0, 1, 1], [], []>} : vector<32x128xbf16>, vector<128x64xbf16>, vector<32x64xf32> -> vector<32x64xf32>
    %395 = arith.addf %388, %394 : vector<32x64xf32>
    %c5_341 = arith.constant 5 : index
    %c0_342 = arith.constant 0 : index
    %c0_343 = arith.constant 0 : index
    %396 = vector.load %arg22[%c5_341, %c0_342, %c0_343] : memref<17x32x8xbf16, #tpu.memory_space<vmem>>, vector<1x32x8xbf16>
    %397 = vector.shape_cast %396 : vector<1x32x8xbf16> to vector<32x8xbf16>
    %cst_344 = arith.constant dense<0.000000e+00> : vector<32x128xf32>
    %398 = tpu.matmul %397, %361, %cst_344 {dimension_numbers = #tpu.dot_dimension_numbers<[1], [0], [0], [1], [0, 0, 1, 1], [], []>} : vector<32x8xbf16>, vector<8x128xbf16>, vector<32x128xf32> -> vector<32x128xf32>
    %399 = arith.truncf %398 : vector<32x128xf32> to vector<32x128xbf16>
    %c640_345 = arith.constant 640 : index
    %c0_346 = arith.constant 0 : index
    %400 = vector.load %arg23[%c640_345, %c0_346] : memref<2048x64xbf16, #tpu.memory_space<vmem>>, vector<128x64xbf16>
    %cst_347 = arith.constant dense<0.000000e+00> : vector<32x64xf32>
    %401 = tpu.matmul %399, %400, %cst_347 {dimension_numbers = #tpu.dot_dimension_numbers<[1], [0], [0], [1], [0, 0, 1, 1], [], []>} : vector<32x128xbf16>, vector<128x64xbf16>, vector<32x64xf32> -> vector<32x64xf32>
    %402 = arith.addf %395, %401 : vector<32x64xf32>
    %c6_348 = arith.constant 6 : index
    %c0_349 = arith.constant 0 : index
    %c0_350 = arith.constant 0 : index
    %403 = vector.load %arg22[%c6_348, %c0_349, %c0_350] : memref<17x32x8xbf16, #tpu.memory_space<vmem>>, vector<1x32x8xbf16>
    %404 = vector.shape_cast %403 : vector<1x32x8xbf16> to vector<32x8xbf16>
    %cst_351 = arith.constant dense<0.000000e+00> : vector<32x128xf32>
    %405 = tpu.matmul %404, %361, %cst_351 {dimension_numbers = #tpu.dot_dimension_numbers<[1], [0], [0], [1], [0, 0, 1, 1], [], []>} : vector<32x8xbf16>, vector<8x128xbf16>, vector<32x128xf32> -> vector<32x128xf32>
    %406 = arith.truncf %405 : vector<32x128xf32> to vector<32x128xbf16>
    %c768_352 = arith.constant 768 : index
    %c0_353 = arith.constant 0 : index
    %407 = vector.load %arg23[%c768_352, %c0_353] : memref<2048x64xbf16, #tpu.memory_space<vmem>>, vector<128x64xbf16>
    %cst_354 = arith.constant dense<0.000000e+00> : vector<32x64xf32>
    %408 = tpu.matmul %406, %407, %cst_354 {dimension_numbers = #tpu.dot_dimension_numbers<[1], [0], [0], [1], [0, 0, 1, 1], [], []>} : vector<32x128xbf16>, vector<128x64xbf16>, vector<32x64xf32> -> vector<32x64xf32>
    %409 = arith.addf %402, %408 : vector<32x64xf32>
    %c7_355 = arith.constant 7 : index
    %c0_356 = arith.constant 0 : index
    %c0_357 = arith.constant 0 : index
    %410 = vector.load %arg22[%c7_355, %c0_356, %c0_357] : memref<17x32x8xbf16, #tpu.memory_space<vmem>>, vector<1x32x8xbf16>
    %411 = vector.shape_cast %410 : vector<1x32x8xbf16> to vector<32x8xbf16>
    %cst_358 = arith.constant dense<0.000000e+00> : vector<32x128xf32>
    %412 = tpu.matmul %411, %361, %cst_358 {dimension_numbers = #tpu.dot_dimension_numbers<[1], [0], [0], [1], [0, 0, 1, 1], [], []>} : vector<32x8xbf16>, vector<8x128xbf16>, vector<32x128xf32> -> vector<32x128xf32>
    %413 = arith.truncf %412 : vector<32x128xf32> to vector<32x128xbf16>
    %c896_359 = arith.constant 896 : index
    %c0_360 = arith.constant 0 : index
    %414 = vector.load %arg23[%c896_359, %c0_360] : memref<2048x64xbf16, #tpu.memory_space<vmem>>, vector<128x64xbf16>
    %cst_361 = arith.constant dense<0.000000e+00> : vector<32x64xf32>
    %415 = tpu.matmul %413, %414, %cst_361 {dimension_numbers = #tpu.dot_dimension_numbers<[1], [0], [0], [1], [0, 0, 1, 1], [], []>} : vector<32x128xbf16>, vector<128x64xbf16>, vector<32x64xf32> -> vector<32x64xf32>
    %416 = arith.addf %409, %415 : vector<32x64xf32>
    %c8_362 = arith.constant 8 : index
    %c0_363 = arith.constant 0 : index
    %c0_364 = arith.constant 0 : index
    %417 = vector.load %arg22[%c8_362, %c0_363, %c0_364] : memref<17x32x8xbf16, #tpu.memory_space<vmem>>, vector<1x32x8xbf16>
    %418 = vector.shape_cast %417 : vector<1x32x8xbf16> to vector<32x8xbf16>
    %cst_365 = arith.constant dense<0.000000e+00> : vector<32x128xf32>
    %419 = tpu.matmul %418, %361, %cst_365 {dimension_numbers = #tpu.dot_dimension_numbers<[1], [0], [0], [1], [0, 0, 1, 1], [], []>} : vector<32x8xbf16>, vector<8x128xbf16>, vector<32x128xf32> -> vector<32x128xf32>
    %420 = arith.truncf %419 : vector<32x128xf32> to vector<32x128xbf16>
    %c1024 = arith.constant 1024 : index
    %c0_366 = arith.constant 0 : index
    %421 = vector.load %arg23[%c1024, %c0_366] : memref<2048x64xbf16, #tpu.memory_space<vmem>>, vector<128x64xbf16>
    %cst_367 = arith.constant dense<0.000000e+00> : vector<32x64xf32>
    %422 = tpu.matmul %420, %421, %cst_367 {dimension_numbers = #tpu.dot_dimension_numbers<[1], [0], [0], [1], [0, 0, 1, 1], [], []>} : vector<32x128xbf16>, vector<128x64xbf16>, vector<32x64xf32> -> vector<32x64xf32>
    %423 = arith.addf %416, %422 : vector<32x64xf32>
    %c9_368 = arith.constant 9 : index
    %c0_369 = arith.constant 0 : index
    %c0_370 = arith.constant 0 : index
    %424 = vector.load %arg22[%c9_368, %c0_369, %c0_370] : memref<17x32x8xbf16, #tpu.memory_space<vmem>>, vector<1x32x8xbf16>
    %425 = vector.shape_cast %424 : vector<1x32x8xbf16> to vector<32x8xbf16>
    %cst_371 = arith.constant dense<0.000000e+00> : vector<32x128xf32>
    %426 = tpu.matmul %425, %361, %cst_371 {dimension_numbers = #tpu.dot_dimension_numbers<[1], [0], [0], [1], [0, 0, 1, 1], [], []>} : vector<32x8xbf16>, vector<8x128xbf16>, vector<32x128xf32> -> vector<32x128xf32>
    %427 = arith.truncf %426 : vector<32x128xf32> to vector<32x128xbf16>
    %c1152 = arith.constant 1152 : index
    %c0_372 = arith.constant 0 : index
    %428 = vector.load %arg23[%c1152, %c0_372] : memref<2048x64xbf16, #tpu.memory_space<vmem>>, vector<128x64xbf16>
    %cst_373 = arith.constant dense<0.000000e+00> : vector<32x64xf32>
    %429 = tpu.matmul %427, %428, %cst_373 {dimension_numbers = #tpu.dot_dimension_numbers<[1], [0], [0], [1], [0, 0, 1, 1], [], []>} : vector<32x128xbf16>, vector<128x64xbf16>, vector<32x64xf32> -> vector<32x64xf32>
    %430 = arith.addf %423, %429 : vector<32x64xf32>
    %c10_374 = arith.constant 10 : index
    %c0_375 = arith.constant 0 : index
    %c0_376 = arith.constant 0 : index
    %431 = vector.load %arg22[%c10_374, %c0_375, %c0_376] : memref<17x32x8xbf16, #tpu.memory_space<vmem>>, vector<1x32x8xbf16>
    %432 = vector.shape_cast %431 : vector<1x32x8xbf16> to vector<32x8xbf16>
    %cst_377 = arith.constant dense<0.000000e+00> : vector<32x128xf32>
    %433 = tpu.matmul %432, %361, %cst_377 {dimension_numbers = #tpu.dot_dimension_numbers<[1], [0], [0], [1], [0, 0, 1, 1], [], []>} : vector<32x8xbf16>, vector<8x128xbf16>, vector<32x128xf32> -> vector<32x128xf32>
    %434 = arith.truncf %433 : vector<32x128xf32> to vector<32x128xbf16>
    %c1280 = arith.constant 1280 : index
    %c0_378 = arith.constant 0 : index
    %435 = vector.load %arg23[%c1280, %c0_378] : memref<2048x64xbf16, #tpu.memory_space<vmem>>, vector<128x64xbf16>
    %cst_379 = arith.constant dense<0.000000e+00> : vector<32x64xf32>
    %436 = tpu.matmul %434, %435, %cst_379 {dimension_numbers = #tpu.dot_dimension_numbers<[1], [0], [0], [1], [0, 0, 1, 1], [], []>} : vector<32x128xbf16>, vector<128x64xbf16>, vector<32x64xf32> -> vector<32x64xf32>
    %437 = arith.addf %430, %436 : vector<32x64xf32>
    %c11_380 = arith.constant 11 : index
    %c0_381 = arith.constant 0 : index
    %c0_382 = arith.constant 0 : index
    %438 = vector.load %arg22[%c11_380, %c0_381, %c0_382] : memref<17x32x8xbf16, #tpu.memory_space<vmem>>, vector<1x32x8xbf16>
    %439 = vector.shape_cast %438 : vector<1x32x8xbf16> to vector<32x8xbf16>
    %cst_383 = arith.constant dense<0.000000e+00> : vector<32x128xf32>
    %440 = tpu.matmul %439, %361, %cst_383 {dimension_numbers = #tpu.dot_dimension_numbers<[1], [0], [0], [1], [0, 0, 1, 1], [], []>} : vector<32x8xbf16>, vector<8x128xbf16>, vector<32x128xf32> -> vector<32x128xf32>
    %441 = arith.truncf %440 : vector<32x128xf32> to vector<32x128xbf16>
    %c1408 = arith.constant 1408 : index
    %c0_384 = arith.constant 0 : index
    %442 = vector.load %arg23[%c1408, %c0_384] : memref<2048x64xbf16, #tpu.memory_space<vmem>>, vector<128x64xbf16>
    %cst_385 = arith.constant dense<0.000000e+00> : vector<32x64xf32>
    %443 = tpu.matmul %441, %442, %cst_385 {dimension_numbers = #tpu.dot_dimension_numbers<[1], [0], [0], [1], [0, 0, 1, 1], [], []>} : vector<32x128xbf16>, vector<128x64xbf16>, vector<32x64xf32> -> vector<32x64xf32>
    %444 = arith.addf %437, %443 : vector<32x64xf32>
    %c12_386 = arith.constant 12 : index
    %c0_387 = arith.constant 0 : index
    %c0_388 = arith.constant 0 : index
    %445 = vector.load %arg22[%c12_386, %c0_387, %c0_388] : memref<17x32x8xbf16, #tpu.memory_space<vmem>>, vector<1x32x8xbf16>
    %446 = vector.shape_cast %445 : vector<1x32x8xbf16> to vector<32x8xbf16>
    %cst_389 = arith.constant dense<0.000000e+00> : vector<32x128xf32>
    %447 = tpu.matmul %446, %361, %cst_389 {dimension_numbers = #tpu.dot_dimension_numbers<[1], [0], [0], [1], [0, 0, 1, 1], [], []>} : vector<32x8xbf16>, vector<8x128xbf16>, vector<32x128xf32> -> vector<32x128xf32>
    %448 = arith.truncf %447 : vector<32x128xf32> to vector<32x128xbf16>
    %c1536 = arith.constant 1536 : index
    %c0_390 = arith.constant 0 : index
    %449 = vector.load %arg23[%c1536, %c0_390] : memref<2048x64xbf16, #tpu.memory_space<vmem>>, vector<128x64xbf16>
    %cst_391 = arith.constant dense<0.000000e+00> : vector<32x64xf32>
    %450 = tpu.matmul %448, %449, %cst_391 {dimension_numbers = #tpu.dot_dimension_numbers<[1], [0], [0], [1], [0, 0, 1, 1], [], []>} : vector<32x128xbf16>, vector<128x64xbf16>, vector<32x64xf32> -> vector<32x64xf32>
    %451 = arith.addf %444, %450 : vector<32x64xf32>
    %c13_392 = arith.constant 13 : index
    %c0_393 = arith.constant 0 : index
    %c0_394 = arith.constant 0 : index
    %452 = vector.load %arg22[%c13_392, %c0_393, %c0_394] : memref<17x32x8xbf16, #tpu.memory_space<vmem>>, vector<1x32x8xbf16>
    %453 = vector.shape_cast %452 : vector<1x32x8xbf16> to vector<32x8xbf16>
    %cst_395 = arith.constant dense<0.000000e+00> : vector<32x128xf32>
    %454 = tpu.matmul %453, %361, %cst_395 {dimension_numbers = #tpu.dot_dimension_numbers<[1], [0], [0], [1], [0, 0, 1, 1], [], []>} : vector<32x8xbf16>, vector<8x128xbf16>, vector<32x128xf32> -> vector<32x128xf32>
    %455 = arith.truncf %454 : vector<32x128xf32> to vector<32x128xbf16>
    %c1664 = arith.constant 1664 : index
    %c0_396 = arith.constant 0 : index
    %456 = vector.load %arg23[%c1664, %c0_396] : memref<2048x64xbf16, #tpu.memory_space<vmem>>, vector<128x64xbf16>
    %cst_397 = arith.constant dense<0.000000e+00> : vector<32x64xf32>
    %457 = tpu.matmul %455, %456, %cst_397 {dimension_numbers = #tpu.dot_dimension_numbers<[1], [0], [0], [1], [0, 0, 1, 1], [], []>} : vector<32x128xbf16>, vector<128x64xbf16>, vector<32x64xf32> -> vector<32x64xf32>
    %458 = arith.addf %451, %457 : vector<32x64xf32>
    %c14_398 = arith.constant 14 : index
    %c0_399 = arith.constant 0 : index
    %c0_400 = arith.constant 0 : index
    %459 = vector.load %arg22[%c14_398, %c0_399, %c0_400] : memref<17x32x8xbf16, #tpu.memory_space<vmem>>, vector<1x32x8xbf16>
    %460 = vector.shape_cast %459 : vector<1x32x8xbf16> to vector<32x8xbf16>
    %cst_401 = arith.constant dense<0.000000e+00> : vector<32x128xf32>
    %461 = tpu.matmul %460, %361, %cst_401 {dimension_numbers = #tpu.dot_dimension_numbers<[1], [0], [0], [1], [0, 0, 1, 1], [], []>} : vector<32x8xbf16>, vector<8x128xbf16>, vector<32x128xf32> -> vector<32x128xf32>
    %462 = arith.truncf %461 : vector<32x128xf32> to vector<32x128xbf16>
    %c1792 = arith.constant 1792 : index
    %c0_402 = arith.constant 0 : index
    %463 = vector.load %arg23[%c1792, %c0_402] : memref<2048x64xbf16, #tpu.memory_space<vmem>>, vector<128x64xbf16>
    %cst_403 = arith.constant dense<0.000000e+00> : vector<32x64xf32>
    %464 = tpu.matmul %462, %463, %cst_403 {dimension_numbers = #tpu.dot_dimension_numbers<[1], [0], [0], [1], [0, 0, 1, 1], [], []>} : vector<32x128xbf16>, vector<128x64xbf16>, vector<32x64xf32> -> vector<32x64xf32>
    %465 = arith.addf %458, %464 : vector<32x64xf32>
    %c15_404 = arith.constant 15 : index
    %c0_405 = arith.constant 0 : index
    %c0_406 = arith.constant 0 : index
    %466 = vector.load %arg22[%c15_404, %c0_405, %c0_406] : memref<17x32x8xbf16, #tpu.memory_space<vmem>>, vector<1x32x8xbf16>
    %467 = vector.shape_cast %466 : vector<1x32x8xbf16> to vector<32x8xbf16>
    %cst_407 = arith.constant dense<0.000000e+00> : vector<32x128xf32>
    %468 = tpu.matmul %467, %361, %cst_407 {dimension_numbers = #tpu.dot_dimension_numbers<[1], [0], [0], [1], [0, 0, 1, 1], [], []>} : vector<32x8xbf16>, vector<8x128xbf16>, vector<32x128xf32> -> vector<32x128xf32>
    %469 = arith.truncf %468 : vector<32x128xf32> to vector<32x128xbf16>
    %c1920 = arith.constant 1920 : index
    %c0_408 = arith.constant 0 : index
    %470 = vector.load %arg23[%c1920, %c0_408] : memref<2048x64xbf16, #tpu.memory_space<vmem>>, vector<128x64xbf16>
    %cst_409 = arith.constant dense<0.000000e+00> : vector<32x64xf32>
    %471 = tpu.matmul %469, %470, %cst_409 {dimension_numbers = #tpu.dot_dimension_numbers<[1], [0], [0], [1], [0, 0, 1, 1], [], []>} : vector<32x128xbf16>, vector<128x64xbf16>, vector<32x64xf32> -> vector<32x64xf32>
    %472 = arith.addf %465, %471 : vector<32x64xf32>
    %c0_410 = arith.constant 0 : index
    %c0_411 = arith.constant 0 : index
    %473 = vector.load %arg24[%c0_410, %c0_411] : memref<1x64xf32, #tpu.memory_space<vmem>>, vector<1x64xf32>
    %474 = vector.broadcast %473 : vector<1x64xf32> to vector<32x64xf32>
    %475 = arith.addf %472, %474 : vector<32x64xf32>
    %c16_412 = arith.constant 16 : index
    %c0_413 = arith.constant 0 : index
    %c0_414 = arith.constant 0 : index
    %476 = vector.load %arg22[%c16_412, %c0_413, %c0_414] : memref<17x32x8xbf16, #tpu.memory_space<vmem>>, vector<1x32x8xbf16>
    %477 = vector.shape_cast %476 : vector<1x32x8xbf16> to vector<32x8xbf16>
    %cst_415 = arith.constant dense<0.000000e+00> : vector<32x128xf32>
    %478 = tpu.matmul %477, %361, %cst_415 {dimension_numbers = #tpu.dot_dimension_numbers<[1], [0], [0], [1], [0, 0, 1, 1], [], []>} : vector<32x8xbf16>, vector<8x128xbf16>, vector<32x128xf32> -> vector<32x128xf32>
    %479 = arith.truncf %478 : vector<32x128xf32> to vector<32x128xbf16>
    %c0_416 = arith.constant 0 : index
    %c0_417 = arith.constant 0 : index
    %480 = vector.load %arg25[%c0_416, %c0_417] : memref<128x64xbf16, #tpu.memory_space<vmem>>, vector<128x64xbf16>
    %cst_418 = arith.constant dense<0.000000e+00> : vector<32x64xf32>
    %481 = tpu.matmul %479, %480, %cst_418 {dimension_numbers = #tpu.dot_dimension_numbers<[1], [0], [0], [1], [0, 0, 1, 1], [], []>} : vector<32x128xbf16>, vector<128x64xbf16>, vector<32x64xf32> -> vector<32x64xf32>
    %c0_419 = arith.constant 0 : index
    %c0_420 = arith.constant 0 : index
    %482 = vector.load %arg26[%c0_419, %c0_420] : memref<1x64xf32, #tpu.memory_space<vmem>>, vector<1x64xf32>
    %483 = vector.broadcast %482 : vector<1x64xf32> to vector<32x64xf32>
    %484 = arith.addf %481, %483 : vector<32x64xf32>
    %cst_421 = arith.constant 0.000000e+00 : f32
    %485 = vector.broadcast %cst_421 : f32 to vector<32x64xf32>
    %486 = arith.maximumf %475, %485 : vector<32x64xf32>
    %487 = arith.addf %486, %484 : vector<32x64xf32>
    %488 = arith.truncf %487 : vector<32x64xf32> to vector<32x64xbf16>
    %c0_422 = arith.constant 0 : index
    %c0_423 = arith.constant 0 : index
    %c0_424 = arith.constant 0 : index
    %489 = vector.load %arg27[%c0_422, %c0_423, %c0_424] : memref<17x128x32xbf16, #tpu.memory_space<vmem>>, vector<1x128x32xbf16>
    %490 = vector.shape_cast %489 : vector<1x128x32xbf16> to vector<128x32xbf16>
    %cst_425 = arith.constant dense<0.000000e+00> : vector<128x64xf32>
    %491 = tpu.matmul %490, %488, %cst_425 {dimension_numbers = #tpu.dot_dimension_numbers<[1], [0], [0], [1], [0, 0, 1, 1], [], []>} : vector<128x32xbf16>, vector<32x64xbf16>, vector<128x64xf32> -> vector<128x64xf32>
    %492 = arith.truncf %491 : vector<128x64xf32> to vector<128x64xbf16>
    %c0_426 = arith.constant 0 : index
    %c0_427 = arith.constant 0 : index
    %493 = vector.load %arg28[%c0_426, %c0_427] : memref<1024x32xbf16, #tpu.memory_space<vmem>>, vector<64x32xbf16>
    %cst_428 = arith.constant dense<0.000000e+00> : vector<128x32xf32>
    %494 = tpu.matmul %492, %493, %cst_428 {dimension_numbers = #tpu.dot_dimension_numbers<[1], [0], [0], [1], [0, 0, 1, 1], [], []>} : vector<128x64xbf16>, vector<64x32xbf16>, vector<128x32xf32> -> vector<128x32xf32>
    %c1_429 = arith.constant 1 : index
    %c0_430 = arith.constant 0 : index
    %c0_431 = arith.constant 0 : index
    %495 = vector.load %arg27[%c1_429, %c0_430, %c0_431] : memref<17x128x32xbf16, #tpu.memory_space<vmem>>, vector<1x128x32xbf16>
    %496 = vector.shape_cast %495 : vector<1x128x32xbf16> to vector<128x32xbf16>
    %cst_432 = arith.constant dense<0.000000e+00> : vector<128x64xf32>
    %497 = tpu.matmul %496, %488, %cst_432 {dimension_numbers = #tpu.dot_dimension_numbers<[1], [0], [0], [1], [0, 0, 1, 1], [], []>} : vector<128x32xbf16>, vector<32x64xbf16>, vector<128x64xf32> -> vector<128x64xf32>
    %498 = arith.truncf %497 : vector<128x64xf32> to vector<128x64xbf16>
    %c64_433 = arith.constant 64 : index
    %c0_434 = arith.constant 0 : index
    %499 = vector.load %arg28[%c64_433, %c0_434] : memref<1024x32xbf16, #tpu.memory_space<vmem>>, vector<64x32xbf16>
    %cst_435 = arith.constant dense<0.000000e+00> : vector<128x32xf32>
    %500 = tpu.matmul %498, %499, %cst_435 {dimension_numbers = #tpu.dot_dimension_numbers<[1], [0], [0], [1], [0, 0, 1, 1], [], []>} : vector<128x64xbf16>, vector<64x32xbf16>, vector<128x32xf32> -> vector<128x32xf32>
    %501 = arith.addf %494, %500 : vector<128x32xf32>
    %c2_436 = arith.constant 2 : index
    %c0_437 = arith.constant 0 : index
    %c0_438 = arith.constant 0 : index
    %502 = vector.load %arg27[%c2_436, %c0_437, %c0_438] : memref<17x128x32xbf16, #tpu.memory_space<vmem>>, vector<1x128x32xbf16>
    %503 = vector.shape_cast %502 : vector<1x128x32xbf16> to vector<128x32xbf16>
    %cst_439 = arith.constant dense<0.000000e+00> : vector<128x64xf32>
    %504 = tpu.matmul %503, %488, %cst_439 {dimension_numbers = #tpu.dot_dimension_numbers<[1], [0], [0], [1], [0, 0, 1, 1], [], []>} : vector<128x32xbf16>, vector<32x64xbf16>, vector<128x64xf32> -> vector<128x64xf32>
    %505 = arith.truncf %504 : vector<128x64xf32> to vector<128x64xbf16>
    %c128_440 = arith.constant 128 : index
    %c0_441 = arith.constant 0 : index
    %506 = vector.load %arg28[%c128_440, %c0_441] : memref<1024x32xbf16, #tpu.memory_space<vmem>>, vector<64x32xbf16>
    %cst_442 = arith.constant dense<0.000000e+00> : vector<128x32xf32>
    %507 = tpu.matmul %505, %506, %cst_442 {dimension_numbers = #tpu.dot_dimension_numbers<[1], [0], [0], [1], [0, 0, 1, 1], [], []>} : vector<128x64xbf16>, vector<64x32xbf16>, vector<128x32xf32> -> vector<128x32xf32>
    %508 = arith.addf %501, %507 : vector<128x32xf32>
    %c3_443 = arith.constant 3 : index
    %c0_444 = arith.constant 0 : index
    %c0_445 = arith.constant 0 : index
    %509 = vector.load %arg27[%c3_443, %c0_444, %c0_445] : memref<17x128x32xbf16, #tpu.memory_space<vmem>>, vector<1x128x32xbf16>
    %510 = vector.shape_cast %509 : vector<1x128x32xbf16> to vector<128x32xbf16>
    %cst_446 = arith.constant dense<0.000000e+00> : vector<128x64xf32>
    %511 = tpu.matmul %510, %488, %cst_446 {dimension_numbers = #tpu.dot_dimension_numbers<[1], [0], [0], [1], [0, 0, 1, 1], [], []>} : vector<128x32xbf16>, vector<32x64xbf16>, vector<128x64xf32> -> vector<128x64xf32>
    %512 = arith.truncf %511 : vector<128x64xf32> to vector<128x64xbf16>
    %c192_447 = arith.constant 192 : index
    %c0_448 = arith.constant 0 : index
    %513 = vector.load %arg28[%c192_447, %c0_448] : memref<1024x32xbf16, #tpu.memory_space<vmem>>, vector<64x32xbf16>
    %cst_449 = arith.constant dense<0.000000e+00> : vector<128x32xf32>
    %514 = tpu.matmul %512, %513, %cst_449 {dimension_numbers = #tpu.dot_dimension_numbers<[1], [0], [0], [1], [0, 0, 1, 1], [], []>} : vector<128x64xbf16>, vector<64x32xbf16>, vector<128x32xf32> -> vector<128x32xf32>
    %515 = arith.addf %508, %514 : vector<128x32xf32>
    %c4_450 = arith.constant 4 : index
    %c0_451 = arith.constant 0 : index
    %c0_452 = arith.constant 0 : index
    %516 = vector.load %arg27[%c4_450, %c0_451, %c0_452] : memref<17x128x32xbf16, #tpu.memory_space<vmem>>, vector<1x128x32xbf16>
    %517 = vector.shape_cast %516 : vector<1x128x32xbf16> to vector<128x32xbf16>
    %cst_453 = arith.constant dense<0.000000e+00> : vector<128x64xf32>
    %518 = tpu.matmul %517, %488, %cst_453 {dimension_numbers = #tpu.dot_dimension_numbers<[1], [0], [0], [1], [0, 0, 1, 1], [], []>} : vector<128x32xbf16>, vector<32x64xbf16>, vector<128x64xf32> -> vector<128x64xf32>
    %519 = arith.truncf %518 : vector<128x64xf32> to vector<128x64xbf16>
    %c256_454 = arith.constant 256 : index
    %c0_455 = arith.constant 0 : index
    %520 = vector.load %arg28[%c256_454, %c0_455] : memref<1024x32xbf16, #tpu.memory_space<vmem>>, vector<64x32xbf16>
    %cst_456 = arith.constant dense<0.000000e+00> : vector<128x32xf32>
    %521 = tpu.matmul %519, %520, %cst_456 {dimension_numbers = #tpu.dot_dimension_numbers<[1], [0], [0], [1], [0, 0, 1, 1], [], []>} : vector<128x64xbf16>, vector<64x32xbf16>, vector<128x32xf32> -> vector<128x32xf32>
    %522 = arith.addf %515, %521 : vector<128x32xf32>
    %c5_457 = arith.constant 5 : index
    %c0_458 = arith.constant 0 : index
    %c0_459 = arith.constant 0 : index
    %523 = vector.load %arg27[%c5_457, %c0_458, %c0_459] : memref<17x128x32xbf16, #tpu.memory_space<vmem>>, vector<1x128x32xbf16>
    %524 = vector.shape_cast %523 : vector<1x128x32xbf16> to vector<128x32xbf16>
    %cst_460 = arith.constant dense<0.000000e+00> : vector<128x64xf32>
    %525 = tpu.matmul %524, %488, %cst_460 {dimension_numbers = #tpu.dot_dimension_numbers<[1], [0], [0], [1], [0, 0, 1, 1], [], []>} : vector<128x32xbf16>, vector<32x64xbf16>, vector<128x64xf32> -> vector<128x64xf32>
    %526 = arith.truncf %525 : vector<128x64xf32> to vector<128x64xbf16>
    %c320_461 = arith.constant 320 : index
    %c0_462 = arith.constant 0 : index
    %527 = vector.load %arg28[%c320_461, %c0_462] : memref<1024x32xbf16, #tpu.memory_space<vmem>>, vector<64x32xbf16>
    %cst_463 = arith.constant dense<0.000000e+00> : vector<128x32xf32>
    %528 = tpu.matmul %526, %527, %cst_463 {dimension_numbers = #tpu.dot_dimension_numbers<[1], [0], [0], [1], [0, 0, 1, 1], [], []>} : vector<128x64xbf16>, vector<64x32xbf16>, vector<128x32xf32> -> vector<128x32xf32>
    %529 = arith.addf %522, %528 : vector<128x32xf32>
    %c6_464 = arith.constant 6 : index
    %c0_465 = arith.constant 0 : index
    %c0_466 = arith.constant 0 : index
    %530 = vector.load %arg27[%c6_464, %c0_465, %c0_466] : memref<17x128x32xbf16, #tpu.memory_space<vmem>>, vector<1x128x32xbf16>
    %531 = vector.shape_cast %530 : vector<1x128x32xbf16> to vector<128x32xbf16>
    %cst_467 = arith.constant dense<0.000000e+00> : vector<128x64xf32>
    %532 = tpu.matmul %531, %488, %cst_467 {dimension_numbers = #tpu.dot_dimension_numbers<[1], [0], [0], [1], [0, 0, 1, 1], [], []>} : vector<128x32xbf16>, vector<32x64xbf16>, vector<128x64xf32> -> vector<128x64xf32>
    %533 = arith.truncf %532 : vector<128x64xf32> to vector<128x64xbf16>
    %c384_468 = arith.constant 384 : index
    %c0_469 = arith.constant 0 : index
    %534 = vector.load %arg28[%c384_468, %c0_469] : memref<1024x32xbf16, #tpu.memory_space<vmem>>, vector<64x32xbf16>
    %cst_470 = arith.constant dense<0.000000e+00> : vector<128x32xf32>
    %535 = tpu.matmul %533, %534, %cst_470 {dimension_numbers = #tpu.dot_dimension_numbers<[1], [0], [0], [1], [0, 0, 1, 1], [], []>} : vector<128x64xbf16>, vector<64x32xbf16>, vector<128x32xf32> -> vector<128x32xf32>
    %536 = arith.addf %529, %535 : vector<128x32xf32>
    %c7_471 = arith.constant 7 : index
    %c0_472 = arith.constant 0 : index
    %c0_473 = arith.constant 0 : index
    %537 = vector.load %arg27[%c7_471, %c0_472, %c0_473] : memref<17x128x32xbf16, #tpu.memory_space<vmem>>, vector<1x128x32xbf16>
    %538 = vector.shape_cast %537 : vector<1x128x32xbf16> to vector<128x32xbf16>
    %cst_474 = arith.constant dense<0.000000e+00> : vector<128x64xf32>
    %539 = tpu.matmul %538, %488, %cst_474 {dimension_numbers = #tpu.dot_dimension_numbers<[1], [0], [0], [1], [0, 0, 1, 1], [], []>} : vector<128x32xbf16>, vector<32x64xbf16>, vector<128x64xf32> -> vector<128x64xf32>
    %540 = arith.truncf %539 : vector<128x64xf32> to vector<128x64xbf16>
    %c448_475 = arith.constant 448 : index
    %c0_476 = arith.constant 0 : index
    %541 = vector.load %arg28[%c448_475, %c0_476] : memref<1024x32xbf16, #tpu.memory_space<vmem>>, vector<64x32xbf16>
    %cst_477 = arith.constant dense<0.000000e+00> : vector<128x32xf32>
    %542 = tpu.matmul %540, %541, %cst_477 {dimension_numbers = #tpu.dot_dimension_numbers<[1], [0], [0], [1], [0, 0, 1, 1], [], []>} : vector<128x64xbf16>, vector<64x32xbf16>, vector<128x32xf32> -> vector<128x32xf32>
    %543 = arith.addf %536, %542 : vector<128x32xf32>
    %c8_478 = arith.constant 8 : index
    %c0_479 = arith.constant 0 : index
    %c0_480 = arith.constant 0 : index
    %544 = vector.load %arg27[%c8_478, %c0_479, %c0_480] : memref<17x128x32xbf16, #tpu.memory_space<vmem>>, vector<1x128x32xbf16>
    %545 = vector.shape_cast %544 : vector<1x128x32xbf16> to vector<128x32xbf16>
    %cst_481 = arith.constant dense<0.000000e+00> : vector<128x64xf32>
    %546 = tpu.matmul %545, %488, %cst_481 {dimension_numbers = #tpu.dot_dimension_numbers<[1], [0], [0], [1], [0, 0, 1, 1], [], []>} : vector<128x32xbf16>, vector<32x64xbf16>, vector<128x64xf32> -> vector<128x64xf32>
    %547 = arith.truncf %546 : vector<128x64xf32> to vector<128x64xbf16>
    %c512_482 = arith.constant 512 : index
    %c0_483 = arith.constant 0 : index
    %548 = vector.load %arg28[%c512_482, %c0_483] : memref<1024x32xbf16, #tpu.memory_space<vmem>>, vector<64x32xbf16>
    %cst_484 = arith.constant dense<0.000000e+00> : vector<128x32xf32>
    %549 = tpu.matmul %547, %548, %cst_484 {dimension_numbers = #tpu.dot_dimension_numbers<[1], [0], [0], [1], [0, 0, 1, 1], [], []>} : vector<128x64xbf16>, vector<64x32xbf16>, vector<128x32xf32> -> vector<128x32xf32>
    %550 = arith.addf %543, %549 : vector<128x32xf32>
    %c9_485 = arith.constant 9 : index
    %c0_486 = arith.constant 0 : index
    %c0_487 = arith.constant 0 : index
    %551 = vector.load %arg27[%c9_485, %c0_486, %c0_487] : memref<17x128x32xbf16, #tpu.memory_space<vmem>>, vector<1x128x32xbf16>
    %552 = vector.shape_cast %551 : vector<1x128x32xbf16> to vector<128x32xbf16>
    %cst_488 = arith.constant dense<0.000000e+00> : vector<128x64xf32>
    %553 = tpu.matmul %552, %488, %cst_488 {dimension_numbers = #tpu.dot_dimension_numbers<[1], [0], [0], [1], [0, 0, 1, 1], [], []>} : vector<128x32xbf16>, vector<32x64xbf16>, vector<128x64xf32> -> vector<128x64xf32>
    %554 = arith.truncf %553 : vector<128x64xf32> to vector<128x64xbf16>
    %c576_489 = arith.constant 576 : index
    %c0_490 = arith.constant 0 : index
    %555 = vector.load %arg28[%c576_489, %c0_490] : memref<1024x32xbf16, #tpu.memory_space<vmem>>, vector<64x32xbf16>
    %cst_491 = arith.constant dense<0.000000e+00> : vector<128x32xf32>
    %556 = tpu.matmul %554, %555, %cst_491 {dimension_numbers = #tpu.dot_dimension_numbers<[1], [0], [0], [1], [0, 0, 1, 1], [], []>} : vector<128x64xbf16>, vector<64x32xbf16>, vector<128x32xf32> -> vector<128x32xf32>
    %557 = arith.addf %550, %556 : vector<128x32xf32>
    %c10_492 = arith.constant 10 : index
    %c0_493 = arith.constant 0 : index
    %c0_494 = arith.constant 0 : index
    %558 = vector.load %arg27[%c10_492, %c0_493, %c0_494] : memref<17x128x32xbf16, #tpu.memory_space<vmem>>, vector<1x128x32xbf16>
    %559 = vector.shape_cast %558 : vector<1x128x32xbf16> to vector<128x32xbf16>
    %cst_495 = arith.constant dense<0.000000e+00> : vector<128x64xf32>
    %560 = tpu.matmul %559, %488, %cst_495 {dimension_numbers = #tpu.dot_dimension_numbers<[1], [0], [0], [1], [0, 0, 1, 1], [], []>} : vector<128x32xbf16>, vector<32x64xbf16>, vector<128x64xf32> -> vector<128x64xf32>
    %561 = arith.truncf %560 : vector<128x64xf32> to vector<128x64xbf16>
    %c640_496 = arith.constant 640 : index
    %c0_497 = arith.constant 0 : index
    %562 = vector.load %arg28[%c640_496, %c0_497] : memref<1024x32xbf16, #tpu.memory_space<vmem>>, vector<64x32xbf16>
    %cst_498 = arith.constant dense<0.000000e+00> : vector<128x32xf32>
    %563 = tpu.matmul %561, %562, %cst_498 {dimension_numbers = #tpu.dot_dimension_numbers<[1], [0], [0], [1], [0, 0, 1, 1], [], []>} : vector<128x64xbf16>, vector<64x32xbf16>, vector<128x32xf32> -> vector<128x32xf32>
    %564 = arith.addf %557, %563 : vector<128x32xf32>
    %c11_499 = arith.constant 11 : index
    %c0_500 = arith.constant 0 : index
    %c0_501 = arith.constant 0 : index
    %565 = vector.load %arg27[%c11_499, %c0_500, %c0_501] : memref<17x128x32xbf16, #tpu.memory_space<vmem>>, vector<1x128x32xbf16>
    %566 = vector.shape_cast %565 : vector<1x128x32xbf16> to vector<128x32xbf16>
    %cst_502 = arith.constant dense<0.000000e+00> : vector<128x64xf32>
    %567 = tpu.matmul %566, %488, %cst_502 {dimension_numbers = #tpu.dot_dimension_numbers<[1], [0], [0], [1], [0, 0, 1, 1], [], []>} : vector<128x32xbf16>, vector<32x64xbf16>, vector<128x64xf32> -> vector<128x64xf32>
    %568 = arith.truncf %567 : vector<128x64xf32> to vector<128x64xbf16>
    %c704_503 = arith.constant 704 : index
    %c0_504 = arith.constant 0 : index
    %569 = vector.load %arg28[%c704_503, %c0_504] : memref<1024x32xbf16, #tpu.memory_space<vmem>>, vector<64x32xbf16>
    %cst_505 = arith.constant dense<0.000000e+00> : vector<128x32xf32>
    %570 = tpu.matmul %568, %569, %cst_505 {dimension_numbers = #tpu.dot_dimension_numbers<[1], [0], [0], [1], [0, 0, 1, 1], [], []>} : vector<128x64xbf16>, vector<64x32xbf16>, vector<128x32xf32> -> vector<128x32xf32>
    %571 = arith.addf %564, %570 : vector<128x32xf32>
    %c12_506 = arith.constant 12 : index
    %c0_507 = arith.constant 0 : index
    %c0_508 = arith.constant 0 : index
    %572 = vector.load %arg27[%c12_506, %c0_507, %c0_508] : memref<17x128x32xbf16, #tpu.memory_space<vmem>>, vector<1x128x32xbf16>
    %573 = vector.shape_cast %572 : vector<1x128x32xbf16> to vector<128x32xbf16>
    %cst_509 = arith.constant dense<0.000000e+00> : vector<128x64xf32>
    %574 = tpu.matmul %573, %488, %cst_509 {dimension_numbers = #tpu.dot_dimension_numbers<[1], [0], [0], [1], [0, 0, 1, 1], [], []>} : vector<128x32xbf16>, vector<32x64xbf16>, vector<128x64xf32> -> vector<128x64xf32>
    %575 = arith.truncf %574 : vector<128x64xf32> to vector<128x64xbf16>
    %c768_510 = arith.constant 768 : index
    %c0_511 = arith.constant 0 : index
    %576 = vector.load %arg28[%c768_510, %c0_511] : memref<1024x32xbf16, #tpu.memory_space<vmem>>, vector<64x32xbf16>
    %cst_512 = arith.constant dense<0.000000e+00> : vector<128x32xf32>
    %577 = tpu.matmul %575, %576, %cst_512 {dimension_numbers = #tpu.dot_dimension_numbers<[1], [0], [0], [1], [0, 0, 1, 1], [], []>} : vector<128x64xbf16>, vector<64x32xbf16>, vector<128x32xf32> -> vector<128x32xf32>
    %578 = arith.addf %571, %577 : vector<128x32xf32>
    %c13_513 = arith.constant 13 : index
    %c0_514 = arith.constant 0 : index
    %c0_515 = arith.constant 0 : index
    %579 = vector.load %arg27[%c13_513, %c0_514, %c0_515] : memref<17x128x32xbf16, #tpu.memory_space<vmem>>, vector<1x128x32xbf16>
    %580 = vector.shape_cast %579 : vector<1x128x32xbf16> to vector<128x32xbf16>
    %cst_516 = arith.constant dense<0.000000e+00> : vector<128x64xf32>
    %581 = tpu.matmul %580, %488, %cst_516 {dimension_numbers = #tpu.dot_dimension_numbers<[1], [0], [0], [1], [0, 0, 1, 1], [], []>} : vector<128x32xbf16>, vector<32x64xbf16>, vector<128x64xf32> -> vector<128x64xf32>
    %582 = arith.truncf %581 : vector<128x64xf32> to vector<128x64xbf16>
    %c832_517 = arith.constant 832 : index
    %c0_518 = arith.constant 0 : index
    %583 = vector.load %arg28[%c832_517, %c0_518] : memref<1024x32xbf16, #tpu.memory_space<vmem>>, vector<64x32xbf16>
    %cst_519 = arith.constant dense<0.000000e+00> : vector<128x32xf32>
    %584 = tpu.matmul %582, %583, %cst_519 {dimension_numbers = #tpu.dot_dimension_numbers<[1], [0], [0], [1], [0, 0, 1, 1], [], []>} : vector<128x64xbf16>, vector<64x32xbf16>, vector<128x32xf32> -> vector<128x32xf32>
    %585 = arith.addf %578, %584 : vector<128x32xf32>
    %c14_520 = arith.constant 14 : index
    %c0_521 = arith.constant 0 : index
    %c0_522 = arith.constant 0 : index
    %586 = vector.load %arg27[%c14_520, %c0_521, %c0_522] : memref<17x128x32xbf16, #tpu.memory_space<vmem>>, vector<1x128x32xbf16>
    %587 = vector.shape_cast %586 : vector<1x128x32xbf16> to vector<128x32xbf16>
    %cst_523 = arith.constant dense<0.000000e+00> : vector<128x64xf32>
    %588 = tpu.matmul %587, %488, %cst_523 {dimension_numbers = #tpu.dot_dimension_numbers<[1], [0], [0], [1], [0, 0, 1, 1], [], []>} : vector<128x32xbf16>, vector<32x64xbf16>, vector<128x64xf32> -> vector<128x64xf32>
    %589 = arith.truncf %588 : vector<128x64xf32> to vector<128x64xbf16>
    %c896_524 = arith.constant 896 : index
    %c0_525 = arith.constant 0 : index
    %590 = vector.load %arg28[%c896_524, %c0_525] : memref<1024x32xbf16, #tpu.memory_space<vmem>>, vector<64x32xbf16>
    %cst_526 = arith.constant dense<0.000000e+00> : vector<128x32xf32>
    %591 = tpu.matmul %589, %590, %cst_526 {dimension_numbers = #tpu.dot_dimension_numbers<[1], [0], [0], [1], [0, 0, 1, 1], [], []>} : vector<128x64xbf16>, vector<64x32xbf16>, vector<128x32xf32> -> vector<128x32xf32>
    %592 = arith.addf %585, %591 : vector<128x32xf32>
    %c15_527 = arith.constant 15 : index
    %c0_528 = arith.constant 0 : index
    %c0_529 = arith.constant 0 : index
    %593 = vector.load %arg27[%c15_527, %c0_528, %c0_529] : memref<17x128x32xbf16, #tpu.memory_space<vmem>>, vector<1x128x32xbf16>
    %594 = vector.shape_cast %593 : vector<1x128x32xbf16> to vector<128x32xbf16>
    %cst_530 = arith.constant dense<0.000000e+00> : vector<128x64xf32>
    %595 = tpu.matmul %594, %488, %cst_530 {dimension_numbers = #tpu.dot_dimension_numbers<[1], [0], [0], [1], [0, 0, 1, 1], [], []>} : vector<128x32xbf16>, vector<32x64xbf16>, vector<128x64xf32> -> vector<128x64xf32>
    %596 = arith.truncf %595 : vector<128x64xf32> to vector<128x64xbf16>
    %c960_531 = arith.constant 960 : index
    %c0_532 = arith.constant 0 : index
    %597 = vector.load %arg28[%c960_531, %c0_532] : memref<1024x32xbf16, #tpu.memory_space<vmem>>, vector<64x32xbf16>
    %cst_533 = arith.constant dense<0.000000e+00> : vector<128x32xf32>
    %598 = tpu.matmul %596, %597, %cst_533 {dimension_numbers = #tpu.dot_dimension_numbers<[1], [0], [0], [1], [0, 0, 1, 1], [], []>} : vector<128x64xbf16>, vector<64x32xbf16>, vector<128x32xf32> -> vector<128x32xf32>
    %599 = arith.addf %592, %598 : vector<128x32xf32>
    %c0_534 = arith.constant 0 : index
    %c0_535 = arith.constant 0 : index
    %600 = vector.load %arg29[%c0_534, %c0_535] : memref<1x32xf32, #tpu.memory_space<vmem>>, vector<1x32xf32>
    %601 = vector.broadcast %600 : vector<1x32xf32> to vector<128x32xf32>
    %602 = arith.addf %599, %601 : vector<128x32xf32>
    %c16_536 = arith.constant 16 : index
    %c0_537 = arith.constant 0 : index
    %c0_538 = arith.constant 0 : index
    %603 = vector.load %arg27[%c16_536, %c0_537, %c0_538] : memref<17x128x32xbf16, #tpu.memory_space<vmem>>, vector<1x128x32xbf16>
    %604 = vector.shape_cast %603 : vector<1x128x32xbf16> to vector<128x32xbf16>
    %cst_539 = arith.constant dense<0.000000e+00> : vector<128x64xf32>
    %605 = tpu.matmul %604, %488, %cst_539 {dimension_numbers = #tpu.dot_dimension_numbers<[1], [0], [0], [1], [0, 0, 1, 1], [], []>} : vector<128x32xbf16>, vector<32x64xbf16>, vector<128x64xf32> -> vector<128x64xf32>
    %606 = arith.truncf %605 : vector<128x64xf32> to vector<128x64xbf16>
    %c0_540 = arith.constant 0 : index
    %c0_541 = arith.constant 0 : index
    %607 = vector.load %arg30[%c0_540, %c0_541] : memref<64x32xbf16, #tpu.memory_space<vmem>>, vector<64x32xbf16>
    %cst_542 = arith.constant dense<0.000000e+00> : vector<128x32xf32>
    %608 = tpu.matmul %606, %607, %cst_542 {dimension_numbers = #tpu.dot_dimension_numbers<[1], [0], [0], [1], [0, 0, 1, 1], [], []>} : vector<128x64xbf16>, vector<64x32xbf16>, vector<128x32xf32> -> vector<128x32xf32>
    %c0_543 = arith.constant 0 : index
    %c0_544 = arith.constant 0 : index
    %609 = vector.load %arg31[%c0_543, %c0_544] : memref<1x32xf32, #tpu.memory_space<vmem>>, vector<1x32xf32>
    %610 = vector.broadcast %609 : vector<1x32xf32> to vector<128x32xf32>
    %611 = arith.addf %608, %610 : vector<128x32xf32>
    %cst_545 = arith.constant 0.000000e+00 : f32
    %612 = vector.broadcast %cst_545 : f32 to vector<128x32xf32>
    %613 = arith.maximumf %602, %612 : vector<128x32xf32>
    %614 = arith.addf %613, %611 : vector<128x32xf32>
    %615 = tpu.transpose %614, [1, 0] : vector<128x32xf32> -> vector<32x128xf32>
    %616 = arith.truncf %615 : vector<32x128xf32> to vector<32x128xbf16>
    %c0_546 = arith.constant 0 : index
    %c0_547 = arith.constant 0 : index
    %c0_548 = arith.constant 0 : index
    %617 = vector.load %arg32[%c0_546, %c0_547, %c0_548] : memref<16x128x128xbf16, #tpu.memory_space<vmem>>, vector<1x128x128xbf16>
    %618 = vector.shape_cast %617 : vector<1x128x128xbf16> to vector<128x128xbf16>
    %cst_549 = arith.constant dense<0.000000e+00> : vector<32x128xf32>
    %619 = tpu.matmul %616, %618, %cst_549 {dimension_numbers = #tpu.dot_dimension_numbers<[1], [0], [0], [1], [0, 0, 1, 1], [], []>} : vector<32x128xbf16>, vector<128x128xbf16>, vector<32x128xf32> -> vector<32x128xf32>
    %620 = arith.truncf %619 : vector<32x128xf32> to vector<32x128xbf16>
    %c5_550 = arith.constant 5 : index
    %c0_551 = arith.constant 0 : index
    %c0_552 = arith.constant 0 : index
    %621 = vector.load %arg33[%c5_550, %c0_551, %c0_552] : memref<16x3x32xbf16, #tpu.memory_space<vmem>>, vector<1x3x32xbf16>
    %622 = vector.shape_cast %621 : vector<1x3x32xbf16> to vector<3x32xbf16>
    %cst_553 = arith.constant dense<0.000000e+00> : vector<3x128xf32>
    %623 = tpu.matmul %622, %620, %cst_553 {dimension_numbers = #tpu.dot_dimension_numbers<[1], [0], [0], [1], [0, 0, 1, 1], [], []>} : vector<3x32xbf16>, vector<32x128xbf16>, vector<3x128xf32> -> vector<3x128xf32>
    %c1_554 = arith.constant 1 : index
    %c0_555 = arith.constant 0 : index
    %c0_556 = arith.constant 0 : index
    %624 = vector.load %arg32[%c1_554, %c0_555, %c0_556] : memref<16x128x128xbf16, #tpu.memory_space<vmem>>, vector<1x128x128xbf16>
    %625 = vector.shape_cast %624 : vector<1x128x128xbf16> to vector<128x128xbf16>
    %cst_557 = arith.constant dense<0.000000e+00> : vector<32x128xf32>
    %626 = tpu.matmul %616, %625, %cst_557 {dimension_numbers = #tpu.dot_dimension_numbers<[1], [0], [0], [1], [0, 0, 1, 1], [], []>} : vector<32x128xbf16>, vector<128x128xbf16>, vector<32x128xf32> -> vector<32x128xf32>
    %627 = arith.truncf %626 : vector<32x128xf32> to vector<32x128xbf16>
    %c7_558 = arith.constant 7 : index
    %c0_559 = arith.constant 0 : index
    %c0_560 = arith.constant 0 : index
    %628 = vector.load %arg33[%c7_558, %c0_559, %c0_560] : memref<16x3x32xbf16, #tpu.memory_space<vmem>>, vector<1x3x32xbf16>
    %629 = vector.shape_cast %628 : vector<1x3x32xbf16> to vector<3x32xbf16>
    %cst_561 = arith.constant dense<0.000000e+00> : vector<3x128xf32>
    %630 = tpu.matmul %629, %627, %cst_561 {dimension_numbers = #tpu.dot_dimension_numbers<[1], [0], [0], [1], [0, 0, 1, 1], [], []>} : vector<3x32xbf16>, vector<32x128xbf16>, vector<3x128xf32> -> vector<3x128xf32>
    %631 = arith.addf %623, %630 : vector<3x128xf32>
    %c2_562 = arith.constant 2 : index
    %c0_563 = arith.constant 0 : index
    %c0_564 = arith.constant 0 : index
    %632 = vector.load %arg32[%c2_562, %c0_563, %c0_564] : memref<16x128x128xbf16, #tpu.memory_space<vmem>>, vector<1x128x128xbf16>
    %633 = vector.shape_cast %632 : vector<1x128x128xbf16> to vector<128x128xbf16>
    %cst_565 = arith.constant dense<0.000000e+00> : vector<32x128xf32>
    %634 = tpu.matmul %616, %633, %cst_565 {dimension_numbers = #tpu.dot_dimension_numbers<[1], [0], [0], [1], [0, 0, 1, 1], [], []>} : vector<32x128xbf16>, vector<128x128xbf16>, vector<32x128xf32> -> vector<32x128xf32>
    %635 = arith.truncf %634 : vector<32x128xf32> to vector<32x128xbf16>
    %c13_566 = arith.constant 13 : index
    %c0_567 = arith.constant 0 : index
    %c0_568 = arith.constant 0 : index
    %636 = vector.load %arg33[%c13_566, %c0_567, %c0_568] : memref<16x3x32xbf16, #tpu.memory_space<vmem>>, vector<1x3x32xbf16>
    %637 = vector.shape_cast %636 : vector<1x3x32xbf16> to vector<3x32xbf16>
    %cst_569 = arith.constant dense<0.000000e+00> : vector<3x128xf32>
    %638 = tpu.matmul %637, %635, %cst_569 {dimension_numbers = #tpu.dot_dimension_numbers<[1], [0], [0], [1], [0, 0, 1, 1], [], []>} : vector<3x32xbf16>, vector<32x128xbf16>, vector<3x128xf32> -> vector<3x128xf32>
    %639 = arith.addf %631, %638 : vector<3x128xf32>
    %c3_570 = arith.constant 3 : index
    %c0_571 = arith.constant 0 : index
    %c0_572 = arith.constant 0 : index
    %640 = vector.load %arg32[%c3_570, %c0_571, %c0_572] : memref<16x128x128xbf16, #tpu.memory_space<vmem>>, vector<1x128x128xbf16>
    %641 = vector.shape_cast %640 : vector<1x128x128xbf16> to vector<128x128xbf16>
    %cst_573 = arith.constant dense<0.000000e+00> : vector<32x128xf32>
    %642 = tpu.matmul %616, %641, %cst_573 {dimension_numbers = #tpu.dot_dimension_numbers<[1], [0], [0], [1], [0, 0, 1, 1], [], []>} : vector<32x128xbf16>, vector<128x128xbf16>, vector<32x128xf32> -> vector<32x128xf32>
    %643 = arith.truncf %642 : vector<32x128xf32> to vector<32x128xbf16>
    %c15_574 = arith.constant 15 : index
    %c0_575 = arith.constant 0 : index
    %c0_576 = arith.constant 0 : index
    %644 = vector.load %arg33[%c15_574, %c0_575, %c0_576] : memref<16x3x32xbf16, #tpu.memory_space<vmem>>, vector<1x3x32xbf16>
    %645 = vector.shape_cast %644 : vector<1x3x32xbf16> to vector<3x32xbf16>
    %cst_577 = arith.constant dense<0.000000e+00> : vector<3x128xf32>
    %646 = tpu.matmul %645, %643, %cst_577 {dimension_numbers = #tpu.dot_dimension_numbers<[1], [0], [0], [1], [0, 0, 1, 1], [], []>} : vector<3x32xbf16>, vector<32x128xbf16>, vector<3x128xf32> -> vector<3x128xf32>
    %647 = arith.addf %639, %646 : vector<3x128xf32>
    %c0_578 = arith.constant 0 : index
    %c0_579 = arith.constant 0 : index
    %648 = vector.load %arg34[%c0_578, %c0_579] : memref<3x1xf32, #tpu.memory_space<vmem>>, vector<3x1xf32>
    %649 = vector.broadcast %648 : vector<3x1xf32> to vector<3x128xf32>
    %650 = arith.addf %647, %649 : vector<3x128xf32>
    %651 = arith.negf %650 : vector<3x128xf32>
    %652 = math.exp %651 : vector<3x128xf32>
    %cst_580 = arith.constant 1.000000e+00 : f32
    %653 = vector.broadcast %cst_580 : f32 to vector<3x128xf32>
    %654 = arith.addf %653, %652 : vector<3x128xf32>
    %655 = arith.divf %653, %654 : vector<3x128xf32>
    %c0_581 = arith.constant 0 : index
    %c0_582 = arith.constant 0 : index
    %656 = vector.load %arg35[%c0_581, %c0_582] : memref<3x512xf32, #tpu.memory_space<vmem>>, vector<3x128xf32>
    tpu.vector_store %arg35[%c0_581, %c0_582], %655 {strides = array<i32>} : memref<3x512xf32, #tpu.memory_space<vmem>>, vector<3x128xf32>,
    %c4_583 = arith.constant 4 : index
    %c0_584 = arith.constant 0 : index
    %c0_585 = arith.constant 0 : index
    %657 = vector.load %arg32[%c4_583, %c0_584, %c0_585] : memref<16x128x128xbf16, #tpu.memory_space<vmem>>, vector<1x128x128xbf16>
    %658 = vector.shape_cast %657 : vector<1x128x128xbf16> to vector<128x128xbf16>
    %cst_586 = arith.constant dense<0.000000e+00> : vector<32x128xf32>
    %659 = tpu.matmul %616, %658, %cst_586 {dimension_numbers = #tpu.dot_dimension_numbers<[1], [0], [0], [1], [0, 0, 1, 1], [], []>} : vector<32x128xbf16>, vector<128x128xbf16>, vector<32x128xf32> -> vector<32x128xf32>
    %660 = arith.truncf %659 : vector<32x128xf32> to vector<32x128xbf16>
    %c4_587 = arith.constant 4 : index
    %c0_588 = arith.constant 0 : index
    %c0_589 = arith.constant 0 : index
    %661 = vector.load %arg33[%c4_587, %c0_588, %c0_589] : memref<16x3x32xbf16, #tpu.memory_space<vmem>>, vector<1x3x32xbf16>
    %662 = vector.shape_cast %661 : vector<1x3x32xbf16> to vector<3x32xbf16>
    %cst_590 = arith.constant dense<0.000000e+00> : vector<3x128xf32>
    %663 = tpu.matmul %662, %660, %cst_590 {dimension_numbers = #tpu.dot_dimension_numbers<[1], [0], [0], [1], [0, 0, 1, 1], [], []>} : vector<3x32xbf16>, vector<32x128xbf16>, vector<3x128xf32> -> vector<3x128xf32>
    %c5_591 = arith.constant 5 : index
    %c0_592 = arith.constant 0 : index
    %c0_593 = arith.constant 0 : index
    %664 = vector.load %arg32[%c5_591, %c0_592, %c0_593] : memref<16x128x128xbf16, #tpu.memory_space<vmem>>, vector<1x128x128xbf16>
    %665 = vector.shape_cast %664 : vector<1x128x128xbf16> to vector<128x128xbf16>
    %cst_594 = arith.constant dense<0.000000e+00> : vector<32x128xf32>
    %666 = tpu.matmul %616, %665, %cst_594 {dimension_numbers = #tpu.dot_dimension_numbers<[1], [0], [0], [1], [0, 0, 1, 1], [], []>} : vector<32x128xbf16>, vector<128x128xbf16>, vector<32x128xf32> -> vector<32x128xf32>
    %667 = arith.truncf %666 : vector<32x128xf32> to vector<32x128xbf16>
    %c6_595 = arith.constant 6 : index
    %c0_596 = arith.constant 0 : index
    %c0_597 = arith.constant 0 : index
    %668 = vector.load %arg33[%c6_595, %c0_596, %c0_597] : memref<16x3x32xbf16, #tpu.memory_space<vmem>>, vector<1x3x32xbf16>
    %669 = vector.shape_cast %668 : vector<1x3x32xbf16> to vector<3x32xbf16>
    %cst_598 = arith.constant dense<0.000000e+00> : vector<3x128xf32>
    %670 = tpu.matmul %669, %667, %cst_598 {dimension_numbers = #tpu.dot_dimension_numbers<[1], [0], [0], [1], [0, 0, 1, 1], [], []>} : vector<3x32xbf16>, vector<32x128xbf16>, vector<3x128xf32> -> vector<3x128xf32>
    %671 = arith.addf %663, %670 : vector<3x128xf32>
    %c6_599 = arith.constant 6 : index
    %c0_600 = arith.constant 0 : index
    %c0_601 = arith.constant 0 : index
    %672 = vector.load %arg32[%c6_599, %c0_600, %c0_601] : memref<16x128x128xbf16, #tpu.memory_space<vmem>>, vector<1x128x128xbf16>
    %673 = vector.shape_cast %672 : vector<1x128x128xbf16> to vector<128x128xbf16>
    %cst_602 = arith.constant dense<0.000000e+00> : vector<32x128xf32>
    %674 = tpu.matmul %616, %673, %cst_602 {dimension_numbers = #tpu.dot_dimension_numbers<[1], [0], [0], [1], [0, 0, 1, 1], [], []>} : vector<32x128xbf16>, vector<128x128xbf16>, vector<32x128xf32> -> vector<32x128xf32>
    %675 = arith.truncf %674 : vector<32x128xf32> to vector<32x128xbf16>
    %c12_603 = arith.constant 12 : index
    %c0_604 = arith.constant 0 : index
    %c0_605 = arith.constant 0 : index
    %676 = vector.load %arg33[%c12_603, %c0_604, %c0_605] : memref<16x3x32xbf16, #tpu.memory_space<vmem>>, vector<1x3x32xbf16>
    %677 = vector.shape_cast %676 : vector<1x3x32xbf16> to vector<3x32xbf16>
    %cst_606 = arith.constant dense<0.000000e+00> : vector<3x128xf32>
    %678 = tpu.matmul %677, %675, %cst_606 {dimension_numbers = #tpu.dot_dimension_numbers<[1], [0], [0], [1], [0, 0, 1, 1], [], []>} : vector<3x32xbf16>, vector<32x128xbf16>, vector<3x128xf32> -> vector<3x128xf32>
    %679 = arith.addf %671, %678 : vector<3x128xf32>
    %c7_607 = arith.constant 7 : index
    %c0_608 = arith.constant 0 : index
    %c0_609 = arith.constant 0 : index
    %680 = vector.load %arg32[%c7_607, %c0_608, %c0_609] : memref<16x128x128xbf16, #tpu.memory_space<vmem>>, vector<1x128x128xbf16>
    %681 = vector.shape_cast %680 : vector<1x128x128xbf16> to vector<128x128xbf16>
    %cst_610 = arith.constant dense<0.000000e+00> : vector<32x128xf32>
    %682 = tpu.matmul %616, %681, %cst_610 {dimension_numbers = #tpu.dot_dimension_numbers<[1], [0], [0], [1], [0, 0, 1, 1], [], []>} : vector<32x128xbf16>, vector<128x128xbf16>, vector<32x128xf32> -> vector<32x128xf32>
    %683 = arith.truncf %682 : vector<32x128xf32> to vector<32x128xbf16>
    %c14_611 = arith.constant 14 : index
    %c0_612 = arith.constant 0 : index
    %c0_613 = arith.constant 0 : index
    %684 = vector.load %arg33[%c14_611, %c0_612, %c0_613] : memref<16x3x32xbf16, #tpu.memory_space<vmem>>, vector<1x3x32xbf16>
    %685 = vector.shape_cast %684 : vector<1x3x32xbf16> to vector<3x32xbf16>
    %cst_614 = arith.constant dense<0.000000e+00> : vector<3x128xf32>
    %686 = tpu.matmul %685, %683, %cst_614 {dimension_numbers = #tpu.dot_dimension_numbers<[1], [0], [0], [1], [0, 0, 1, 1], [], []>} : vector<3x32xbf16>, vector<32x128xbf16>, vector<3x128xf32> -> vector<3x128xf32>
    %687 = arith.addf %679, %686 : vector<3x128xf32>
    %c0_615 = arith.constant 0 : index
    %c0_616 = arith.constant 0 : index
    %688 = vector.load %arg34[%c0_615, %c0_616] : memref<3x1xf32, #tpu.memory_space<vmem>>, vector<3x1xf32>
    %689 = vector.broadcast %688 : vector<3x1xf32> to vector<3x128xf32>
    %690 = arith.addf %687, %689 : vector<3x128xf32>
    %691 = arith.negf %690 : vector<3x128xf32>
    %692 = math.exp %691 : vector<3x128xf32>
    %cst_617 = arith.constant 1.000000e+00 : f32
    %693 = vector.broadcast %cst_617 : f32 to vector<3x128xf32>
    %694 = arith.addf %693, %692 : vector<3x128xf32>
    %695 = arith.divf %693, %694 : vector<3x128xf32>
    %c0_618 = arith.constant 0 : index
    %c128_619 = arith.constant 128 : index
    %696 = vector.load %arg35[%c0_618, %c128_619] : memref<3x512xf32, #tpu.memory_space<vmem>>, vector<3x128xf32>
    tpu.vector_store %arg35[%c0_618, %c128_619], %695 {strides = array<i32>} : memref<3x512xf32, #tpu.memory_space<vmem>>, vector<3x128xf32>,
    %c8_620 = arith.constant 8 : index
    %c0_621 = arith.constant 0 : index
    %c0_622 = arith.constant 0 : index
    %697 = vector.load %arg32[%c8_620, %c0_621, %c0_622] : memref<16x128x128xbf16, #tpu.memory_space<vmem>>, vector<1x128x128xbf16>
    %698 = vector.shape_cast %697 : vector<1x128x128xbf16> to vector<128x128xbf16>
    %cst_623 = arith.constant dense<0.000000e+00> : vector<32x128xf32>
    %699 = tpu.matmul %616, %698, %cst_623 {dimension_numbers = #tpu.dot_dimension_numbers<[1], [0], [0], [1], [0, 0, 1, 1], [], []>} : vector<32x128xbf16>, vector<128x128xbf16>, vector<32x128xf32> -> vector<32x128xf32>
    %700 = arith.truncf %699 : vector<32x128xf32> to vector<32x128xbf16>
    %c1_624 = arith.constant 1 : index
    %c0_625 = arith.constant 0 : index
    %c0_626 = arith.constant 0 : index
    %701 = vector.load %arg33[%c1_624, %c0_625, %c0_626] : memref<16x3x32xbf16, #tpu.memory_space<vmem>>, vector<1x3x32xbf16>
    %702 = vector.shape_cast %701 : vector<1x3x32xbf16> to vector<3x32xbf16>
    %cst_627 = arith.constant dense<0.000000e+00> : vector<3x128xf32>
    %703 = tpu.matmul %702, %700, %cst_627 {dimension_numbers = #tpu.dot_dimension_numbers<[1], [0], [0], [1], [0, 0, 1, 1], [], []>} : vector<3x32xbf16>, vector<32x128xbf16>, vector<3x128xf32> -> vector<3x128xf32>
    %c9_628 = arith.constant 9 : index
    %c0_629 = arith.constant 0 : index
    %c0_630 = arith.constant 0 : index
    %704 = vector.load %arg32[%c9_628, %c0_629, %c0_630] : memref<16x128x128xbf16, #tpu.memory_space<vmem>>, vector<1x128x128xbf16>
    %705 = vector.shape_cast %704 : vector<1x128x128xbf16> to vector<128x128xbf16>
    %cst_631 = arith.constant dense<0.000000e+00> : vector<32x128xf32>
    %706 = tpu.matmul %616, %705, %cst_631 {dimension_numbers = #tpu.dot_dimension_numbers<[1], [0], [0], [1], [0, 0, 1, 1], [], []>} : vector<32x128xbf16>, vector<128x128xbf16>, vector<32x128xf32> -> vector<32x128xf32>
    %707 = arith.truncf %706 : vector<32x128xf32> to vector<32x128xbf16>
    %c3_632 = arith.constant 3 : index
    %c0_633 = arith.constant 0 : index
    %c0_634 = arith.constant 0 : index
    %708 = vector.load %arg33[%c3_632, %c0_633, %c0_634] : memref<16x3x32xbf16, #tpu.memory_space<vmem>>, vector<1x3x32xbf16>
    %709 = vector.shape_cast %708 : vector<1x3x32xbf16> to vector<3x32xbf16>
    %cst_635 = arith.constant dense<0.000000e+00> : vector<3x128xf32>
    %710 = tpu.matmul %709, %707, %cst_635 {dimension_numbers = #tpu.dot_dimension_numbers<[1], [0], [0], [1], [0, 0, 1, 1], [], []>} : vector<3x32xbf16>, vector<32x128xbf16>, vector<3x128xf32> -> vector<3x128xf32>
    %711 = arith.addf %703, %710 : vector<3x128xf32>
    %c10_636 = arith.constant 10 : index
    %c0_637 = arith.constant 0 : index
    %c0_638 = arith.constant 0 : index
    %712 = vector.load %arg32[%c10_636, %c0_637, %c0_638] : memref<16x128x128xbf16, #tpu.memory_space<vmem>>, vector<1x128x128xbf16>
    %713 = vector.shape_cast %712 : vector<1x128x128xbf16> to vector<128x128xbf16>
    %cst_639 = arith.constant dense<0.000000e+00> : vector<32x128xf32>
    %714 = tpu.matmul %616, %713, %cst_639 {dimension_numbers = #tpu.dot_dimension_numbers<[1], [0], [0], [1], [0, 0, 1, 1], [], []>} : vector<32x128xbf16>, vector<128x128xbf16>, vector<32x128xf32> -> vector<32x128xf32>
    %715 = arith.truncf %714 : vector<32x128xf32> to vector<32x128xbf16>
    %c9_640 = arith.constant 9 : index
    %c0_641 = arith.constant 0 : index
    %c0_642 = arith.constant 0 : index
    %716 = vector.load %arg33[%c9_640, %c0_641, %c0_642] : memref<16x3x32xbf16, #tpu.memory_space<vmem>>, vector<1x3x32xbf16>
    %717 = vector.shape_cast %716 : vector<1x3x32xbf16> to vector<3x32xbf16>
    %cst_643 = arith.constant dense<0.000000e+00> : vector<3x128xf32>
    %718 = tpu.matmul %717, %715, %cst_643 {dimension_numbers = #tpu.dot_dimension_numbers<[1], [0], [0], [1], [0, 0, 1, 1], [], []>} : vector<3x32xbf16>, vector<32x128xbf16>, vector<3x128xf32> -> vector<3x128xf32>
    %719 = arith.addf %711, %718 : vector<3x128xf32>
    %c11_644 = arith.constant 11 : index
    %c0_645 = arith.constant 0 : index
    %c0_646 = arith.constant 0 : index
    %720 = vector.load %arg32[%c11_644, %c0_645, %c0_646] : memref<16x128x128xbf16, #tpu.memory_space<vmem>>, vector<1x128x128xbf16>
    %721 = vector.shape_cast %720 : vector<1x128x128xbf16> to vector<128x128xbf16>
    %cst_647 = arith.constant dense<0.000000e+00> : vector<32x128xf32>
    %722 = tpu.matmul %616, %721, %cst_647 {dimension_numbers = #tpu.dot_dimension_numbers<[1], [0], [0], [1], [0, 0, 1, 1], [], []>} : vector<32x128xbf16>, vector<128x128xbf16>, vector<32x128xf32> -> vector<32x128xf32>
    %723 = arith.truncf %722 : vector<32x128xf32> to vector<32x128xbf16>
    %c11_648 = arith.constant 11 : index
    %c0_649 = arith.constant 0 : index
    %c0_650 = arith.constant 0 : index
    %724 = vector.load %arg33[%c11_648, %c0_649, %c0_650] : memref<16x3x32xbf16, #tpu.memory_space<vmem>>, vector<1x3x32xbf16>
    %725 = vector.shape_cast %724 : vector<1x3x32xbf16> to vector<3x32xbf16>
    %cst_651 = arith.constant dense<0.000000e+00> : vector<3x128xf32>
    %726 = tpu.matmul %725, %723, %cst_651 {dimension_numbers = #tpu.dot_dimension_numbers<[1], [0], [0], [1], [0, 0, 1, 1], [], []>} : vector<3x32xbf16>, vector<32x128xbf16>, vector<3x128xf32> -> vector<3x128xf32>
    %727 = arith.addf %719, %726 : vector<3x128xf32>
    %c0_652 = arith.constant 0 : index
    %c0_653 = arith.constant 0 : index
    %728 = vector.load %arg34[%c0_652, %c0_653] : memref<3x1xf32, #tpu.memory_space<vmem>>, vector<3x1xf32>
    %729 = vector.broadcast %728 : vector<3x1xf32> to vector<3x128xf32>
    %730 = arith.addf %727, %729 : vector<3x128xf32>
    %731 = arith.negf %730 : vector<3x128xf32>
    %732 = math.exp %731 : vector<3x128xf32>
    %cst_654 = arith.constant 1.000000e+00 : f32
    %733 = vector.broadcast %cst_654 : f32 to vector<3x128xf32>
    %734 = arith.addf %733, %732 : vector<3x128xf32>
    %735 = arith.divf %733, %734 : vector<3x128xf32>
    %c0_655 = arith.constant 0 : index
    %c256_656 = arith.constant 256 : index
    %736 = vector.load %arg35[%c0_655, %c256_656] : memref<3x512xf32, #tpu.memory_space<vmem>>, vector<3x128xf32>
    tpu.vector_store %arg35[%c0_655, %c256_656], %735 {strides = array<i32>} : memref<3x512xf32, #tpu.memory_space<vmem>>, vector<3x128xf32>,
    %c12_657 = arith.constant 12 : index
    %c0_658 = arith.constant 0 : index
    %c0_659 = arith.constant 0 : index
    %737 = vector.load %arg32[%c12_657, %c0_658, %c0_659] : memref<16x128x128xbf16, #tpu.memory_space<vmem>>, vector<1x128x128xbf16>
    %738 = vector.shape_cast %737 : vector<1x128x128xbf16> to vector<128x128xbf16>
    %cst_660 = arith.constant dense<0.000000e+00> : vector<32x128xf32>
    %739 = tpu.matmul %616, %738, %cst_660 {dimension_numbers = #tpu.dot_dimension_numbers<[1], [0], [0], [1], [0, 0, 1, 1], [], []>} : vector<32x128xbf16>, vector<128x128xbf16>, vector<32x128xf32> -> vector<32x128xf32>
    %740 = arith.truncf %739 : vector<32x128xf32> to vector<32x128xbf16>
    %c0_661 = arith.constant 0 : index
    %c0_662 = arith.constant 0 : index
    %c0_663 = arith.constant 0 : index
    %741 = vector.load %arg33[%c0_661, %c0_662, %c0_663] : memref<16x3x32xbf16, #tpu.memory_space<vmem>>, vector<1x3x32xbf16>
    %742 = vector.shape_cast %741 : vector<1x3x32xbf16> to vector<3x32xbf16>
    %cst_664 = arith.constant dense<0.000000e+00> : vector<3x128xf32>
    %743 = tpu.matmul %742, %740, %cst_664 {dimension_numbers = #tpu.dot_dimension_numbers<[1], [0], [0], [1], [0, 0, 1, 1], [], []>} : vector<3x32xbf16>, vector<32x128xbf16>, vector<3x128xf32> -> vector<3x128xf32>
    %c13_665 = arith.constant 13 : index
    %c0_666 = arith.constant 0 : index
    %c0_667 = arith.constant 0 : index
    %744 = vector.load %arg32[%c13_665, %c0_666, %c0_667] : memref<16x128x128xbf16, #tpu.memory_space<vmem>>, vector<1x128x128xbf16>
    %745 = vector.shape_cast %744 : vector<1x128x128xbf16> to vector<128x128xbf16>
    %cst_668 = arith.constant dense<0.000000e+00> : vector<32x128xf32>
    %746 = tpu.matmul %616, %745, %cst_668 {dimension_numbers = #tpu.dot_dimension_numbers<[1], [0], [0], [1], [0, 0, 1, 1], [], []>} : vector<32x128xbf16>, vector<128x128xbf16>, vector<32x128xf32> -> vector<32x128xf32>
    %747 = arith.truncf %746 : vector<32x128xf32> to vector<32x128xbf16>
    %c2_669 = arith.constant 2 : index
    %c0_670 = arith.constant 0 : index
    %c0_671 = arith.constant 0 : index
    %748 = vector.load %arg33[%c2_669, %c0_670, %c0_671] : memref<16x3x32xbf16, #tpu.memory_space<vmem>>, vector<1x3x32xbf16>
    %749 = vector.shape_cast %748 : vector<1x3x32xbf16> to vector<3x32xbf16>
    %cst_672 = arith.constant dense<0.000000e+00> : vector<3x128xf32>
    %750 = tpu.matmul %749, %747, %cst_672 {dimension_numbers = #tpu.dot_dimension_numbers<[1], [0], [0], [1], [0, 0, 1, 1], [], []>} : vector<3x32xbf16>, vector<32x128xbf16>, vector<3x128xf32> -> vector<3x128xf32>
    %751 = arith.addf %743, %750 : vector<3x128xf32>
    %c14_673 = arith.constant 14 : index
    %c0_674 = arith.constant 0 : index
    %c0_675 = arith.constant 0 : index
    %752 = vector.load %arg32[%c14_673, %c0_674, %c0_675] : memref<16x128x128xbf16, #tpu.memory_space<vmem>>, vector<1x128x128xbf16>
    %753 = vector.shape_cast %752 : vector<1x128x128xbf16> to vector<128x128xbf16>
    %cst_676 = arith.constant dense<0.000000e+00> : vector<32x128xf32>
    %754 = tpu.matmul %616, %753, %cst_676 {dimension_numbers = #tpu.dot_dimension_numbers<[1], [0], [0], [1], [0, 0, 1, 1], [], []>} : vector<32x128xbf16>, vector<128x128xbf16>, vector<32x128xf32> -> vector<32x128xf32>
    %755 = arith.truncf %754 : vector<32x128xf32> to vector<32x128xbf16>
    %c8_677 = arith.constant 8 : index
    %c0_678 = arith.constant 0 : index
    %c0_679 = arith.constant 0 : index
    %756 = vector.load %arg33[%c8_677, %c0_678, %c0_679] : memref<16x3x32xbf16, #tpu.memory_space<vmem>>, vector<1x3x32xbf16>
    %757 = vector.shape_cast %756 : vector<1x3x32xbf16> to vector<3x32xbf16>
    %cst_680 = arith.constant dense<0.000000e+00> : vector<3x128xf32>
    %758 = tpu.matmul %757, %755, %cst_680 {dimension_numbers = #tpu.dot_dimension_numbers<[1], [0], [0], [1], [0, 0, 1, 1], [], []>} : vector<3x32xbf16>, vector<32x128xbf16>, vector<3x128xf32> -> vector<3x128xf32>
    %759 = arith.addf %751, %758 : vector<3x128xf32>
    %c15_681 = arith.constant 15 : index
    %c0_682 = arith.constant 0 : index
    %c0_683 = arith.constant 0 : index
    %760 = vector.load %arg32[%c15_681, %c0_682, %c0_683] : memref<16x128x128xbf16, #tpu.memory_space<vmem>>, vector<1x128x128xbf16>
    %761 = vector.shape_cast %760 : vector<1x128x128xbf16> to vector<128x128xbf16>
    %cst_684 = arith.constant dense<0.000000e+00> : vector<32x128xf32>
    %762 = tpu.matmul %616, %761, %cst_684 {dimension_numbers = #tpu.dot_dimension_numbers<[1], [0], [0], [1], [0, 0, 1, 1], [], []>} : vector<32x128xbf16>, vector<128x128xbf16>, vector<32x128xf32> -> vector<32x128xf32>
    %763 = arith.truncf %762 : vector<32x128xf32> to vector<32x128xbf16>
    %c10_685 = arith.constant 10 : index
    %c0_686 = arith.constant 0 : index
    %c0_687 = arith.constant 0 : index
    %764 = vector.load %arg33[%c10_685, %c0_686, %c0_687] : memref<16x3x32xbf16, #tpu.memory_space<vmem>>, vector<1x3x32xbf16>
    %765 = vector.shape_cast %764 : vector<1x3x32xbf16> to vector<3x32xbf16>
    %cst_688 = arith.constant dense<0.000000e+00> : vector<3x128xf32>
    %766 = tpu.matmul %765, %763, %cst_688 {dimension_numbers = #tpu.dot_dimension_numbers<[1], [0], [0], [1], [0, 0, 1, 1], [], []>} : vector<3x32xbf16>, vector<32x128xbf16>, vector<3x128xf32> -> vector<3x128xf32>
    %767 = arith.addf %759, %766 : vector<3x128xf32>
    %c0_689 = arith.constant 0 : index
    %c0_690 = arith.constant 0 : index
    %768 = vector.load %arg34[%c0_689, %c0_690] : memref<3x1xf32, #tpu.memory_space<vmem>>, vector<3x1xf32>
    %769 = vector.broadcast %768 : vector<3x1xf32> to vector<3x128xf32>
    %770 = arith.addf %767, %769 : vector<3x128xf32>
    %771 = arith.negf %770 : vector<3x128xf32>
    %772 = math.exp %771 : vector<3x128xf32>
    %cst_691 = arith.constant 1.000000e+00 : f32
    %773 = vector.broadcast %cst_691 : f32 to vector<3x128xf32>
    %774 = arith.addf %773, %772 : vector<3x128xf32>
    %775 = arith.divf %773, %774 : vector<3x128xf32>
    %c0_692 = arith.constant 0 : index
    %c384_693 = arith.constant 384 : index
    %776 = vector.load %arg35[%c0_692, %c384_693] : memref<3x512xf32, #tpu.memory_space<vmem>>, vector<3x128xf32>
    tpu.vector_store %arg35[%c0_692, %c384_693], %775 {strides = array<i32>} : memref<3x512xf32, #tpu.memory_space<vmem>>, vector<3x128xf32>,
    return
  }
}

</mosaic_0001>

<bundles_post_ra>
// kernel: autoencoder_forward.1
= control target key start
LH: loop header
LB: loop body
LE: loop exit
PB: predicated region body
PF: predicated region fallthrough
CT: control target
= control target key end

     0   :  { %s25190_s6 = smov 1   ;;  %s25191_s10 = smov 2   ;;  %s28641_s0 = inlined_call_operand.smem [shape: u32[37], index: -1, kind: input, shape index: {}] }
   0x1   :  { %s25239_s5 = sld [smem:[%s28641_s0]]   ;;  %s25192_s14 = smov 3  }
   0x2   :  { %s25244_s9 = sld [smem:[%s28641_s0 + %s25190_s6]]   ;;  %s25193_s18 = smov 4  }
   0x3   :  { %s25249_s13 = sld [smem:[%s28641_s0 + %s25191_s10]]   ;;  %s25194_s22 = smov 5  }
   0x4   :  { %s25254_s17 = sld [smem:[%s28641_s0 + %s25192_s14]]   ;;  %s25195_s26 = smov 6  }
   0x5   :  { %s25259_s21 = sld [smem:[%s28641_s0 + %s25193_s18]]   ;;  %s25196_s30 = smov 7  }
   0x6   :  { %s25264_s25 = sld [smem:[%s28641_s0 + %s25194_s22]]   ;;  %s25197_s4 = smov 8  }
   0x7   :  { %s25269_s29 = sld [smem:[%s28641_s0 + %s25195_s26]]   ;;  %s25198_s10 = smov 9  }
   0x8   :  { %s25274_s3 = sld [smem:[%s28641_s0 + %s25196_s30]]   ;;  %s25199_s15 = smov 10  }
   0x9   :  { %s25279_s8 = sld [smem:[%s28641_s0 + %s25197_s4]]   ;;  %s25200_s20 = smov 11  }
   0xa   :  { %s25284_s14 = sld [smem:[%s28641_s0 + %s25198_s10]]   ;;  %s25201_s26 = smov 12  }
   0xb   :  { %s25289_s19 = sld [smem:[%s28641_s0 + %s25199_s15]]   ;;  %s25202_s1 = smov 13  }
   0xc   :  { %s25294_s24 = sld [smem:[%s28641_s0 + %s25200_s20]]   ;;  %s25203_s7 = smov 14  }
   0xd   :  { %s25299_s30 = sld [smem:[%s28641_s0 + %s25201_s26]]   ;;  %s25204_s15 = smov 15  }
   0xe   :  { %s25304_s6 = sld [smem:[%s28641_s0 + %s25202_s1]]   ;;  %s25205_s22 = smov 16  }
   0xf   :  { %s25309_s12 = sld [smem:[%s28641_s0 + %s25203_s7]]   ;;  %s25206_s28 = smov 17  }
  0x10   :  { %s25314_s20 = sld [smem:[%s28641_s0 + %s25204_s15]]   ;;  %s25207_s7 = smov 18  }
  0x11   :  { %s25319_s27 = sld [smem:[%s28641_s0 + %s25205_s22]]   ;;  %s25208_s15 = smov 19  }
  0x12   :  { %s25324_s4 = sld [smem:[%s28641_s0 + %s25206_s28]]   ;;  %s25209_s22 = smov 20  }
  0x13   :  { %s25210_s28 = smov 21  }
  0x14   :  { %28711 = sst [smem:[#allocation5_spill]] %s25304_s6 }
  0x15   :  { %s25329_s6 = sld [smem:[%s28641_s0 + %s25207_s7]]   ;;  %s25211_s7 = smov 22  }
  0x16   :  { %28712 = sst [smem:[#allocation6_spill]] %s25314_s20 }
  0x17   :  { %28713 = sst [smem:[#allocation7_spill]] %s25319_s27 }
  0x18   :  { %28714 = sst [smem:[#allocation8_spill]] %s25324_s4 }
  0x19   :  { %s25334_s20 = sld [smem:[%s28641_s0 + %s25208_s15]]   ;;  %s25212_s15 = smov 23  }
  0x1a   :  { %s25339_s27 = sld [smem:[%s28641_s0 + %s25209_s22]]   ;;  %s25213_s22 = smov 24  }
  0x1b   :  { %28715 = sst [smem:[#allocation9_spill]] %s25329_s6 }
  0x1c   :  { %s25344_s4 = sld [smem:[%s28641_s0 + %s25210_s28]]   ;;  %s25214_s28 = smov 25  }
  0x1d   :  { %s25349_s6 = sld [smem:[%s28641_s0 + %s25211_s7]]   ;;  %s25215_s7 = smov 26  }
  0x1f   :  { %28716 = sst [smem:[#allocation10_spill]] %s25334_s20 }
  0x20   :  { %28717 = sst [smem:[#allocation11_spill]] %s25339_s27 }
  0x21   :  { %s25354_s20 = sld [smem:[%s28641_s0 + %s25212_s15]]   ;;  %s25216_s15 = smov 27  }
  0x22   :  { %28718 = sst [smem:[#allocation12_spill]] %s25344_s4 }
  0x23   :  { %28719 = sst [smem:[#allocation13_spill]] %s25349_s6 }
  0x24   :  { %s25359_s27 = sld [smem:[%s28641_s0 + %s25213_s22]]   ;;  %s25217_s22 = smov 28  }
  0x25   :  { %s25364_s4 = sld [smem:[%s28641_s0 + %s25214_s28]]   ;;  %s25218_s28 = smov 29  }
  0x26   :  { %s25369_s6 = sld [smem:[%s28641_s0 + %s25215_s7]]   ;;  %s25219_s7 = smov 30  }
  0x27   :  { %28720 = sst [smem:[#allocation14_spill]] %s25354_s20 }
  0x28   :  { %s25374_s20 = sld [smem:[%s28641_s0 + %s25216_s15]]   ;;  %s25220_s15 = smov 31  }
  0x2a   :  { %28721 = sst [smem:[#allocation15_spill]] %s25359_s27 }
  0x2b   :  { %28722 = sst [smem:[#allocation16_spill]] %s25364_s4 }
  0x2c   :  { %28723 = sst [smem:[#allocation17_spill]] %s25369_s6 }
  0x2d   :  { %s25379_s27 = sld [smem:[%s28641_s0 + %s25217_s22]]   ;;  %s25221_s22 = smov 32  }
  0x2e   :  { %28724 = sst [smem:[#allocation18_spill]] %s25374_s20 }
  0x2f   :  { %s25384_s4 = sld [smem:[%s28641_s0 + %s25218_s28]]   ;;  %s25222_s28 = smov 33  }
  0x30   :  { %s25389_s6 = sld [smem:[%s28641_s0 + %s25219_s7]]   ;;  %s25223_s7 = smov 34  }
  0x31   :  { %s25394_s20 = sld [smem:[%s28641_s0 + %s25220_s15]]   ;;  %s25224_s15 = smov 35  }
  0x33   :  { %28725 = sst [smem:[#allocation19_spill]] %s25379_s27 }
  0x34   :  { %s25399_s27 = sld [smem:[%s28641_s0 + %s25221_s22]]   ;;  %s25225_s22 = smov 36  }
  0x35   :  { %28726 = sst [smem:[#allocation20_spill]] %s25384_s4 }
  0x36   :  { %28727 = sst [smem:[#allocation21_spill]] %s25389_s6 }
  0x37   :  { %28728 = sst [smem:[#allocation22_spill]] %s25394_s20 }
  0x38   :  { %s25404_s4 = sld [smem:[%s28641_s0 + %s25222_s28]]  }
  0x39   :  { %s25409_s6 = sld [smem:[%s28641_s0 + %s25223_s7]]  }
  0x3a   :  { %28729 = sst [smem:[#allocation23_spill]] %s25399_s27 }
  0x3b   :  { %s25414_s20 = sld [smem:[%s28641_s0 + %s25224_s15]]  }
  0x3c   :  { %s25419_s27 = sld [smem:[%s28641_s0 + %s25225_s22]]  }
  0x3d   :  { %v24453_v0 = vld [vmem:[%s25249_s13] sm:$0xff]   ;;  %vm458_vm0 = vcmask 1040384   ;;  %v24454_v1 = vld [vmem:[%s25249_s13 + $0x8] sm:$0xff]   ;;  %vm459_vm1 = vcmask 1041408   ;;  %v24455_v2 = vld [vmem:[%s25249_s13 + $0x10] sm:$0xff]   ;;  %v25226_v4 = vmov 65535  }
  0x3e   :  { %21354 = vmatprep.subr.bf16.mxu0 %v24453_v0  ;;  %v392_v3 = vld [vmem:[%s25259_s21] sm:$0x3]  ;;  %v460_v5 = vsel %vm458_vm0, 4294967295, %v25226_v4  ;;  %vm238_vm2 = vcmask 392192   ;;  %vm433_vm3 = vcmask 23552   ;;  %v24459_v10 = vld [vmem:[%s25244_s9 + $0x8] sm:$0xff]  }
  0x3f   :  { %21355 = vmatpush3.bf16.msra.mxu0 %v24453_v0  ;;  %v24456_v6 = vld [vmem:[%s25239_s5] sm:$0xff]   ;;  %v461_v7 = vsel %vm459_vm1, %v460_v5, 0  ;;  %v24457_v11 = vld [vmem:[%s25239_s5 + $0x8] sm:$0xff]   ;;  %v24462_v12 = vld [vmem:[%s25244_s9 + $0x10] sm:$0xff]   ;;  %vm764_vm4 = vcmask 261120  }
  0x40   :  { %21356 = vmatprep.subr.bf16.mxu0 %v24454_v1  ;;  %v463_v8 = vand.u32 %v461_v7, %v392_v3  ;;  %21360 = vmatprep.mubr.msk.bf16.mxu0 %vm238_vm2, %v24456_v6  ;;  %v24458_v9 = vld [vmem:[%s25244_s9] sm:$0xff]   ;;  %v24460_v13 = vld [vmem:[%s25239_s5 + $0x10] sm:$0xff]   ;;  %v24463_v14 = vld [vmem:[%s25244_s9 + $0x18] sm:$0xff]  }
  0x41   :  { %21378 = vmatprep.mubr.msk.bf16.mxu1 %vm433_vm3, %v24458_v9  ;;  %v24466_v15 = vld [vmem:[%s25244_s9 + $0x20] sm:$0xff]   ;;  %v24461_v16 = vld [vmem:[%s25239_s5 + $0x18] sm:$0xff]   ;;  %v24467_v18 = vld [vmem:[%s25244_s9 + $0x28] sm:$0xff]  }
  0x42   :  { %21376 = vmatprep.subr.bf16.mxu1 %v463_v8  ;;  %v24464_v17 = vld [vmem:[%s25239_s5 + $0x20] sm:$0xff]   ;;  %v24470_v19 = vld [vmem:[%s25244_s9 + $0x30] sm:$0xff]   ;;  %v24465_v20 = vld [vmem:[%s25239_s5 + $0x28] sm:$0xff]  }
  0x43   :  { %21357 = vmatpush3.bf16.msra.mxu0 %v24454_v1  ;;  %21377 = vmatpush3.bf16.msra.mxu1 %v463_v8  ;;  %v24468_v21 = vld [vmem:[%s25239_s5 + $0x30] sm:$0xff]   ;;  %v24471_v22 = vld [vmem:[%s25244_s9 + $0x38] sm:$0xff]   ;;  %v24474_v25 = vld [vmem:[%s25269_s29] sm:$0xff]  }
  0x44   :  { %21358 = vmatprep.subr.bf16.mxu0 %v24455_v2  ;;  %v24469_v23 = vld [vmem:[%s25239_s5 + $0x38] sm:$0xff]   ;;  %v24472_v24 = vld [vmem:[%s25269_s29 + $0x10] sm:$0xff]   ;;  %v25461_v26 = vld [vmem:[%s25254_s17] ss:$0 sm:$0xff] }
  0x45   :  { %v25467_v40 = vld [vmem:[%s25264_s25] ss:$0 sm:$0xff] }
  0x46   :  { %21379 = vmatmul.mubr.msk.bf16.vlgmr.msra.gmra.mrb[0].mxu1 %vm433_vm3, %v24459_v10 }
  0x47   :  { %21359 = vmatpush3.bf16.msra.mxu0 %v24455_v2  ;;  %21382 = vmatprep.mubr.msk.bf16.mxu1 %vm433_vm3, %v24462_v12 }
  0x4a   :  { %21361 = vmatmul.mubr.msk.bf16.vlgmr.msra.gmra.mrb[0].mxu0 %vm238_vm2, %v24457_v11 }
  0x4b   :  { %21364 = vmatprep.mubr.msk.bf16.mxu0 %vm238_vm2, %v24460_v13 }
  0x4e   :  { %21383 = vmatmul.mubr.msk.bf16.gmra.mrb[4].mxu1 %vm433_vm3, %v24463_v14 }
  0x4f   :  { %21386 = vmatprep.mubr.msk.bf16.mxu1 %vm433_vm3, %v24466_v15 }
  0x52   :  { %21365 = vmatmul.mubr.msk.bf16.gmra.mrb[4].mxu0 %vm238_vm2, %v24461_v16 }
  0x53   :  { %21368 = vmatprep.mubr.msk.bf16.mxu0 %vm238_vm2, %v24464_v17 }
  0x56   :  { %21387 = vmatmul.mubr.msk.bf16.gmra.mrb[8].mxu1 %vm433_vm3, %v24467_v18 }
  0x57   :  { %21390 = vmatprep.mubr.msk.bf16.mxu1 %vm433_vm3, %v24470_v19 }
  0x5a   :  { %21369 = vmatmul.mubr.msk.bf16.gmra.mrb[8].mxu0 %vm238_vm2, %v24465_v20 }
  0x5b   :  { %21372 = vmatprep.mubr.msk.bf16.mxu0 %vm238_vm2, %v24468_v21 }
  0x5e   :  { %21391 = vmatmul.mubr.msk.bf16.gmra.mrb[12].mxu1 %vm433_vm3, %v24471_v22 }
  0x5f   :  { %21410 = vmatprep.mubr.bf16.mxu1 %v24474_v25 }
  0x62   :  { %21373 = vmatmul.mubr.msk.bf16.gmra.mrb[12].mxu0 %vm238_vm2, %v24469_v23 }
  0x63   :  { %21430 = vmatprep.mubr.bf16.mxu0 %v24472_v24 }
 0x119   :  { %v21380_v27 = vpop.f32.mrb[0].mxu1 }
 0x11a   :  { %v499_v28 = vpop.f32.mrb[1].mxu1 }
 0x11b   :  { %v21381_v29 = vpop.f32.mrb[2].mxu1 }
 0x11c   :  { %v502_v31 = vpop.f32.mrb[3].mxu1 }
 0x11d   :  { %v21362_v30 = vpop.f32.mrb[0].mxu0 }
 0x11e   :  { %v306_v32 = vadd.f32 %v21362_v30, %v25461_v26  ;;  %v297_v33 = vpop.f32.mrb[1].mxu0 }
 0x11f   :  { %v298_v34 = vadd.f32 %v25461_v26, %v297_v33  ;;  %v21363_v35 = vpop.f32.mrb[2].mxu0 }
 0x120   :  { %v362_v36 = vmax.f32 %v306_v32, 0.0  ;;  %v309_v37 = vadd.f32 %v21363_v35, %v25461_v26  ;;  %v300_v38 = vpop.f32.mrb[3].mxu0 }
 0x121   :  { %v360_v39 = vmax.f32 %v298_v34, 0.0  ;;  %v301_v41 = vadd.f32 %v25461_v26, %v300_v38  ;;  %v21384_v44 = vpop.f32.mrb[4].mxu1 }
 0x122   :  { %v564_v42 = vadd.f32 %v21380_v27, %v362_v36  ;;  %v363_v43 = vmax.f32 %v309_v37, 0.0  ;;  %v515_v47 = vpop.f32.mrb[5].mxu1 }
 0x123   :  { %v562_v45 = vadd.f32 %v499_v28, %v360_v39  ;;  %v361_v46 = vmax.f32 %v301_v41, 0.0  ;;  %v21385_v49 = vpop.f32.mrb[6].mxu1 }
 0x124   :  { %v565_v48 = vadd.f32 %v21381_v29, %v363_v43  ;;  %v518_v52 = vpop.f32.mrb[7].mxu1  ;;  %v587_v53 = vadd.f32 %v25467_v40, %v564_v42 }
 0x125   :  { %v563_v50 = vadd.f32 %v502_v31, %v361_v46  ;;  %v21366_v51 = vpop.f32.mrb[4].mxu0  ;;  %v585_v57 = vadd.f32 %v25467_v40, %v562_v45 }
 0x126   :  { %v588_v54 = vadd.f32 %v25467_v40, %v565_v48  ;;  %v322_v55 = vadd.f32 %v21366_v51, %v25461_v26  ;;  %v313_v56 = vpop.f32.mrb[5].mxu0 }
 0x127   :  { %v586_v58 = vadd.f32 %v25467_v40, %v563_v50  ;;  %v314_v59 = vadd.f32 %v25461_v26, %v313_v56  ;;  %v21367_v60 = vpop.f32.mrb[6].mxu0 }
 0x128   :  { %v25476_v61 = vpack.c.bf16 %v588_v54, %v587_v53  ;;  %v366_v62 = vmax.f32 %v322_v55, 0.0  ;;  %v325_v63 = vadd.f32 %v21367_v60, %v25461_v26  ;;  %v316_v0 = vpop.f32.mrb[7].mxu0 }
 0x129   :  { %v25479_v1 = vpack.c.bf16 %v586_v58, %v585_v57  ;;  %v364_v2 = vmax.f32 %v314_v59, 0.0  ;;  %v317_v3 = vadd.f32 %v25461_v26, %v316_v0  ;;  %v21388_v6 = vpop.f32.mrb[8].mxu1 }
 0x12a   :  { %v568_v4 = vadd.f32 %v21384_v44, %v366_v62  ;;  %v367_v5 = vmax.f32 %v325_v63, 0.0  ;;  %v531_v9 = vpop.f32.mrb[9].mxu1 }
 0x12b   :  { %v566_v7 = vadd.f32 %v515_v47, %v364_v2  ;;  %v365_v8 = vmax.f32 %v317_v3, 0.0  ;;  %21394 = vmatprep.subr.bf16.mxu1 %v25479_v1  ;;  %21414 = vmatprep.subr.bf16.mxu0 %v25479_v1  ;;  %v21389_v11 = vpop.f32.mrb[10].mxu1 }
 0x12c   :  { %v569_v10 = vadd.f32 %v21385_v49, %v367_v5  ;;  %21395 = vmatpush3.bf16.msra.mxu1 %v25479_v1  ;;  %21415 = vmatpush3.bf16.msra.mxu0 %v25479_v1  ;;  %v534_v14 = vpop.f32.mrb[11].mxu1  ;;  %v591_v15 = vadd.f32 %v25467_v40, %v568_v4 }
 0x12d   :  { %v567_v12 = vadd.f32 %v518_v52, %v365_v8  ;;  %v21370_v13 = vpop.f32.mrb[8].mxu0  ;;  %21396 = vmatprep.subr.bf16.mxu1 %v25476_v61  ;;  %21416 = vmatprep.subr.bf16.mxu0 %v25476_v61  ;;  %v589_v19 = vadd.f32 %v25467_v40, %v566_v7  ;;  %v24475_v7 = vld [vmem:[%s25269_s29 + $0x8] sm:$0xff]   ;;  %v24476_v8 = vld [vmem:[%s25269_s29 + $0x20] sm:$0xff]  }
 0x12e   :  { %v592_v16 = vadd.f32 %v25467_v40, %v569_v10  ;;  %v338_v17 = vadd.f32 %v21370_v13, %v25461_v26  ;;  %v329_v18 = vpop.f32.mrb[9].mxu0  ;;  %v24478_v10 = vld [vmem:[%s25269_s29 + $0x40] sm:$0xff]   ;;  %v24488_v13 = vld [vmem:[%s25274_s3 + $0x10] sm:$0xff]  }
 0x12f   :  { %v590_v20 = vadd.f32 %v25467_v40, %v567_v12  ;;  %v330_v21 = vadd.f32 %v25461_v26, %v329_v18  ;;  %v21371_v22 = vpop.f32.mrb[10].mxu0  ;;  %v24480_v12 = vld [vmem:[%s25269_s29 + $0x50] sm:$0xff]   ;;  %v24483_v18 = vld [vmem:[%s25269_s29 + $0x78] sm:$0xff]  }
 0x130   :  { %v25494_v23 = vpack.c.bf16 %v592_v16, %v591_v15  ;;  %v370_v24 = vmax.f32 %v338_v17, 0.0  ;;  %v341_v25 = vadd.f32 %v21371_v22, %v25461_v26  ;;  %v332_v27 = vpop.f32.mrb[11].mxu0  ;;  %21397 = vmatpush3.bf16.msra.mxu1 %v25476_v61  ;;  %21417 = vmatpush3.bf16.msra.mxu0 %v25476_v61  ;;  %v24481_v15 = vld [vmem:[%s25269_s29 + $0x58] sm:$0xff]   ;;  %v25604_v16 = vld [vmem:[%s25274_s3] sm:$0xff]   ;;  %v24482_v17 = vld [vmem:[%s25269_s29 + $0x70] sm:$0xff]  }
 0x131   :  { %v25499_v28 = vpack.c.bf16 %v590_v20, %v589_v19  ;;  %v368_v29 = vmax.f32 %v330_v21, 0.0  ;;  %v333_v30 = vadd.f32 %v25461_v26, %v332_v27  ;;  %v21392_v33 = vpop.f32.mrb[12].mxu1  ;;  %v24484_v19 = vld [vmem:[%s25269_s29 + $0x90] sm:$0xff]   ;;  %v24485_v20 = vld [vmem:[%s25269_s29 + $0x98] sm:$0xff]   ;;  %v24486_v21 = vld [vmem:[%s25269_s29 + $0xa0] sm:$0xff]  }
 0x132   :  { %v572_v31 = vadd.f32 %v21388_v6, %v370_v24  ;;  %v371_v32 = vmax.f32 %v341_v25, 0.0  ;;  %v547_v36 = vpop.f32.mrb[13].mxu1  ;;  %v24487_v22 = vld [vmem:[%s25269_s29 + $0xa8] sm:$0xff]   ;;  %v24491_v24 = vld [vmem:[%s25269_s29 + $0xc0] sm:$0xff]  }
 0x133   :  { %v570_v34 = vadd.f32 %v531_v9, %v368_v29  ;;  %v369_v35 = vmax.f32 %v333_v30, 0.0  ;;  %21398 = vmatprep.subr.bf16.mxu1 %v25499_v28  ;;  %21418 = vmatprep.subr.bf16.mxu0 %v25499_v28  ;;  %v21393_v38 = vpop.f32.mrb[14].mxu1  ;;  %v24477_v9 = vld [vmem:[%s25269_s29 + $0x28] sm:$0xff]  }
 0x134   :  { %v573_v37 = vadd.f32 %v21389_v11, %v371_v32  ;;  %21399 = vmatpush3.bf16.msra.mxu1 %v25499_v28  ;;  %21419 = vmatpush3.bf16.msra.mxu0 %v25499_v28  ;;  %v550_v42 = vpop.f32.mrb[15].mxu1  ;;  %v595_v43 = vadd.f32 %v25467_v40, %v572_v31  ;;  %v24479_v11 = vld [vmem:[%s25269_s29 + $0x48] sm:$0xff]  }
 0x135   :  { %v571_v39 = vadd.f32 %v534_v14, %v369_v35  ;;  %v21374_v41 = vpop.f32.mrb[12].mxu0  ;;  %21400 = vmatprep.subr.bf16.mxu1 %v25494_v23  ;;  %21420 = vmatprep.subr.bf16.mxu0 %v25494_v23  ;;  %v593_v47 = vadd.f32 %v25467_v40, %v570_v34  ;;  %v24489_v14 = vld [vmem:[%s25274_s3 + $0x18] sm:$0xff]  }
 0x136   :  { %v596_v44 = vadd.f32 %v25467_v40, %v573_v37  ;;  %v354_v45 = vadd.f32 %v21374_v41, %v25461_v26  ;;  %v345_v46 = vpop.f32.mrb[13].mxu0  ;;  %v24493_v41 = vld [vmem:[%s25269_s29 + $0xc8] sm:$0xff]  }
 0x137   :  { %v594_v48 = vadd.f32 %v25467_v40, %v571_v39  ;;  %v346_v49 = vadd.f32 %v25461_v26, %v345_v46  ;;  %v21375_v50 = vpop.f32.mrb[14].mxu0 }
 0x138   :  { %v25514_v51 = vpack.c.bf16 %v596_v44, %v595_v43  ;;  %v374_v52 = vmax.f32 %v354_v45, 0.0  ;;  %v357_v53 = vadd.f32 %v21375_v50, %v25461_v26  ;;  %v348_v54 = vpop.f32.mrb[15].mxu0  ;;  %21401 = vmatpush3.bf16.msra.mxu1 %v25494_v23  ;;  %21421 = vmatpush3.bf16.msra.mxu0 %v25494_v23  ;;  %v24496_v43 = vld [vmem:[%s25269_s29 + $0xd0] sm:$0xff]  }
 0x139   :  { %v25519_v55 = vpack.c.bf16 %v594_v48, %v593_v47  ;;  %v372_v56 = vmax.f32 %v346_v49, 0.0  ;;  %v349_v57 = vadd.f32 %v25461_v26, %v348_v54 }
 0x13a   :  { %v576_v58 = vadd.f32 %v21392_v33, %v374_v52  ;;  %v375_v59 = vmax.f32 %v357_v53, 0.0 }
 0x13b   :  { %v574_v60 = vadd.f32 %v547_v36, %v372_v56  ;;  %v373_v62 = vmax.f32 %v349_v57, 0.0  ;;  %21402 = vmatprep.subr.bf16.mxu1 %v25519_v55  ;;  %21422 = vmatprep.subr.bf16.mxu0 %v25519_v55  ;;  %v24492_v36 = vld [vmem:[%s25274_s3 + $0x8] sm:$0xff]  }
 0x13c   :  { %v577_v63 = vadd.f32 %v21393_v38, %v375_v59  ;;  %21403 = vmatpush3.bf16.msra.mxu1 %v25519_v55  ;;  %21423 = vmatpush3.bf16.msra.mxu0 %v25519_v55  ;;  %v599_v26 = vadd.f32 %v25467_v40, %v576_v58 }
 0x13d   :  { %v575_v0 = vadd.f32 %v550_v42, %v373_v62  ;;  %21404 = vmatprep.subr.bf16.mxu1 %v25514_v51  ;;  %21424 = vmatprep.subr.bf16.mxu0 %v25514_v51  ;;  %v597_v3 = vadd.f32 %v25467_v40, %v574_v60  ;;  %v24494_v42 = vld [vmem:[%s25274_s3 + $0x20] sm:$0xff]  }
 0x13e   :  { %v600_v2 = vadd.f32 %v25467_v40, %v577_v63 }
 0x13f   :  { %v598_v4 = vadd.f32 %v25467_v40, %v575_v0  ;;  %v24473_v40 = vld [vmem:[%s25269_s29 + $0x18] sm:$0xff]  }
 0x140   :  { %v25532_v5 = vpack.c.bf16 %v600_v2, %v599_v26  ;;  %21405 = vmatpush3.bf16.msra.mxu1 %v25514_v51  ;;  %21425 = vmatpush3.bf16.msra.mxu0 %v25514_v51 }
 0x141   :  { %v25536_v6 = vpack.c.bf16 %v598_v4, %v597_v3 }
 0x143   :  { %21406 = vmatprep.subr.bf16.mxu1 %v25536_v6  ;;  %21426 = vmatprep.subr.bf16.mxu0 %v25536_v6 }
 0x144   :  { %21407 = vmatpush3.bf16.msra.mxu1 %v25536_v6  ;;  %21427 = vmatpush3.bf16.msra.mxu0 %v25536_v6 }
 0x145   :  { %21408 = vmatprep.subr.bf16.mxu1 %v25532_v5  ;;  %21428 = vmatprep.subr.bf16.mxu0 %v25532_v5 }
 0x148   :  { %21409 = vmatpush3.bf16.msra.mxu1 %v25532_v5  ;;  %21429 = vmatpush3.bf16.msra.mxu0 %v25532_v5 }
 0x149   :  { %21450 = vmatprep.subr.bf16.mxu0 %v25479_v1  ;;  %21434 = vmatprep.subr.bf16.mxu1 %v24488_v13 }
 0x14b   :  { %21431 = vmatmul.mubr.bf16.vlgmr.msra.gmra.mrb[16].mxu0 %v24473_v40  ;;  %21411 = vmatmul.mubr.bf16.vlgmr.msra.gmra.mrb[16].mxu1 %v24475_v7 }
 0x14c   :  { %21451 = vmatpush3.bf16.msra.mxu0 %v25479_v1  ;;  %21466 = vmatprep.mubr.bf16.mxu0 %v24476_v8 }
 0x14d   :  { %21452 = vmatprep.subr.bf16.mxu0 %v25476_v61  ;;  %21435 = vmatpush3.bf16.msra.mxu1 %v24488_v13 }
 0x14e   :  { %21436 = vmatprep.subr.bf16.mxu1 %v24489_v14 }
 0x150   :  { %21453 = vmatpush3.bf16.msra.mxu0 %v25476_v61 }
 0x151   :  { %21454 = vmatprep.subr.bf16.mxu0 %v25499_v28  ;;  %21437 = vmatpush3.bf16.msra.mxu1 %v24489_v14 }
 0x152   :  { %21442 = vmatprep.subr.bf16.mxu1 %v25604_v16 }
 0x154   :  { %21455 = vmatpush3.bf16.msra.mxu0 %v25499_v28 }
 0x155   :  { %21456 = vmatprep.subr.bf16.mxu0 %v25494_v23 }
 0x158   :  { %21457 = vmatpush3.bf16.msra.mxu0 %v25494_v23 }
 0x159   :  { %21458 = vmatprep.subr.bf16.mxu0 %v25519_v55 }
 0x15c   :  { %21459 = vmatpush3.bf16.msra.mxu0 %v25519_v55 }
 0x15d   :  { %21460 = vmatprep.subr.bf16.mxu0 %v25514_v51 }
 0x160   :  { %21461 = vmatpush3.bf16.msra.mxu0 %v25514_v51 }
 0x161   :  { %21462 = vmatprep.subr.bf16.mxu0 %v25536_v6 }
 0x164   :  { %21463 = vmatpush3.bf16.msra.mxu0 %v25536_v6 }
 0x165   :  { %21464 = vmatprep.subr.bf16.mxu0 %v25532_v5 }
 0x168   :  { %21465 = vmatpush3.bf16.msra.mxu0 %v25532_v5 }
 0x169   :  { %21506 = vmatprep.subr.bf16.mxu0 %v25479_v1 }
 0x16b   :  { %21467 = vmatmul.mubr.bf16.vlgmr.msra.gmra.mrb[20].mxu0 %v24477_v9 }
 0x16c   :  { %21507 = vmatpush3.bf16.msra.mxu0 %v25479_v1  ;;  %21522 = vmatprep.mubr.bf16.mxu0 %v24478_v10 }
 0x16d   :  { %21508 = vmatprep.subr.bf16.mxu0 %v25476_v61 }
 0x170   :  { %21509 = vmatpush3.bf16.msra.mxu0 %v25476_v61 }
 0x171   :  { %21510 = vmatprep.subr.bf16.mxu0 %v25499_v28 }
 0x174   :  { %21511 = vmatpush3.bf16.msra.mxu0 %v25499_v28 }
 0x175   :  { %21512 = vmatprep.subr.bf16.mxu0 %v25494_v23 }
 0x178   :  { %21513 = vmatpush3.bf16.msra.mxu0 %v25494_v23 }
 0x179   :  { %21514 = vmatprep.subr.bf16.mxu0 %v25519_v55 }
 0x17c   :  { %21515 = vmatpush3.bf16.msra.mxu0 %v25519_v55 }
 0x17d   :  { %21516 = vmatprep.subr.bf16.mxu0 %v25514_v51 }
 0x180   :  { %21517 = vmatpush3.bf16.msra.mxu0 %v25514_v51 }
 0x181   :  { %21518 = vmatprep.subr.bf16.mxu0 %v25536_v6 }
 0x184   :  { %21519 = vmatpush3.bf16.msra.mxu0 %v25536_v6 }
 0x185   :  { %21520 = vmatprep.subr.bf16.mxu0 %v25532_v5 }
 0x188   :  { %21521 = vmatpush3.bf16.msra.mxu0 %v25532_v5 }
 0x189   :  { %21534 = vmatprep.subr.bf16.mxu0 %v25479_v1 }
 0x18b   :  { %21523 = vmatmul.mubr.bf16.vlgmr.msra.gmra.mrb[24].mxu0 %v24479_v11 }
 0x18c   :  { %21535 = vmatpush3.bf16.msra.mxu0 %v25479_v1  ;;  %21550 = vmatprep.mubr.bf16.mxu0 %v24480_v12 }
 0x18d   :  { %21536 = vmatprep.subr.bf16.mxu0 %v25476_v61 }
 0x190   :  { %21537 = vmatpush3.bf16.msra.mxu0 %v25476_v61 }
 0x191   :  { %21538 = vmatprep.subr.bf16.mxu0 %v25499_v28 }
 0x194   :  { %21539 = vmatpush3.bf16.msra.mxu0 %v25499_v28 }
 0x195   :  { %21540 = vmatprep.subr.bf16.mxu0 %v25494_v23 }
 0x198   :  { %21541 = vmatpush3.bf16.msra.mxu0 %v25494_v23 }
 0x199   :  { %21542 = vmatprep.subr.bf16.mxu0 %v25519_v55 }
 0x19c   :  { %21543 = vmatpush3.bf16.msra.mxu0 %v25519_v55 }
 0x19d   :  { %21544 = vmatprep.subr.bf16.mxu0 %v25514_v51 }
 0x1a0   :  { %21545 = vmatpush3.bf16.msra.mxu0 %v25514_v51 }
 0x1a1   :  { %21546 = vmatprep.subr.bf16.mxu0 %v25536_v6 }
 0x1a4   :  { %21547 = vmatpush3.bf16.msra.mxu0 %v25536_v6 }
 0x1a5   :  { %21548 = vmatprep.subr.bf16.mxu0 %v25532_v5 }
 0x1a8   :  { %21549 = vmatpush3.bf16.msra.mxu0 %v25532_v5 }
 0x1a9   :  { %21590 = vmatprep.subr.bf16.mxu0 %v25479_v1 }
 0x1ab   :  { %21551 = vmatmul.mubr.bf16.vlgmr.msra.gmra.mrb[28].mxu0 %v24481_v15 }
 0x1ac   :  { %21591 = vmatpush3.bf16.msra.mxu0 %v25479_v1  ;;  %21606 = vmatprep.mubr.bf16.mxu0 %v24482_v17 }
 0x1ad   :  { %21592 = vmatprep.subr.bf16.mxu0 %v25476_v61 }
 0x1b0   :  { %21593 = vmatpush3.bf16.msra.mxu0 %v25476_v61 }
 0x1b1   :  { %21594 = vmatprep.subr.bf16.mxu0 %v25499_v28 }
 0x1b4   :  { %21595 = vmatpush3.bf16.msra.mxu0 %v25499_v28 }
 0x1b5   :  { %21596 = vmatprep.subr.bf16.mxu0 %v25494_v23 }
 0x1b8   :  { %21597 = vmatpush3.bf16.msra.mxu0 %v25494_v23 }
 0x1b9   :  { %21598 = vmatprep.subr.bf16.mxu0 %v25519_v55 }
 0x1bc   :  { %21599 = vmatpush3.bf16.msra.mxu0 %v25519_v55 }
 0x1bd   :  { %21600 = vmatprep.subr.bf16.mxu0 %v25514_v51 }
 0x1c0   :  { %21601 = vmatpush3.bf16.msra.mxu0 %v25514_v51 }
 0x1c1   :  { %21602 = vmatprep.subr.bf16.mxu0 %v25536_v6 }
 0x1c4   :  { %21603 = vmatpush3.bf16.msra.mxu0 %v25536_v6 }
 0x1c5   :  { %21604 = vmatprep.subr.bf16.mxu0 %v25532_v5 }
 0x1c8   :  { %21605 = vmatpush3.bf16.msra.mxu0 %v25532_v5 }
 0x1c9   :  { %21646 = vmatprep.subr.bf16.mxu0 %v25479_v1 }
 0x1cb   :  { %21607 = vmatmul.mubr.bf16.vlgmr.msra.gmra.mrb[32].mxu0 %v24483_v18 }
 0x1cc   :  { %21647 = vmatpush3.bf16.msra.mxu0 %v25479_v1  ;;  %21662 = vmatprep.mubr.bf16.mxu0 %v24484_v19 }
 0x1cd   :  { %21648 = vmatprep.subr.bf16.mxu0 %v25476_v61 }
 0x1d0   :  { %21649 = vmatpush3.bf16.msra.mxu0 %v25476_v61 }
 0x1d1   :  { %21650 = vmatprep.subr.bf16.mxu0 %v25499_v28 }
 0x1d4   :  { %21651 = vmatpush3.bf16.msra.mxu0 %v25499_v28 }
 0x1d5   :  { %21652 = vmatprep.subr.bf16.mxu0 %v25494_v23 }
 0x1d8   :  { %21653 = vmatpush3.bf16.msra.mxu0 %v25494_v23 }
 0x1d9   :  { %21654 = vmatprep.subr.bf16.mxu0 %v25519_v55 }
 0x1dc   :  { %21655 = vmatpush3.bf16.msra.mxu0 %v25519_v55 }
 0x1dd   :  { %21656 = vmatprep.subr.bf16.mxu0 %v25514_v51 }
 0x1e0   :  { %21657 = vmatpush3.bf16.msra.mxu0 %v25514_v51 }
 0x1e1   :  { %21658 = vmatprep.subr.bf16.mxu0 %v25536_v6 }
 0x1e4   :  { %21659 = vmatpush3.bf16.msra.mxu0 %v25536_v6 }
 0x1e5   :  { %21660 = vmatprep.subr.bf16.mxu0 %v25532_v5 }
 0x1e8   :  { %21661 = vmatpush3.bf16.msra.mxu0 %v25532_v5 }
 0x1e9   :  { %21674 = vmatprep.subr.bf16.mxu0 %v25479_v1 }
 0x1eb   :  { %21663 = vmatmul.mubr.bf16.vlgmr.msra.gmra.mrb[36].mxu0 %v24485_v20 }
 0x1ec   :  { %21675 = vmatpush3.bf16.msra.mxu0 %v25479_v1  ;;  %21690 = vmatprep.mubr.bf16.mxu0 %v24486_v21 }
 0x1ed   :  { %21676 = vmatprep.subr.bf16.mxu0 %v25476_v61 }
 0x1f0   :  { %21677 = vmatpush3.bf16.msra.mxu0 %v25476_v61 }
 0x1f1   :  { %21678 = vmatprep.subr.bf16.mxu0 %v25499_v28 }
 0x1f4   :  { %21679 = vmatpush3.bf16.msra.mxu0 %v25499_v28 }
 0x1f5   :  { %21680 = vmatprep.subr.bf16.mxu0 %v25494_v23 }
 0x1f8   :  { %21681 = vmatpush3.bf16.msra.mxu0 %v25494_v23 }
 0x1f9   :  { %21682 = vmatprep.subr.bf16.mxu0 %v25519_v55 }
 0x1fc   :  { %21683 = vmatpush3.bf16.msra.mxu0 %v25519_v55 }
 0x1fd   :  { %21684 = vmatprep.subr.bf16.mxu0 %v25514_v51 }
 0x200   :  { %21685 = vmatpush3.bf16.msra.mxu0 %v25514_v51 }
 0x201   :  { %21686 = vmatprep.subr.bf16.mxu0 %v25536_v6 }
 0x204   :  { %21687 = vmatpush3.bf16.msra.mxu0 %v25536_v6 }
 0x205   :  { %21688 = vmatprep.subr.bf16.mxu0 %v25532_v5 }
 0x208   :  { %21689 = vmatpush3.bf16.msra.mxu0 %v25532_v5 }
 0x209   :  { %21730 = vmatprep.subr.bf16.mxu0 %v25479_v1 }
 0x20b   :  { %21691 = vmatmul.mubr.bf16.vlgmr.msra.gmra.mrb[40].mxu0 %v24487_v22 }
 0x20c   :  { %21731 = vmatpush3.bf16.msra.mxu0 %v25479_v1  ;;  %21746 = vmatprep.mubr.bf16.mxu0 %v24491_v24 }
 0x20d   :  { %21732 = vmatprep.subr.bf16.mxu0 %v25476_v61 }
 0x210   :  { %21733 = vmatpush3.bf16.msra.mxu0 %v25476_v61 }
 0x211   :  { %21734 = vmatprep.subr.bf16.mxu0 %v25499_v28 }
 0x214   :  { %21735 = vmatpush3.bf16.msra.mxu0 %v25499_v28 }
 0x215   :  { %21736 = vmatprep.subr.bf16.mxu0 %v25494_v23 }
 0x218   :  { %21737 = vmatpush3.bf16.msra.mxu0 %v25494_v23 }
 0x219   :  { %21738 = vmatprep.subr.bf16.mxu0 %v25519_v55 }
 0x21c   :  { %21739 = vmatpush3.bf16.msra.mxu0 %v25519_v55 }
 0x21d   :  { %21740 = vmatprep.subr.bf16.mxu0 %v25514_v51 }
 0x21e   :  { %v21432_v25 = vpop.f32.mrb[16].mxu0  ;;  %v21412_v27 = vpop.f32.mrb[16].mxu1 }
 0x21f   :  { %v731_v29 = vpop.f32.mrb[17].mxu0  ;;  %v659_v30 = vpop.f32.mrb[17].mxu1 }
 0x220   :  { %v21433_v31 = vpop.f32.mrb[18].mxu0  ;;  %21741 = vmatpush3.bf16.msra.mxu0 %v25514_v51  ;;  %v21413_v32 = vpop.f32.mrb[18].mxu1 }
 0x221   :  { %v747_v33 = vpack.c.bf16 %v21433_v31, %v21432_v25  ;;  %v734_v34 = vpop.f32.mrb[19].mxu0  ;;  %21742 = vmatprep.subr.bf16.mxu0 %v25536_v6  ;;  %v675_v35 = vpack.c.bf16 %v21413_v32, %v21412_v27  ;;  %v662_v37 = vpop.f32.mrb[19].mxu1 }
 0x222   :  { %v746_v38 = vpack.c.bf16 %v734_v34, %v731_v29  ;;  %v674_v39 = vpack.c.bf16 %v662_v37, %v659_v30 }
 0x224   :  { %21438 = vmatprep.mubr.msk.bf16.mxu1 %vm764_vm4, %v746_v38  ;;  %21743 = vmatpush3.bf16.msra.mxu0 %v25536_v6 }
 0x225   :  { %21439 = vmatmul.mubr.msk.bf16.vlgmr.msra.gmra.mrb[20].mxu1 %vm764_vm4, %v747_v33  ;;  %21744 = vmatprep.subr.bf16.mxu0 %v25532_v5 }
 0x226   :  { %21443 = vmatpush3.bf16.msra.mxu1 %v25604_v16  ;;  %21446 = vmatprep.mubr.msk.bf16.mxu1 %vm764_vm4, %v674_v39 }
 0x227   :  { %21444 = vmatprep.subr.bf16.mxu1 %v24492_v36 }
 0x228   :  { %21745 = vmatpush3.bf16.msra.mxu0 %v25532_v5 }
 0x229   :  { %21758 = vmatprep.subr.bf16.mxu0 %v25479_v1 }
 0x22a   :  { %21445 = vmatpush3.bf16.msra.mxu1 %v24492_v36 }
 0x22b   :  { %79 = vsyncpa [#allocation3], 0  ;;  %21747 = vmatmul.mubr.bf16.vlgmr.msra.gmra.mrb[44].mxu0 %v24493_v41  ;;  %21470 = vmatprep.subr.bf16.mxu1 %v24494_v42  ;;  %v24495_v44 = vld [vmem:[%s25274_s3 + $0x28] sm:$0xff]   ;;  %v24498_v52 = vld [vmem:[%s25269_s29 + $0x30] sm:$0xff]   ;;  %vm25228_vm5 = vmmov 0   ;;  %vm3187_vm6 = vcmask 523264  }
 0x22c   :  { %21759 = vmatpush3.bf16.msra.mxu0 %v25479_v1  ;;  %21774 = vmatprep.mubr.bf16.mxu0 %v24496_v43  ;;  %v24497_v53 = vld [vmem:[%s25269_s29 + $0xd8] sm:$0xff]   ;;  %v24500_v57 = vld [vmem:[%s25274_s3 + $0x30] sm:$0xff]   ;;  %v24502_v26 = vld [vmem:[%s25274_s3 + $0x40] sm:$0xff]   ;;  %s28730_s0 = sld [smem:[#allocation5_spill]]  ;;  %s28731_s5 = sld [smem:[#allocation6_spill]]  ;;  %vm5151_vm7 = vcmask 1043456  }
 0x22d   :  { %21760 = vmatprep.subr.bf16.mxu0 %v25476_v61  ;;  %v24499_v59 = vld [vmem:[%s25269_s29 + $0x38] sm:$0xff]   ;;  %v24503_v15 = vld [vmem:[%s25274_s3 + $0x48] sm:$0xff]   ;;  %v24504_v16 = vld [vmem:[%s25274_s3 + $0x50] sm:$0xff]   ;;  %s28732_s9 = sld [smem:[#allocation7_spill]]  ;;  %s28733_s13 = sld [smem:[#allocation8_spill]]  ;;  %vm5147_vm8 = vcmask 64512  }
 0x22e   :  { %v24501_v0 = vld [vmem:[%s25274_s3 + $0x38] sm:$0xff]   ;;  %v24506_v18 = vld [vmem:[%s25269_s29 + $0x60] sm:$0xff]   ;;  %v24507_v20 = vld [vmem:[%s25269_s29 + $0x68] sm:$0xff]   ;;  %s28734_s17 = sld [smem:[#allocation11_spill]]  ;;  %s28735_s21 = sld [smem:[#allocation9_spill]]  ;;  %vm5763_vm9 = vcmask 254976  }
 0x22f   :  { %v24505_v17 = vld [vmem:[%s25274_s3 + $0x58] sm:$0xff]   ;;  %v24508_v19 = vld [vmem:[%s25274_s3 + $0x60] sm:$0xff]   ;;  %v24509_v21 = vld [vmem:[%s25274_s3 + $0x68] sm:$0xff]   ;;  %s28736_s25 = sld [smem:[#allocation12_spill]]  ;;  %vm5904_vm10 = vcmask 15360   ;;  %s28838_s28 = sld [smem:[#allocation21_spill]] }
 0x230   :  { %21761 = vmatpush3.bf16.msra.mxu0 %v25476_v61  ;;  %v24510_v22 = vld [vmem:[%s25274_s3 + $0x70] sm:$0xff]   ;;  %s28936_s1 = sld [smem:[#allocation23_spill]]  ;;  %s28937_s2 = sld [smem:[#allocation20_spill]] }
 0x231   :  { %21447 = vmatmul.mubr.msk.bf16.vlgmr.msra.gmra.mrb[20].mxu1 %vm764_vm4, %v675_v35  ;;  %21762 = vmatprep.subr.bf16.mxu0 %v25499_v28  ;;  %s28938_s7 = sld [smem:[#allocation22_spill]] }
 0x232   :  { %21471 = vmatpush3.bf16.msra.mxu1 %v24494_v42 }
 0x233   :  { %21472 = vmatprep.subr.bf16.mxu1 %v24495_v44 }
 0x234   :  { %21763 = vmatpush3.bf16.msra.mxu0 %v25499_v28 }
 0x235   :  { %21764 = vmatprep.subr.bf16.mxu0 %v25494_v23 }
 0x236   :  { %21473 = vmatpush3.bf16.msra.mxu1 %v24495_v44 }
 0x237   :  { %21478 = vmatprep.subr.bf16.mxu1 %v25479_v1 }
 0x238   :  { %21765 = vmatpush3.bf16.msra.mxu0 %v25494_v23 }
 0x239   :  { %21766 = vmatprep.subr.bf16.mxu0 %v25519_v55 }
 0x23c   :  { %21767 = vmatpush3.bf16.msra.mxu0 %v25519_v55 }
 0x23d   :  { %21768 = vmatprep.subr.bf16.mxu0 %v25514_v51 }
 0x23e   :  { %v21468_v45 = vpop.f32.mrb[20].mxu0 }
 0x23f   :  { %v938_v46 = vpop.f32.mrb[21].mxu0 }
 0x240   :  { %v21469_v47 = vpop.f32.mrb[22].mxu0  ;;  %21769 = vmatpush3.bf16.msra.mxu0 %v25514_v51 }
 0x241   :  { %v954_v48 = vpack.c.bf16 %v21469_v47, %v21468_v45  ;;  %v941_v49 = vpop.f32.mrb[23].mxu0  ;;  %21770 = vmatprep.subr.bf16.mxu0 %v25536_v6  ;;  %v24511_v45 = vld [vmem:[%s25274_s3 + $0x78] sm:$0xff]   ;;  %v24514_v47 = vld [vmem:[%s25274_s3 + $0x80] sm:$0xff]  }
 0x242   :  { %v953_v50 = vpack.c.bf16 %v941_v49, %v938_v46  ;;  %v24512_v46 = vld [vmem:[%s25269_s29 + $0x80] sm:$0xff]   ;;  %v24515_v49 = vld [vmem:[%s25274_s3 + $0x88] sm:$0xff]  }
 0x244   :  { %21474 = vmatprep.mubr.msk.bf16.mxu1 %vm764_vm4, %v953_v50  ;;  %21771 = vmatpush3.bf16.msra.mxu0 %v25536_v6  ;;  %v24516_v50 = vld [vmem:[%s25274_s3 + $0x90] sm:$0xff]  }
 0x245   :  { %21475 = vmatmul.mubr.msk.bf16.vlgmr.msra.gmra.mrb[20].mxu1 %vm764_vm4, %v954_v48  ;;  %21772 = vmatprep.subr.bf16.mxu0 %v25532_v5  ;;  %v24513_v48 = vld [vmem:[%s25269_s29 + $0x88] sm:$0xff]  }
 0x246   :  { %21479 = vmatpush3.bf16.msra.mxu1 %v25479_v1  ;;  %21494 = vmatprep.mubr.bf16.mxu1 %v24498_v52 }
 0x247   :  { %21480 = vmatprep.subr.bf16.mxu1 %v25476_v61 }
 0x248   :  { %21773 = vmatpush3.bf16.msra.mxu0 %v25532_v5 }
 0x249   :  { %21814 = vmatprep.subr.bf16.mxu0 %v25479_v1 }
 0x24a   :  { %21481 = vmatpush3.bf16.msra.mxu1 %v25476_v61 }
 0x24b   :  { %21482 = vmatprep.subr.bf16.mxu1 %v25499_v28  ;;  %21775 = vmatmul.mubr.bf16.vlgmr.msra.gmra.mrb[48].mxu0 %v24497_v53 }
 0x24c   :  { %21815 = vmatpush3.bf16.msra.mxu0 %v25479_v1 }
 0x24d   :  { %21816 = vmatprep.subr.bf16.mxu0 %v25476_v61 }
 0x24e   :  { %21483 = vmatpush3.bf16.msra.mxu1 %v25499_v28 }
 0x24f   :  { %21484 = vmatprep.subr.bf16.mxu1 %v25494_v23 }
 0x250   :  { %21817 = vmatpush3.bf16.msra.mxu0 %v25476_v61 }
 0x251   :  { %21818 = vmatprep.subr.bf16.mxu0 %v25499_v28 }
 0x252   :  { %21485 = vmatpush3.bf16.msra.mxu1 %v25494_v23 }
 0x253   :  { %21486 = vmatprep.subr.bf16.mxu1 %v25519_v55 }
 0x254   :  { %21819 = vmatpush3.bf16.msra.mxu0 %v25499_v28 }
 0x255   :  { %21820 = vmatprep.subr.bf16.mxu0 %v25494_v23 }
 0x256   :  { %21487 = vmatpush3.bf16.msra.mxu1 %v25519_v55 }
 0x257   :  { %21488 = vmatprep.subr.bf16.mxu1 %v25514_v51 }
 0x258   :  { %21821 = vmatpush3.bf16.msra.mxu0 %v25494_v23 }
 0x259   :  { %21822 = vmatprep.subr.bf16.mxu0 %v25519_v55 }
 0x25a   :  { %21489 = vmatpush3.bf16.msra.mxu1 %v25514_v51 }
 0x25b   :  { %21490 = vmatprep.subr.bf16.mxu1 %v25536_v6 }
 0x25c   :  { %21823 = vmatpush3.bf16.msra.mxu0 %v25519_v55 }
 0x25d   :  { %21824 = vmatprep.subr.bf16.mxu0 %v25514_v51 }
 0x25e   :  { %21491 = vmatpush3.bf16.msra.mxu1 %v25536_v6  ;;  %v21524_v54 = vpop.f32.mrb[24].mxu0 }
 0x25f   :  { %21492 = vmatprep.subr.bf16.mxu1 %v25532_v5  ;;  %v1224_v56 = vpop.f32.mrb[25].mxu0 }
 0x260   :  { %21825 = vmatpush3.bf16.msra.mxu0 %v25514_v51  ;;  %v21525_v58 = vpop.f32.mrb[26].mxu0 }
 0x261   :  { %21826 = vmatprep.subr.bf16.mxu0 %v25536_v6  ;;  %v1240_v60 = vpack.c.bf16 %v21525_v58, %v21524_v54  ;;  %v1227_v62 = vpop.f32.mrb[27].mxu0 }
 0x262   :  { %21493 = vmatpush3.bf16.msra.mxu1 %v25532_v5  ;;  %v1239_v63 = vpack.c.bf16 %v1227_v62, %v1224_v56 }
 0x263   :  { %21498 = vmatprep.subr.bf16.mxu1 %v24500_v57 }
 0x264   :  { %21827 = vmatpush3.bf16.msra.mxu0 %v25536_v6 }
 0x265   :  { %21495 = vmatmul.mubr.bf16.vlgmr.msra.gmra.mrb[24].mxu1 %v24499_v59  ;;  %21828 = vmatprep.subr.bf16.mxu0 %v25532_v5 }
 0x266   :  { %21499 = vmatpush3.bf16.msra.mxu1 %v24500_v57 }
 0x267   :  { %21500 = vmatprep.subr.bf16.mxu1 %v24501_v0 }
 0x268   :  { %21829 = vmatpush3.bf16.msra.mxu0 %v25532_v5 }
 0x26a   :  { %21501 = vmatpush3.bf16.msra.mxu1 %v24501_v0 }
 0x26b   :  { %21526 = vmatprep.subr.bf16.mxu1 %v24502_v26 }
 0x27e   :  { %v21552_v2 = vpop.f32.mrb[28].mxu0 }
 0x27f   :  { %v1367_v3 = vpop.f32.mrb[29].mxu0 }
 0x280   :  { %v21553_v4 = vpop.f32.mrb[30].mxu0 }
 0x281   :  { %v1383_v40 = vpack.c.bf16 %v21553_v4, %v21552_v2  ;;  %v1370_v7 = vpop.f32.mrb[31].mxu0 }
 0x282   :  { %v1382_v8 = vpack.c.bf16 %v1370_v7, %v1367_v3 }
 0x29e   :  { %v21608_v24 = vpop.f32.mrb[32].mxu0 }
 0x29f   :  { %v1653_v25 = vpop.f32.mrb[33].mxu0 }
 0x2a0   :  { %v21609_v27 = vpop.f32.mrb[34].mxu0 }
 0x2a1   :  { %v1669_v29 = vpack.c.bf16 %v21609_v27, %v21608_v24  ;;  %v1656_v30 = vpop.f32.mrb[35].mxu0  ;;  %v24530_v24 = vld [vmem:[%s25269_s29 + $0xf0] sm:$0xff]  }
 0x2a2   :  { %v1668_v31 = vpack.c.bf16 %v1656_v30, %v1653_v25  ;;  %v24531_v25 = vld [vmem:[%s25269_s29 + $0xf8] sm:$0xff]   ;;  %21830 = vmatprep.mubr.bf16.mxu0 %v24530_v24 }
 0x2a3   :  { %21831 = vmatmul.mubr.bf16.vlgmr.msra.gmra.mrb[52].mxu0 %v24531_v25 }
 0x2be   :  { %v25775_v32 = vpop.f32.mrb[36].mxu0 }
 0x2bf   :  { %v25777_v33 = vpop.f32.mrb[37].mxu0 }
 0x2c0   :  { %v25779_v34 = vpop.f32.mrb[38].mxu0 }
 0x2c1   :  { %v1955_v35 = vpack.c.bf16 %v25779_v34, %v25775_v32  ;;  %v25783_v36 = vpop.f32.mrb[39].mxu0  ;;  %v24525_v34 = vld [vmem:[%s25274_s3 + $0xc8] sm:$0xff]  }
 0x2c2   :  { %v1954_v37 = vpack.c.bf16 %v25783_v36, %v25777_v33  ;;  %v24527_v36 = vld [vmem:[%s25274_s3 + $0xd8] sm:$0xff]  }
 0x2de   :  { %v21692_v52 = vpop.f32.mrb[40].mxu0 }
 0x2df   :  { %v2082_v53 = vpop.f32.mrb[41].mxu0 }
 0x2e0   :  { %v21693_v54 = vpop.f32.mrb[42].mxu0 }
 0x2e1   :  { %v2098_v56 = vpack.c.bf16 %v21693_v54, %v21692_v52  ;;  %v2085_v57 = vpop.f32.mrb[43].mxu0 }
 0x2e2   :  { %v2097_v58 = vpack.c.bf16 %v2085_v57, %v2082_v53  ;;  %v24535_v57 = vld [vmem:[%s25274_s3 + $0xf8] sm:$0xff]  }
 0x2fe   :  { %v25813_v59 = vpop.f32.mrb[44].mxu0 }
 0x338   :  { %v21496_v9 = vpop.f32.mrb[24].mxu1 }
 0x339   :  { %v1081_v10 = vpop.f32.mrb[25].mxu1 }
 0x33a   :  { %v21497_v11 = vpop.f32.mrb[26].mxu1 }
 0x33b   :  { %v1097_v12 = vpack.c.bf16 %v21497_v11, %v21496_v9  ;;  %v1084_v13 = vpop.f32.mrb[27].mxu1  ;;  %v24517_v9 = vld [vmem:[%s25274_s3 + $0x98] sm:$0xff]   ;;  %v24519_v11 = vld [vmem:[%s25274_s3 + $0xa8] sm:$0xff]  }
 0x33c   :  { %v1096_v14 = vpack.c.bf16 %v1084_v13, %v1081_v10  ;;  %v24518_v10 = vld [vmem:[%s25274_s3 + $0xa0] sm:$0xff]   ;;  %v24522_v13 = vld [vmem:[%s25274_s3 + $0xb0] sm:$0xff]  }
 0x33e   :  { %21502 = vmatprep.mubr.msk.bf16.mxu1 %vm764_vm4, %v1096_v14  ;;  %v24521_v14 = vld [vmem:[%s25269_s29 + $0xb8] sm:$0xff]  }
 0x33f   :  { %21503 = vmatmul.mubr.msk.bf16.vlgmr.msra.gmra.mrb[20].mxu1 %vm764_vm4, %v1097_v12  ;;  %v24520_v12 = vld [vmem:[%s25269_s29 + $0xb0] sm:$0xff]  }
 0x340   :  { %21530 = vmatprep.mubr.msk.bf16.mxu1 %vm764_vm4, %v1239_v63  ;;  %21527 = vmatpush3.bf16.msra.mxu1 %v24502_v26 }
 0x341   :  { %21528 = vmatprep.subr.bf16.mxu1 %v24503_v15 }
 0x344   :  { %21529 = vmatpush3.bf16.msra.mxu1 %v24503_v15  ;;  %v24523_v15 = vld [vmem:[%s25274_s3 + $0xb8] sm:$0xff]  }
 0x345   :  { %21554 = vmatprep.subr.bf16.mxu1 %v24504_v16 }
 0x34b   :  { %21531 = vmatmul.mubr.msk.bf16.vlgmr.msra.gmra.mrb[20].mxu1 %vm764_vm4, %v1240_v60  ;;  %v25815_v60 = vpop.f32.mrb[45].mxu0 }
 0x34c   :  { %21555 = vmatpush3.bf16.msra.mxu1 %v24504_v16  ;;  %21558 = vmatprep.mubr.msk.bf16.mxu1 %vm764_vm4, %v1382_v8  ;;  %v25817_v62 = vpop.f32.mrb[46].mxu0  ;;  %v24524_v16 = vld [vmem:[%s25274_s3 + $0xc0] sm:$0xff]  }
 0x34d   :  { %21556 = vmatprep.subr.bf16.mxu1 %v24505_v17  ;;  %v2384_v63 = vpack.c.bf16 %v25817_v62, %v25813_v59  ;;  %v25821_v0 = vpop.f32.mrb[47].mxu0 }
 0x34e   :  { %v2383_v26 = vpack.c.bf16 %v25821_v0, %v25815_v60 }
 0x350   :  { %21557 = vmatpush3.bf16.msra.mxu1 %v24505_v17  ;;  %v21776_v17 = vpop.f32.mrb[48].mxu0 }
 0x351   :  { %21562 = vmatprep.subr.bf16.mxu1 %v25479_v1 }
 0x357   :  { %21559 = vmatmul.mubr.msk.bf16.vlgmr.msra.gmra.mrb[20].mxu1 %vm764_vm4, %v1383_v40 }
 0x358   :  { %21563 = vmatpush3.bf16.msra.mxu1 %v25479_v1  ;;  %21578 = vmatprep.mubr.bf16.mxu1 %v24506_v18  ;;  %v2511_v18 = vpop.f32.mrb[49].mxu0 }
 0x359   :  { %21564 = vmatprep.subr.bf16.mxu1 %v25476_v61 }
 0x35c   :  { %21565 = vmatpush3.bf16.msra.mxu1 %v25476_v61 }
 0x35d   :  { %21566 = vmatprep.subr.bf16.mxu1 %v25499_v28 }
 0x360   :  { %21567 = vmatpush3.bf16.msra.mxu1 %v25499_v28 }
 0x361   :  { %21568 = vmatprep.subr.bf16.mxu1 %v25494_v23 }
 0x364   :  { %21569 = vmatpush3.bf16.msra.mxu1 %v25494_v23 }
 0x365   :  { %21570 = vmatprep.subr.bf16.mxu1 %v25519_v55 }
 0x368   :  { %21571 = vmatpush3.bf16.msra.mxu1 %v25519_v55 }
 0x369   :  { %21572 = vmatprep.subr.bf16.mxu1 %v25514_v51 }
 0x36c   :  { %21573 = vmatpush3.bf16.msra.mxu1 %v25514_v51 }
 0x36d   :  { %21574 = vmatprep.subr.bf16.mxu1 %v25536_v6 }
 0x370   :  { %21575 = vmatpush3.bf16.msra.mxu1 %v25536_v6 }
 0x371   :  { %21576 = vmatprep.subr.bf16.mxu1 %v25532_v5 }
 0x374   :  { %21577 = vmatpush3.bf16.msra.mxu1 %v25532_v5 }
 0x375   :  { %21582 = vmatprep.subr.bf16.mxu1 %v24508_v19 }
 0x377   :  { %21579 = vmatmul.mubr.bf16.vlgmr.msra.gmra.mrb[28].mxu1 %v24507_v20 }
 0x378   :  { %21583 = vmatpush3.bf16.msra.mxu1 %v24508_v19  ;;  %v21777_v19 = vpop.f32.mrb[50].mxu0 }
 0x379   :  { %21584 = vmatprep.subr.bf16.mxu1 %v24509_v21  ;;  %v2527_v20 = vpack.c.bf16 %v21777_v19, %v21776_v17 }
 0x37c   :  { %21585 = vmatpush3.bf16.msra.mxu1 %v24509_v21  ;;  %v2514_v21 = vpop.f32.mrb[51].mxu0 }
 0x37d   :  { %21610 = vmatprep.subr.bf16.mxu1 %v24510_v22 }
 0x44a   :  { %v21580_v38 = vpop.f32.mrb[28].mxu1 }
 0x44b   :  { %v1510_v39 = vpop.f32.mrb[29].mxu1 }
 0x44c   :  { %v21581_v41 = vpop.f32.mrb[30].mxu1 }
 0x44d   :  { %v1526_v42 = vpack.c.bf16 %v21581_v41, %v21580_v38  ;;  %v1513_v43 = vpop.f32.mrb[31].mxu1  ;;  %v24532_v38 = vld [vmem:[%s25274_s3 + $0xe0] sm:$0xff]   ;;  %v24533_v41 = vld [vmem:[%s25274_s3 + $0xe8] sm:$0xff]  }
 0x44e   :  { %v1525_v44 = vpack.c.bf16 %v1513_v43, %v1510_v39  ;;  %v24529_v39 = vld [vmem:[%s25269_s29 + $0xe8] sm:$0xff]   ;;  %v21832_v43 = vpop.f32.mrb[52].mxu0 }
 0x450   :  { %21586 = vmatprep.mubr.msk.bf16.mxu1 %vm764_vm4, %v1525_v44  ;;  %v2797_v44 = vpop.f32.mrb[53].mxu0 }
 0x451   :  { %21587 = vmatmul.mubr.msk.bf16.vlgmr.msra.gmra.mrb[20].mxu1 %vm764_vm4, %v1526_v42  ;;  %v24534_v42 = vld [vmem:[%s25274_s3 + $0xf0] sm:$0xff]  }
 0x452   :  { %21611 = vmatpush3.bf16.msra.mxu1 %v24510_v22  ;;  %21614 = vmatprep.mubr.msk.bf16.mxu1 %vm764_vm4, %v1668_v31  ;;  %v2526_v22 = vpack.c.bf16 %v2514_v21, %v2511_v18 }
 0x453   :  { %21612 = vmatprep.subr.bf16.mxu1 %v24511_v45 }
 0x456   :  { %21613 = vmatpush3.bf16.msra.mxu1 %v24511_v45  ;;  %v21833_v45 = vpop.f32.mrb[54].mxu0 }
 0x457   :  { %21618 = vmatprep.subr.bf16.mxu1 %v25479_v1 }
 0x45d   :  { %21615 = vmatmul.mubr.msk.bf16.vlgmr.msra.gmra.mrb[20].mxu1 %vm764_vm4, %v1669_v29 }
 0x45e   :  { %21619 = vmatpush3.bf16.msra.mxu1 %v25479_v1  ;;  %21634 = vmatprep.mubr.bf16.mxu1 %v24512_v46  ;;  %v2813_v46 = vpack.c.bf16 %v21833_v45, %v21832_v43 }
 0x45f   :  { %21620 = vmatprep.subr.bf16.mxu1 %v25476_v61 }
 0x462   :  { %21621 = vmatpush3.bf16.msra.mxu1 %v25476_v61 }
 0x463   :  { %21622 = vmatprep.subr.bf16.mxu1 %v25499_v28 }
 0x466   :  { %21623 = vmatpush3.bf16.msra.mxu1 %v25499_v28 }
 0x467   :  { %21624 = vmatprep.subr.bf16.mxu1 %v25494_v23 }
 0x46a   :  { %21625 = vmatpush3.bf16.msra.mxu1 %v25494_v23 }
 0x46b   :  { %21626 = vmatprep.subr.bf16.mxu1 %v25519_v55 }
 0x46e   :  { %21627 = vmatpush3.bf16.msra.mxu1 %v25519_v55 }
 0x46f   :  { %21628 = vmatprep.subr.bf16.mxu1 %v25514_v51 }
 0x472   :  { %21629 = vmatpush3.bf16.msra.mxu1 %v25514_v51 }
 0x473   :  { %21630 = vmatprep.subr.bf16.mxu1 %v25536_v6 }
 0x476   :  { %21631 = vmatpush3.bf16.msra.mxu1 %v25536_v6 }
 0x477   :  { %21632 = vmatprep.subr.bf16.mxu1 %v25532_v5 }
 0x47a   :  { %21633 = vmatpush3.bf16.msra.mxu1 %v25532_v5 }
 0x47b   :  { %21638 = vmatprep.subr.bf16.mxu1 %v24514_v47 }
 0x47d   :  { %21635 = vmatmul.mubr.bf16.vlgmr.msra.gmra.mrb[32].mxu1 %v24513_v48 }
 0x47e   :  { %21639 = vmatpush3.bf16.msra.mxu1 %v24514_v47  ;;  %v2800_v47 = vpop.f32.mrb[55].mxu0 }
 0x47f   :  { %21640 = vmatprep.subr.bf16.mxu1 %v24515_v49  ;;  %v2812_v48 = vpack.c.bf16 %v2800_v47, %v2797_v44 }
 0x482   :  { %21641 = vmatpush3.bf16.msra.mxu1 %v24515_v49 }
 0x483   :  { %21666 = vmatprep.subr.bf16.mxu1 %v24516_v50 }
 0x550   :  { %v21636_v2 = vpop.f32.mrb[32].mxu1 }
 0x551   :  { %v1796_v3 = vpop.f32.mrb[33].mxu1 }
 0x552   :  { %v21637_v4 = vpop.f32.mrb[34].mxu1 }
 0x553   :  { %v1812_v40 = vpack.c.bf16 %v21637_v4, %v21636_v2  ;;  %v1799_v7 = vpop.f32.mrb[35].mxu1  ;;  %v24540_v2 = vld [vmem:[%s25299_s30] sm:$0xff]   ;;  %v24543_v4 = vld [vmem:[%s25299_s30 + $0x10] sm:$0xff]  }
 0x554   :  { %v1811_v8 = vpack.c.bf16 %v1799_v7, %v1796_v3  ;;  %v24541_v3 = vld [vmem:[%s25299_s30 + $0x8] sm:$0xff]  }
 0x556   :  { %21642 = vmatprep.mubr.msk.bf16.mxu1 %vm764_vm4, %v1811_v8 }
 0x557   :  { %21643 = vmatmul.mubr.msk.bf16.vlgmr.msra.gmra.mrb[20].mxu1 %vm764_vm4, %v1812_v40  ;;  %v18428_v40 = vld [vmem:[%s25279_s8] ss:$0 sm:$0xff]  ;;  %s28739_s8 = sld [smem:[#allocation14_spill]] }
 0x558   :  { %21670 = vmatprep.mubr.msk.bf16.mxu1 %vm764_vm4, %v1954_v37  ;;  %21667 = vmatpush3.bf16.msra.mxu1 %v24516_v50  ;;  %v24528_v37 = vld [vmem:[%s25269_s29 + $0xe0] sm:$0xff]  }
 0x559   :  { %21668 = vmatprep.subr.bf16.mxu1 %v24517_v9 }
 0x55c   :  { %21669 = vmatpush3.bf16.msra.mxu1 %v24517_v9  ;;  %v18435_v9 = vld [vmem:[%s25289_s19] ss:$0 sm:$0xff]  ;;  %s28741_s19 = sld [smem:[#allocation18_spill]] }
 0x55d   :  { %21694 = vmatprep.subr.bf16.mxu1 %v24518_v10 }
 0x563   :  { %21671 = vmatmul.mubr.msk.bf16.vlgmr.msra.gmra.mrb[20].mxu1 %vm764_vm4, %v1955_v35  ;;  %v24526_v35 = vld [vmem:[%s25274_s3 + $0xd0] sm:$0xff]   ;;  %s28738_s3 = sld [smem:[#allocation13_spill]] }
 0x564   :  { %21695 = vmatpush3.bf16.msra.mxu1 %v24518_v10  ;;  %21698 = vmatprep.mubr.msk.bf16.mxu1 %vm764_vm4, %v2097_v58  ;;  %v24536_v58 = vld [vmem:[%s25269_s29 + $0x100] sm:$0xff]  }
 0x565   :  { %21696 = vmatprep.subr.bf16.mxu1 %v24519_v11 }
 0x568   :  { %21697 = vmatpush3.bf16.msra.mxu1 %v24519_v11 }
 0x569   :  { %21702 = vmatprep.subr.bf16.mxu1 %v25479_v1 }
 0x56f   :  { %21699 = vmatmul.mubr.msk.bf16.vlgmr.msra.gmra.mrb[20].mxu1 %vm764_vm4, %v2098_v56 }
 0x570   :  { %21703 = vmatpush3.bf16.msra.mxu1 %v25479_v1  ;;  %21718 = vmatprep.mubr.bf16.mxu1 %v24520_v12 }
 0x571   :  { %21704 = vmatprep.subr.bf16.mxu1 %v25476_v61 }
 0x574   :  { %21705 = vmatpush3.bf16.msra.mxu1 %v25476_v61 }
 0x575   :  { %21706 = vmatprep.subr.bf16.mxu1 %v25499_v28 }
 0x578   :  { %21707 = vmatpush3.bf16.msra.mxu1 %v25499_v28 }
 0x579   :  { %21708 = vmatprep.subr.bf16.mxu1 %v25494_v23 }
 0x57c   :  { %21709 = vmatpush3.bf16.msra.mxu1 %v25494_v23 }
 0x57d   :  { %21710 = vmatprep.subr.bf16.mxu1 %v25519_v55 }
 0x580   :  { %21711 = vmatpush3.bf16.msra.mxu1 %v25519_v55 }
 0x581   :  { %21712 = vmatprep.subr.bf16.mxu1 %v25514_v51 }
 0x584   :  { %21713 = vmatpush3.bf16.msra.mxu1 %v25514_v51 }
 0x585   :  { %21714 = vmatprep.subr.bf16.mxu1 %v25536_v6 }
 0x588   :  { %21715 = vmatpush3.bf16.msra.mxu1 %v25536_v6 }
 0x589   :  { %21716 = vmatprep.subr.bf16.mxu1 %v25532_v5 }
 0x58c   :  { %21717 = vmatpush3.bf16.msra.mxu1 %v25532_v5 }
 0x58d   :  { %21722 = vmatprep.subr.bf16.mxu1 %v24522_v13 }
 0x58f   :  { %21719 = vmatmul.mubr.bf16.vlgmr.msra.gmra.mrb[36].mxu1 %v24521_v14 }
 0x590   :  { %21723 = vmatpush3.bf16.msra.mxu1 %v24522_v13 }
 0x591   :  { %21724 = vmatprep.subr.bf16.mxu1 %v24523_v15 }
 0x594   :  { %21725 = vmatpush3.bf16.msra.mxu1 %v24523_v15 }
 0x595   :  { %21750 = vmatprep.subr.bf16.mxu1 %v24524_v16 }
 0x662   :  { %v21720_v27 = vpop.f32.mrb[36].mxu1 }
 0x663   :  { %v2225_v29 = vpop.f32.mrb[37].mxu1 }
 0x664   :  { %v21721_v30 = vpop.f32.mrb[38].mxu1 }
 0x665   :  { %v2241_v31 = vpack.c.bf16 %v21721_v30, %v21720_v27  ;;  %v2228_v32 = vpop.f32.mrb[39].mxu1 }
 0x666   :  { %v2240_v33 = vpack.c.bf16 %v2228_v32, %v2225_v29 }
 0x668   :  { %21726 = vmatprep.mubr.msk.bf16.mxu1 %vm764_vm4, %v2240_v33  ;;  %v3056_v33 = vld [vmem:[%s25294_s24] sm:$0xf] }
 0x669   :  { %21727 = vmatmul.mubr.msk.bf16.vlgmr.msra.gmra.mrb[20].mxu1 %vm764_vm4, %v2241_v31 }
 0x66a   :  { %21754 = vmatprep.mubr.msk.bf16.mxu1 %vm764_vm4, %v2383_v26  ;;  %21751 = vmatpush3.bf16.msra.mxu1 %v24524_v16  ;;  %v28654_v26 = vmov 0.0  }
 0x66b   :  { %21752 = vmatprep.subr.bf16.mxu1 %v24525_v34 }
 0x66e   :  { %21753 = vmatpush3.bf16.msra.mxu1 %v24525_v34  ;;  %v18441_v34 = vld [vmem:[%s25294_s24 + $0x4] sm:$0xf] }
 0x66f   :  { %21778 = vmatprep.subr.bf16.mxu1 %v24526_v35 }
 0x675   :  { %21755 = vmatmul.mubr.msk.bf16.vlgmr.msra.gmra.mrb[20].mxu1 %vm764_vm4, %v2384_v63 }
 0x676   :  { %21779 = vmatpush3.bf16.msra.mxu1 %v24526_v35  ;;  %21782 = vmatprep.mubr.msk.bf16.mxu1 %vm764_vm4, %v2526_v22  ;;  %v24542_v35 = vld [vmem:[%s25299_s30 + $0x20] sm:$0xff]  }
 0x677   :  { %21780 = vmatprep.subr.bf16.mxu1 %v24527_v36 }
 0x67a   :  { %21781 = vmatpush3.bf16.msra.mxu1 %v24527_v36  ;;  %v24544_v36 = vld [vmem:[%s25299_s30 + $0x28] sm:$0xff]  }
 0x67b   :  { %21786 = vmatprep.subr.bf16.mxu1 %v25479_v1 }
 0x681   :  { %21783 = vmatmul.mubr.msk.bf16.vlgmr.msra.gmra.mrb[20].mxu1 %vm764_vm4, %v2527_v20 }
 0x682   :  { %21787 = vmatpush3.bf16.msra.mxu1 %v25479_v1  ;;  %21802 = vmatprep.mubr.bf16.mxu1 %v24528_v37  ;;  %v24545_v37 = vld [vmem:[%s25299_s30 + $0x18] sm:$0xff]  }
 0x683   :  { %21788 = vmatprep.subr.bf16.mxu1 %v25476_v61 }
 0x686   :  { %21789 = vmatpush3.bf16.msra.mxu1 %v25476_v61 }
 0x687   :  { %21790 = vmatprep.subr.bf16.mxu1 %v25499_v28 }
 0x68a   :  { %21791 = vmatpush3.bf16.msra.mxu1 %v25499_v28 }
 0x68b   :  { %21792 = vmatprep.subr.bf16.mxu1 %v25494_v23 }
 0x68e   :  { %21793 = vmatpush3.bf16.msra.mxu1 %v25494_v23 }
 0x68f   :  { %21794 = vmatprep.subr.bf16.mxu1 %v25519_v55 }
 0x692   :  { %21795 = vmatpush3.bf16.msra.mxu1 %v25519_v55 }
 0x693   :  { %21796 = vmatprep.subr.bf16.mxu1 %v25514_v51 }
 0x696   :  { %21797 = vmatpush3.bf16.msra.mxu1 %v25514_v51 }
 0x697   :  { %21798 = vmatprep.subr.bf16.mxu1 %v25536_v6 }
 0x69a   :  { %21799 = vmatpush3.bf16.msra.mxu1 %v25536_v6 }
 0x69b   :  { %21800 = vmatprep.subr.bf16.mxu1 %v25532_v5 }
 0x69e   :  { %21801 = vmatpush3.bf16.msra.mxu1 %v25532_v5 }
 0x69f   :  { %21806 = vmatprep.subr.bf16.mxu1 %v24532_v38 }
 0x6a1   :  { %21803 = vmatmul.mubr.bf16.vlgmr.msra.gmra.mrb[40].mxu1 %v24529_v39  ;;  %v24547_v39 = vld [vmem:[%s25299_s30 + $0x38] sm:$0xff]  }
 0x6a2   :  { %21807 = vmatpush3.bf16.msra.mxu1 %v24532_v38  ;;  %v24546_v38 = vld [vmem:[%s25299_s30 + $0x30] sm:$0xff]  }
 0x6a3   :  { %21808 = vmatprep.subr.bf16.mxu1 %v24533_v41 }
 0x6a6   :  { %21809 = vmatpush3.bf16.msra.mxu1 %v24533_v41 }
 0x6a7   :  { %21834 = vmatprep.subr.bf16.mxu1 %v24534_v42 }
 0x774   :  { %v21804_v49 = vpop.f32.mrb[40].mxu1 }
 0x775   :  { %v2654_v50 = vpop.f32.mrb[41].mxu1 }
 0x776   :  { %v21805_v52 = vpop.f32.mrb[42].mxu1 }
 0x777   :  { %v2670_v53 = vpack.c.bf16 %v21805_v52, %v21804_v49  ;;  %v2657_v54 = vpop.f32.mrb[43].mxu1  ;;  %v18453_v52 = vld [vmem:[%s25294_s24 + $0x8] sm:$0xf] }
 0x778   :  { %v2669_v56 = vpack.c.bf16 %v2657_v54, %v2654_v50  ;;  %v24548_v54 = vld [vmem:[%s25299_s30 + $0x40] sm:$0xff]  }
 0x77a   :  { %21810 = vmatprep.mubr.msk.bf16.mxu1 %vm764_vm4, %v2669_v56  ;;  %v24549_v56 = vld [vmem:[%s25299_s30 + $0x48] sm:$0xff]  }
 0x77b   :  { %21811 = vmatmul.mubr.msk.bf16.vlgmr.msra.gmra.mrb[20].mxu1 %vm764_vm4, %v2670_v53  ;;  %v18460_v53 = vld [vmem:[%s25294_s24 + $0xc] sm:$0xf] }
 0x77c   :  { %21835 = vmatpush3.bf16.msra.mxu1 %v24534_v42  ;;  %21838 = vmatprep.mubr.msk.bf16.mxu1 %vm764_vm4, %v2812_v48 }
 0x77d   :  { %21836 = vmatprep.subr.bf16.mxu1 %v24535_v57 }
 0x780   :  { %21837 = vmatpush3.bf16.msra.mxu1 %v24535_v57  ;;  %v24550_v57 = vld [vmem:[%s25299_s30 + $0x50] sm:$0xff]  }
 0x781   :  { %21842 = vmatprep.subr.bf16.mxu1 %v25479_v1 }
 0x787   :  { %21839 = vmatmul.mubr.msk.bf16.vlgmr.msra.gmra.mrb[20].mxu1 %vm764_vm4, %v2813_v46 }
 0x788   :  { %21843 = vmatpush3.bf16.msra.mxu1 %v25479_v1  ;;  %21858 = vmatprep.mubr.bf16.mxu1 %v24536_v58  ;;  %v24538_v1 = vld [vmem:[%s25284_s14] sm:$0xff]  }
 0x789   :  { %21844 = vmatprep.subr.bf16.mxu1 %v25476_v61  ;;  %21862 = vmatprep.subr.bf16.mxu0 %v24538_v1  ;;  %v24551_v58 = vld [vmem:[%s25299_s30 + $0x60] sm:$0xff]  }
 0x78a   :  { %21863 = vmatpush3.bf16.msra.mxu0 %v24538_v1  ;;  %v24553_v1 = vld [vmem:[%s25299_s30 + $0x68] sm:$0xff]  }
 0x78c   :  { %21845 = vmatpush3.bf16.msra.mxu1 %v25476_v61  ;;  %v24537_v61 = vld [vmem:[%s25269_s29 + $0x108] sm:$0xff]   ;;  %s28737_s29 = sld [smem:[#allocation10_spill]] }
 0x78d   :  { %21846 = vmatprep.subr.bf16.mxu1 %v25499_v28 }
 0x790   :  { %21847 = vmatpush3.bf16.msra.mxu1 %v25499_v28 }
 0x791   :  { %21848 = vmatprep.subr.bf16.mxu1 %v25494_v23 }
 0x794   :  { %21849 = vmatpush3.bf16.msra.mxu1 %v25494_v23  ;;  %v24539_v23 = vld [vmem:[%s25284_s14 + $0x8] sm:$0xff]   ;;  %s28740_s14 = sld [smem:[#allocation16_spill]] }
 0x795   :  { %21850 = vmatprep.subr.bf16.mxu1 %v25519_v55  ;;  %21864 = vmatprep.subr.bf16.mxu0 %v24539_v23 }
 0x796   :  { %21865 = vmatpush3.bf16.msra.mxu0 %v24539_v23  ;;  %v24554_v23 = vld [vmem:[%s25299_s30 + $0x70] sm:$0xff]  }
 0x797   :  { %21870 = vmatprep.subr.bf16.mxu0 %v28654_v26 }
 0x798   :  { %21851 = vmatpush3.bf16.msra.mxu1 %v25519_v55 }
 0x799   :  { %21852 = vmatprep.subr.bf16.mxu1 %v25514_v51 }
 0x79c   :  { %21853 = vmatpush3.bf16.msra.mxu1 %v25514_v51 }
 0x79d   :  { %21854 = vmatprep.subr.bf16.mxu1 %v25536_v6 }
 0x7a0   :  { %21855 = vmatpush3.bf16.msra.mxu1 %v25536_v6 }
 0x7a1   :  { %21856 = vmatprep.subr.bf16.mxu1 %v25532_v5 }
 0x7a4   :  { %21857 = vmatpush3.bf16.msra.mxu1 %v25532_v5 }
 0x7a5   :  { %21898 = vmatprep.subr.bf16.mxu1 %v28654_v26 }
 0x7a7   :  { %21859 = vmatmul.mubr.bf16.vlgmr.msra.gmra.mrb[44].mxu1 %v24537_v61  ;;  %v24552_v61 = vld [vmem:[%s25299_s30 + $0x58] sm:$0xff]  }
 0x7a8   :  { %21906 = vmatprep.mubr.msk.bf16.mxu1 %vm25228_vm5, %v28654_v26  ;;  %21899 = vmatpush3.bf16.msra.mxu1 %v24540_v2 }
 0x7a9   :  { %21900 = vmatprep.subr.bf16.mxu1 %v28654_v26 }
 0x7ac   :  { %21901 = vmatpush3.bf16.msra.mxu1 %v24541_v3 }
 0x7ad   :  { %21902 = vmatprep.subr.bf16.mxu1 %v28654_v26 }
 0x7b0   :  { %21903 = vmatpush3.bf16.msra.mxu1 %v24543_v4 }
 0x7b1   :  { %21904 = vmatprep.subr.bf16.mxu1 %v28654_v26 }
 0x7b4   :  { %21905 = vmatpush3.bf16.msra.mxu1 %v24545_v37 }
 0x7b5   :  { %21918 = vmatprep.subr.bf16.mxu1 %v28654_v26 }
 0x85a   :  { %v21840_v28 = vpop.f32.mrb[20].mxu1 }
 0x85b   :  { %v2870_v55 = vpop.f32.mrb[21].mxu1  ;;  %v2898_v7 = vadd.f32 %v21840_v28, %v18428_v40  ;;  %v24555_v28 = vld [vmem:[%s25299_s30 + $0x78] sm:$0xff]  }
 0x85c   :  { %v21841_v59 = vpop.f32.mrb[22].mxu1  ;;  %v2896_v8 = vadd.f32 %v18428_v40, %v2870_v55 }
 0x85d   :  { %v2873_v51 = vpop.f32.mrb[23].mxu1  ;;  %v2899_v10 = vadd.f32 %v21841_v59, %v18428_v40  ;;  %v3048_v13 = vmax.f32 %v2898_v7, 0.0 }
 0x85e   :  { %v2897_v11 = vadd.f32 %v18428_v40, %v2873_v51  ;;  %v3046_v16 = vmax.f32 %v2896_v8, 0.0 }
 0x85f   :  { %v3049_v19 = vmax.f32 %v2899_v10, 0.0 }
 0x860   :  { %v3047_v24 = vmax.f32 %v2897_v11, 0.0  ;;  %v24556_v11 = vld [vmem:[%s25299_s30 + $0x80] sm:$0xff]  }
 0x87a   :  { %v21860_v60 = vpop.f32.mrb[44].mxu1 }
 0x87b   :  { %v2951_v6 = vpop.f32.mrb[45].mxu1 }
 0x87c   :  { %v21861_v62 = vpop.f32.mrb[46].mxu1 }
 0x87d   :  { %v2967_v63 = vpack.c.bf16 %v21861_v62, %v21860_v60  ;;  %v2954_v0 = vpop.f32.mrb[47].mxu1 }
 0x87e   :  { %v2966_v5 = vpack.c.bf16 %v2954_v0, %v2951_v6 }
 0x880   :  { %21866 = vmatprep.mubr.msk.bf16.mxu0 %vm764_vm4, %v2966_v5 }
 0x881   :  { %21867 = vmatmul.mubr.msk.bf16.vlgmr.msra.gmra.mrb[56].mxu0 %vm764_vm4, %v2967_v63 }
 0x882   :  { %21874 = vmatprep.mubr.msk.bf16.mxu0 %vm25228_vm5, %v28654_v26 }
 0x954   :  { %v21868_v12 = vpop.f32.mrb[56].mxu0 }
 0x955   :  { %v3040_v14 = vadd.f32 %v21868_v12, %v18435_v9  ;;  %v3031_v15 = vpop.f32.mrb[57].mxu0 }
 0x956   :  { %v3032_v17 = vadd.f32 %v18435_v9, %v3031_v15  ;;  %v21869_v18 = vpop.f32.mrb[58].mxu0  ;;  %v24557_v15 = vld [vmem:[%s25299_s30 + $0x88] sm:$0xff]  }
 0x957   :  { %v3052_v20 = vadd.f32 %v3048_v13, %v3040_v14  ;;  %v3043_v21 = vadd.f32 %v21869_v18, %v18435_v9  ;;  %v3034_v22 = vpop.f32.mrb[59].mxu0  ;;  %v24559_v18 = vld [vmem:[%s25299_s30 + $0xa0] sm:$0xff]  }
 0x958   :  { %v3050_v25 = vadd.f32 %v3046_v16, %v3032_v17  ;;  %v3035_v27 = vadd.f32 %v18435_v9, %v3034_v22  ;;  %v18467_v9 = vld [vmem:[%s25294_s24 + $0x10] sm:$0xf]  ;;  %v18474_v16 = vld [vmem:[%s25294_s24 + $0x14] sm:$0xf]  ;;  %v24563_v22 = vld [vmem:[%s25299_s30 + $0xb8] sm:$0xff]  }
 0x959   :  { %v3053_v29 = vadd.f32 %v3049_v19, %v3043_v21  ;;  %v24558_v17 = vld [vmem:[%s25299_s30 + $0x90] sm:$0xff]   ;;  %v24560_v19 = vld [vmem:[%s25299_s30 + $0x98] sm:$0xff]  }
 0x95a   :  { %v3051_v30 = vadd.f32 %v3047_v24, %v3035_v27  ;;  %v24562_v21 = vld [vmem:[%s25299_s30 + $0xb0] sm:$0xff]  }
 0x95b   :  { %v25940_v31 = vpack.c.bf16 %v3053_v29, %v3052_v20  ;;  %v24561_v20 = vld [vmem:[%s25299_s30 + $0xa8] sm:$0xff]  }
 0x95c   :  { %v25942_v32 = vpack.c.bf16 %v3051_v30, %v3050_v25 }
 0x95e   :  { %21871 = vmatpush3.bf16.msra.mxu0 %v25942_v32 }
 0x95f   :  { %21872 = vmatprep.subr.bf16.mxu0 %v28654_v26 }
 0x962   :  { %21873 = vmatpush3.bf16.msra.mxu0 %v25940_v31 }
 0x963   :  { %21878 = vmatprep.subr.bf16.mxu0 %v28654_v26 }
 0x965   :  { %21875 = vmatmul.mubr.msk.bf16.vlgmr.msra.gmra.mrb[60].mxu0 %vm764_vm4, %v3056_v33 }
 0x966   :  { %21879 = vmatpush3.bf16.msra.mxu0 %v25942_v32  ;;  %21882 = vmatprep.mubr.msk.bf16.mxu0 %vm25228_vm5, %v28654_v26 }
 0x967   :  { %21880 = vmatprep.subr.bf16.mxu0 %v28654_v26 }
 0x96a   :  { %21881 = vmatpush3.bf16.msra.mxu0 %v25940_v31 }
 0x96b   :  { %21886 = vmatprep.subr.bf16.mxu0 %v28654_v26 }
 0x96d   :  { %21883 = vmatmul.mubr.msk.bf16.vlgmr.msra.gmra.mrb[64].mxu0 %vm764_vm4, %v18441_v34 }
 0x96e   :  { %21887 = vmatpush3.bf16.msra.mxu0 %v24542_v35  ;;  %21894 = vmatprep.mubr.msk.bf16.mxu0 %vm25228_vm5, %v28654_v26 }
 0x96f   :  { %21888 = vmatprep.subr.bf16.mxu0 %v28654_v26 }
 0x972   :  { %21889 = vmatpush3.bf16.msra.mxu0 %v24544_v36 }
 0x973   :  { %21890 = vmatprep.subr.bf16.mxu0 %v28654_v26 }
 0x976   :  { %21891 = vmatpush3.bf16.msra.mxu0 %v24546_v38 }
 0x977   :  { %21892 = vmatprep.subr.bf16.mxu0 %v28654_v26 }
 0x97a   :  { %21893 = vmatpush3.bf16.msra.mxu0 %v24547_v39 }
 0x97b   :  { %21910 = vmatprep.subr.bf16.mxu0 %v28654_v26 }
 0xa38   :  { %v3094_v41 = vpop.f32.mrb[60].mxu0 }
 0xa39   :  { %v3100_v42 = vpack.c.bf16 %v3094_v41, %v3094_v41  ;;  %v21876_v43 = vpop.f32.mrb[61].mxu0 }
 0xa3a   :  { %v3097_v44 = vpop.f32.mrb[62].mxu0 }
 0xa3b   :  { %v21877_v45 = vpop.f32.mrb[63].mxu0  ;;  %21907 = vmatmul.mubr.msk.bf16.vlgmr.msra.gmra.mrb[48].mxu1 %vm3187_vm6, %v3100_v42 }
 0xa3c   :  { %21926 = vmatprep.mubr.msk.bf16.mxu1 %vm25228_vm5, %v28654_v26  ;;  %21919 = vmatpush3.bf16.msra.mxu1 %v24548_v54  ;;  %v18481_v45 = vld [vmem:[%s25294_s24 + $0x18] sm:$0xf]  ;;  %v24566_v54 = vld [vmem:[%s25299_s30 + $0xd0] sm:$0xff]  }
 0xa3d   :  { %21920 = vmatprep.subr.bf16.mxu1 %v28654_v26 }
 0xa40   :  { %v3148_v46 = vpop.f32.mrb[64].mxu0  ;;  %21921 = vmatpush3.bf16.msra.mxu1 %v24549_v56  ;;  %v24567_v56 = vld [vmem:[%s25299_s30 + $0xe0] sm:$0xff]  }
 0xa41   :  { %v3154_v47 = vpack.c.bf16 %v3148_v46, %v3148_v46  ;;  %v21884_v48 = vpop.f32.mrb[65].mxu0  ;;  %21922 = vmatprep.subr.bf16.mxu1 %v28654_v26 }
 0xa42   :  { %v3151_v49 = vpop.f32.mrb[66].mxu0 }
 0xa43   :  { %v21885_v50 = vpop.f32.mrb[67].mxu0  ;;  %21895 = vmatmul.mubr.msk.bf16.vlgmr.msra.gmra.mrb[68].mxu0 %vm3187_vm6, %v3154_v47  ;;  %v24564_v47 = vld [vmem:[%s25299_s30 + $0xc0] sm:$0xff]  }
 0xa44   :  { %21911 = vmatpush3.bf16.msra.mxu0 %v25942_v32  ;;  %21914 = vmatprep.mubr.msk.bf16.mxu0 %vm25228_vm5, %v28654_v26 }
 0xa45   :  { %21912 = vmatprep.subr.bf16.mxu0 %v28654_v26  ;;  %21923 = vmatpush3.bf16.msra.mxu1 %v24550_v57  ;;  %v24568_v57 = vld [vmem:[%s25299_s30 + $0xd8] sm:$0xff]  }
 0xa46   :  { %21924 = vmatprep.subr.bf16.mxu1 %v28654_v26 }
 0xa48   :  { %21913 = vmatpush3.bf16.msra.mxu0 %v25940_v31 }
 0xa49   :  { %21930 = vmatprep.subr.bf16.mxu0 %v28654_v26  ;;  %21925 = vmatpush3.bf16.msra.mxu1 %v24552_v61  ;;  %v24570_v61 = vld [vmem:[%s25299_s30 + $0xf0] sm:$0xff]  }
 0xa4a   :  { %21950 = vmatprep.subr.bf16.mxu1 %v28654_v26 }
 0xa4b   :  { %21915 = vmatmul.mubr.msk.bf16.vlgmr.msra.gmra.mrb[72].mxu0 %vm764_vm4, %v18453_v52  ;;  %v24565_v52 = vld [vmem:[%s25299_s30 + $0xc8] sm:$0xff]  }
 0xa4c   :  { %21931 = vmatpush3.bf16.msra.mxu0 %v25942_v32  ;;  %21934 = vmatprep.mubr.msk.bf16.mxu0 %vm25228_vm5, %v28654_v26 }
 0xa4d   :  { %21932 = vmatprep.subr.bf16.mxu0 %v28654_v26 }
 0xa50   :  { %21933 = vmatpush3.bf16.msra.mxu0 %v25940_v31 }
 0xa51   :  { %21938 = vmatprep.subr.bf16.mxu0 %v28654_v26 }
 0xa53   :  { %21935 = vmatmul.mubr.msk.bf16.vlgmr.msra.gmra.mrb[76].mxu0 %vm764_vm4, %v18460_v53  ;;  %v18488_v53 = vld [vmem:[%s25294_s24 + $0x1c] sm:$0xf] }
 0xa54   :  { %21946 = vmatprep.mubr.msk.bf16.mxu0 %vm25228_vm5, %v28654_v26  ;;  %21939 = vmatpush3.bf16.msra.mxu0 %v24551_v58  ;;  %v24569_v58 = vld [vmem:[%s25299_s30 + $0xe8] sm:$0xff]  }
 0xa55   :  { %21940 = vmatprep.subr.bf16.mxu0 %v28654_v26 }
 0xa58   :  { %21941 = vmatpush3.bf16.msra.mxu0 %v24553_v1  ;;  %v24571_v1 = vld [vmem:[%s25299_s30 + $0xf8] sm:$0xff]  }
 0xa59   :  { %21942 = vmatprep.subr.bf16.mxu0 %v28654_v26 }
 0xa5c   :  { %21943 = vmatpush3.bf16.msra.mxu0 %v24554_v23 }
 0xa5d   :  { %21944 = vmatprep.subr.bf16.mxu0 %v28654_v26 }
 0xa60   :  { %21945 = vmatpush3.bf16.msra.mxu0 %v24555_v28 }
 0xa61   :  { %21970 = vmatprep.subr.bf16.mxu0 %v28654_v26 }
 0xb0e   :  { %v3292_v55 = vpop.f32.mrb[48].mxu1 }
 0xb0f   :  { %v21908_v59 = vpop.f32.mrb[49].mxu1 }
 0xb10   :  { %v3295_v51 = vpop.f32.mrb[50].mxu1 }
 0xb11   :  { %v21909_v60 = vpop.f32.mrb[51].mxu1 }
 0xb16   :  { %v3225_v6 = vpop.f32.mrb[68].mxu0 }
 0xb17   :  { %v3293_v62 = vadd.f32 %v3292_v55, %v3225_v6  ;;  %v21896_v63 = vpop.f32.mrb[69].mxu0 }
 0xb18   :  { %v3228_v0 = vpop.f32.mrb[70].mxu0 }
 0xb19   :  { %v21897_v5 = vpop.f32.mrb[71].mxu0 }
 0xb1e   :  { %v3337_v2 = vpop.f32.mrb[72].mxu0 }
 0xb1f   :  { %v3343_v3 = vpack.c.bf16 %v3337_v2, %v3337_v2  ;;  %v21916_v4 = vpop.f32.mrb[73].mxu0 }
 0xb20   :  { %v3340_v40 = vpop.f32.mrb[74].mxu0 }
 0xb21   :  { %v21917_v7 = vpop.f32.mrb[75].mxu0  ;;  %21927 = vmatmul.mubr.msk.bf16.vlgmr.msra.gmra.mrb[52].mxu1 %vm3187_vm6, %v3343_v3 }
 0xb22   :  { %21951 = vmatpush3.bf16.msra.mxu1 %v25942_v32  ;;  %21954 = vmatprep.mubr.msk.bf16.mxu1 %vm25228_vm5, %v28654_v26 }
 0xb23   :  { %21952 = vmatprep.subr.bf16.mxu1 %v28654_v26 }
 0xb26   :  { %21953 = vmatpush3.bf16.msra.mxu1 %v25940_v31  ;;  %v3459_v8 = vpop.f32.mrb[76].mxu0 }
 0xb27   :  { %v3465_v10 = vpack.c.bf16 %v3459_v8, %v3459_v8  ;;  %21958 = vmatprep.subr.bf16.mxu1 %v28654_v26  ;;  %v21936_v12 = vpop.f32.mrb[77].mxu0  ;;  %v18495_v8 = vld [vmem:[%s25294_s24 + $0x20] sm:$0xf] }
 0xb28   :  { %v3462_v13 = vpop.f32.mrb[78].mxu0 }
 0xb29   :  { %21947 = vmatmul.mubr.msk.bf16.vlgmr.msra.gmra.mrb[80].mxu0 %vm3187_vm6, %v3465_v10  ;;  %21955 = vmatmul.mubr.msk.bf16.vlgmr.msra.gmra.mrb[56].mxu1 %vm764_vm4, %v18467_v9  ;;  %v21937_v14 = vpop.f32.mrb[79].mxu0  ;;  %v24572_v10 = vld [vmem:[%s25299_s30 + $0x100] sm:$0xff]  }
 0xb2a   :  { %21971 = vmatpush3.bf16.msra.mxu0 %v25942_v32  ;;  %21974 = vmatprep.mubr.msk.bf16.mxu0 %vm25228_vm5, %v28654_v26  ;;  %v24573_v14 = vld [vmem:[%s25299_s30 + $0x108] sm:$0xff]  }
 0xb2b   :  { %21972 = vmatprep.subr.bf16.mxu0 %v28654_v26  ;;  %21959 = vmatpush3.bf16.msra.mxu1 %v24556_v11 }
 0xb2c   :  { %21960 = vmatprep.subr.bf16.mxu1 %v28654_v26  ;;  %21966 = vmatprep.mubr.msk.bf16.mxu1 %vm25228_vm5, %v28654_v26 }
 0xb2e   :  { %21973 = vmatpush3.bf16.msra.mxu0 %v25940_v31 }
 0xb2f   :  { %21961 = vmatpush3.bf16.msra.mxu1 %v24557_v15  ;;  %21978 = vmatprep.subr.bf16.mxu0 %v28654_v26  ;;  %v18502_v15 = vld [vmem:[%s25294_s24 + $0x24] sm:$0xf] }
 0xb30   :  { %21962 = vmatprep.subr.bf16.mxu1 %v28654_v26 }
 0xb31   :  { %21975 = vmatmul.mubr.msk.bf16.vlgmr.msra.gmra.mrb[84].mxu0 %vm764_vm4, %v18474_v16  ;;  %v24574_v16 = vld [vmem:[%s25299_s30 + $0x110] sm:$0xff]  }
 0xb32   :  { %21986 = vmatprep.mubr.msk.bf16.mxu0 %vm25228_vm5, %v28654_v26  ;;  %21979 = vmatpush3.bf16.msra.mxu0 %v24559_v18  ;;  %v24576_v18 = vld [vmem:[%s25299_s30 + $0x118] sm:$0xff]  }
 0xb33   :  { %21963 = vmatpush3.bf16.msra.mxu1 %v24558_v17  ;;  %21980 = vmatprep.subr.bf16.mxu0 %v28654_v26  ;;  %v24575_v17 = vld [vmem:[%s25299_s30 + $0x120] sm:$0xff]  }
 0xb34   :  { %21964 = vmatprep.subr.bf16.mxu1 %v28654_v26 }
 0xb36   :  { %21981 = vmatpush3.bf16.msra.mxu0 %v24561_v20  ;;  %v24578_v20 = vld [vmem:[%s25299_s30 + $0x130] sm:$0xff]  }
 0xb37   :  { %21965 = vmatpush3.bf16.msra.mxu1 %v24560_v19  ;;  %21982 = vmatprep.subr.bf16.mxu0 %v28654_v26  ;;  %v24577_v19 = vld [vmem:[%s25299_s30 + $0x128] sm:$0xff]  }
 0xb38   :  { %21990 = vmatprep.subr.bf16.mxu1 %v28654_v26 }
 0xb3a   :  { %21983 = vmatpush3.bf16.msra.mxu0 %v24562_v21  ;;  %v24579_v21 = vld [vmem:[%s25299_s30 + $0x138] sm:$0xff]  }
 0xb3b   :  { %21984 = vmatprep.subr.bf16.mxu0 %v28654_v26 }
 0xb3e   :  { %21985 = vmatpush3.bf16.msra.mxu0 %v24563_v22 }
 0xb3f   :  { %22010 = vmatprep.subr.bf16.mxu0 %v28654_v26 }
 0xbf4   :  { %v3413_v24 = vpop.f32.mrb[52].mxu1 }
 0xbf5   :  { %v3419_v25 = vadd.f32 %v3413_v24, %v3293_v62  ;;  %v21928_v27 = vpop.f32.mrb[53].mxu1 }
 0xbf6   :  { %v3416_v29 = vpop.f32.mrb[54].mxu1 }
 0xbf7   :  { %v21929_v30 = vpop.f32.mrb[55].mxu1 }
 0xbfc   :  { %v3535_v33 = vpop.f32.mrb[80].mxu0  ;;  %v3581_v34 = vpop.f32.mrb[56].mxu1 }
 0xbfd   :  { %v3541_v35 = vadd.f32 %v3535_v33, %v3419_v25  ;;  %v3587_v36 = vpack.c.bf16 %v3581_v34, %v3581_v34  ;;  %v21956_v37 = vpop.f32.mrb[57].mxu1  ;;  %v21948_v38 = vpop.f32.mrb[81].mxu0 }
 0xbfe   :  { %v3584_v39 = vpop.f32.mrb[58].mxu1  ;;  %v3538_v41 = vpop.f32.mrb[82].mxu0 }
 0xbff   :  { %v21957_v42 = vpop.f32.mrb[59].mxu1  ;;  %21967 = vmatmul.mubr.msk.bf16.vlgmr.msra.gmra.mrb[60].mxu1 %vm3187_vm6, %v3587_v36  ;;  %v21949_v43 = vpop.f32.mrb[83].mxu0 }
 0xc00   :  { %21991 = vmatpush3.bf16.msra.mxu1 %v25942_v32  ;;  %21994 = vmatprep.mubr.msk.bf16.mxu1 %vm25228_vm5, %v28654_v26 }
 0xc01   :  { %21992 = vmatprep.subr.bf16.mxu1 %v28654_v26 }
 0xc04   :  { %21993 = vmatpush3.bf16.msra.mxu1 %v25940_v31  ;;  %v3703_v44 = vpop.f32.mrb[84].mxu0 }
 0xc05   :  { %v3709_v46 = vpack.c.bf16 %v3703_v44, %v3703_v44  ;;  %21998 = vmatprep.subr.bf16.mxu1 %v28654_v26  ;;  %v21976_v48 = vpop.f32.mrb[85].mxu0  ;;  %v18509_v44 = vld [vmem:[%s25294_s24 + $0x28] sm:$0xf] }
 0xc06   :  { %v3706_v49 = vpop.f32.mrb[86].mxu0 }
 0xc07   :  { %21987 = vmatmul.mubr.msk.bf16.vlgmr.msra.gmra.mrb[88].mxu0 %vm3187_vm6, %v3709_v46  ;;  %21995 = vmatmul.mubr.msk.bf16.vlgmr.msra.gmra.mrb[64].mxu1 %vm764_vm4, %v18481_v45  ;;  %v21977_v50 = vpop.f32.mrb[87].mxu0  ;;  %v24580_v46 = vld [vmem:[%s25299_s30 + $0x140] sm:$0xff]  }
 0xc08   :  { %22011 = vmatpush3.bf16.msra.mxu0 %v25942_v32  ;;  %22014 = vmatprep.mubr.msk.bf16.mxu0 %vm25228_vm5, %v28654_v26  ;;  %v24581_v50 = vld [vmem:[%s25299_s30 + $0x148] sm:$0xff]  }
 0xc09   :  { %22012 = vmatprep.subr.bf16.mxu0 %v28654_v26  ;;  %21999 = vmatpush3.bf16.msra.mxu1 %v24564_v47 }
 0xc0a   :  { %22000 = vmatprep.subr.bf16.mxu1 %v28654_v26  ;;  %22006 = vmatprep.mubr.msk.bf16.mxu1 %vm25228_vm5, %v28654_v26 }
 0xc0c   :  { %22013 = vmatpush3.bf16.msra.mxu0 %v25940_v31 }
 0xc0d   :  { %22001 = vmatpush3.bf16.msra.mxu1 %v24565_v52  ;;  %22018 = vmatprep.subr.bf16.mxu0 %v28654_v26  ;;  %v18516_v52 = vld [vmem:[%s25294_s24 + $0x2c] sm:$0xf] }
 0xc0e   :  { %22002 = vmatprep.subr.bf16.mxu1 %v28654_v26 }
 0xc0f   :  { %22015 = vmatmul.mubr.msk.bf16.vlgmr.msra.gmra.mrb[92].mxu0 %vm764_vm4, %v18488_v53  ;;  %v24582_v53 = vld [vmem:[%s25299_s30 + $0x150] sm:$0xff]  }
 0xc10   :  { %22026 = vmatprep.mubr.msk.bf16.mxu0 %vm25228_vm5, %v28654_v26  ;;  %22019 = vmatpush3.bf16.msra.mxu0 %v24567_v56  ;;  %v24584_v56 = vld [vmem:[%s25299_s30 + $0x158] sm:$0xff]  }
 0xc11   :  { %22003 = vmatpush3.bf16.msra.mxu1 %v24566_v54  ;;  %22020 = vmatprep.subr.bf16.mxu0 %v28654_v26  ;;  %v24583_v54 = vld [vmem:[%s25299_s30 + $0x160] sm:$0xff]  }
 0xc12   :  { %22004 = vmatprep.subr.bf16.mxu1 %v28654_v26 }
 0xc14   :  { %22021 = vmatpush3.bf16.msra.mxu0 %v24569_v58  ;;  %v24586_v58 = vld [vmem:[%s25299_s30 + $0x170] sm:$0xff]  }
 0xc15   :  { %22005 = vmatpush3.bf16.msra.mxu1 %v24568_v57  ;;  %22022 = vmatprep.subr.bf16.mxu0 %v28654_v26  ;;  %v24585_v57 = vld [vmem:[%s25299_s30 + $0x168] sm:$0xff]  }
 0xc16   :  { %22030 = vmatprep.subr.bf16.mxu1 %v28654_v26 }
 0xc18   :  { %22023 = vmatpush3.bf16.msra.mxu0 %v24570_v61  ;;  %v24587_v61 = vld [vmem:[%s25299_s30 + $0x178] sm:$0xff]  }
 0xc19   :  { %22024 = vmatprep.subr.bf16.mxu0 %v28654_v26 }
 0xc1c   :  { %22025 = vmatpush3.bf16.msra.mxu0 %v24571_v1 }
 0xc1d   :  { %22050 = vmatprep.subr.bf16.mxu0 %v28654_v26 }
 0xcd2   :  { %v3657_v23 = vpop.f32.mrb[60].mxu1 }
 0xcd3   :  { %v3663_v28 = vadd.f32 %v3657_v23, %v3541_v35  ;;  %v21968_v55 = vpop.f32.mrb[61].mxu1 }
 0xcd4   :  { %v3660_v59 = vpop.f32.mrb[62].mxu1 }
 0xcd5   :  { %v21969_v51 = vpop.f32.mrb[63].mxu1 }
 0xcda   :  { %v3779_v60 = vpop.f32.mrb[88].mxu0  ;;  %v3825_v6 = vpop.f32.mrb[64].mxu1 }
 0xcdb   :  { %v3785_v62 = vadd.f32 %v3779_v60, %v3663_v28  ;;  %v3831_v63 = vpack.c.bf16 %v3825_v6, %v3825_v6  ;;  %v21996_v0 = vpop.f32.mrb[65].mxu1  ;;  %v21988_v5 = vpop.f32.mrb[89].mxu0 }
 0xcdc   :  { %v3828_v2 = vpop.f32.mrb[66].mxu1  ;;  %v3782_v3 = vpop.f32.mrb[90].mxu0 }
 0xcdd   :  { %v21997_v4 = vpop.f32.mrb[67].mxu1  ;;  %22007 = vmatmul.mubr.msk.bf16.vlgmr.msra.gmra.mrb[68].mxu1 %vm3187_vm6, %v3831_v63  ;;  %v21989_v40 = vpop.f32.mrb[91].mxu0 }
 0xcde   :  { %22031 = vmatpush3.bf16.msra.mxu1 %v25942_v32  ;;  %22034 = vmatprep.mubr.msk.bf16.mxu1 %vm25228_vm5, %v28654_v26 }
 0xcdf   :  { %22032 = vmatprep.subr.bf16.mxu1 %v28654_v26 }
 0xce2   :  { %22033 = vmatpush3.bf16.msra.mxu1 %v25940_v31  ;;  %v3947_v7 = vpop.f32.mrb[92].mxu0 }
 0xce3   :  { %v3953_v9 = vpack.c.bf16 %v3947_v7, %v3947_v7  ;;  %22038 = vmatprep.subr.bf16.mxu1 %v28654_v26  ;;  %v22016_v11 = vpop.f32.mrb[93].mxu0  ;;  %v18523_v7 = vld [vmem:[%s25294_s24 + $0x30] sm:$0xf] }
 0xce4   :  { %v3950_v12 = vpop.f32.mrb[94].mxu0 }
 0xce5   :  { %22027 = vmatmul.mubr.msk.bf16.vlgmr.msra.gmra.mrb[96].mxu0 %vm3187_vm6, %v3953_v9  ;;  %22035 = vmatmul.mubr.msk.bf16.vlgmr.msra.gmra.mrb[72].mxu1 %vm764_vm4, %v18495_v8  ;;  %v22017_v13 = vpop.f32.mrb[95].mxu0  ;;  %v24588_v9 = vld [vmem:[%s25299_s30 + $0x180] sm:$0xff]  }
 0xce6   :  { %22051 = vmatpush3.bf16.msra.mxu0 %v25942_v32  ;;  %22054 = vmatprep.mubr.msk.bf16.mxu0 %vm25228_vm5, %v28654_v26  ;;  %v24589_v13 = vld [vmem:[%s25299_s30 + $0x188] sm:$0xff]  }
 0xce7   :  { %22052 = vmatprep.subr.bf16.mxu0 %v28654_v26  ;;  %22039 = vmatpush3.bf16.msra.mxu1 %v24572_v10 }
 0xce8   :  { %22040 = vmatprep.subr.bf16.mxu1 %v28654_v26  ;;  %22046 = vmatprep.mubr.msk.bf16.mxu1 %vm25228_vm5, %v28654_v26 }
 0xcea   :  { %22053 = vmatpush3.bf16.msra.mxu0 %v25940_v31 }
 0xceb   :  { %22041 = vmatpush3.bf16.msra.mxu1 %v24573_v14  ;;  %22058 = vmatprep.subr.bf16.mxu0 %v28654_v26  ;;  %v18530_v14 = vld [vmem:[%s25294_s24 + $0x34] sm:$0xf] }
 0xcec   :  { %22042 = vmatprep.subr.bf16.mxu1 %v28654_v26 }
 0xced   :  { %22055 = vmatmul.mubr.msk.bf16.vlgmr.msra.gmra.mrb[100].mxu0 %vm764_vm4, %v18502_v15  ;;  %v24590_v15 = vld [vmem:[%s25299_s30 + $0x190] sm:$0xff]  }
 0xcee   :  { %22066 = vmatprep.mubr.msk.bf16.mxu0 %vm25228_vm5, %v28654_v26  ;;  %22059 = vmatpush3.bf16.msra.mxu0 %v24575_v17  ;;  %v24592_v17 = vld [vmem:[%s25299_s30 + $0x198] sm:$0xff]  }
 0xcef   :  { %22043 = vmatpush3.bf16.msra.mxu1 %v24574_v16  ;;  %22060 = vmatprep.subr.bf16.mxu0 %v28654_v26  ;;  %v24591_v16 = vld [vmem:[%s25299_s30 + $0x1a0] sm:$0xff]  }
 0xcf0   :  { %22044 = vmatprep.subr.bf16.mxu1 %v28654_v26 }
 0xcf2   :  { %22061 = vmatpush3.bf16.msra.mxu0 %v24577_v19  ;;  %v24594_v19 = vld [vmem:[%s25299_s30 + $0x1b0] sm:$0xff]  }
 0xcf3   :  { %22045 = vmatpush3.bf16.msra.mxu1 %v24576_v18  ;;  %22062 = vmatprep.subr.bf16.mxu0 %v28654_v26  ;;  %v24593_v18 = vld [vmem:[%s25299_s30 + $0x1a8] sm:$0xff]  }
 0xcf4   :  { %22070 = vmatprep.subr.bf16.mxu1 %v28654_v26 }
 0xcf6   :  { %22063 = vmatpush3.bf16.msra.mxu0 %v24578_v20  ;;  %v24595_v20 = vld [vmem:[%s25299_s30 + $0x1b8] sm:$0xff]  }
 0xcf7   :  { %22064 = vmatprep.subr.bf16.mxu0 %v28654_v26 }
 0xcfa   :  { %22065 = vmatpush3.bf16.msra.mxu0 %v24579_v21 }
 0xcfb   :  { %22090 = vmatprep.subr.bf16.mxu0 %v28654_v26 }
 0xdb0   :  { %v3901_v22 = vpop.f32.mrb[68].mxu1 }
 0xdb1   :  { %v3907_v24 = vadd.f32 %v3901_v22, %v3785_v62  ;;  %v22008_v25 = vpop.f32.mrb[69].mxu1 }
 0xdb2   :  { %v3904_v27 = vpop.f32.mrb[70].mxu1 }
 0xdb3   :  { %v22009_v29 = vpop.f32.mrb[71].mxu1 }
 0xdb8   :  { %v4023_v30 = vpop.f32.mrb[96].mxu0  ;;  %v4069_v33 = vpop.f32.mrb[72].mxu1 }
 0xdb9   :  { %v4029_v34 = vadd.f32 %v4023_v30, %v3907_v24  ;;  %v4075_v35 = vpack.c.bf16 %v4069_v33, %v4069_v33  ;;  %v22036_v36 = vpop.f32.mrb[73].mxu1  ;;  %v22028_v37 = vpop.f32.mrb[97].mxu0 }
 0xdba   :  { %v4072_v38 = vpop.f32.mrb[74].mxu1  ;;  %v4026_v39 = vpop.f32.mrb[98].mxu0 }
 0xdbb   :  { %v22037_v41 = vpop.f32.mrb[75].mxu1  ;;  %22047 = vmatmul.mubr.msk.bf16.vlgmr.msra.gmra.mrb[76].mxu1 %vm3187_vm6, %v4075_v35  ;;  %v22029_v42 = vpop.f32.mrb[99].mxu0 }
 0xdbc   :  { %22071 = vmatpush3.bf16.msra.mxu1 %v25942_v32  ;;  %22074 = vmatprep.mubr.msk.bf16.mxu1 %vm25228_vm5, %v28654_v26 }
 0xdbd   :  { %22072 = vmatprep.subr.bf16.mxu1 %v28654_v26 }
 0xdc0   :  { %22073 = vmatpush3.bf16.msra.mxu1 %v25940_v31  ;;  %v4191_v43 = vpop.f32.mrb[100].mxu0 }
 0xdc1   :  { %v4197_v45 = vpack.c.bf16 %v4191_v43, %v4191_v43  ;;  %22078 = vmatprep.subr.bf16.mxu1 %v28654_v26  ;;  %v22056_v47 = vpop.f32.mrb[101].mxu0  ;;  %v18537_v43 = vld [vmem:[%s25294_s24 + $0x38] sm:$0xf] }
 0xdc2   :  { %v4194_v48 = vpop.f32.mrb[102].mxu0 }
 0xdc3   :  { %22067 = vmatmul.mubr.msk.bf16.vlgmr.msra.gmra.mrb[104].mxu0 %vm3187_vm6, %v4197_v45  ;;  %22075 = vmatmul.mubr.msk.bf16.vlgmr.msra.gmra.mrb[80].mxu1 %vm764_vm4, %v18509_v44  ;;  %v22057_v49 = vpop.f32.mrb[103].mxu0  ;;  %v24596_v45 = vld [vmem:[%s25299_s30 + $0x1c0] sm:$0xff]  }
 0xdc4   :  { %22091 = vmatpush3.bf16.msra.mxu0 %v25942_v32  ;;  %22094 = vmatprep.mubr.msk.bf16.mxu0 %vm25228_vm5, %v28654_v26  ;;  %v24597_v49 = vld [vmem:[%s25299_s30 + $0x1c8] sm:$0xff]  }
 0xdc5   :  { %22092 = vmatprep.subr.bf16.mxu0 %v28654_v26  ;;  %22079 = vmatpush3.bf16.msra.mxu1 %v24580_v46 }
 0xdc6   :  { %22080 = vmatprep.subr.bf16.mxu1 %v28654_v26  ;;  %22086 = vmatprep.mubr.msk.bf16.mxu1 %vm25228_vm5, %v28654_v26 }
 0xdc8   :  { %22093 = vmatpush3.bf16.msra.mxu0 %v25940_v31 }
 0xdc9   :  { %22081 = vmatpush3.bf16.msra.mxu1 %v24581_v50  ;;  %22098 = vmatprep.subr.bf16.mxu0 %v28654_v26  ;;  %v18544_v50 = vld [vmem:[%s25294_s24 + $0x3c] sm:$0xf] }
 0xdca   :  { %22082 = vmatprep.subr.bf16.mxu1 %v28654_v26 }
 0xdcb   :  { %22095 = vmatmul.mubr.msk.bf16.vlgmr.msra.gmra.mrb[108].mxu0 %vm764_vm4, %v18516_v52  ;;  %v24598_v52 = vld [vmem:[%s25299_s30 + $0x1d0] sm:$0xff]  }
 0xdcc   :  { %22106 = vmatprep.mubr.msk.bf16.mxu0 %vm25228_vm5, %v28654_v26  ;;  %22099 = vmatpush3.bf16.msra.mxu0 %v24583_v54  ;;  %v24600_v54 = vld [vmem:[%s25299_s30 + $0x1d8] sm:$0xff]  }
 0xdcd   :  { %22083 = vmatpush3.bf16.msra.mxu1 %v24582_v53  ;;  %22100 = vmatprep.subr.bf16.mxu0 %v28654_v26  ;;  %v24599_v53 = vld [vmem:[%s25299_s30 + $0x1e0] sm:$0xff]  }
 0xdce   :  { %22084 = vmatprep.subr.bf16.mxu1 %v28654_v26 }
 0xdd0   :  { %22101 = vmatpush3.bf16.msra.mxu0 %v24585_v57  ;;  %v24602_v57 = vld [vmem:[%s25299_s30 + $0x1f0] sm:$0xff]  }
 0xdd1   :  { %22085 = vmatpush3.bf16.msra.mxu1 %v24584_v56  ;;  %22102 = vmatprep.subr.bf16.mxu0 %v28654_v26  ;;  %v24601_v56 = vld [vmem:[%s25299_s30 + $0x1e8] sm:$0xff]  }
 0xdd2   :  { %22110 = vmatprep.subr.bf16.mxu1 %v28654_v26 }
 0xdd4   :  { %22103 = vmatpush3.bf16.msra.mxu0 %v24586_v58  ;;  %v24603_v58 = vld [vmem:[%s25299_s30 + $0x1f8] sm:$0xff]   ;;  %s28743_s30 = sld [smem:[#allocation17_spill]] }
 0xdd5   :  { %22104 = vmatprep.subr.bf16.mxu0 %v28654_v26 }
 0xdd8   :  { %22105 = vmatpush3.bf16.msra.mxu0 %v24587_v61 }
 0xdd9   :  { %22130 = vmatprep.subr.bf16.mxu0 %v28654_v26 }
 0xe8e   :  { %v4145_v1 = vpop.f32.mrb[76].mxu1 }
 0xe8f   :  { %v4151_v23 = vadd.f32 %v4145_v1, %v4029_v34  ;;  %v22048_v28 = vpop.f32.mrb[77].mxu1 }
 0xe90   :  { %v4148_v55 = vpop.f32.mrb[78].mxu1 }
 0xe91   :  { %v22049_v59 = vpop.f32.mrb[79].mxu1 }
 0xe96   :  { %v4267_v51 = vpop.f32.mrb[104].mxu0  ;;  %v4313_v60 = vpop.f32.mrb[80].mxu1 }
 0xe97   :  { %v4273_v6 = vadd.f32 %v4267_v51, %v4151_v23  ;;  %v4319_v62 = vpack.c.bf16 %v4313_v60, %v4313_v60  ;;  %v22076_v63 = vpop.f32.mrb[81].mxu1  ;;  %v22068_v0 = vpop.f32.mrb[105].mxu0 }
 0xe98   :  { %v4316_v5 = vpop.f32.mrb[82].mxu1  ;;  %v4270_v2 = vpop.f32.mrb[106].mxu0 }
 0xe99   :  { %v22077_v3 = vpop.f32.mrb[83].mxu1  ;;  %22087 = vmatmul.mubr.msk.bf16.vlgmr.msra.gmra.mrb[84].mxu1 %vm3187_vm6, %v4319_v62  ;;  %v22069_v4 = vpop.f32.mrb[107].mxu0 }
 0xe9a   :  { %22111 = vmatpush3.bf16.msra.mxu1 %v25942_v32  ;;  %22114 = vmatprep.mubr.msk.bf16.mxu1 %vm25228_vm5, %v28654_v26 }
 0xe9b   :  { %22112 = vmatprep.subr.bf16.mxu1 %v28654_v26 }
 0xe9e   :  { %22113 = vmatpush3.bf16.msra.mxu1 %v25940_v31  ;;  %v4435_v40 = vpop.f32.mrb[108].mxu0 }
 0xe9f   :  { %v4441_v8 = vpack.c.bf16 %v4435_v40, %v4435_v40  ;;  %22118 = vmatprep.subr.bf16.mxu1 %v28654_v26  ;;  %v22096_v10 = vpop.f32.mrb[109].mxu0  ;;  %v18552_v40 = vld [vmem:[%s25294_s24 + $0x40] sm:$0xf]  ;;  %s28742_s24 = sld [smem:[#allocation15_spill]] }
 0xea0   :  { %v4438_v11 = vpop.f32.mrb[110].mxu0 }
 0xea1   :  { %22107 = vmatmul.mubr.msk.bf16.vlgmr.msra.gmra.mrb[112].mxu0 %vm3187_vm6, %v4441_v8  ;;  %22115 = vmatmul.mubr.msk.bf16.vlgmr.msra.gmra.mrb[88].mxu1 %vm764_vm4, %v18523_v7  ;;  %v22097_v12 = vpop.f32.mrb[111].mxu0  ;;  %v24604_v7 = vld [vmem:[%s25309_s12] sm:$0xff]   ;;  %v24606_v11 = vld [vmem:[%s25309_s12 + $0x10] sm:$0xff]  }
 0xea2   :  { %22131 = vmatpush3.bf16.msra.mxu0 %v25942_v32  ;;  %22134 = vmatprep.mubr.msk.bf16.mxu0 %vm25228_vm5, %v28654_v26  ;;  %v24607_v12 = vld [vmem:[%s25309_s12 + $0x18] sm:$0xff]  }
 0xea3   :  { %22132 = vmatprep.subr.bf16.mxu0 %v28654_v26  ;;  %22119 = vmatpush3.bf16.msra.mxu1 %v24588_v9 }
 0xea4   :  { %22120 = vmatprep.subr.bf16.mxu1 %v28654_v26  ;;  %22126 = vmatprep.mubr.msk.bf16.mxu1 %vm25228_vm5, %v28654_v26 }
 0xea6   :  { %22133 = vmatpush3.bf16.msra.mxu0 %v25940_v31 }
 0xea7   :  { %22121 = vmatpush3.bf16.msra.mxu1 %v24589_v13  ;;  %22138 = vmatprep.subr.bf16.mxu0 %v28654_v26 }
 0xea8   :  { %22122 = vmatprep.subr.bf16.mxu1 %v28654_v26 }
 0xea9   :  { %22135 = vmatmul.mubr.msk.bf16.vlgmr.msra.gmra.mrb[116].mxu0 %vm764_vm4, %v18530_v14 }
 0xeaa   :  { %22146 = vmatprep.mubr.msk.bf16.mxu0 %vm25228_vm5, %v28654_v26  ;;  %22139 = vmatpush3.bf16.msra.mxu0 %v24591_v16 }
 0xeab   :  { %22123 = vmatpush3.bf16.msra.mxu1 %v24590_v15  ;;  %22140 = vmatprep.subr.bf16.mxu0 %v28654_v26 }
 0xeac   :  { %22124 = vmatprep.subr.bf16.mxu1 %v28654_v26 }
 0xeae   :  { %22141 = vmatpush3.bf16.msra.mxu0 %v24593_v18 }
 0xeaf   :  { %22125 = vmatpush3.bf16.msra.mxu1 %v24592_v17  ;;  %22142 = vmatprep.subr.bf16.mxu0 %v28654_v26 }
 0xeb0   :  { %22150 = vmatprep.subr.bf16.mxu1 %v28654_v26 }
 0xeb2   :  { %22143 = vmatpush3.bf16.msra.mxu0 %v24594_v19 }
 0xeb3   :  { %22144 = vmatprep.subr.bf16.mxu0 %v28654_v26 }
 0xeb6   :  { %22145 = vmatpush3.bf16.msra.mxu0 %v24595_v20 }
 0xeb7   :  { %22170 = vmatprep.subr.bf16.mxu0 %v28654_v26 }
 0xf6c   :  { %v4389_v21 = vpop.f32.mrb[84].mxu1 }
 0xf6d   :  { %v4395_v22 = vadd.f32 %v4389_v21, %v4273_v6  ;;  %v22088_v24 = vpop.f32.mrb[85].mxu1 }
 0xf6e   :  { %v4392_v25 = vpop.f32.mrb[86].mxu1 }
 0xf6f   :  { %v22089_v27 = vpop.f32.mrb[87].mxu1 }
 0xf74   :  { %v4511_v29 = vpop.f32.mrb[112].mxu0  ;;  %v4557_v30 = vpop.f32.mrb[88].mxu1 }
 0xf75   :  { %v4517_v33 = vadd.f32 %v4511_v29, %v4395_v22  ;;  %v4563_v34 = vpack.c.bf16 %v4557_v30, %v4557_v30  ;;  %v22116_v35 = vpop.f32.mrb[89].mxu1  ;;  %v22108_v36 = vpop.f32.mrb[113].mxu0 }
 0xf76   :  { %v4560_v37 = vpop.f32.mrb[90].mxu1  ;;  %v4514_v38 = vpop.f32.mrb[114].mxu0  ;;  %v18554_v35 = vld [vmem:[%s28731_s5] ss:$0 sm:$0xff] }
 0xf77   :  { %v22117_v39 = vpop.f32.mrb[91].mxu1  ;;  %22127 = vmatmul.mubr.msk.bf16.vlgmr.msra.gmra.mrb[92].mxu1 %vm3187_vm6, %v4563_v34  ;;  %v22109_v41 = vpop.f32.mrb[115].mxu0 }
 0xf78   :  { %22151 = vmatpush3.bf16.msra.mxu1 %v25942_v32  ;;  %22154 = vmatprep.mubr.msk.bf16.mxu1 %vm25228_vm5, %v28654_v26 }
 0xf79   :  { %22152 = vmatprep.subr.bf16.mxu1 %v28654_v26 }
 0xf7c   :  { %22153 = vmatpush3.bf16.msra.mxu1 %v25940_v31  ;;  %v4679_v42 = vpop.f32.mrb[116].mxu0 }
 0xf7d   :  { %v4685_v44 = vpack.c.bf16 %v4679_v42, %v4679_v42  ;;  %22158 = vmatprep.subr.bf16.mxu1 %v28654_v26  ;;  %v22136_v46 = vpop.f32.mrb[117].mxu0 }
 0xf7e   :  { %v4682_v47 = vpop.f32.mrb[118].mxu0  ;;  %v5146_v46 = vld [vmem:[%s28732_s9] sm:$0x1] }
 0xf7f   :  { %22147 = vmatmul.mubr.msk.bf16.vlgmr.msra.gmra.mrb[120].mxu0 %vm3187_vm6, %v4685_v44  ;;  %22155 = vmatmul.mubr.msk.bf16.vlgmr.msra.gmra.mrb[96].mxu1 %vm764_vm4, %v18537_v43  ;;  %v22137_v48 = vpop.f32.mrb[119].mxu0  ;;  %v18570_v47 = vld [vmem:[%s28732_s9 + $0x1] sm:$0x1] }
 0xf80   :  { %22171 = vmatpush3.bf16.msra.mxu0 %v25942_v32  ;;  %22174 = vmatprep.mubr.msk.bf16.mxu0 %vm25228_vm5, %v28654_v26  ;;  %v24608_v48 = vld [vmem:[%s28733_s13] sm:$0xff]  }
 0xf81   :  { %22172 = vmatprep.subr.bf16.mxu0 %v28654_v26  ;;  %22159 = vmatpush3.bf16.msra.mxu1 %v24596_v45 }
 0xf82   :  { %22160 = vmatprep.subr.bf16.mxu1 %v28654_v26  ;;  %22166 = vmatprep.mubr.msk.bf16.mxu1 %vm25228_vm5, %v28654_v26 }
 0xf84   :  { %22173 = vmatpush3.bf16.msra.mxu0 %v25940_v31 }
 0xf85   :  { %22161 = vmatpush3.bf16.msra.mxu1 %v24597_v49  ;;  %22178 = vmatprep.subr.bf16.mxu0 %v28654_v26  ;;  %v24609_v49 = vld [vmem:[%s28733_s13 + $0x8] sm:$0xff]  }
 0xf86   :  { %22162 = vmatprep.subr.bf16.mxu1 %v28654_v26 }
 0xf87   :  { %22175 = vmatmul.mubr.msk.bf16.vlgmr.msra.gmra.mrb[124].mxu0 %vm764_vm4, %v18544_v50  ;;  %v18596_v50 = vld [vmem:[%s28732_s9 + $0x2] sm:$0x1] }
 0xf88   :  { %22186 = vmatprep.mubr.msk.bf16.mxu0 %vm25228_vm5, %v28654_v26  ;;  %22179 = vmatpush3.bf16.msra.mxu0 %v24599_v53  ;;  %v24611_v53 = vld [vmem:[%s28733_s13 + $0x18] sm:$0xff]  }
 0xf89   :  { %22163 = vmatpush3.bf16.msra.mxu1 %v24598_v52  ;;  %22180 = vmatprep.subr.bf16.mxu0 %v28654_v26  ;;  %v24610_v52 = vld [vmem:[%s28733_s13 + $0x10] sm:$0xff]  }
 0xf8a   :  { %22164 = vmatprep.subr.bf16.mxu1 %v28654_v26 }
 0xf8c   :  { %22181 = vmatpush3.bf16.msra.mxu0 %v24601_v56  ;;  %v24612_v56 = vld [vmem:[%s28733_s13 + $0x20] sm:$0xff]  }
 0xf8d   :  { %22165 = vmatpush3.bf16.msra.mxu1 %v24600_v54  ;;  %22182 = vmatprep.subr.bf16.mxu0 %v28654_v26  ;;  %v18622_v54 = vld [vmem:[%s28732_s9 + $0x3] sm:$0x1] }
 0xf8e   :  { %22190 = vmatprep.subr.bf16.mxu1 %v28654_v26 }
 0xf90   :  { %22183 = vmatpush3.bf16.msra.mxu0 %v24602_v57  ;;  %v24613_v57 = vld [vmem:[%s28733_s13 + $0x28] sm:$0xff]  }
 0xf91   :  { %22184 = vmatprep.subr.bf16.mxu0 %v28654_v26 }
 0xf94   :  { %22185 = vmatpush3.bf16.msra.mxu0 %v24603_v58  ;;  %v24614_v58 = vld [vmem:[%s28733_s13 + $0x30] sm:$0xff]  }
 0xf95   :  { %22210 = vmatprep.subr.bf16.mxu0 %v28654_v26 }
0x104a   :  { %v4633_v61 = vpop.f32.mrb[92].mxu1 }
0x104b   :  { %v4639_v1 = vadd.f32 %v4633_v61, %v4517_v33  ;;  %v22128_v23 = vpop.f32.mrb[93].mxu1  ;;  %v18551_v33 = vld [vmem:[%s28730_s0] ss:$0 sm:$0xff]  ;;  %v24615_v61 = vld [vmem:[%s28733_s13 + $0x38] sm:$0xff]  }
0x104c   :  { %v4636_v28 = vpop.f32.mrb[94].mxu1 }
0x104d   :  { %v22129_v55 = vpop.f32.mrb[95].mxu1  ;;  %v24616_v28 = vld [vmem:[%s28733_s13 + $0x40] sm:$0xff]  }
0x1052   :  { %v4755_v59 = vpop.f32.mrb[120].mxu0  ;;  %v4801_v51 = vpop.f32.mrb[96].mxu1 }
0x1053   :  { %v4761_v60 = vadd.f32 %v4755_v59, %v4639_v1  ;;  %v4807_v6 = vpack.c.bf16 %v4801_v51, %v4801_v51  ;;  %v22156_v62 = vpop.f32.mrb[97].mxu1  ;;  %v22148_v63 = vpop.f32.mrb[121].mxu0  ;;  %v24640_v1 = vld [vmem:[%s28734_s17] sm:$0xff]  }
0x1054   :  { %v4804_v0 = vpop.f32.mrb[98].mxu1  ;;  %v4758_v5 = vpop.f32.mrb[122].mxu0 }
0x1055   :  { %v22157_v2 = vpop.f32.mrb[99].mxu1  ;;  %22167 = vmatmul.mubr.msk.bf16.vlgmr.msra.gmra.mrb[100].mxu1 %vm3187_vm6, %v4807_v6  ;;  %v22149_v3 = vpop.f32.mrb[123].mxu0  ;;  %v24617_v5 = vld [vmem:[%s28733_s13 + $0x48] sm:$0xff]  }
0x1056   :  { %22191 = vmatpush3.bf16.msra.mxu1 %v25942_v32  ;;  %22194 = vmatprep.mubr.msk.bf16.mxu1 %vm25228_vm5, %v28654_v26  ;;  %v24618_v2 = vld [vmem:[%s28733_s13 + $0x50] sm:$0xff]  }
0x1057   :  { %22192 = vmatprep.subr.bf16.mxu1 %v28654_v26 }
0x105a   :  { %22193 = vmatpush3.bf16.msra.mxu1 %v25940_v31  ;;  %v4923_v4 = vpop.f32.mrb[124].mxu0  ;;  %v24605_v31 = vld [vmem:[%s25309_s12 + $0x8] sm:$0xff]   ;;  %s28744_s12 = sld [smem:[#allocation19_spill]] }
0x105b   :  { %v4929_v8 = vpack.c.bf16 %v4923_v4, %v4923_v4  ;;  %22198 = vmatprep.subr.bf16.mxu1 %v28654_v26  ;;  %v22176_v9 = vpop.f32.mrb[125].mxu0 }
0x105c   :  { %v4926_v10 = vpop.f32.mrb[126].mxu0  ;;  %v24620_v9 = vld [vmem:[%s28733_s13 + $0x60] sm:$0xff]  }
0x105d   :  { %22187 = vmatmul.mubr.msk.bf16.vlgmr.msra.gmra.mrb[128].mxu0 %vm3187_vm6, %v4929_v8  ;;  %22195 = vmatmul.mubr.msk.bf16.vlgmr.msra.gmra.mrb[104].mxu1 %vm764_vm4, %v18552_v40  ;;  %v22177_v32 = vpop.f32.mrb[127].mxu0  ;;  %v24619_v8 = vld [vmem:[%s28733_s13 + $0x58] sm:$0xff]  }
0x105e   :  { %22199 = vmatpush3.bf16.msra.mxu1 %v24604_v7  ;;  %22206 = vmatprep.mubr.msk.bf16.mxu1 %vm25228_vm5, %v28654_v26 }
0x105f   :  { %22200 = vmatprep.subr.bf16.mxu1 %v28654_v26  ;;  %22212 = vmatprep.mubr.msk.bf16.mxu0 %vm25228_vm5, %v28654_v26 }
0x1062   :  { %22201 = vmatpush3.bf16.msra.mxu1 %v24605_v31 }
0x1063   :  { %22202 = vmatprep.subr.bf16.mxu1 %v28654_v26 }
0x1066   :  { %22203 = vmatpush3.bf16.msra.mxu1 %v24606_v11 }
0x1067   :  { %22204 = vmatprep.subr.bf16.mxu1 %v28654_v26 }
0x106a   :  { %22205 = vmatpush3.bf16.msra.mxu1 %v24607_v12  ;;  %v24621_v12 = vld [vmem:[%s28733_s13 + $0x68] sm:$0xff]  }
0x106b   :  { %22236 = vmatprep.subr.bf16.mxu1 %v28654_v26 }
0x1128   :  { %v4877_v13 = vpop.f32.mrb[100].mxu1 }
0x1129   :  { %v22168_v14 = vpop.f32.mrb[101].mxu1  ;;  %v4883_v15 = vadd.f32 %v4877_v13, %v4761_v60  ;;  %v24622_v13 = vld [vmem:[%s28733_s13 + $0x70] sm:$0xff]  }
0x112a   :  { %v4880_v16 = vpop.f32.mrb[102].mxu1  ;;  %v24623_v14 = vld [vmem:[%s28733_s13 + $0x78] sm:$0xff]  }
0x112b   :  { %v22169_v17 = vpop.f32.mrb[103].mxu1  ;;  %v24624_v16 = vld [vmem:[%s28733_s13 + $0x80] sm:$0xff]  }
0x112c   :  { %v24625_v17 = vld [vmem:[%s28733_s13 + $0x88] sm:$0xff]  }
0x1130   :  { %v4999_v18 = vpop.f32.mrb[128].mxu0  ;;  %v5053_v19 = vpop.f32.mrb[104].mxu1 }
0x1131   :  { %v5005_v20 = vadd.f32 %v4999_v18, %v4883_v15  ;;  %v5059_v21 = vpack.c.bf16 %v5053_v19, %v5053_v19  ;;  %v22196_v22 = vpop.f32.mrb[105].mxu1  ;;  %v22188_v24 = vpop.f32.mrb[129].mxu0  ;;  %v24626_v18 = vld [vmem:[%s28733_s13 + $0x90] sm:$0xff]   ;;  %v24627_v19 = vld [vmem:[%s28733_s13 + $0x98] sm:$0xff]  }
0x1132   :  { %v5056_v25 = vpop.f32.mrb[106].mxu1  ;;  %v5002_v27 = vpop.f32.mrb[130].mxu0  ;;  %v24630_v22 = vld [vmem:[%s28733_s13 + $0xb0] sm:$0xff]   ;;  %v24631_v24 = vld [vmem:[%s28733_s13 + $0xb8] sm:$0xff]  }
0x1133   :  { %v22197_v29 = vpop.f32.mrb[107].mxu1  ;;  %22207 = vmatmul.mubr.msk.bf16.vlgmr.msra.gmra.mrb[108].mxu1 %vm3187_vm6, %v5059_v21  ;;  %v22189_v30 = vpop.f32.mrb[131].mxu0  ;;  %v5013_v34 = vadd.f32 %v18551_v33, %v5005_v20  ;;  %v24628_v20 = vld [vmem:[%s28733_s13 + $0xa0] sm:$0xff]   ;;  %v24629_v21 = vld [vmem:[%s28733_s13 + $0xa8] sm:$0xff]   ;;  %v24635_v33 = vld [vmem:[%s28733_s13 + $0xd8] sm:$0xff]  }
0x1134   :  { %22238 = vmatprep.mubr.msk.bf16.mxu1 %vm25228_vm5, %v28654_v26  ;;  %v24632_v27 = vld [vmem:[%s28733_s13 + $0xc0] sm:$0xff]   ;;  %v24633_v29 = vld [vmem:[%s28733_s13 + $0xc8] sm:$0xff]   ;;  %v24634_v30 = vld [vmem:[%s28733_s13 + $0xd0] sm:$0xff]  }
0x1135   :  { %v5142_v37 = vmax.f32 %v5013_v34, 0.0  ;;  %v24636_v34 = vld [vmem:[%s28733_s13 + $0xe0] sm:$0xff]  }
0x1206   :  { %v5136_v36 = vpop.f32.mrb[108].mxu1 }
0x1207   :  { %v5137_v38 = vadd.f32 %v18554_v35, %v5136_v36  ;;  %v22208_v39 = vpop.f32.mrb[109].mxu1  ;;  %v24637_v35 = vld [vmem:[%s28733_s13 + $0xe8] sm:$0xff]   ;;  %v24638_v36 = vld [vmem:[%s28733_s13 + $0xf0] sm:$0xff]  }
0x1208   :  { %v5139_v41 = vpop.f32.mrb[110].mxu1  ;;  %v24641_v39 = vld [vmem:[%s28734_s17 + $0x8] sm:$0xff]  }
0x1209   :  { %v5143_v42 = vadd.f32 %v5142_v37, %v5137_v38  ;;  %v22209_v43 = vpop.f32.mrb[111].mxu1  ;;  %v24639_v37 = vld [vmem:[%s28733_s13 + $0xf8] sm:$0xff]   ;;  %v18569_v41 = vld [vmem:[%s28735_s21] ss:$0 sm:$0xff] }
0x120b   :  { %v5144_v44 = vpack.c.bf16 %v5143_v42, %v5143_v42 }
0x120d   :  { %v5153_v45 = vsel %vm5151_vm7, %v5144_v44, 0 }
0x120e   :  { %22211 = vmatpush3.bf16.msra.mxu0 %v5153_v45  ;;  %22237 = vmatpush3.bf16.msra.mxu1 %v5153_v45 }
0x120f   :  { %22262 = vmatprep.subr.bf16.mxu1 %v28654_v26  ;;  %22216 = vmatprep.subr.bf16.mxu0 %v28654_v26 }
0x1211   :  { %22213 = vmatmul.mubr.msk.bf16.vlgmr.msra.gmra.mrb[132].mxu0 %vm5147_vm8, %v5146_v46  ;;  %22239 = vmatmul.mubr.msk.bf16.vlgmr.msra.gmra.mrb[112].mxu1 %vm5147_vm8, %v18570_v47  ;;  %v24642_v46 = vld [vmem:[%s28734_s17 + $0x10] sm:$0xff]  }
0x1212   :  { %22263 = vmatpush3.bf16.msra.mxu1 %v5153_v45  ;;  %22264 = vmatprep.mubr.msk.bf16.mxu1 %vm25228_vm5, %v28654_v26 }
0x1213   :  { %22288 = vmatprep.subr.bf16.mxu1 %v28654_v26  ;;  %22217 = vmatpush3.bf16.msra.mxu0 %v24608_v48 }
0x1214   :  { %22218 = vmatprep.subr.bf16.mxu0 %v28654_v26  ;;  %22232 = vmatprep.mubr.msk.bf16.mxu0 %vm25228_vm5, %v28654_v26 }
0x1217   :  { %22219 = vmatpush3.bf16.msra.mxu0 %v24609_v49  ;;  %v24643_v49 = vld [vmem:[%s28734_s17 + $0x18] sm:$0xff]  }
0x1218   :  { %22220 = vmatprep.subr.bf16.mxu0 %v28654_v26 }
0x1219   :  { %22265 = vmatmul.mubr.msk.bf16.vlgmr.msra.gmra.mrb[116].mxu1 %vm5147_vm8, %v18596_v50 }
0x121a   :  { %22289 = vmatpush3.bf16.msra.mxu1 %v5153_v45  ;;  %22290 = vmatprep.mubr.msk.bf16.mxu1 %vm25228_vm5, %v28654_v26 }
0x121b   :  { %22221 = vmatpush3.bf16.msra.mxu0 %v24610_v52  ;;  %22314 = vmatprep.subr.bf16.mxu1 %v28654_v26 }
0x121c   :  { %22222 = vmatprep.subr.bf16.mxu0 %v28654_v26 }
0x121f   :  { %22223 = vmatpush3.bf16.msra.mxu0 %v24611_v53 }
0x1220   :  { %22224 = vmatprep.subr.bf16.mxu0 %v28654_v26 }
0x1221   :  { %22291 = vmatmul.mubr.msk.bf16.vlgmr.msra.gmra.mrb[120].mxu1 %vm5147_vm8, %v18622_v54 }
0x1222   :  { %22318 = vmatprep.mubr.msk.bf16.mxu1 %vm25228_vm5, %v28654_v26  ;;  %22315 = vmatpush3.bf16.msra.mxu1 %v24640_v1 }
0x1223   :  { %22225 = vmatpush3.bf16.msra.mxu0 %v24612_v56  ;;  %22316 = vmatprep.subr.bf16.mxu1 %v28654_v26  ;;  %v18648_v56 = vld [vmem:[%s28736_s25] ss:$0 sm:$0xff] }
0x1224   :  { %22226 = vmatprep.subr.bf16.mxu0 %v28654_v26 }
0x1226   :  { %22317 = vmatpush3.bf16.msra.mxu1 %v24641_v39  ;;  %v24651_v39 = vld [vmem:[%s28738_s3 + $0x28] sm:$0xff]  }
0x1227   :  { %22227 = vmatpush3.bf16.msra.mxu0 %v24613_v57  ;;  %22322 = vmatprep.subr.bf16.mxu1 %v28654_v26  ;;  %v18657_v57 = vld [vmem:[%s28736_s25 + $0x1] ss:$0 sm:$0xff] }
0x1228   :  { %22228 = vmatprep.subr.bf16.mxu0 %v28654_v26 }
0x122b   :  { %22229 = vmatpush3.bf16.msra.mxu0 %v24614_v58 }
0x122c   :  { %22230 = vmatprep.subr.bf16.mxu0 %v28654_v26 }
0x122f   :  { %22231 = vmatpush3.bf16.msra.mxu0 %v24615_v61 }
0x1230   :  { %22242 = vmatprep.subr.bf16.mxu0 %v28654_v26 }
0x12e4   :  { %v5189_v23 = vpop.f32.mrb[132].mxu0  ;;  %v5346_v55 = vpop.f32.mrb[112].mxu1 }
0x12e5   :  { %v5195_v59 = vpack.c.bf16 %v5189_v23, %v5189_v23  ;;  %v22214_v51 = vpop.f32.mrb[133].mxu0  ;;  %v22240_v60 = vpop.f32.mrb[113].mxu1  ;;  %v5352_v15 = vpack.c.bf16 %v5346_v55, %v5346_v55 }
0x12e6   :  { %v5192_v6 = vpop.f32.mrb[134].mxu0  ;;  %v5349_v62 = vpop.f32.mrb[114].mxu1 }
0x12e7   :  { %v22215_v63 = vpop.f32.mrb[135].mxu0  ;;  %22233 = vmatmul.mubr.bf16.vlgmr.msra.gmra.mrb[136].mxu0 %v5195_v59  ;;  %v22241_v0 = vpop.f32.mrb[115].mxu1 }
0x12e8   :  { %22243 = vmatpush3.bf16.msra.mxu0 %v24616_v28  ;;  %22258 = vmatprep.mubr.msk.bf16.mxu0 %vm25228_vm5, %v28654_v26  ;;  %v18661_v63 = vld [vmem:[%s28737_s29 + $0x4] sm:$0xf] }
0x12e9   :  { %22244 = vmatprep.subr.bf16.mxu0 %v28654_v26 }
0x12ec   :  { %22245 = vmatpush3.bf16.msra.mxu0 %v24617_v5  ;;  %v5498_v3 = vpop.f32.mrb[116].mxu1  ;;  %v5833_v5 = vld [vmem:[%s28737_s29] sm:$0xf] }
0x12ed   :  { %22246 = vmatprep.subr.bf16.mxu0 %v28654_v26  ;;  %v22266_v4 = vpop.f32.mrb[117].mxu1  ;;  %v5504_v25 = vpack.c.bf16 %v5498_v3, %v5498_v3  ;;  %v24645_v3 = vld [vmem:[%s28734_s17 + $0x28] sm:$0xff]  }
0x12ee   :  { %v5501_v40 = vpop.f32.mrb[118].mxu1  ;;  %v18669_v4 = vld [vmem:[%s28736_s25 + $0x2] ss:$0 sm:$0xff] }
0x12ef   :  { %v22267_v7 = vpop.f32.mrb[119].mxu1 }
0x12f0   :  { %22247 = vmatpush3.bf16.msra.mxu0 %v24618_v2  ;;  %v24644_v2 = vld [vmem:[%s28734_s17 + $0x20] sm:$0xff]  }
0x12f1   :  { %22248 = vmatprep.subr.bf16.mxu0 %v28654_v26 }
0x12f4   :  { %22249 = vmatpush3.bf16.msra.mxu0 %v24619_v8  ;;  %v26312_v10 = vpop.f32.mrb[120].mxu1 }
0x12f5   :  { %22250 = vmatprep.subr.bf16.mxu0 %v28654_v26  ;;  %v22292_v32 = vpop.f32.mrb[121].mxu1  ;;  %v5656_v38 = vpack.c.bf16 %v26312_v10, %v26312_v10 }
0x12f6   :  { %v5653_v31 = vpop.f32.mrb[122].mxu1 }
0x12f7   :  { %v22293_v11 = vpop.f32.mrb[123].mxu1 }
0x12f8   :  { %22251 = vmatpush3.bf16.msra.mxu0 %v24620_v9 }
0x12f9   :  { %22252 = vmatprep.subr.bf16.mxu0 %v28654_v26 }
0x12fc   :  { %22253 = vmatpush3.bf16.msra.mxu0 %v24621_v12  ;;  %v18673_v12 = vld [vmem:[%s28737_s29 + $0x8] sm:$0xf] }
0x12fd   :  { %22254 = vmatprep.subr.bf16.mxu0 %v28654_v26 }
0x1300   :  { %22255 = vmatpush3.bf16.msra.mxu0 %v24622_v13  ;;  %v24646_v13 = vld [vmem:[%s28734_s17 + $0x30] sm:$0xff]  }
0x1301   :  { %22256 = vmatprep.subr.bf16.mxu0 %v28654_v26 }
0x1304   :  { %22257 = vmatpush3.bf16.msra.mxu0 %v24623_v14  ;;  %v24647_v14 = vld [vmem:[%s28734_s17 + $0x38] sm:$0xff]  }
0x1305   :  { %22268 = vmatprep.subr.bf16.mxu0 %v28654_v26 }
0x1307   :  { %22259 = vmatmul.mubr.bf16.vlgmr.msra.gmra.mrb[136].mxu0 %v5352_v15  ;;  %v18680_v15 = vld [vmem:[%s28736_s25 + $0x3] ss:$0 sm:$0xff] }
0x1308   :  { %22269 = vmatpush3.bf16.msra.mxu0 %v24624_v16  ;;  %22284 = vmatprep.mubr.msk.bf16.mxu0 %vm25228_vm5, %v28654_v26 }
0x1309   :  { %22270 = vmatprep.subr.bf16.mxu0 %v28654_v26 }
0x130c   :  { %22271 = vmatpush3.bf16.msra.mxu0 %v24625_v17 }
0x130d   :  { %22272 = vmatprep.subr.bf16.mxu0 %v28654_v26 }
0x1310   :  { %22273 = vmatpush3.bf16.msra.mxu0 %v24626_v18 }
0x1311   :  { %22274 = vmatprep.subr.bf16.mxu0 %v28654_v26 }
0x1314   :  { %22275 = vmatpush3.bf16.msra.mxu0 %v24627_v19 }
0x1315   :  { %22276 = vmatprep.subr.bf16.mxu0 %v28654_v26 }
0x1318   :  { %22277 = vmatpush3.bf16.msra.mxu0 %v24628_v20 }
0x1319   :  { %22278 = vmatprep.subr.bf16.mxu0 %v28654_v26 }
0x131c   :  { %22279 = vmatpush3.bf16.msra.mxu0 %v24629_v21 }
0x131d   :  { %22280 = vmatprep.subr.bf16.mxu0 %v28654_v26 }
0x1320   :  { %22281 = vmatpush3.bf16.msra.mxu0 %v24630_v22 }
0x1321   :  { %22282 = vmatprep.subr.bf16.mxu0 %v28654_v26 }
0x1324   :  { %22283 = vmatpush3.bf16.msra.mxu0 %v24631_v24 }
0x1325   :  { %22294 = vmatprep.subr.bf16.mxu0 %v28654_v26 }
0x1327   :  { %22285 = vmatmul.mubr.bf16.vlgmr.msra.gmra.mrb[136].mxu0 %v5504_v25  ;;  %v18684_v25 = vld [vmem:[%s28737_s29 + $0xc] sm:$0xf] }
0x1328   :  { %22295 = vmatpush3.bf16.msra.mxu0 %v24632_v27  ;;  %22310 = vmatprep.mubr.msk.bf16.mxu0 %vm25228_vm5, %v28654_v26  ;;  %v24648_v27 = vld [vmem:[%s28738_s3] sm:$0xff]  }
0x1329   :  { %22296 = vmatprep.subr.bf16.mxu0 %v28654_v26 }
0x132c   :  { %22297 = vmatpush3.bf16.msra.mxu0 %v24633_v29  ;;  %v24649_v29 = vld [vmem:[%s28738_s3 + $0x20] sm:$0xff]  }
0x132d   :  { %22298 = vmatprep.subr.bf16.mxu0 %v28654_v26 }
0x1330   :  { %22299 = vmatpush3.bf16.msra.mxu0 %v24634_v30 }
0x1331   :  { %22300 = vmatprep.subr.bf16.mxu0 %v28654_v26 }
0x1334   :  { %22301 = vmatpush3.bf16.msra.mxu0 %v24635_v33 }
0x1335   :  { %22302 = vmatprep.subr.bf16.mxu0 %v28654_v26 }
0x1338   :  { %22303 = vmatpush3.bf16.msra.mxu0 %v24636_v34 }
0x1339   :  { %22304 = vmatprep.subr.bf16.mxu0 %v28654_v26 }
0x133c   :  { %22305 = vmatpush3.bf16.msra.mxu0 %v24637_v35 }
0x133d   :  { %22306 = vmatprep.subr.bf16.mxu0 %v28654_v26 }
0x1340   :  { %22307 = vmatpush3.bf16.msra.mxu0 %v24638_v36 }
0x1341   :  { %22308 = vmatprep.subr.bf16.mxu0 %v28654_v26 }
0x1344   :  { %22309 = vmatpush3.bf16.msra.mxu0 %v24639_v37 }
0x1347   :  { %22311 = vmatmul.mubr.bf16.vlgmr.msra.gmra.mrb[136].mxu0 %v5656_v38  ;;  %v24650_v38 = vld [vmem:[%s28738_s3 + $0x8] sm:$0xff]  }
0x1348   :  { %22424 = vmatprep.mubr.msk.bf16.mxu0 %vm5147_vm8, %v24649_v29 }
0x141a   :  { %v5756_v42 = vpop.f32.mrb[136].mxu0 }
0x141b   :  { %v24008_v43 = vadd.f32 %v18569_v41, %v5756_v42  ;;  %v22312_v44 = vpop.f32.mrb[137].mxu0  ;;  %v24652_v41 = vld [vmem:[%s28738_s3 + $0x10] sm:$0xff]  }
0x141c   :  { %v5759_v45 = vpop.f32.mrb[138].mxu0  ;;  %v24653_v42 = vld [vmem:[%s28738_s3 + $0x30] sm:$0xff]   ;;  %v24654_v44 = vld [vmem:[%s28738_s3 + $0x18] sm:$0xff]  }
0x141d   :  { %v26363_v47 = vpack.c.bf16 %v24008_v43, %v24008_v43  ;;  %v22313_v48 = vpop.f32.mrb[139].mxu0  ;;  %5764 = vst.msk [vmem:[#allocation2] sm:$0x3] %vm5763_vm9, %v24008_v43  ;;  %v24680_v43 = vld [vmem:[%s28739_s8 + $0x40] sm:$0xff]   ;;  %v24655_v45 = vld [vmem:[%s28738_s3 + $0x38] sm:$0xff]  }
0x141e   :  { %v24682_v48 = vld [vmem:[%s28739_s8 + $0x50] sm:$0xff]  }
0x141f   :  { %22319 = vmatmul.mubr.msk.bf16.vlgmr.msra.gmra.mrb[124].mxu1 %vm764_vm4, %v26363_v47 }
0x1420   :  { %22323 = vmatpush3.bf16.msra.mxu1 %v24642_v46  ;;  %22326 = vmatprep.mubr.msk.bf16.mxu1 %vm25228_vm5, %v28654_v26  ;;  %v24656_v46 = vld [vmem:[%s28738_s3 + $0x40] sm:$0xff]  }
0x1421   :  { %22324 = vmatprep.subr.bf16.mxu1 %v28654_v26 }
0x1424   :  { %22325 = vmatpush3.bf16.msra.mxu1 %v24643_v49  ;;  %v24657_v49 = vld [vmem:[%s28738_s3 + $0x48] sm:$0xff]  }
0x1425   :  { %22330 = vmatprep.subr.bf16.mxu1 %v28654_v26 }
0x1427   :  { %22327 = vmatmul.mubr.msk.bf16.vlgmr.msra.gmra.mrb[128].mxu1 %vm764_vm4, %v26363_v47 }
0x1428   :  { %22332 = vmatprep.mubr.msk.bf16.mxu1 %vm25228_vm5, %v28654_v26 }
0x14f2   :  { %v5826_v50 = vpop.f32.mrb[124].mxu1 }
0x14f3   :  { %v22320_v52 = vpop.f32.mrb[125].mxu1  ;;  %v5827_v58 = vadd.f32 %v18648_v56, %v5826_v50  ;;  %v24658_v50 = vld [vmem:[%s28738_s3 + $0x50] sm:$0xff]   ;;  %v24660_v56 = vld [vmem:[%s28738_s3 + $0x60] sm:$0xff]  }
0x14f4   :  { %v5829_v53 = vpop.f32.mrb[126].mxu1  ;;  %v24683_v52 = vld [vmem:[%s28739_s8 + $0x58] sm:$0xff]  }
0x14f5   :  { %v22321_v54 = vpop.f32.mrb[127].mxu1  ;;  %v5832_v55 = vmax.f32 %v5827_v58, 0.0  ;;  %v24684_v53 = vld [vmem:[%s28739_s8 + $0x60] sm:$0xff]   ;;  %v24662_v58 = vld [vmem:[%s28738_s3 + $0x70] sm:$0xff]  }
0x14f6   :  { %v24659_v54 = vld [vmem:[%s28738_s3 + $0x58] sm:$0xff]  }
0x14f7   :  { %v5834_v6 = vpack.c.bf16 %v5832_v55, %v5832_v55  ;;  %v24667_v55 = vld [vmem:[%s28738_s3 + $0x98] sm:$0xff]  }
0x14f9   :  { %v5955_v0 = vsel %vm458_vm0, %v5834_v6, 0  ;;  %v24671_v6 = vld [vmem:[%s28738_s3 + $0xb8] sm:$0xff]  }
0x14fa   :  { %v5894_v61 = vpop.f32.mrb[128].mxu1 }
0x14fb   :  { %v5895_v1 = vadd.f32 %v18657_v57, %v5894_v61  ;;  %v22328_v23 = vpop.f32.mrb[129].mxu1  ;;  %v24661_v57 = vld [vmem:[%s28738_s3 + $0x68] sm:$0xff]   ;;  %v24663_v61 = vld [vmem:[%s28738_s3 + $0x78] sm:$0xff]  }
0x14fc   :  { %v5897_v28 = vpop.f32.mrb[130].mxu1  ;;  %v24665_v23 = vld [vmem:[%s28738_s3 + $0x88] sm:$0xff]  }
0x14fd   :  { %v5900_v59 = vmax.f32 %v5895_v1, 0.0  ;;  %v22329_v51 = vpop.f32.mrb[131].mxu1  ;;  %v24664_v1 = vld [vmem:[%s28738_s3 + $0x80] sm:$0xff]   ;;  %v24666_v28 = vld [vmem:[%s28738_s3 + $0x90] sm:$0xff]  }
0x14fe   :  { %v24669_v51 = vld [vmem:[%s28738_s3 + $0xa8] sm:$0xff]  }
0x14ff   :  { %v5903_v60 = vpack.c.bf16 %v5900_v59, %v5900_v59  ;;  %v24668_v59 = vld [vmem:[%s28738_s3 + $0xa0] sm:$0xff]  }
0x1501   :  { %v5909_v62 = vsel %vm458_vm0, %v5903_v60, 0  ;;  %v24670_v60 = vld [vmem:[%s28738_s3 + $0xb0] sm:$0xff]  }
0x1502   :  { %22331 = vmatpush3.bf16.msra.mxu1 %v5909_v62  ;;  %v24672_v62 = vld [vmem:[%s28738_s3 + $0xc0] sm:$0xff]  }
0x1503   :  { %22336 = vmatprep.subr.bf16.mxu1 %v28654_v26 }
0x1505   :  { %22333 = vmatmul.mubr.msk.bf16.vlgmr.msra.gmra.mrb[132].mxu1 %vm5904_vm10, %v18661_v63  ;;  %v24673_v63 = vld [vmem:[%s28738_s3 + $0xc8] sm:$0xff]  }
0x1506   :  { %22337 = vmatpush3.bf16.msra.mxu1 %v5955_v0  ;;  %22338 = vmatprep.mubr.msk.bf16.mxu1 %vm25228_vm5, %v28654_v26  ;;  %v24674_v0 = vld [vmem:[%s28738_s3 + $0xd0] sm:$0xff]  }
0x1507   :  { %22342 = vmatprep.subr.bf16.mxu1 %v28654_v26 }
0x1511   :  { %22339 = vmatmul.mubr.msk.bf16.vlgmr.msra.gmra.mrb[132].mxu1 %vm5904_vm10, %v5833_v5  ;;  %v24675_v5 = vld [vmem:[%s28738_s3 + $0xd8] sm:$0xff]  }
0x1512   :  { %22343 = vmatpush3.bf16.msra.mxu1 %v24644_v2  ;;  %22346 = vmatprep.mubr.msk.bf16.mxu1 %vm25228_vm5, %v28654_v26  ;;  %v24685_v2 = vld [vmem:[%s28739_s8 + $0x68] sm:$0xff]  }
0x1513   :  { %22344 = vmatprep.subr.bf16.mxu1 %v28654_v26 }
0x1516   :  { %22345 = vmatpush3.bf16.msra.mxu1 %v24645_v3  ;;  %v24676_v3 = vld [vmem:[%s28738_s3 + $0xe0] sm:$0xff]  }
0x1517   :  { %22350 = vmatprep.subr.bf16.mxu1 %v28654_v26 }
0x1519   :  { %22347 = vmatmul.mubr.msk.bf16.vlgmr.msra.gmra.mrb[136].mxu1 %vm764_vm4, %v26363_v47 }
0x151a   :  { %22352 = vmatprep.mubr.msk.bf16.mxu1 %vm25228_vm5, %v28654_v26 }
0x15ec   :  { %v6056_v40 = vpop.f32.mrb[136].mxu1 }
0x15ed   :  { %v6057_v7 = vadd.f32 %v18669_v4, %v6056_v40  ;;  %v22348_v8 = vpop.f32.mrb[137].mxu1  ;;  %v24686_v4 = vld [vmem:[%s28739_s8 + $0x70] sm:$0xff]   ;;  %v24677_v40 = vld [vmem:[%s28738_s3 + $0xe8] sm:$0xff]  }
0x15ee   :  { %v6059_v9 = vpop.f32.mrb[138].mxu1  ;;  %v24678_v8 = vld [vmem:[%s28738_s3 + $0xf0] sm:$0xff]  }
0x15ef   :  { %v6062_v10 = vmax.f32 %v6057_v7, 0.0  ;;  %v22349_v32 = vpop.f32.mrb[139].mxu1  ;;  %v24687_v7 = vld [vmem:[%s28739_s8 + $0x78] sm:$0xff]   ;;  %v24688_v9 = vld [vmem:[%s28739_s8] sm:$0xff]  }
0x15f1   :  { %v6065_v31 = vpack.c.bf16 %v6062_v10, %v6062_v10  ;;  %v24679_v10 = vld [vmem:[%s28738_s3 + $0xf8] sm:$0xff]  }
0x15f3   :  { %v6070_v11 = vsel %vm458_vm0, %v6065_v31, 0 }
0x15f4   :  { %22351 = vmatpush3.bf16.msra.mxu1 %v6070_v11 }
0x15f5   :  { %22356 = vmatprep.subr.bf16.mxu1 %v28654_v26 }
0x15f7   :  { %22353 = vmatmul.mubr.msk.bf16.vlgmr.msra.gmra.mrb[132].mxu1 %vm5904_vm10, %v18673_v12 }
0x15f8   :  { %22357 = vmatpush3.bf16.msra.mxu1 %v24646_v13  ;;  %22360 = vmatprep.mubr.msk.bf16.mxu1 %vm25228_vm5, %v28654_v26 }
0x15f9   :  { %22358 = vmatprep.subr.bf16.mxu1 %v28654_v26 }
0x15fc   :  { %22359 = vmatpush3.bf16.msra.mxu1 %v24647_v14 }
0x15fd   :  { %22364 = vmatprep.subr.bf16.mxu1 %v28654_v26 }
0x15ff   :  { %22361 = vmatmul.mubr.msk.bf16.vlgmr.msra.gmra.mrb[140].mxu1 %vm764_vm4, %v26363_v47  ;;  %v24681_v47 = vld [vmem:[%s28739_s8 + $0x48] sm:$0xff]  }
0x1600   :  { %22366 = vmatprep.mubr.msk.bf16.mxu1 %vm25228_vm5, %v28654_v26 }
0x16d2   :  { %v6172_v16 = vpop.f32.mrb[140].mxu1 }
0x16d3   :  { %v6173_v17 = vadd.f32 %v18680_v15, %v6172_v16  ;;  %v22362_v18 = vpop.f32.mrb[141].mxu1 }
0x16d4   :  { %v6175_v19 = vpop.f32.mrb[142].mxu1 }
0x16d5   :  { %v6178_v20 = vmax.f32 %v6173_v17, 0.0  ;;  %v22363_v21 = vpop.f32.mrb[143].mxu1 }
0x16d7   :  { %v6181_v22 = vpack.c.bf16 %v6178_v20, %v6178_v20 }
0x16d9   :  { %v6186_v24 = vsel %vm458_vm0, %v6181_v22, 0 }
0x16da   :  { %22365 = vmatpush3.bf16.msra.mxu1 %v6186_v24 }
0x16dd   :  { %22367 = vmatmul.mubr.msk.bf16.vlgmr.msra.gmra.mrb[132].mxu1 %vm5904_vm10, %v18684_v25 }
0x16de   :  { %22372 = vmatprep.mubr.msk.bf16.mxu1 %vm5147_vm8, %v24648_v27 }
0x17b0   :  { %v6222_v30 = vpop.f32.mrb[132].mxu1 }
0x17b1   :  { %v26421_v33 = vpack.c.bf16 %v6222_v30, %v6222_v30  ;;  %v22368_v34 = vpop.f32.mrb[133].mxu1 }
0x17b2   :  { %v6225_v35 = vpop.f32.mrb[134].mxu1 }
0x17b3   :  { %v22369_v36 = vpop.f32.mrb[135].mxu1  ;;  %24393 = vmatprep.subr.msk.bf16.mxu1 %vm5151_vm7, %v26421_v33  ;;  %24395 = vmatprep.subr.msk.bf16.mxu0 %vm5151_vm7, %v26421_v33  ;;  %v26429_v37 = vsel %vm5151_vm7, %v26421_v33, 0 }
0x17b4   :  { %22371 = vmatpush3.bf16.msra.mxu1 %v26429_v37  ;;  %22423 = vmatpush3.bf16.msra.mxu0 %v26429_v37 }
0x17b5   :  { %24394 = vmatprep.subr.msk.bf16.mxu1 %vm5151_vm7, %v26421_v33  ;;  %24396 = vmatprep.subr.msk.bf16.mxu0 %vm5151_vm7, %v26421_v33 }
0x17b7   :  { %22373 = vmatmul.mubr.msk.bf16.vlgmr.msra.gmra.mrb[144].mxu1 %vm5147_vm8, %v24650_v38  ;;  %22425 = vmatmul.mubr.msk.bf16.vlgmr.msra.gmra.mrb[140].mxu0 %vm5147_vm8, %v24651_v39  ;;  %v24689_v38 = vld [vmem:[%s28739_s8 + $0x8] sm:$0xff]  }
0x17b8   :  { %22377 = vmatpush3.bf16.msra.mxu1 %v26429_v37  ;;  %22449 = vmatpush3.bf16.msra.mxu0 %v26429_v37 }
0x17b9   :  { %24397 = vmatprep.subr.msk.bf16.mxu0 %vm5151_vm7, %v26421_v33  ;;  %22378 = vmatprep.mubr.msk.bf16.mxu1 %vm5147_vm8, %v24652_v41  ;;  %v24690_v41 = vld [vmem:[%s28739_s8 + $0x10] sm:$0xff]  }
0x17ba   :  { %22450 = vmatprep.mubr.msk.bf16.mxu0 %vm5147_vm8, %v24653_v42  ;;  %22382 = vmatprep.subr.bf16.mxu1 %v24680_v43 }
0x17bf   :  { %22379 = vmatmul.mubr.msk.bf16.vlgmr.msra.gmra.mrb[148].mxu1 %vm5147_vm8, %v24654_v44  ;;  %22451 = vmatmul.mubr.msk.bf16.vlgmr.msra.gmra.mrb[144].mxu0 %vm5147_vm8, %v24655_v45 }
0x17c0   :  { %22475 = vmatpush3.bf16.msra.mxu0 %v26429_v37  ;;  %22476 = vmatprep.mubr.msk.bf16.mxu0 %vm5147_vm8, %v24656_v46 }
0x17c1   :  { %24398 = vmatprep.subr.msk.bf16.mxu0 %vm5151_vm7, %v26421_v33  ;;  %22383 = vmatpush3.bf16.msra.mxu1 %v24680_v43 }
0x17c2   :  { %22384 = vmatprep.subr.bf16.mxu1 %v24681_v47 }
0x17c5   :  { %22385 = vmatpush3.bf16.msra.mxu1 %v24681_v47  ;;  %v24691_v47 = vld [vmem:[%s28739_s8 + $0x18] sm:$0xff]  }
0x17c6   :  { %22386 = vmatprep.subr.bf16.mxu1 %v24682_v48 }
0x17c7   :  { %22477 = vmatmul.mubr.msk.bf16.vlgmr.msra.gmra.mrb[148].mxu0 %vm5147_vm8, %v24657_v49  ;;  %v24693_v49 = vld [vmem:[%s28739_s8 + $0x28] sm:$0xff]  }
0x17c8   :  { %22501 = vmatpush3.bf16.msra.mxu0 %v26429_v37  ;;  %22502 = vmatprep.mubr.msk.bf16.mxu0 %vm5147_vm8, %v24658_v50  ;;  %v24694_v50 = vld [vmem:[%s28739_s8 + $0x30] sm:$0xff]  }
0x17c9   :  { %24399 = vmatprep.subr.msk.bf16.mxu0 %vm5151_vm7, %v26421_v33  ;;  %22387 = vmatpush3.bf16.msra.mxu1 %v24682_v48  ;;  %v24692_v48 = vld [vmem:[%s28739_s8 + $0x20] sm:$0xff]  }
0x17ca   :  { %22388 = vmatprep.subr.bf16.mxu1 %v24683_v52 }
0x17cd   :  { %22389 = vmatpush3.bf16.msra.mxu1 %v24683_v52  ;;  %v24695_v52 = vld [vmem:[%s28739_s8 + $0x38] sm:$0xff]  }
0x17ce   :  { %22390 = vmatprep.subr.bf16.mxu1 %v24684_v53 }
0x17cf   :  { %22503 = vmatmul.mubr.msk.bf16.vlgmr.msra.gmra.mrb[152].mxu0 %vm5147_vm8, %v24659_v54 }
0x17d0   :  { %22527 = vmatpush3.bf16.msra.mxu0 %v26429_v37  ;;  %22528 = vmatprep.mubr.msk.bf16.mxu0 %vm5147_vm8, %v24660_v56 }
0x17d1   :  { %24400 = vmatprep.subr.msk.bf16.mxu0 %vm5151_vm7, %v26421_v33  ;;  %22391 = vmatpush3.bf16.msra.mxu1 %v24684_v53 }
0x17d2   :  { %22392 = vmatprep.subr.bf16.mxu1 %v24685_v2 }
0x17d5   :  { %22393 = vmatpush3.bf16.msra.mxu1 %v24685_v2 }
0x17d6   :  { %22394 = vmatprep.subr.bf16.mxu1 %v24686_v4 }
0x17d7   :  { %22529 = vmatmul.mubr.msk.bf16.vlgmr.msra.gmra.mrb[156].mxu0 %vm5147_vm8, %v24661_v57  ;;  %v24696_v57 = vld [vmem:[%s28739_s8 + $0x80] sm:$0xff]  }
0x17d8   :  { %22553 = vmatpush3.bf16.msra.mxu0 %v26429_v37  ;;  %22554 = vmatprep.mubr.msk.bf16.mxu0 %vm5147_vm8, %v24662_v58 }
0x17d9   :  { %24401 = vmatprep.subr.msk.bf16.mxu0 %vm5151_vm7, %v26421_v33  ;;  %22395 = vmatpush3.bf16.msra.mxu1 %v24686_v4 }
0x17da   :  { %22396 = vmatprep.subr.bf16.mxu1 %v24687_v7 }
0x17dd   :  { %22397 = vmatpush3.bf16.msra.mxu1 %v24687_v7  ;;  %v24706_v7 = vld [vmem:[%s28739_s8 + $0xd0] sm:$0xff]  }
0x17de   :  { %22402 = vmatprep.subr.bf16.mxu1 %v24688_v9 }
0x17df   :  { %22555 = vmatmul.mubr.msk.bf16.vlgmr.msra.gmra.mrb[160].mxu0 %vm5147_vm8, %v24663_v61 }
0x17e0   :  { %22579 = vmatpush3.bf16.msra.mxu0 %v26429_v37  ;;  %22580 = vmatprep.mubr.msk.bf16.mxu0 %vm5147_vm8, %v24664_v1 }
0x17e1   :  { %24402 = vmatprep.subr.msk.bf16.mxu0 %vm5151_vm7, %v26421_v33 }
0x17e7   :  { %22581 = vmatmul.mubr.msk.bf16.vlgmr.msra.gmra.mrb[164].mxu0 %vm5147_vm8, %v24665_v23  ;;  %v24697_v23 = vld [vmem:[%s28739_s8 + $0x88] sm:$0xff]  }
0x17e8   :  { %22605 = vmatpush3.bf16.msra.mxu0 %v26429_v37  ;;  %22606 = vmatprep.mubr.msk.bf16.mxu0 %vm5147_vm8, %v24666_v28  ;;  %v24698_v28 = vld [vmem:[%s28739_s8 + $0x90] sm:$0xff]  }
0x17e9   :  { %24403 = vmatprep.subr.msk.bf16.mxu0 %vm5151_vm7, %v26421_v33 }
0x17ef   :  { %22607 = vmatmul.mubr.msk.bf16.vlgmr.msra.gmra.mrb[168].mxu0 %vm5147_vm8, %v24667_v55  ;;  %v24699_v55 = vld [vmem:[%s28739_s8 + $0x98] sm:$0xff]  }
0x17f0   :  { %22631 = vmatpush3.bf16.msra.mxu0 %v26429_v37  ;;  %22632 = vmatprep.mubr.msk.bf16.mxu0 %vm5147_vm8, %v24668_v59  ;;  %v24700_v59 = vld [vmem:[%s28739_s8 + $0xa0] sm:$0xff]  }
0x17f1   :  { %24404 = vmatprep.subr.msk.bf16.mxu0 %vm5151_vm7, %v26421_v33 }
0x17f7   :  { %22633 = vmatmul.mubr.msk.bf16.vlgmr.msra.gmra.mrb[172].mxu0 %vm5147_vm8, %v24669_v51  ;;  %v24701_v51 = vld [vmem:[%s28739_s8 + $0xa8] sm:$0xff]  }
0x17f8   :  { %22657 = vmatpush3.bf16.msra.mxu0 %v26429_v37  ;;  %22658 = vmatprep.mubr.msk.bf16.mxu0 %vm5147_vm8, %v24670_v60  ;;  %v24702_v60 = vld [vmem:[%s28739_s8 + $0xb0] sm:$0xff]  }
0x17f9   :  { %24405 = vmatprep.subr.msk.bf16.mxu0 %vm5151_vm7, %v26421_v33 }
0x17ff   :  { %22659 = vmatmul.mubr.msk.bf16.vlgmr.msra.gmra.mrb[176].mxu0 %vm5147_vm8, %v24671_v6  ;;  %v24703_v6 = vld [vmem:[%s28739_s8 + $0xb8] sm:$0xff]  }
0x1800   :  { %22683 = vmatpush3.bf16.msra.mxu0 %v26429_v37  ;;  %22684 = vmatprep.mubr.msk.bf16.mxu0 %vm5147_vm8, %v24672_v62 }
0x1801   :  { %24406 = vmatprep.subr.msk.bf16.mxu0 %vm5151_vm7, %v26421_v33 }
0x1807   :  { %22685 = vmatmul.mubr.msk.bf16.vlgmr.msra.gmra.mrb[180].mxu0 %vm5147_vm8, %v24673_v63 }
0x1808   :  { %22709 = vmatpush3.bf16.msra.mxu0 %v26429_v37  ;;  %22710 = vmatprep.mubr.msk.bf16.mxu0 %vm5147_vm8, %v24674_v0 }
0x1809   :  { %24407 = vmatprep.subr.msk.bf16.mxu0 %vm5151_vm7, %v26421_v33 }
0x180f   :  { %22711 = vmatmul.mubr.msk.bf16.vlgmr.msra.gmra.mrb[184].mxu0 %vm5147_vm8, %v24675_v5  ;;  %v24704_v5 = vld [vmem:[%s28739_s8 + $0xc0] sm:$0xff]  }
0x1810   :  { %22735 = vmatpush3.bf16.msra.mxu0 %v26429_v37  ;;  %22736 = vmatprep.mubr.msk.bf16.mxu0 %vm5147_vm8, %v24676_v3 }
0x1811   :  { %24408 = vmatprep.subr.msk.bf16.mxu0 %vm5151_vm7, %v26421_v33 }
0x1817   :  { %22737 = vmatmul.mubr.msk.bf16.vlgmr.msra.gmra.mrb[188].mxu0 %vm5147_vm8, %v24677_v40  ;;  %v24705_v40 = vld [vmem:[%s28739_s8 + $0xc8] sm:$0xff]  }
0x1818   :  { %22761 = vmatpush3.bf16.msra.mxu0 %v26429_v37  ;;  %22762 = vmatprep.mubr.msk.bf16.mxu0 %vm5147_vm8, %v24678_v8  ;;  %v24707_v8 = vld [vmem:[%s28739_s8 + $0xd8] sm:$0xff]  }
0x1819   :  { %24409 = vmatprep.subr.msk.bf16.mxu0 %vm5151_vm7, %v26421_v33 }
0x181f   :  { %22763 = vmatmul.mubr.msk.bf16.vlgmr.msra.gmra.mrb[192].mxu0 %vm5147_vm8, %v24679_v10  ;;  %v24709_v10 = vld [vmem:[%s28739_s8 + $0xe8] sm:$0xff]  }
0x1820   :  { %22787 = vmatpush3.bf16.msra.mxu0 %v26429_v37 }
0x188a   :  { %v26547_v32 = vpop.f32.mrb[144].mxu1  ;;  %v26549_v31 = vpop.f32.mrb[140].mxu0 }
0x188b   :  { %v6287_v11 = vpop.f32.mrb[145].mxu1  ;;  %v26551_v12 = vpop.f32.mrb[141].mxu0 }
0x188c   :  { %v22375_v13 = vpop.f32.mrb[146].mxu1  ;;  %v26553_v14 = vpop.f32.mrb[142].mxu0 }
0x188d   :  { %v6303_v15 = vpack.c.bf16 %v22375_v13, %v26547_v32  ;;  %v6290_v16 = vpop.f32.mrb[147].mxu1  ;;  %v6673_v17 = vpack.c.bf16 %v26553_v14, %v26549_v31  ;;  %v6660_v18 = vpop.f32.mrb[143].mxu0  ;;  %v24710_v32 = vld [vmem:[%s28739_s8 + $0xf0] sm:$0xff]   ;;  %v24711_v31 = vld [vmem:[%s28739_s8 + $0xf8] sm:$0xff]   ;;  %v24712_v14 = vld [vmem:[%s28739_s8 + $0x100] sm:$0xff]  }
0x188e   :  { %v6302_v19 = vpack.c.bf16 %v6290_v16, %v6287_v11  ;;  %v6672_v20 = vpack.c.bf16 %v6660_v18, %v26551_v12  ;;  %v24713_v18 = vld [vmem:[%s28739_s8 + $0x108] sm:$0xff]  }
0x1892   :  { %v22380_v21 = vpop.f32.mrb[148].mxu1  ;;  %v26559_v22 = vpop.f32.mrb[144].mxu0 }
0x1893   :  { %v6375_v24 = vpop.f32.mrb[149].mxu1  ;;  %v26561_v25 = vpop.f32.mrb[145].mxu0 }
0x1894   :  { %v22381_v27 = vpop.f32.mrb[150].mxu1  ;;  %v26563_v29 = vpop.f32.mrb[146].mxu0 }
0x1895   :  { %v6391_v30 = vpack.c.bf16 %v22381_v27, %v22380_v21  ;;  %v6378_v33 = vpop.f32.mrb[151].mxu1  ;;  %v6862_v34 = vpack.c.bf16 %v26563_v29, %v26559_v22  ;;  %v26567_v35 = vpop.f32.mrb[147].mxu0  ;;  %v24716_v21 = vld [vmem:[%s28739_s8 + $0x120] sm:$0xff]   ;;  %v24717_v22 = vld [vmem:[%s28739_s8 + $0x128] sm:$0xff]  }
0x1896   :  { %v6390_v36 = vpack.c.bf16 %v6378_v33, %v6375_v24  ;;  %v6861_v37 = vpack.c.bf16 %v26567_v35, %v26561_v25  ;;  %v24718_v24 = vld [vmem:[%s28739_s8 + $0x130] sm:$0xff]   ;;  %v24719_v25 = vld [vmem:[%s28739_s8 + $0x138] sm:$0xff]   ;;  %v24720_v33 = vld [vmem:[%s28739_s8 + $0x140] sm:$0xff]  }
0x1898   :  { %22398 = vmatprep.mubr.bf16.mxu1 %v6390_v36 }
0x1899   :  { %22399 = vmatmul.mubr.bf16.vlgmr.msra.gmra.mrb[152].mxu1 %v6391_v30 }
0x189a   :  { %22403 = vmatpush3.bf16.msra.mxu1 %v24688_v9  ;;  %22418 = vmatprep.mubr.bf16.mxu1 %v6302_v19  ;;  %v26572_v39 = vpop.f32.mrb[148].mxu0  ;;  %v24708_v9 = vld [vmem:[%s28739_s8 + $0xe0] sm:$0xff]   ;;  %v24714_v19 = vld [vmem:[%s28739_s8 + $0x110] sm:$0xff]  }
0x189b   :  { %22404 = vmatprep.subr.bf16.mxu1 %v24689_v38  ;;  %v26575_v42 = vpop.f32.mrb[149].mxu0 }
0x189c   :  { %v26577_v43 = vpop.f32.mrb[150].mxu0 }
0x189d   :  { %v7051_v44 = vpack.c.bf16 %v26577_v43, %v26572_v39  ;;  %v26581_v45 = vpop.f32.mrb[151].mxu0  ;;  %v24724_v39 = vld [vmem:[%s28739_s8 + $0x160] sm:$0xff]   ;;  %v24725_v43 = vld [vmem:[%s28739_s8 + $0x168] sm:$0xff]  }
0x189e   :  { %22405 = vmatpush3.bf16.msra.mxu1 %v24689_v38  ;;  %v7050_v46 = vpack.c.bf16 %v26581_v45, %v26575_v42  ;;  %v24754_v38 = vld [vmem:[%s28738_s3 + $0x100] sm:$0xff]   ;;  %v24722_v42 = vld [vmem:[%s28739_s8 + $0x150] sm:$0xff]   ;;  %v24723_v45 = vld [vmem:[%s28739_s8 + $0x158] sm:$0xff]  }
0x189f   :  { %22406 = vmatprep.subr.bf16.mxu1 %v24690_v41  ;;  %22788 = vmatprep.mubr.msk.bf16.mxu0 %vm5147_vm8, %v24754_v38  ;;  %v24758_v38 = vld [vmem:[%s28739_s8 + $0x260] sm:$0xff]  }
0x18a2   :  { %22407 = vmatpush3.bf16.msra.mxu1 %v24690_v41  ;;  %v26590_v53 = vpop.f32.mrb[152].mxu0  ;;  %v24755_v41 = vld [vmem:[%s28738_s3 + $0x108] sm:$0xff]  }
0x18a3   :  { %22408 = vmatprep.subr.bf16.mxu1 %v24691_v47  ;;  %v26592_v54 = vpop.f32.mrb[153].mxu0  ;;  %22789 = vmatmul.mubr.msk.bf16.vlgmr.msra.gmra.mrb[196].mxu0 %vm5147_vm8, %v24755_v41 }
0x18a4   :  { %v26594_v56 = vpop.f32.mrb[154].mxu0 }
0x18a5   :  { %v7240_v58 = vpack.c.bf16 %v26594_v56, %v26590_v53  ;;  %v26599_v61 = vpop.f32.mrb[155].mxu0  ;;  %v24733_v53 = vld [vmem:[%s28739_s8 + $0x1a8] sm:$0xff]   ;;  %v24734_v56 = vld [vmem:[%s28739_s8 + $0x1b0] sm:$0xff]  }
0x18a6   :  { %22409 = vmatpush3.bf16.msra.mxu1 %v24691_v47  ;;  %v7239_v1 = vpack.c.bf16 %v26599_v61, %v26592_v54  ;;  %v24729_v61 = vld [vmem:[%s28739_s8 + $0x188] sm:$0xff]  }
0x18a7   :  { %22410 = vmatprep.subr.bf16.mxu1 %v24692_v48 }
0x18aa   :  { %22411 = vmatpush3.bf16.msra.mxu1 %v24692_v48  ;;  %v26610_v62 = vpop.f32.mrb[156].mxu0 }
0x18ab   :  { %22412 = vmatprep.subr.bf16.mxu1 %v24693_v49  ;;  %v26612_v63 = vpop.f32.mrb[157].mxu0 }
0x18ac   :  { %v26614_v0 = vpop.f32.mrb[158].mxu0 }
0x18ad   :  { %v7429_v2 = vpack.c.bf16 %v26614_v0, %v26610_v62  ;;  %v26619_v3 = vpop.f32.mrb[159].mxu0  ;;  %v24741_v62 = vld [vmem:[%s28739_s8 + $0x1e8] sm:$0xff]   ;;  %v24742_v0 = vld [vmem:[%s28739_s8 + $0x1f0] sm:$0xff]  }
0x18ae   :  { %22413 = vmatpush3.bf16.msra.mxu1 %v24693_v49  ;;  %v7428_v4 = vpack.c.bf16 %v26619_v3, %v26612_v63  ;;  %v24737_v3 = vld [vmem:[%s28739_s8 + $0x1c8] sm:$0xff]  }
0x18af   :  { %22414 = vmatprep.subr.bf16.mxu1 %v24694_v50 }
0x18b2   :  { %22415 = vmatpush3.bf16.msra.mxu1 %v24694_v50  ;;  %v26636_v11 = vpop.f32.mrb[160].mxu0  ;;  %v24728_v50 = vld [vmem:[%s28739_s8 + $0x180] sm:$0xff]  }
0x18b3   :  { %22416 = vmatprep.subr.bf16.mxu1 %v24695_v52  ;;  %v26638_v12 = vpop.f32.mrb[161].mxu0 }
0x18b4   :  { %v26640_v13 = vpop.f32.mrb[162].mxu0 }
0x18b5   :  { %v26645_v16 = vpop.f32.mrb[163].mxu0 }
0x18b6   :  { %22417 = vmatpush3.bf16.msra.mxu1 %v24695_v52 }
0x18b7   :  { %22428 = vmatprep.subr.bf16.mxu1 %v24696_v57 }
0x18b9   :  { %22419 = vmatmul.mubr.bf16.vlgmr.msra.gmra.mrb[152].mxu1 %v6303_v15  ;;  %v7618_v15 = vpack.c.bf16 %v26640_v13, %v26636_v11  ;;  %v24749_v11 = vld [vmem:[%s28739_s8 + $0x228] sm:$0xff]   ;;  %v24750_v13 = vld [vmem:[%s28739_s8 + $0x230] sm:$0xff]  }
0x18ba   :  { %22429 = vmatpush3.bf16.msra.mxu1 %v24696_v57  ;;  %22444 = vmatprep.mubr.bf16.mxu1 %v6672_v20  ;;  %v24715_v20 = vld [vmem:[%s28739_s8 + $0x118] sm:$0xff]   ;;  %v26662_v27 = vpop.f32.mrb[164].mxu0 }
0x18bb   :  { %22430 = vmatprep.subr.bf16.mxu1 %v24697_v23  ;;  %v26664_v29 = vpop.f32.mrb[165].mxu0 }
0x18bc   :  { %v26666_v30 = vpop.f32.mrb[166].mxu0 }
0x18bd   :  { %v26671_v35 = vpop.f32.mrb[167].mxu0 }
0x18be   :  { %22431 = vmatpush3.bf16.msra.mxu1 %v24697_v23  ;;  %v7806_v36 = vpack.c.bf16 %v26671_v35, %v26664_v29  ;;  %v24731_v23 = vld [vmem:[%s28739_s8 + $0x198] sm:$0xff]   ;;  %v24753_v35 = vld [vmem:[%s28739_s8 + $0x248] sm:$0xff]  }
0x18bf   :  { %22432 = vmatprep.subr.bf16.mxu1 %v24698_v28 }
0x18c2   :  { %22433 = vmatpush3.bf16.msra.mxu1 %v24698_v28  ;;  %v26692_v47 = vpop.f32.mrb[168].mxu0  ;;  %v24732_v28 = vld [vmem:[%s28739_s8 + $0x1a0] sm:$0xff]  }
0x18c3   :  { %22434 = vmatprep.subr.bf16.mxu1 %v24699_v55  ;;  %v26694_v48 = vpop.f32.mrb[169].mxu0 }
0x18c4   :  { %v26696_v49 = vpop.f32.mrb[170].mxu0 }
0x18c5   :  { %v7996_v52 = vpack.c.bf16 %v26696_v49, %v26692_v47  ;;  %v26701_v54 = vpop.f32.mrb[171].mxu0  ;;  %v24767_v47 = vld [vmem:[%s28739_s8 + $0x2a8] sm:$0xff]   ;;  %v24768_v49 = vld [vmem:[%s28739_s8 + $0x2b0] sm:$0xff]  }
0x18c6   :  { %22435 = vmatpush3.bf16.msra.mxu1 %v24699_v55  ;;  %v7995_v57 = vpack.c.bf16 %v26701_v54, %v26694_v48  ;;  %v24763_v48 = vld [vmem:[%s28739_s8 + $0x288] sm:$0xff]   ;;  %v24765_v54 = vld [vmem:[%s28739_s8 + $0x298] sm:$0xff]  }
0x18c7   :  { %22436 = vmatprep.subr.bf16.mxu1 %v24700_v59 }
0x18ca   :  { %22437 = vmatpush3.bf16.msra.mxu1 %v24700_v59  ;;  %v26718_v55 = vpop.f32.mrb[172].mxu0 }
0x18cb   :  { %22438 = vmatprep.subr.bf16.mxu1 %v24701_v51  ;;  %v26720_v59 = vpop.f32.mrb[173].mxu0 }
0x18ce   :  { %22439 = vmatpush3.bf16.msra.mxu1 %v24701_v51  ;;  %v26722_v51 = vpop.f32.mrb[174].mxu0 }
0x18cf   :  { %22440 = vmatprep.subr.bf16.mxu1 %v24702_v60  ;;  %v26727_v63 = vpop.f32.mrb[175].mxu0 }
0x18d2   :  { %22441 = vmatpush3.bf16.msra.mxu1 %v24702_v60  ;;  %v24736_v60 = vld [vmem:[%s28739_s8 + $0x1c0] sm:$0xff]  }
0x18d3   :  { %22442 = vmatprep.subr.bf16.mxu1 %v24703_v6 }
0x18d6   :  { %22443 = vmatpush3.bf16.msra.mxu1 %v24703_v6  ;;  %v8185_v6 = vpack.c.bf16 %v26722_v51, %v26718_v55  ;;  %v24773_v55 = vld [vmem:[%s28739_s8 + $0x2d8] sm:$0xff]   ;;  %v24810_v51 = vld [vmem:[%s28740_s14 + $0x20] sm:$0xff]  }
0x18d7   :  { %22454 = vmatprep.subr.bf16.mxu1 %v24704_v5 }
0x18d9   :  { %22445 = vmatmul.mubr.bf16.vlgmr.msra.gmra.mrb[152].mxu1 %v6673_v17  ;;  %v7617_v17 = vpack.c.bf16 %v26645_v16, %v26638_v12  ;;  %v24745_v16 = vld [vmem:[%s28739_s8 + $0x208] sm:$0xff]  }
0x18da   :  { %22455 = vmatpush3.bf16.msra.mxu1 %v24704_v5  ;;  %22470 = vmatprep.mubr.bf16.mxu1 %v6861_v37  ;;  %v24721_v37 = vld [vmem:[%s28739_s8 + $0x148] sm:$0xff]   ;;  %v8184_v5 = vpack.c.bf16 %v26727_v63, %v26720_v59 }
0x18db   :  { %22456 = vmatprep.subr.bf16.mxu1 %v24705_v40  ;;  %v24771_v63 = vld [vmem:[%s28739_s8 + $0x2c8] sm:$0xff]  }
0x18de   :  { %22457 = vmatpush3.bf16.msra.mxu1 %v24705_v40  ;;  %v24739_v40 = vld [vmem:[%s28739_s8 + $0x1d8] sm:$0xff]  }
0x18df   :  { %22458 = vmatprep.subr.bf16.mxu1 %v24706_v7 }
0x18e2   :  { %22459 = vmatpush3.bf16.msra.mxu1 %v24706_v7  ;;  %v24740_v7 = vld [vmem:[%s28739_s8 + $0x1e0] sm:$0xff]  }
0x18e3   :  { %22460 = vmatprep.subr.bf16.mxu1 %v24707_v8 }
0x18e6   :  { %22461 = vmatpush3.bf16.msra.mxu1 %v24707_v8  ;;  %v26744_v8 = vpop.f32.mrb[176].mxu0 }
0x18e7   :  { %22462 = vmatprep.subr.bf16.mxu1 %v24708_v9 }
0x18ea   :  { %22463 = vmatpush3.bf16.msra.mxu1 %v24708_v9  ;;  %v26746_v9 = vpop.f32.mrb[177].mxu0 }
0x18eb   :  { %22464 = vmatprep.subr.bf16.mxu1 %v24709_v10 }
0x18ee   :  { %22465 = vmatpush3.bf16.msra.mxu1 %v24709_v10  ;;  %v26748_v10 = vpop.f32.mrb[178].mxu0 }
0x18ef   :  { %22466 = vmatprep.subr.bf16.mxu1 %v24710_v32  ;;  %v26753_v12 = vpop.f32.mrb[179].mxu0 }
0x18f2   :  { %22467 = vmatpush3.bf16.msra.mxu1 %v24710_v32  ;;  %v24744_v32 = vld [vmem:[%s28739_s8 + $0x200] sm:$0xff]  }
0x18f3   :  { %22468 = vmatprep.subr.bf16.mxu1 %v24711_v31 }
0x18f6   :  { %22469 = vmatpush3.bf16.msra.mxu1 %v24711_v31  ;;  %v8374_v31 = vpack.c.bf16 %v26748_v10, %v26744_v8  ;;  %v24783_v8 = vld [vmem:[%s28739_s8 + $0x328] sm:$0xff]   ;;  %v24784_v10 = vld [vmem:[%s28739_s8 + $0x330] sm:$0xff]  }
0x18f7   :  { %22480 = vmatprep.subr.bf16.mxu1 %v24712_v14 }
0x18f9   :  { %22471 = vmatmul.mubr.bf16.vlgmr.msra.gmra.mrb[152].mxu1 %v6862_v34  ;;  %v7807_v34 = vpack.c.bf16 %v26666_v30, %v26662_v27  ;;  %v24759_v27 = vld [vmem:[%s28739_s8 + $0x268] sm:$0xff]   ;;  %v24760_v30 = vld [vmem:[%s28739_s8 + $0x270] sm:$0xff]  }
0x18fa   :  { %22481 = vmatpush3.bf16.msra.mxu1 %v24712_v14  ;;  %22496 = vmatprep.mubr.bf16.mxu1 %v7050_v46  ;;  %v24727_v46 = vld [vmem:[%s28739_s8 + $0x178] sm:$0xff]   ;;  %v8373_v14 = vpack.c.bf16 %v26753_v12, %v26746_v9  ;;  %v24776_v9 = vld [vmem:[%s28739_s8 + $0x2f0] sm:$0xff]  }
0x18fb   :  { %22482 = vmatprep.subr.bf16.mxu1 %v24713_v18 }
0x18fe   :  { %22483 = vmatpush3.bf16.msra.mxu1 %v24713_v18  ;;  %v24747_v18 = vld [vmem:[%s28739_s8 + $0x218] sm:$0xff]  }
0x18ff   :  { %22484 = vmatprep.subr.bf16.mxu1 %v24714_v19 }
0x1902   :  { %22485 = vmatpush3.bf16.msra.mxu1 %v24714_v19  ;;  %v24748_v19 = vld [vmem:[%s28739_s8 + $0x220] sm:$0xff]  }
0x1903   :  { %22486 = vmatprep.subr.bf16.mxu1 %v24715_v20 }
0x1906   :  { %22487 = vmatpush3.bf16.msra.mxu1 %v24715_v20  ;;  %v26770_v20 = vpop.f32.mrb[180].mxu0 }
0x1907   :  { %22488 = vmatprep.subr.bf16.mxu1 %v24716_v21 }
0x190a   :  { %22489 = vmatpush3.bf16.msra.mxu1 %v24716_v21  ;;  %v26772_v21 = vpop.f32.mrb[181].mxu0 }
0x190b   :  { %22490 = vmatprep.subr.bf16.mxu1 %v24717_v22 }
0x190e   :  { %22491 = vmatpush3.bf16.msra.mxu1 %v24717_v22  ;;  %v26774_v22 = vpop.f32.mrb[182].mxu0 }
0x190f   :  { %22492 = vmatprep.subr.bf16.mxu1 %v24718_v24  ;;  %v26779_v29 = vpop.f32.mrb[183].mxu0 }
0x1910   :  { %v26796_v41 = vpop.f32.mrb[184].mxu0 }
0x1912   :  { %22493 = vmatpush3.bf16.msra.mxu1 %v24718_v24  ;;  %v24752_v24 = vld [vmem:[%s28739_s8 + $0x240] sm:$0xff]  }
0x1913   :  { %22494 = vmatprep.subr.bf16.mxu1 %v24719_v25 }
0x1916   :  { %22495 = vmatpush3.bf16.msra.mxu1 %v24719_v25  ;;  %v8563_v25 = vpack.c.bf16 %v26774_v22, %v26770_v20  ;;  %v24791_v20 = vld [vmem:[%s28739_s8 + $0x368] sm:$0xff]   ;;  %v24792_v22 = vld [vmem:[%s28739_s8 + $0x370] sm:$0xff]  }
0x1917   :  { %22506 = vmatprep.subr.bf16.mxu1 %v24720_v33 }
0x1919   :  { %22497 = vmatmul.mubr.bf16.vlgmr.msra.gmra.mrb[152].mxu1 %v7051_v44  ;;  %v24726_v44 = vld [vmem:[%s28739_s8 + $0x170] sm:$0xff]  }
0x191a   :  { %22507 = vmatpush3.bf16.msra.mxu1 %v24720_v33  ;;  %22522 = vmatprep.mubr.bf16.mxu1 %v7239_v1  ;;  %v24730_v1 = vld [vmem:[%s28739_s8 + $0x190] sm:$0xff]   ;;  %v8562_v33 = vpack.c.bf16 %v26779_v29, %v26772_v21  ;;  %v24786_v21 = vld [vmem:[%s28739_s8 + $0x340] sm:$0xff]   ;;  %v24787_v29 = vld [vmem:[%s28739_s8 + $0x348] sm:$0xff]  }
0x191b   :  { %22508 = vmatprep.subr.bf16.mxu1 %v24721_v37 }
0x191e   :  { %22509 = vmatpush3.bf16.msra.mxu1 %v24721_v37  ;;  %v24757_v37 = vld [vmem:[%s28739_s8 + $0x258] sm:$0xff]  }
0x191f   :  { %22510 = vmatprep.subr.bf16.mxu1 %v24722_v42 }
0x1922   :  { %22511 = vmatpush3.bf16.msra.mxu1 %v24722_v42  ;;  %v26798_v42 = vpop.f32.mrb[185].mxu0 }
0x1923   :  { %22512 = vmatprep.subr.bf16.mxu1 %v24723_v45 }
0x1926   :  { %22513 = vmatpush3.bf16.msra.mxu1 %v24723_v45  ;;  %v26800_v45 = vpop.f32.mrb[186].mxu0 }
0x1927   :  { %22514 = vmatprep.subr.bf16.mxu1 %v24724_v39 }
0x192a   :  { %22515 = vmatpush3.bf16.msra.mxu1 %v24724_v39  ;;  %v24762_v39 = vld [vmem:[%s28739_s8 + $0x280] sm:$0xff]  }
0x192b   :  { %22516 = vmatprep.subr.bf16.mxu1 %v24725_v43 }
0x192e   :  { %22517 = vmatpush3.bf16.msra.mxu1 %v24725_v43  ;;  %v8752_v43 = vpack.c.bf16 %v26800_v45, %v26796_v41  ;;  %v24799_v41 = vld [vmem:[%s28739_s8 + $0x3a8] sm:$0xff]   ;;  %v24800_v45 = vld [vmem:[%s28739_s8 + $0x3b0] sm:$0xff]  }
0x192f   :  { %22518 = vmatprep.subr.bf16.mxu1 %v24726_v44 }
0x1932   :  { %22519 = vmatpush3.bf16.msra.mxu1 %v24726_v44  ;;  %v26805_v44 = vpop.f32.mrb[187].mxu0 }
0x1933   :  { %22520 = vmatprep.subr.bf16.mxu1 %v24727_v46 }
0x1936   :  { %22521 = vmatpush3.bf16.msra.mxu1 %v24727_v46  ;;  %v8751_v46 = vpack.c.bf16 %v26805_v44, %v26798_v42  ;;  %v24794_v42 = vld [vmem:[%s28739_s8 + $0x380] sm:$0xff]   ;;  %v24795_v44 = vld [vmem:[%s28739_s8 + $0x388] sm:$0xff]  }
0x1937   :  { %22532 = vmatprep.subr.bf16.mxu1 %v24728_v50 }
0x1939   :  { %22523 = vmatmul.mubr.bf16.vlgmr.msra.gmra.mrb[152].mxu1 %v7240_v58  ;;  %v24735_v58 = vld [vmem:[%s28739_s8 + $0x1b8] sm:$0xff]  }
0x193a   :  { %22533 = vmatpush3.bf16.msra.mxu1 %v24728_v50  ;;  %22548 = vmatprep.mubr.bf16.mxu1 %v7428_v4  ;;  %v24738_v4 = vld [vmem:[%s28739_s8 + $0x1d0] sm:$0xff]  }
0x193b   :  { %22534 = vmatprep.subr.bf16.mxu1 %v24729_v61  ;;  %v24764_v50 = vld [vmem:[%s28739_s8 + $0x290] sm:$0xff]  }
0x193e   :  { %22535 = vmatpush3.bf16.msra.mxu1 %v24729_v61  ;;  %v26822_v61 = vpop.f32.mrb[188].mxu0 }
0x193f   :  { %22536 = vmatprep.subr.bf16.mxu1 %v24730_v1 }
0x1942   :  { %22537 = vmatpush3.bf16.msra.mxu1 %v24730_v1  ;;  %v26824_v1 = vpop.f32.mrb[189].mxu0 }
0x1943   :  { %22538 = vmatprep.subr.bf16.mxu1 %v24731_v23 }
0x1946   :  { %22539 = vmatpush3.bf16.msra.mxu1 %v24731_v23  ;;  %v26826_v23 = vpop.f32.mrb[190].mxu0 }
0x1947   :  { %22540 = vmatprep.subr.bf16.mxu1 %v24732_v28 }
0x194a   :  { %22541 = vmatpush3.bf16.msra.mxu1 %v24732_v28  ;;  %v24802_v28 = vld [vmem:[%s28740_s14] sm:$0xff]  }
0x194b   :  { %22542 = vmatprep.subr.bf16.mxu1 %v24733_v53  ;;  %22792 = vmatprep.subr.bf16.mxu0 %v24802_v28 }
0x194c   :  { %22793 = vmatpush3.bf16.msra.mxu0 %v24802_v28 }
0x194e   :  { %22543 = vmatpush3.bf16.msra.mxu1 %v24733_v53  ;;  %v24770_v53 = vld [vmem:[%s28739_s8 + $0x2c0] sm:$0xff]  }
0x194f   :  { %22544 = vmatprep.subr.bf16.mxu1 %v24734_v56 }
0x1952   :  { %22545 = vmatpush3.bf16.msra.mxu1 %v24734_v56  ;;  %v8941_v56 = vpack.c.bf16 %v26826_v23, %v26822_v61  ;;  %v24813_v61 = vld [vmem:[%s28739_s8 + $0x3e8] sm:$0xff]   ;;  %v24817_v23 = vld [vmem:[%s28739_s8 + $0x3f8] sm:$0xff]  }
0x1953   :  { %22546 = vmatprep.subr.bf16.mxu1 %v24735_v58 }
0x1956   :  { %22547 = vmatpush3.bf16.msra.mxu1 %v24735_v58  ;;  %v26832_v58 = vpop.f32.mrb[191].mxu0 }
0x1957   :  { %22558 = vmatprep.subr.bf16.mxu1 %v24736_v60  ;;  %v8940_v59 = vpack.c.bf16 %v26832_v58, %v26824_v1  ;;  %v24815_v1 = vld [vmem:[%s28739_s8 + $0x3f0] sm:$0xff]  }
0x1959   :  { %22549 = vmatmul.mubr.bf16.vlgmr.msra.gmra.mrb[152].mxu1 %v7429_v2  ;;  %v24743_v2 = vld [vmem:[%s28739_s8 + $0x1f8] sm:$0xff]  }
0x195a   :  { %22559 = vmatpush3.bf16.msra.mxu1 %v24736_v60  ;;  %22574 = vmatprep.mubr.bf16.mxu1 %v7617_v17  ;;  %v24746_v17 = vld [vmem:[%s28739_s8 + $0x210] sm:$0xff]   ;;  %v24804_v60 = vld [vmem:[%s28740_s14 + $0x8] sm:$0xff]  }
0x195b   :  { %22560 = vmatprep.subr.bf16.mxu1 %v24737_v3  ;;  %22794 = vmatprep.subr.bf16.mxu0 %v24804_v60 }
0x195c   :  { %22795 = vmatpush3.bf16.msra.mxu0 %v24804_v60  ;;  %v24819_v60 = vld [vmem:[%s28741_s19 + $0x180] sm:$0xff]  }
0x195e   :  { %22561 = vmatpush3.bf16.msra.mxu1 %v24737_v3  ;;  %v24772_v3 = vld [vmem:[%s28739_s8 + $0x2d0] sm:$0xff]  }
0x195f   :  { %22562 = vmatprep.subr.bf16.mxu1 %v24738_v4 }
0x1962   :  { %22563 = vmatpush3.bf16.msra.mxu1 %v24738_v4  ;;  %v24808_v4 = vld [vmem:[%s28740_s14 + $0x18] sm:$0xff]  }
0x1963   :  { %22564 = vmatprep.subr.bf16.mxu1 %v24739_v40 }
0x1966   :  { %22565 = vmatpush3.bf16.msra.mxu1 %v24739_v40  ;;  %v24812_v40 = vld [vmem:[%s28740_s14 + $0x28] sm:$0xff]  }
0x1967   :  { %22566 = vmatprep.subr.bf16.mxu1 %v24740_v7 }
0x196a   :  { %22567 = vmatpush3.bf16.msra.mxu1 %v24740_v7  ;;  %v24775_v7 = vld [vmem:[%s28739_s8 + $0x2e8] sm:$0xff]  }
0x196b   :  { %22568 = vmatprep.subr.bf16.mxu1 %v24741_v62 }
0x196e   :  { %22569 = vmatpush3.bf16.msra.mxu1 %v24741_v62  ;;  %v26852_v62 = vpop.f32.mrb[192].mxu0 }
0x196f   :  { %22570 = vmatprep.subr.bf16.mxu1 %v24742_v0 }
0x1972   :  { %22571 = vmatpush3.bf16.msra.mxu1 %v24742_v0  ;;  %v26854_v0 = vpop.f32.mrb[193].mxu0 }
0x1973   :  { %22572 = vmatprep.subr.bf16.mxu1 %v24743_v2 }
0x1976   :  { %22573 = vmatpush3.bf16.msra.mxu1 %v24743_v2  ;;  %v24814_v2 = vld [vmem:[%s28740_s14 + $0x30] sm:$0xff]  }
0x1977   :  { %22584 = vmatprep.subr.bf16.mxu1 %v24744_v32 }
0x1979   :  { %22575 = vmatmul.mubr.bf16.vlgmr.msra.gmra.mrb[152].mxu1 %v7618_v15  ;;  %v24751_v15 = vld [vmem:[%s28739_s8 + $0x238] sm:$0xff]  }
0x197a   :  { %22585 = vmatpush3.bf16.msra.mxu1 %v24744_v32  ;;  %22600 = vmatprep.mubr.bf16.mxu1 %v7806_v36  ;;  %v24756_v36 = vld [vmem:[%s28739_s8 + $0x250] sm:$0xff]   ;;  %v26858_v32 = vpop.f32.mrb[194].mxu0 }
0x197b   :  { %22586 = vmatprep.subr.bf16.mxu1 %v24745_v16  ;;  %v26860_v12 = vpop.f32.mrb[195].mxu0 }
0x197e   :  { %22587 = vmatpush3.bf16.msra.mxu1 %v24745_v16  ;;  %v9129_v16 = vpack.c.bf16 %v26860_v12, %v26854_v0 }
0x197f   :  { %22588 = vmatprep.subr.bf16.mxu1 %v24746_v17 }
0x1982   :  { %22589 = vmatpush3.bf16.msra.mxu1 %v24746_v17  ;;  %v22790_v17 = vpop.f32.mrb[196].mxu0 }
0x1983   :  { %22590 = vmatprep.subr.bf16.mxu1 %v24747_v18 }
0x1986   :  { %22591 = vmatpush3.bf16.msra.mxu1 %v24747_v18  ;;  %v24816_v18 = vld [vmem:[%s28740_s14 + $0x38] sm:$0xff]  }
0x1987   :  { %22592 = vmatprep.subr.bf16.mxu1 %v24748_v19 }
0x198a   :  { %22593 = vmatpush3.bf16.msra.mxu1 %v24748_v19  ;;  %v24777_v19 = vld [vmem:[%s28739_s8 + $0x2f8] sm:$0xff]  }
0x198b   :  { %22594 = vmatprep.subr.bf16.mxu1 %v24749_v11 }
0x198e   :  { %22595 = vmatpush3.bf16.msra.mxu1 %v24749_v11  ;;  %v9314_v11 = vpop.f32.mrb[197].mxu0 }
0x198f   :  { %22596 = vmatprep.subr.bf16.mxu1 %v24750_v13 }
0x1992   :  { %22597 = vmatpush3.bf16.msra.mxu1 %v24750_v13  ;;  %v22791_v13 = vpop.f32.mrb[198].mxu0 }
0x1993   :  { %22598 = vmatprep.subr.bf16.mxu1 %v24751_v15 }
0x1996   :  { %22599 = vmatpush3.bf16.msra.mxu1 %v24751_v15  ;;  %v9317_v15 = vpop.f32.mrb[199].mxu0 }
0x1997   :  { %22610 = vmatprep.subr.bf16.mxu1 %v24752_v24 }
0x1999   :  { %22601 = vmatmul.mubr.bf16.vlgmr.msra.gmra.mrb[152].mxu1 %v7807_v34  ;;  %v24761_v34 = vld [vmem:[%s28739_s8 + $0x278] sm:$0xff]  }
0x199a   :  { %22611 = vmatpush3.bf16.msra.mxu1 %v24752_v24  ;;  %22626 = vmatprep.mubr.bf16.mxu1 %v7995_v57  ;;  %v24766_v57 = vld [vmem:[%s28739_s8 + $0x2a0] sm:$0xff]   ;;  %v9330_v24 = vpack.c.bf16 %v22791_v13, %v22790_v17 }
0x199b   :  { %22612 = vmatprep.subr.bf16.mxu1 %v24753_v35 }
0x199e   :  { %22613 = vmatpush3.bf16.msra.mxu1 %v24753_v35  ;;  %v9329_v35 = vpack.c.bf16 %v9317_v15, %v9314_v11 }
0x199f   :  { %22614 = vmatprep.subr.bf16.mxu1 %v24756_v36 }
0x19a0   :  { %22808 = vmatprep.mubr.bf16.mxu0 %v9329_v35  ;;  %v24820_v35 = vld [vmem:[%s28741_s19 + $0x8] sm:$0xff]  }
0x19a2   :  { %22615 = vmatpush3.bf16.msra.mxu1 %v24756_v36  ;;  %v24778_v36 = vld [vmem:[%s28739_s8 + $0x300] sm:$0xff]  }
0x19a3   :  { %22616 = vmatprep.subr.bf16.mxu1 %v24757_v37 }
0x19a6   :  { %22617 = vmatpush3.bf16.msra.mxu1 %v24757_v37  ;;  %v24779_v37 = vld [vmem:[%s28739_s8 + $0x308] sm:$0xff]  }
0x19a7   :  { %22618 = vmatprep.subr.bf16.mxu1 %v24758_v38 }
0x19aa   :  { %22619 = vmatpush3.bf16.msra.mxu1 %v24758_v38  ;;  %v24780_v38 = vld [vmem:[%s28739_s8 + $0x310] sm:$0xff]  }
0x19ab   :  { %22620 = vmatprep.subr.bf16.mxu1 %v24759_v27 }
0x19ae   :  { %22621 = vmatpush3.bf16.msra.mxu1 %v24759_v27  ;;  %v24781_v27 = vld [vmem:[%s28739_s8 + $0x318] sm:$0xff]  }
0x19af   :  { %22622 = vmatprep.subr.bf16.mxu1 %v24760_v30 }
0x19b2   :  { %22623 = vmatpush3.bf16.msra.mxu1 %v24760_v30  ;;  %v24782_v30 = vld [vmem:[%s28739_s8 + $0x320] sm:$0xff]  }
0x19b3   :  { %22624 = vmatprep.subr.bf16.mxu1 %v24761_v34 }
0x19b6   :  { %22625 = vmatpush3.bf16.msra.mxu1 %v24761_v34  ;;  %v24789_v34 = vld [vmem:[%s28739_s8 + $0x358] sm:$0xff]  }
0x19b7   :  { %22636 = vmatprep.subr.bf16.mxu1 %v24762_v39 }
0x19b9   :  { %22627 = vmatmul.mubr.bf16.vlgmr.msra.gmra.mrb[152].mxu1 %v7996_v52  ;;  %v24769_v52 = vld [vmem:[%s28739_s8 + $0x2b8] sm:$0xff]  }
0x19ba   :  { %22637 = vmatpush3.bf16.msra.mxu1 %v24762_v39  ;;  %22652 = vmatprep.mubr.bf16.mxu1 %v8184_v5  ;;  %v24806_v5 = vld [vmem:[%s28740_s14 + $0x10] sm:$0xff]   ;;  %v24790_v39 = vld [vmem:[%s28739_s8 + $0x360] sm:$0xff]  }
0x19bb   :  { %22638 = vmatprep.subr.bf16.mxu1 %v24763_v48  ;;  %22796 = vmatprep.subr.bf16.mxu0 %v24806_v5 }
0x19bc   :  { %22797 = vmatpush3.bf16.msra.mxu0 %v24806_v5  ;;  %v18947_v5 = vld [vmem:[%s28743_s30] ss:$0 sm:$0xff] }
0x19bd   :  { %22798 = vmatprep.subr.bf16.mxu0 %v24808_v4 }
0x19be   :  { %22639 = vmatpush3.bf16.msra.mxu1 %v24763_v48  ;;  %v24797_v48 = vld [vmem:[%s28739_s8 + $0x398] sm:$0xff]  }
0x19bf   :  { %22640 = vmatprep.subr.bf16.mxu1 %v24764_v50 }
0x19c0   :  { %22799 = vmatpush3.bf16.msra.mxu0 %v24808_v4 }
0x19c1   :  { %22800 = vmatprep.subr.bf16.mxu0 %v24810_v51 }
0x19c2   :  { %22641 = vmatpush3.bf16.msra.mxu1 %v24764_v50  ;;  %v24798_v50 = vld [vmem:[%s28739_s8 + $0x3a0] sm:$0xff]  }
0x19c3   :  { %22642 = vmatprep.subr.bf16.mxu1 %v24765_v54 }
0x19c4   :  { %22801 = vmatpush3.bf16.msra.mxu0 %v24810_v51 }
0x19c5   :  { %22802 = vmatprep.subr.bf16.mxu0 %v24812_v40 }
0x19c6   :  { %22643 = vmatpush3.bf16.msra.mxu1 %v24765_v54  ;;  %v24803_v54 = vld [vmem:[%s28739_s8 + $0x3c0] sm:$0xff]  }
0x19c7   :  { %22644 = vmatprep.subr.bf16.mxu1 %v24766_v57 }
0x19c8   :  { %22803 = vmatpush3.bf16.msra.mxu0 %v24812_v40 }
0x19c9   :  { %22804 = vmatprep.subr.bf16.mxu0 %v24814_v2 }
0x19ca   :  { %22645 = vmatpush3.bf16.msra.mxu1 %v24766_v57  ;;  %v24805_v57 = vld [vmem:[%s28739_s8 + $0x3c8] sm:$0xff]  }
0x19cb   :  { %22646 = vmatprep.subr.bf16.mxu1 %v24767_v47 }
0x19cc   :  { %22805 = vmatpush3.bf16.msra.mxu0 %v24814_v2 }
0x19cd   :  { %22806 = vmatprep.subr.bf16.mxu0 %v24816_v18 }
0x19ce   :  { %22647 = vmatpush3.bf16.msra.mxu1 %v24767_v47  ;;  %v24807_v47 = vld [vmem:[%s28739_s8 + $0x3d0] sm:$0xff]  }
0x19cf   :  { %22648 = vmatprep.subr.bf16.mxu1 %v24768_v49 }
0x19d0   :  { %22807 = vmatpush3.bf16.msra.mxu0 %v24816_v18 }
0x19d2   :  { %22649 = vmatpush3.bf16.msra.mxu1 %v24768_v49  ;;  %v24809_v49 = vld [vmem:[%s28739_s8 + $0x3d8] sm:$0xff]  }
0x19d3   :  { %22650 = vmatprep.subr.bf16.mxu1 %v24769_v52  ;;  %22809 = vmatmul.mubr.bf16.vlgmr.msra.gmra.mrb[200].mxu0 %v9330_v24 }
0x19d6   :  { %22651 = vmatpush3.bf16.msra.mxu1 %v24769_v52  ;;  %v24811_v52 = vld [vmem:[%s28739_s8 + $0x3e0] sm:$0xff]  }
0x19d7   :  { %22662 = vmatprep.subr.bf16.mxu1 %v24770_v53 }
0x19d9   :  { %22653 = vmatmul.mubr.bf16.vlgmr.msra.gmra.mrb[152].mxu1 %v8185_v6  ;;  %v24774_v6 = vld [vmem:[%s28739_s8 + $0x2e0] sm:$0xff]  }
0x19da   :  { %22663 = vmatpush3.bf16.msra.mxu1 %v24770_v53  ;;  %22678 = vmatprep.mubr.bf16.mxu1 %v8373_v14  ;;  %v9130_v14 = vpack.c.bf16 %v26858_v32, %v26852_v62 }
0x19db   :  { %22664 = vmatprep.subr.bf16.mxu1 %v24771_v63 }
0x19de   :  { %22665 = vmatpush3.bf16.msra.mxu1 %v24771_v63  ;;  %v18938_v63 = vld [vmem:[%s28742_s24] ss:$0 sm:$0xff] }
0x19df   :  { %22666 = vmatprep.subr.bf16.mxu1 %v24772_v3 }
0x19e2   :  { %22667 = vmatpush3.bf16.msra.mxu1 %v24772_v3 }
0x19e3   :  { %22668 = vmatprep.subr.bf16.mxu1 %v24773_v55 }
0x19e6   :  { %22669 = vmatpush3.bf16.msra.mxu1 %v24773_v55 }
0x19e7   :  { %22670 = vmatprep.subr.bf16.mxu1 %v24774_v6 }
0x19ea   :  { %22671 = vmatpush3.bf16.msra.mxu1 %v24774_v6 }
0x19eb   :  { %22672 = vmatprep.subr.bf16.mxu1 %v24775_v7 }
0x19ee   :  { %22673 = vmatpush3.bf16.msra.mxu1 %v24775_v7 }
0x19ef   :  { %22674 = vmatprep.subr.bf16.mxu1 %v24776_v9 }
0x19f2   :  { %22675 = vmatpush3.bf16.msra.mxu1 %v24776_v9 }
0x19f3   :  { %22676 = vmatprep.subr.bf16.mxu1 %v24777_v19 }
0x19f6   :  { %22677 = vmatpush3.bf16.msra.mxu1 %v24777_v19 }
0x19f7   :  { %22688 = vmatprep.subr.bf16.mxu1 %v24778_v36 }
0x19f9   :  { %22679 = vmatmul.mubr.bf16.vlgmr.msra.gmra.mrb[152].mxu1 %v8374_v31  ;;  %v24785_v31 = vld [vmem:[%s28739_s8 + $0x338] sm:$0xff]  }
0x19fa   :  { %22689 = vmatpush3.bf16.msra.mxu1 %v24778_v36  ;;  %22704 = vmatprep.mubr.bf16.mxu1 %v8562_v33  ;;  %v24788_v33 = vld [vmem:[%s28739_s8 + $0x350] sm:$0xff]   ;;  %v24821_v36 = vld [vmem:[%s28741_s19 + $0x188] sm:$0xff]  }
0x19fb   :  { %22690 = vmatprep.subr.bf16.mxu1 %v24779_v37 }
0x19fe   :  { %22691 = vmatpush3.bf16.msra.mxu1 %v24779_v37  ;;  %v24822_v37 = vld [vmem:[%s28741_s19 + $0x10] sm:$0xff]  }
0x19ff   :  { %22692 = vmatprep.subr.bf16.mxu1 %v24780_v38 }
0x1a02   :  { %22693 = vmatpush3.bf16.msra.mxu1 %v24780_v38  ;;  %v24823_v38 = vld [vmem:[%s28741_s19 + $0x190] sm:$0xff]  }
0x1a03   :  { %22694 = vmatprep.subr.bf16.mxu1 %v24781_v27 }
0x1a06   :  { %22695 = vmatpush3.bf16.msra.mxu1 %v24781_v27  ;;  %v24824_v27 = vld [vmem:[%s28741_s19 + $0x18] sm:$0xff]  }
0x1a07   :  { %22696 = vmatprep.subr.bf16.mxu1 %v24782_v30 }
0x1a0a   :  { %22697 = vmatpush3.bf16.msra.mxu1 %v24782_v30  ;;  %v24825_v30 = vld [vmem:[%s28741_s19 + $0x198] sm:$0xff]  }
0x1a0b   :  { %22698 = vmatprep.subr.bf16.mxu1 %v24783_v8 }
0x1a0e   :  { %22699 = vmatpush3.bf16.msra.mxu1 %v24783_v8  ;;  %v24826_v8 = vld [vmem:[%s28741_s19 + $0x20] sm:$0xff]  }
0x1a0f   :  { %22700 = vmatprep.subr.bf16.mxu1 %v24784_v10 }
0x1a12   :  { %22701 = vmatpush3.bf16.msra.mxu1 %v24784_v10  ;;  %v24827_v10 = vld [vmem:[%s28741_s19 + $0x1a0] sm:$0xff]  }
0x1a13   :  { %22702 = vmatprep.subr.bf16.mxu1 %v24785_v31 }
0x1a16   :  { %22703 = vmatpush3.bf16.msra.mxu1 %v24785_v31  ;;  %v24828_v31 = vld [vmem:[%s28741_s19 + $0x28] sm:$0xff]  }
0x1a17   :  { %22714 = vmatprep.subr.bf16.mxu1 %v24786_v21 }
0x1a19   :  { %22705 = vmatmul.mubr.bf16.vlgmr.msra.gmra.mrb[152].mxu1 %v8563_v25  ;;  %v24793_v25 = vld [vmem:[%s28739_s8 + $0x378] sm:$0xff]  }
0x1a1a   :  { %22715 = vmatpush3.bf16.msra.mxu1 %v24786_v21  ;;  %22730 = vmatprep.mubr.bf16.mxu1 %v8751_v46  ;;  %v24796_v46 = vld [vmem:[%s28739_s8 + $0x390] sm:$0xff]   ;;  %v24829_v21 = vld [vmem:[%s28741_s19 + $0x1a8] sm:$0xff]  }
0x1a1b   :  { %22716 = vmatprep.subr.bf16.mxu1 %v24787_v29 }
0x1a1e   :  { %22717 = vmatpush3.bf16.msra.mxu1 %v24787_v29  ;;  %v24830_v29 = vld [vmem:[%s28741_s19 + $0x30] sm:$0xff]  }
0x1a1f   :  { %22718 = vmatprep.subr.bf16.mxu1 %v24788_v33 }
0x1a22   :  { %22719 = vmatpush3.bf16.msra.mxu1 %v24788_v33  ;;  %v24831_v33 = vld [vmem:[%s28741_s19 + $0x1b0] sm:$0xff]  }
0x1a23   :  { %22720 = vmatprep.subr.bf16.mxu1 %v24789_v34 }
0x1a26   :  { %22721 = vmatpush3.bf16.msra.mxu1 %v24789_v34  ;;  %v24832_v34 = vld [vmem:[%s28741_s19 + $0x38] sm:$0xff]  }
0x1a27   :  { %22722 = vmatprep.subr.bf16.mxu1 %v24790_v39 }
0x1a2a   :  { %22723 = vmatpush3.bf16.msra.mxu1 %v24790_v39  ;;  %v24833_v39 = vld [vmem:[%s28741_s19 + $0x1b8] sm:$0xff]  }
0x1a2b   :  { %22724 = vmatprep.subr.bf16.mxu1 %v24791_v20 }
0x1a2e   :  { %22725 = vmatpush3.bf16.msra.mxu1 %v24791_v20  ;;  %v24834_v20 = vld [vmem:[%s28741_s19 + $0x40] sm:$0xff]  }
0x1a2f   :  { %22726 = vmatprep.subr.bf16.mxu1 %v24792_v22 }
0x1a32   :  { %22727 = vmatpush3.bf16.msra.mxu1 %v24792_v22  ;;  %v24835_v22 = vld [vmem:[%s28741_s19 + $0x1c0] sm:$0xff]  }
0x1a33   :  { %22728 = vmatprep.subr.bf16.mxu1 %v24793_v25 }
0x1a36   :  { %22729 = vmatpush3.bf16.msra.mxu1 %v24793_v25  ;;  %v24836_v25 = vld [vmem:[%s28741_s19 + $0x48] sm:$0xff]  }
0x1a37   :  { %22740 = vmatprep.subr.bf16.mxu1 %v24794_v42 }
0x1a39   :  { %22731 = vmatmul.mubr.bf16.vlgmr.msra.gmra.mrb[152].mxu1 %v8752_v43  ;;  %v24801_v43 = vld [vmem:[%s28739_s8 + $0x3b8] sm:$0xff]  }
0x1a3a   :  { %22741 = vmatpush3.bf16.msra.mxu1 %v24794_v42  ;;  %22756 = vmatprep.mubr.bf16.mxu1 %v8940_v59  ;;  %v24818_v59 = vld [vmem:[%s28741_s19] sm:$0xff]   ;;  %v24837_v42 = vld [vmem:[%s28741_s19 + $0x1c8] sm:$0xff]  }
0x1a3b   :  { %22742 = vmatprep.subr.bf16.mxu1 %v24795_v44  ;;  %22816 = vmatprep.mubr.msk.bf16.mxu0 %vm764_vm4, %v24818_v59  ;;  %v24857_v59 = vld [vmem:[%s28741_s19 + $0x238] sm:$0xff]  }
0x1a3e   :  { %22743 = vmatpush3.bf16.msra.mxu1 %v24795_v44  ;;  %v24838_v44 = vld [vmem:[%s28741_s19 + $0x50] sm:$0xff]  }
0x1a3f   :  { %22744 = vmatprep.subr.bf16.mxu1 %v24796_v46 }
0x1a42   :  { %22745 = vmatpush3.bf16.msra.mxu1 %v24796_v46  ;;  %v24839_v46 = vld [vmem:[%s28741_s19 + $0x1d0] sm:$0xff]  }
0x1a43   :  { %22746 = vmatprep.subr.bf16.mxu1 %v24797_v48 }
0x1a46   :  { %22747 = vmatpush3.bf16.msra.mxu1 %v24797_v48  ;;  %v24840_v48 = vld [vmem:[%s28741_s19 + $0x58] sm:$0xff]  }
0x1a47   :  { %22748 = vmatprep.subr.bf16.mxu1 %v24798_v50 }
0x1a4a   :  { %22749 = vmatpush3.bf16.msra.mxu1 %v24798_v50  ;;  %v24841_v50 = vld [vmem:[%s28741_s19 + $0x1d8] sm:$0xff]  }
0x1a4b   :  { %22750 = vmatprep.subr.bf16.mxu1 %v24799_v41 }
0x1a4e   :  { %22751 = vmatpush3.bf16.msra.mxu1 %v24799_v41  ;;  %v24842_v41 = vld [vmem:[%s28741_s19 + $0x60] sm:$0xff]  }
0x1a4f   :  { %22752 = vmatprep.subr.bf16.mxu1 %v24800_v45 }
0x1a52   :  { %22753 = vmatpush3.bf16.msra.mxu1 %v24800_v45  ;;  %v24843_v45 = vld [vmem:[%s28741_s19 + $0x1e0] sm:$0xff]  }
0x1a53   :  { %22754 = vmatprep.subr.bf16.mxu1 %v24801_v43 }
0x1a56   :  { %22755 = vmatpush3.bf16.msra.mxu1 %v24801_v43  ;;  %v24844_v43 = vld [vmem:[%s28741_s19 + $0x68] sm:$0xff]  }
0x1a57   :  { %22766 = vmatprep.subr.bf16.mxu1 %v24803_v54 }
0x1a59   :  { %22757 = vmatmul.mubr.bf16.vlgmr.msra.gmra.mrb[152].mxu1 %v8941_v56 }
0x1a5a   :  { %22767 = vmatpush3.bf16.msra.mxu1 %v24803_v54  ;;  %22782 = vmatprep.mubr.bf16.mxu1 %v9129_v16  ;;  %v24845_v54 = vld [vmem:[%s28741_s19 + $0x1e8] sm:$0xff]  }
0x1a5b   :  { %22768 = vmatprep.subr.bf16.mxu1 %v24805_v57 }
0x1a5e   :  { %22769 = vmatpush3.bf16.msra.mxu1 %v24805_v57  ;;  %v24846_v57 = vld [vmem:[%s28741_s19 + $0x70] sm:$0xff]  }
0x1a5f   :  { %22770 = vmatprep.subr.bf16.mxu1 %v24807_v47 }
0x1a62   :  { %22771 = vmatpush3.bf16.msra.mxu1 %v24807_v47  ;;  %v24847_v47 = vld [vmem:[%s28741_s19 + $0x1f0] sm:$0xff]  }
0x1a63   :  { %22772 = vmatprep.subr.bf16.mxu1 %v24809_v49 }
0x1a66   :  { %22773 = vmatpush3.bf16.msra.mxu1 %v24809_v49  ;;  %v24848_v49 = vld [vmem:[%s28741_s19 + $0x78] sm:$0xff]  }
0x1a67   :  { %22774 = vmatprep.subr.bf16.mxu1 %v24811_v52 }
0x1a6a   :  { %22775 = vmatpush3.bf16.msra.mxu1 %v24811_v52  ;;  %v24849_v52 = vld [vmem:[%s28741_s19 + $0x1f8] sm:$0xff]  }
0x1a6b   :  { %22776 = vmatprep.subr.bf16.mxu1 %v24813_v61 }
0x1a6e   :  { %22777 = vmatpush3.bf16.msra.mxu1 %v24813_v61  ;;  %v24850_v61 = vld [vmem:[%s28741_s19 + $0x200] sm:$0xff]  }
0x1a6f   :  { %22778 = vmatprep.subr.bf16.mxu1 %v24815_v1 }
0x1a72   :  { %22779 = vmatpush3.bf16.msra.mxu1 %v24815_v1  ;;  %v24851_v1 = vld [vmem:[%s28741_s19 + $0x208] sm:$0xff]  }
0x1a73   :  { %22780 = vmatprep.subr.bf16.mxu1 %v24817_v23 }
0x1a76   :  { %22781 = vmatpush3.bf16.msra.mxu1 %v24817_v23  ;;  %v24852_v23 = vld [vmem:[%s28741_s19 + $0x210] sm:$0xff]  }
0x1a79   :  { %22783 = vmatmul.mubr.bf16.vlgmr.msra.gmra.mrb[152].mxu1 %v9130_v14 }
0x1a7a   :  { %23080 = vmatprep.mubr.msk.bf16.mxu1 %vm764_vm4, %v24819_v60  ;;  %v24858_v60 = vld [vmem:[%s28741_s19 + $0x240] sm:$0xff]  }
0x1aa6   :  { %v22810_v28 = vpop.f32.mrb[200].mxu0 }
0x1aa7   :  { %v9436_v53 = vpop.f32.mrb[201].mxu0  ;;  %v9445_v40 = vadd.f32 %v22810_v28, %v18947_v5  ;;  %v24853_v28 = vld [vmem:[%s28741_s19 + $0x218] sm:$0xff]  }
0x1aa8   :  { %v22811_v56 = vpop.f32.mrb[202].mxu0  ;;  %v9437_v2 = vadd.f32 %v18947_v5, %v9436_v53  ;;  %v24854_v53 = vld [vmem:[%s28741_s19 + $0x220] sm:$0xff]  }
0x1aa9   :  { %v9439_v58 = vpop.f32.mrb[203].mxu0  ;;  %v9448_v14 = vadd.f32 %v22811_v56, %v18947_v5  ;;  %v24855_v56 = vld [vmem:[%s28741_s19 + $0x228] sm:$0xff]  }
0x1aaa   :  { %v9440_v18 = vadd.f32 %v18947_v5, %v9439_v58  ;;  %v24856_v58 = vld [vmem:[%s28741_s19 + $0x230] sm:$0xff]  }
0x1aab   :  { %v24860_v5 = vld [vmem:[%s28741_s19 + $0x250] sm:$0xff]  }
0x1b4c   :  { %v22784_v3 = vpop.f32.mrb[152].mxu1 }
0x1b4d   :  { %v9257_v4 = vadd.f32 %v22784_v3, %v18938_v63  ;;  %v9229_v55 = vpop.f32.mrb[153].mxu1  ;;  %v24890_v3 = vld [vmem:[%s28744_s12 + $0x20] sm:$0xff]  }
0x1b4e   :  { %v9255_v51 = vadd.f32 %v18938_v63, %v9229_v55  ;;  %v22785_v6 = vpop.f32.mrb[154].mxu1  ;;  %v24862_v55 = vld [vmem:[%s28741_s19 + $0x260] sm:$0xff]  }
0x1b4f   :  { %v9453_v7 = vmax.f32 %v9257_v4, 0.0  ;;  %v9258_v62 = vadd.f32 %v22785_v6, %v18938_v63  ;;  %v9232_v0 = vpop.f32.mrb[155].mxu1  ;;  %v24861_v4 = vld [vmem:[%s28741_s19 + $0x258] sm:$0xff]   ;;  %v24863_v6 = vld [vmem:[%s28741_s19 + $0x268] sm:$0xff]  }
0x1b50   :  { %v9451_v9 = vmax.f32 %v9255_v51, 0.0  ;;  %v9256_v32 = vadd.f32 %v18938_v63, %v9232_v0  ;;  %v24859_v63 = vld [vmem:[%s28741_s19 + $0x248] sm:$0xff]   ;;  %v24899_v0 = vld [vmem:[%s28744_s12 + $0x38] sm:$0xff]  }
0x1b51   :  { %v9457_v12 = vadd.f32 %v9453_v7, %v9445_v40  ;;  %v9454_v16 = vmax.f32 %v9258_v62, 0.0  ;;  %v24893_v51 = vld [vmem:[%s28744_s12 + $0x28] sm:$0xff]   ;;  %v24864_v40 = vld [vmem:[%s28741_s19 + $0x270] sm:$0xff]   ;;  %v24865_v62 = vld [vmem:[%s28741_s19 + $0x278] sm:$0xff]  }
0x1b52   :  { %v9455_v17 = vadd.f32 %v9451_v9, %v9437_v2  ;;  %v9452_v19 = vmax.f32 %v9256_v32, 0.0  ;;  %v24896_v7 = vld [vmem:[%s28744_s12 + $0x30] sm:$0xff]   ;;  %v24866_v2 = vld [vmem:[%s28741_s19 + $0x280] sm:$0xff]   ;;  %v24867_v32 = vld [vmem:[%s28741_s19 + $0x288] sm:$0xff]  }
0x1b53   :  { %v9458_v11 = vadd.f32 %v9454_v16, %v9448_v14  ;;  %v27064_v9 = vld [vmem:[%s28744_s12] sm:$0xff]   ;;  %v24869_v14 = vld [vmem:[%s28741_s19 + $0x298] sm:$0xff]  }
0x1b54   :  { %v9456_v13 = vadd.f32 %v9452_v19, %v9440_v18  ;;  %v24870_v16 = vld [vmem:[%s28741_s19 + $0x2a0] sm:$0xff]   ;;  %v24872_v18 = vld [vmem:[%s28741_s19 + $0x2b0] sm:$0xff]   ;;  %v24873_v19 = vld [vmem:[%s28741_s19 + $0x2b8] sm:$0xff]  }
0x1b55   :  { %v26933_v15 = vpack.c.bf16 %v9458_v11, %v9457_v12  ;;  %v24868_v12 = vld [vmem:[%s28741_s19 + $0x290] sm:$0xff]   ;;  %v24874_v11 = vld [vmem:[%s28741_s19 + $0x2c0] sm:$0xff]  }
0x1b56   :  { %v26935_v24 = vpack.c.bf16 %v9456_v13, %v9455_v17  ;;  %v24871_v17 = vld [vmem:[%s28741_s19 + $0x2a8] sm:$0xff]  }
0x1b57   :  { %v24875_v13 = vld [vmem:[%s28741_s19 + $0x2c8] sm:$0xff]  }
0x1b58   :  { %22812 = vmatprep.subr.bf16.mxu0 %v26935_v24  ;;  %23076 = vmatprep.subr.bf16.mxu1 %v26935_v24 }
0x1b59   :  { %22813 = vmatpush3.bf16.msra.mxu0 %v26935_v24  ;;  %23077 = vmatpush3.bf16.msra.mxu1 %v26935_v24 }
0x1b5a   :  { %22814 = vmatprep.subr.bf16.mxu0 %v26933_v15  ;;  %23078 = vmatprep.subr.bf16.mxu1 %v26933_v15 }
0x1b5d   :  { %22815 = vmatpush3.bf16.msra.mxu0 %v26933_v15  ;;  %23079 = vmatpush3.bf16.msra.mxu1 %v26933_v15 }
0x1b5e   :  { %22832 = vmatprep.subr.bf16.mxu0 %v26935_v24  ;;  %23120 = vmatprep.subr.bf16.mxu1 %v26935_v24 }
0x1b60   :  { %22817 = vmatmul.mubr.msk.bf16.vlgmr.msra.gmra.mrb[204].mxu0 %vm764_vm4, %v24820_v35  ;;  %23081 = vmatmul.mubr.msk.bf16.vlgmr.msra.gmra.mrb[156].mxu1 %vm764_vm4, %v24821_v36  ;;  %v24876_v35 = vld [vmem:[%s28741_s19 + $0x2d0] sm:$0xff]   ;;  %v24877_v36 = vld [vmem:[%s28741_s19 + $0x2d8] sm:$0xff]  }
0x1b61   :  { %22833 = vmatpush3.bf16.msra.mxu0 %v26935_v24  ;;  %23121 = vmatpush3.bf16.msra.mxu1 %v26935_v24 }
0x1b62   :  { %22834 = vmatprep.subr.bf16.mxu0 %v26933_v15  ;;  %23122 = vmatprep.subr.bf16.mxu1 %v26933_v15 }
0x1b63   :  { %22820 = vmatprep.mubr.msk.bf16.mxu0 %vm764_vm4, %v24822_v37  ;;  %23084 = vmatprep.mubr.msk.bf16.mxu1 %vm764_vm4, %v24823_v38  ;;  %v24878_v37 = vld [vmem:[%s28741_s19 + $0x2e0] sm:$0xff]   ;;  %v24879_v38 = vld [vmem:[%s28741_s19 + $0x2e8] sm:$0xff]  }
0x1b65   :  { %22835 = vmatpush3.bf16.msra.mxu0 %v26933_v15  ;;  %23123 = vmatpush3.bf16.msra.mxu1 %v26933_v15 }
0x1b66   :  { %23164 = vmatprep.subr.bf16.mxu1 %v26935_v24  ;;  %22852 = vmatprep.subr.bf16.mxu0 %v24890_v3 }
0x1b68   :  { %22821 = vmatmul.mubr.msk.bf16.gmra.mrb[208].mxu0 %vm764_vm4, %v24824_v27  ;;  %23085 = vmatmul.mubr.msk.bf16.gmra.mrb[160].mxu1 %vm764_vm4, %v24825_v30  ;;  %v24880_v27 = vld [vmem:[%s28741_s19 + $0x2f0] sm:$0xff]   ;;  %v24881_v30 = vld [vmem:[%s28741_s19 + $0x2f8] sm:$0xff]  }
0x1b69   :  { %22824 = vmatprep.mubr.msk.bf16.mxu0 %vm764_vm4, %v24826_v8  ;;  %23088 = vmatprep.mubr.msk.bf16.mxu1 %vm764_vm4, %v24827_v10  ;;  %v24882_v8 = vld [vmem:[%s28741_s19 + $0x300] sm:$0xff]   ;;  %v24883_v10 = vld [vmem:[%s28741_s19 + $0x308] sm:$0xff]  }
0x1b70   :  { %22825 = vmatmul.mubr.msk.bf16.gmra.mrb[212].mxu0 %vm764_vm4, %v24828_v31  ;;  %23089 = vmatmul.mubr.msk.bf16.gmra.mrb[164].mxu1 %vm764_vm4, %v24829_v21  ;;  %v24884_v31 = vld [vmem:[%s28741_s19 + $0x310] sm:$0xff]   ;;  %v24885_v21 = vld [vmem:[%s28741_s19 + $0x318] sm:$0xff]  }
0x1b71   :  { %22828 = vmatprep.mubr.msk.bf16.mxu0 %vm764_vm4, %v24830_v29  ;;  %23092 = vmatprep.mubr.msk.bf16.mxu1 %vm764_vm4, %v24831_v33  ;;  %v24886_v29 = vld [vmem:[%s28741_s19 + $0x320] sm:$0xff]   ;;  %v24887_v33 = vld [vmem:[%s28741_s19 + $0x328] sm:$0xff]  }
0x1b78   :  { %22829 = vmatmul.mubr.msk.bf16.gmra.mrb[216].mxu0 %vm764_vm4, %v24832_v34  ;;  %23093 = vmatmul.mubr.msk.bf16.gmra.mrb[168].mxu1 %vm764_vm4, %v24833_v39  ;;  %v24888_v34 = vld [vmem:[%s28741_s19 + $0x330] sm:$0xff]  }
0x1b79   :  { %22836 = vmatprep.mubr.msk.bf16.mxu0 %vm764_vm4, %v24834_v20  ;;  %23124 = vmatprep.mubr.msk.bf16.mxu1 %vm764_vm4, %v24835_v22  ;;  %v24889_v22 = vld [vmem:[%s28741_s19 + $0x338] sm:$0xff]  }
0x1b80   :  { %22837 = vmatmul.mubr.msk.bf16.vlgmr.msra.gmra.mrb[220].mxu0 %vm764_vm4, %v24836_v25  ;;  %23125 = vmatmul.mubr.msk.bf16.vlgmr.msra.gmra.mrb[172].mxu1 %vm764_vm4, %v24837_v42  ;;  %v24891_v42 = vld [vmem:[%s28741_s19 + $0x340] sm:$0xff]  }
0x1b81   :  { %23165 = vmatpush3.bf16.msra.mxu1 %v26935_v24  ;;  %22840 = vmatprep.mubr.msk.bf16.mxu0 %vm764_vm4, %v24838_v44 }
0x1b82   :  { %23166 = vmatprep.subr.bf16.mxu1 %v26933_v15  ;;  %23128 = vmatprep.mubr.msk.bf16.mxu1 %vm764_vm4, %v24839_v46 }
0x1b83   :  { %22853 = vmatpush3.bf16.msra.mxu0 %v24890_v3  ;;  %v24900_v3 = vld [vmem:[%s28741_s19 + $0x370] sm:$0xff]  }
0x1b84   :  { %22854 = vmatprep.subr.bf16.mxu0 %v24893_v51 }
0x1b85   :  { %23167 = vmatpush3.bf16.msra.mxu1 %v26933_v15 }
0x1b86   :  { %23208 = vmatprep.subr.bf16.mxu1 %v26935_v24 }
0x1b87   :  { %22855 = vmatpush3.bf16.msra.mxu0 %v24893_v51 }
0x1b88   :  { %22841 = vmatmul.mubr.msk.bf16.gmra.mrb[224].mxu0 %vm764_vm4, %v24840_v48  ;;  %23129 = vmatmul.mubr.msk.bf16.gmra.mrb[176].mxu1 %vm764_vm4, %v24841_v50 }
0x1b89   :  { %22844 = vmatprep.mubr.msk.bf16.mxu0 %vm764_vm4, %v24842_v41  ;;  %23132 = vmatprep.mubr.msk.bf16.mxu1 %vm764_vm4, %v24843_v45  ;;  %v24892_v45 = vld [vmem:[%s28741_s19 + $0x348] sm:$0xff]  }
0x1b8a   :  { %22856 = vmatprep.subr.bf16.mxu0 %v24896_v7 }
0x1b8b   :  { %22857 = vmatpush3.bf16.msra.mxu0 %v24896_v7  ;;  %v24901_v7 = vld [vmem:[%s28741_s19 + $0x378] sm:$0xff]  }
0x1b8c   :  { %22858 = vmatprep.subr.bf16.mxu0 %v24899_v0 }
0x1b8f   :  { %22859 = vmatpush3.bf16.msra.mxu0 %v24899_v0  ;;  %v24904_v0 = vld [vmem:[%s28741_s19 + $0x380] sm:$0xff]  }
0x1b90   :  { %22845 = vmatmul.mubr.msk.bf16.gmra.mrb[228].mxu0 %vm764_vm4, %v24844_v43  ;;  %23133 = vmatmul.mubr.msk.bf16.gmra.mrb[180].mxu1 %vm764_vm4, %v24845_v54  ;;  %v24894_v54 = vld [vmem:[%s28741_s19 + $0x350] sm:$0xff]  }
0x1b91   :  { %22848 = vmatprep.mubr.msk.bf16.mxu0 %vm764_vm4, %v24846_v57  ;;  %23136 = vmatprep.mubr.msk.bf16.mxu1 %vm764_vm4, %v24847_v47 }
0x1b92   :  { %22876 = vmatprep.subr.bf16.mxu0 %v27064_v9 }
0x1b98   :  { %22849 = vmatmul.mubr.msk.bf16.gmra.mrb[232].mxu0 %vm764_vm4, %v24848_v49  ;;  %23137 = vmatmul.mubr.msk.bf16.gmra.mrb[184].mxu1 %vm764_vm4, %v24849_v52 }
0x1b99   :  { %23168 = vmatprep.mubr.msk.bf16.mxu1 %vm764_vm4, %v24850_v61 }
0x1ba0   :  { %23169 = vmatmul.mubr.msk.bf16.vlgmr.msra.gmra.mrb[188].mxu1 %vm764_vm4, %v24851_v1  ;;  %v24895_v1 = vld [vmem:[%s28741_s19 + $0x358] sm:$0xff]  }
0x1ba1   :  { %23209 = vmatpush3.bf16.msra.mxu1 %v26935_v24  ;;  %23172 = vmatprep.mubr.msk.bf16.mxu1 %vm764_vm4, %v24852_v23 }
0x1ba2   :  { %23210 = vmatprep.subr.bf16.mxu1 %v26933_v15 }
0x1ba5   :  { %23211 = vmatpush3.bf16.msra.mxu1 %v26933_v15 }
0x1ba6   :  { %23252 = vmatprep.subr.bf16.mxu1 %v26935_v24 }
0x1ba8   :  { %23173 = vmatmul.mubr.msk.bf16.gmra.mrb[192].mxu1 %vm764_vm4, %v24853_v28  ;;  %v24897_v28 = vld [vmem:[%s28741_s19 + $0x360] sm:$0xff]  }
0x1ba9   :  { %23176 = vmatprep.mubr.msk.bf16.mxu1 %vm764_vm4, %v24854_v53 }
0x1bb0   :  { %23177 = vmatmul.mubr.msk.bf16.gmra.mrb[196].mxu1 %vm764_vm4, %v24855_v56 }
0x1bb1   :  { %23180 = vmatprep.mubr.msk.bf16.mxu1 %vm764_vm4, %v24856_v58 }
0x1bb8   :  { %23181 = vmatmul.mubr.msk.bf16.gmra.mrb[200].mxu1 %vm764_vm4, %v24857_v59 }
0x1bb9   :  { %23212 = vmatprep.mubr.msk.bf16.mxu1 %vm764_vm4, %v24858_v60 }
0x1bc0   :  { %23213 = vmatmul.mubr.msk.bf16.vlgmr.msra.gmra.mrb[204].mxu1 %vm764_vm4, %v24859_v63  ;;  %v24898_v63 = vld [vmem:[%s28741_s19 + $0x368] sm:$0xff]  }
0x1bc1   :  { %23253 = vmatpush3.bf16.msra.mxu1 %v26935_v24  ;;  %23216 = vmatprep.mubr.msk.bf16.mxu1 %vm764_vm4, %v24860_v5 }
0x1bc2   :  { %23254 = vmatprep.subr.bf16.mxu1 %v26933_v15 }
0x1bc5   :  { %23255 = vmatpush3.bf16.msra.mxu1 %v26933_v15 }
0x1bc6   :  { %23296 = vmatprep.subr.bf16.mxu1 %v26935_v24 }
0x1bc8   :  { %23217 = vmatmul.mubr.msk.bf16.gmra.mrb[208].mxu1 %vm764_vm4, %v24861_v4 }
0x1bc9   :  { %23220 = vmatprep.mubr.msk.bf16.mxu1 %vm764_vm4, %v24862_v55 }
0x1bd0   :  { %23221 = vmatmul.mubr.msk.bf16.gmra.mrb[212].mxu1 %vm764_vm4, %v24863_v6 }
0x1bd1   :  { %23224 = vmatprep.mubr.msk.bf16.mxu1 %vm764_vm4, %v24864_v40 }
0x1bd8   :  { %23225 = vmatmul.mubr.msk.bf16.gmra.mrb[216].mxu1 %vm764_vm4, %v24865_v62 }
0x1bd9   :  { %23256 = vmatprep.mubr.msk.bf16.mxu1 %vm764_vm4, %v24866_v2 }
0x1be0   :  { %23257 = vmatmul.mubr.msk.bf16.vlgmr.msra.gmra.mrb[220].mxu1 %vm764_vm4, %v24867_v32 }
0x1be1   :  { %23297 = vmatpush3.bf16.msra.mxu1 %v26935_v24  ;;  %23260 = vmatprep.mubr.msk.bf16.mxu1 %vm764_vm4, %v24868_v12 }
0x1be2   :  { %23298 = vmatprep.subr.bf16.mxu1 %v26933_v15 }
0x1be5   :  { %23299 = vmatpush3.bf16.msra.mxu1 %v26933_v15 }
0x1be6   :  { %23340 = vmatprep.subr.bf16.mxu1 %v26935_v24 }
0x1be8   :  { %23261 = vmatmul.mubr.msk.bf16.gmra.mrb[224].mxu1 %vm764_vm4, %v24869_v14  ;;  %v24903_v14 = vld [vmem:[%s28744_s12 + $0x8] sm:$0xff]  }
0x1be9   :  { %23264 = vmatprep.mubr.msk.bf16.mxu1 %vm764_vm4, %v24870_v16 }
0x1bf0   :  { %23265 = vmatmul.mubr.msk.bf16.gmra.mrb[228].mxu1 %vm764_vm4, %v24871_v17 }
0x1bf1   :  { %23268 = vmatprep.mubr.msk.bf16.mxu1 %vm764_vm4, %v24872_v18  ;;  %v24905_v18 = vld [vmem:[%s28741_s19 + $0x388] sm:$0xff]  }
0x1bf8   :  { %23269 = vmatmul.mubr.msk.bf16.gmra.mrb[232].mxu1 %vm764_vm4, %v24873_v19  ;;  %v24906_v19 = vld [vmem:[%s28744_s12 + $0x10] sm:$0xff]  }
0x1bf9   :  { %23300 = vmatprep.mubr.msk.bf16.mxu1 %vm764_vm4, %v24874_v11 }
0x1c00   :  { %23301 = vmatmul.mubr.msk.bf16.vlgmr.msra.gmra.mrb[236].mxu1 %vm764_vm4, %v24875_v13 }
0x1c01   :  { %23341 = vmatpush3.bf16.msra.mxu1 %v26935_v24  ;;  %23304 = vmatprep.mubr.msk.bf16.mxu1 %vm764_vm4, %v24876_v35 }
0x1c02   :  { %23342 = vmatprep.subr.bf16.mxu1 %v26933_v15 }
0x1c05   :  { %23343 = vmatpush3.bf16.msra.mxu1 %v26933_v15 }
0x1c06   :  { %23384 = vmatprep.subr.bf16.mxu1 %v26935_v24 }
0x1c08   :  { %23305 = vmatmul.mubr.msk.bf16.gmra.mrb[240].mxu1 %vm764_vm4, %v24877_v36 }
0x1c09   :  { %23308 = vmatprep.mubr.msk.bf16.mxu1 %vm764_vm4, %v24878_v37  ;;  %v24908_v37 = vld [vmem:[%s28741_s19 + $0x390] sm:$0xff]  }
0x1c10   :  { %23309 = vmatmul.mubr.msk.bf16.gmra.mrb[244].mxu1 %vm764_vm4, %v24879_v38  ;;  %v24907_v38 = vld [vmem:[%s28744_s12 + $0x18] sm:$0xff]  }
0x1c11   :  { %23312 = vmatprep.mubr.msk.bf16.mxu1 %vm764_vm4, %v24880_v27 }
0x1c18   :  { %23313 = vmatmul.mubr.msk.bf16.gmra.mrb[248].mxu1 %vm764_vm4, %v24881_v30  ;;  %v24909_v30 = vld [vmem:[%s28741_s19 + $0x398] sm:$0xff]  }
0x1c19   :  { %23344 = vmatprep.mubr.msk.bf16.mxu1 %vm764_vm4, %v24882_v8 }
0x1c20   :  { %23345 = vmatmul.mubr.msk.bf16.vlgmr.msra.gmra.mrb[252].mxu1 %vm764_vm4, %v24883_v10  ;;  %v24910_v10 = vld [vmem:[%s28741_s19 + $0x3a0] sm:$0xff]  }
0x1c21   :  { %23385 = vmatpush3.bf16.msra.mxu1 %v26935_v24  ;;  %23348 = vmatprep.mubr.msk.bf16.mxu1 %vm764_vm4, %v24884_v31 }
0x1c22   :  { %23386 = vmatprep.subr.bf16.mxu1 %v26933_v15 }
0x1c25   :  { %23387 = vmatpush3.bf16.msra.mxu1 %v26933_v15 }
0x1c26   :  { %23428 = vmatprep.subr.bf16.mxu1 %v26935_v24 }
0x1c28   :  { %23349 = vmatmul.mubr.msk.bf16.gmra.mrb[0].mxu1 %vm764_vm4, %v24885_v21 }
0x1c29   :  { %23352 = vmatprep.mubr.msk.bf16.mxu1 %vm764_vm4, %v24886_v29 }
0x1c30   :  { %23353 = vmatmul.mubr.msk.bf16.gmra.mrb[4].mxu1 %vm764_vm4, %v24887_v33 }
0x1c31   :  { %23356 = vmatprep.mubr.msk.bf16.mxu1 %vm764_vm4, %v24888_v34 }
0x1c33   :  { %v27124_v39 = vpop.f32.mrb[204].mxu0 }
0x1c34   :  { %v27126_v20 = vpop.f32.mrb[205].mxu0 }
0x1c35   :  { %v27129_v25 = vpop.f32.mrb[206].mxu0 }
0x1c36   :  { %v9639_v44 = vpack.c.bf16 %v27129_v25, %v27124_v39  ;;  %v27134_v46 = vpop.f32.mrb[207].mxu0  ;;  %v24916_v39 = vld [vmem:[%s28741_s19 + $0x80] sm:$0xff]   ;;  %v24918_v25 = vld [vmem:[%s28741_s19 + $0x88] sm:$0xff]  }
0x1c37   :  { %v9638_v48 = vpack.c.bf16 %v27134_v46, %v27126_v20  ;;  %v24915_v20 = vld [vmem:[%s28741_s19 + $0x3c8] sm:$0xff]   ;;  %v24917_v46 = vld [vmem:[%s28744_s12 + $0x40] sm:$0xff]  }
0x1c38   :  { %23357 = vmatmul.mubr.msk.bf16.gmra.mrb[8].mxu1 %vm764_vm4, %v24889_v22  ;;  %v24911_v22 = vld [vmem:[%s28741_s19 + $0x3a8] sm:$0xff]  }
0x1c39   :  { %23388 = vmatprep.mubr.msk.bf16.mxu1 %vm764_vm4, %v24891_v42 }
0x1c3b   :  { %v27140_v50 = vpop.f32.mrb[208].mxu0 }
0x1c3c   :  { %v27142_v41 = vpop.f32.mrb[209].mxu0 }
0x1c3d   :  { %v27145_v43 = vpop.f32.mrb[210].mxu0 }
0x1c3e   :  { %v9641_v57 = vpack.c.bf16 %v27145_v43, %v27140_v50  ;;  %v27150_v47 = vpop.f32.mrb[211].mxu0  ;;  %v24921_v50 = vld [vmem:[%s28744_s12 + $0x50] sm:$0xff]   ;;  %v24924_v43 = vld [vmem:[%s28741_s19 + $0xa0] sm:$0xff]  }
0x1c3f   :  { %v9640_v49 = vpack.c.bf16 %v27150_v47, %v27142_v41  ;;  %v24922_v41 = vld [vmem:[%s28741_s19 + $0x98] sm:$0xff]   ;;  %v24925_v47 = vld [vmem:[%s28741_s19 + $0xa8] sm:$0xff]  }
0x1c40   :  { %23389 = vmatmul.mubr.msk.bf16.vlgmr.msra.gmra.mrb[12].mxu1 %vm764_vm4, %v24892_v45  ;;  %v24912_v45 = vld [vmem:[%s28741_s19 + $0x3b0] sm:$0xff]  }
0x1c41   :  { %23429 = vmatpush3.bf16.msra.mxu1 %v26935_v24  ;;  %23392 = vmatprep.mubr.msk.bf16.mxu1 %vm764_vm4, %v24894_v54 }
0x1c42   :  { %23430 = vmatprep.subr.bf16.mxu1 %v26933_v15 }
0x1c43   :  { %v27158_v52 = vpop.f32.mrb[212].mxu0 }
0x1c44   :  { %v27160_v61 = vpop.f32.mrb[213].mxu0 }
0x1c45   :  { %23431 = vmatpush3.bf16.msra.mxu1 %v26933_v15  ;;  %v27164_v23 = vpop.f32.mrb[214].mxu0 }
0x1c46   :  { %23472 = vmatprep.subr.bf16.mxu1 %v26935_v24  ;;  %v9643_v53 = vpack.c.bf16 %v27164_v23, %v27158_v52  ;;  %v27170_v56 = vpop.f32.mrb[215].mxu0  ;;  %v24927_v52 = vld [vmem:[%s28741_s19 + $0xb8] sm:$0xff]  }
0x1c47   :  { %v9642_v58 = vpack.c.bf16 %v27170_v56, %v27160_v61 }
0x1c48   :  { %23393 = vmatmul.mubr.msk.bf16.gmra.mrb[16].mxu1 %vm764_vm4, %v24895_v1 }
0x1c49   :  { %23396 = vmatprep.mubr.msk.bf16.mxu1 %vm764_vm4, %v24897_v28 }
0x1c4b   :  { %v27176_v59 = vpop.f32.mrb[216].mxu0 }
0x1c4c   :  { %v27178_v60 = vpop.f32.mrb[217].mxu0 }
0x1c4d   :  { %v27181_v5 = vpop.f32.mrb[218].mxu0 }
0x1c4e   :  { %v9645_v4 = vpack.c.bf16 %v27181_v5, %v27176_v59  ;;  %v27186_v55 = vpop.f32.mrb[219].mxu0 }
0x1c4f   :  { %v9644_v51 = vpack.c.bf16 %v27186_v55, %v27178_v60 }
0x1c50   :  { %23397 = vmatmul.mubr.msk.bf16.gmra.mrb[24].mxu1 %vm764_vm4, %v24898_v63  ;;  %v24913_v63 = vld [vmem:[%s28741_s19 + $0x3b8] sm:$0xff]  }
0x1c51   :  { %23400 = vmatprep.mubr.msk.bf16.mxu1 %vm764_vm4, %v24900_v3  ;;  %v24914_v3 = vld [vmem:[%s28741_s19 + $0x3c0] sm:$0xff]  }
0x1c53   :  { %v22838_v6 = vpop.f32.mrb[220].mxu0 }
0x1c54   :  { %v9769_v40 = vpop.f32.mrb[221].mxu0 }
0x1c55   :  { %v22839_v62 = vpop.f32.mrb[222].mxu0 }
0x1c56   :  { %v9833_v2 = vpack.c.bf16 %v22839_v62, %v22838_v6  ;;  %v9772_v32 = vpop.f32.mrb[223].mxu0 }
0x1c57   :  { %v9832_v12 = vpack.c.bf16 %v9772_v32, %v9769_v40 }
0x1c58   :  { %23401 = vmatmul.mubr.msk.bf16.gmra.mrb[28].mxu1 %vm764_vm4, %v24901_v7 }
0x1c59   :  { %22860 = vmatprep.mubr.msk.bf16.mxu0 %vm3187_vm6, %v9832_v12  ;;  %23432 = vmatprep.mubr.msk.bf16.mxu1 %vm764_vm4, %v24904_v0 }
0x1c5a   :  { %22861 = vmatmul.mubr.msk.bf16.vlgmr.msra.gmra.mrb[236].mxu0 %vm3187_vm6, %v9833_v2 }
0x1c5b   :  { %22877 = vmatpush3.bf16.msra.mxu0 %v27064_v9  ;;  %v22842_v16 = vpop.f32.mrb[224].mxu0 }
0x1c5c   :  { %v9785_v17 = vpop.f32.mrb[225].mxu0  ;;  %22878 = vmatprep.subr.bf16.mxu0 %v24903_v14 }
0x1c5d   :  { %v22843_v11 = vpop.f32.mrb[226].mxu0 }
0x1c5e   :  { %v9835_v13 = vpack.c.bf16 %v22843_v11, %v22842_v16  ;;  %v9788_v35 = vpop.f32.mrb[227].mxu0 }
0x1c5f   :  { %v9834_v36 = vpack.c.bf16 %v9788_v35, %v9785_v17  ;;  %22879 = vmatpush3.bf16.msra.mxu0 %v24903_v14  ;;  %v24930_v35 = vld [vmem:[%s28741_s19 + $0xc8] sm:$0xff]  }
0x1c60   :  { %23433 = vmatmul.mubr.msk.bf16.vlgmr.msra.gmra.mrb[32].mxu1 %vm764_vm4, %v24905_v18  ;;  %22880 = vmatprep.subr.bf16.mxu0 %v24906_v19 }
0x1c61   :  { %23473 = vmatpush3.bf16.msra.mxu1 %v26935_v24  ;;  %22864 = vmatprep.mubr.msk.bf16.mxu0 %vm3187_vm6, %v9834_v36  ;;  %v24932_v36 = vld [vmem:[%s28741_s19 + $0xd0] sm:$0xff]  }
0x1c62   :  { %23474 = vmatprep.subr.bf16.mxu1 %v26933_v15  ;;  %22865 = vmatmul.mubr.msk.bf16.gmra.mrb[240].mxu0 %vm3187_vm6, %v9835_v13  ;;  %v24928_v13 = vld [vmem:[%s28741_s19 + $0xc0] sm:$0xff]  }
0x1c63   :  { %22881 = vmatpush3.bf16.msra.mxu0 %v24906_v19  ;;  %v22846_v9 = vpop.f32.mrb[228].mxu0  ;;  %23436 = vmatprep.mubr.msk.bf16.mxu1 %vm764_vm4, %v24908_v37  ;;  %v24931_v37 = vld [vmem:[%s28744_s12 + $0x68] sm:$0xff]  }
0x1c64   :  { %v9801_v27 = vpop.f32.mrb[229].mxu0  ;;  %22882 = vmatprep.subr.bf16.mxu0 %v24907_v38 }
0x1c65   :  { %23475 = vmatpush3.bf16.msra.mxu1 %v26933_v15  ;;  %v22847_v8 = vpop.f32.mrb[230].mxu0 }
0x1c66   :  { %v9837_v31 = vpack.c.bf16 %v22847_v8, %v22846_v9  ;;  %23516 = vmatprep.subr.bf16.mxu1 %v26935_v24  ;;  %v9804_v21 = vpop.f32.mrb[231].mxu0  ;;  %v24934_v9 = vld [vmem:[%s28741_s19 + $0xd8] sm:$0xff]   ;;  %v24937_v8 = vld [vmem:[%s28741_s19 + $0xe8] sm:$0xff]  }
0x1c67   :  { %v9836_v29 = vpack.c.bf16 %v9804_v21, %v9801_v27  ;;  %22883 = vmatpush3.bf16.msra.mxu0 %v24907_v38  ;;  %v24933_v38 = vld [vmem:[%s28744_s12 + $0x70] sm:$0xff]   ;;  %v24936_v27 = vld [vmem:[%s28741_s19 + $0xe0] sm:$0xff]  }
0x1c68   :  { %22900 = vmatprep.subr.bf16.mxu0 %v26935_v24  ;;  %23437 = vmatmul.mubr.msk.bf16.gmra.mrb[36].mxu1 %vm764_vm4, %v24909_v30  ;;  %v24935_v30 = vld [vmem:[%s28744_s12 + $0x78] sm:$0xff]  }
0x1c69   :  { %22868 = vmatprep.mubr.msk.bf16.mxu0 %vm3187_vm6, %v9836_v29  ;;  %23440 = vmatprep.mubr.msk.bf16.mxu1 %vm764_vm4, %v24910_v10  ;;  %v24938_v10 = vld [vmem:[%s28741_s19 + $0xf0] sm:$0xff]  }
0x1c6a   :  { %22869 = vmatmul.mubr.msk.bf16.gmra.mrb[244].mxu0 %vm3187_vm6, %v9837_v31  ;;  %v24939_v31 = vld [vmem:[%s28741_s19 + $0xf8] sm:$0xff]  }
0x1c6b   :  { %v22850_v33 = vpop.f32.mrb[232].mxu0 }
0x1c6c   :  { %v9817_v34 = vpop.f32.mrb[233].mxu0 }
0x1c6d   :  { %v22851_v42 = vpop.f32.mrb[234].mxu0 }
0x1c6e   :  { %v9839_v54 = vpack.c.bf16 %v22851_v42, %v22850_v33  ;;  %v9820_v1 = vpop.f32.mrb[235].mxu0 }
0x1c6f   :  { %v9838_v28 = vpack.c.bf16 %v9820_v1, %v9817_v34  ;;  %v24941_v1 = vld [vmem:[%s28744_s12 + $0x80] sm:$0xff]  }
0x1c70   :  { %23441 = vmatmul.mubr.msk.bf16.gmra.mrb[40].mxu1 %vm764_vm4, %v24911_v22 }
0x1c71   :  { %22872 = vmatprep.mubr.msk.bf16.mxu0 %vm3187_vm6, %v9838_v28  ;;  %23444 = vmatprep.mubr.msk.bf16.mxu1 %vm764_vm4, %v24912_v45 }
0x1c72   :  { %22873 = vmatmul.mubr.msk.bf16.gmra.mrb[248].mxu0 %vm3187_vm6, %v9839_v54 }
0x1c73   :  { %22884 = vmatprep.mubr.msk.bf16.mxu0 %vm3187_vm6, %v9638_v48  ;;  %v24919_v48 = vld [vmem:[%s28744_s12 + $0x48] sm:$0xff]  }
0x1c78   :  { %23445 = vmatmul.mubr.msk.bf16.gmra.mrb[20].mxu1 %vm764_vm4, %v24913_v63 }
0x1c79   :  { %23476 = vmatprep.mubr.msk.bf16.mxu1 %vm764_vm4, %v24914_v3 }
0x1c7a   :  { %22885 = vmatmul.mubr.msk.bf16.vlgmr.msra.gmra.mrb[236].mxu0 %vm3187_vm6, %v9639_v44  ;;  %v24920_v44 = vld [vmem:[%s28741_s19 + $0x90] sm:$0xff]  }
0x1c7b   :  { %22901 = vmatpush3.bf16.msra.mxu0 %v26935_v24  ;;  %22888 = vmatprep.mubr.msk.bf16.mxu0 %vm3187_vm6, %v9640_v49  ;;  %v24926_v49 = vld [vmem:[%s28741_s19 + $0xb0] sm:$0xff]  }
0x1c7c   :  { %22902 = vmatprep.subr.bf16.mxu0 %v26933_v15 }
0x1c7f   :  { %22903 = vmatpush3.bf16.msra.mxu0 %v26933_v15 }
0x1c80   :  { %23477 = vmatmul.mubr.msk.bf16.vlgmr.msra.gmra.mrb[44].mxu1 %vm764_vm4, %v24915_v20  ;;  %22920 = vmatprep.subr.bf16.mxu0 %v24917_v46 }
0x1c81   :  { %23517 = vmatpush3.bf16.msra.mxu1 %v26935_v24 }
0x1c82   :  { %23518 = vmatprep.subr.bf16.mxu1 %v26933_v15  ;;  %22889 = vmatmul.mubr.msk.bf16.gmra.mrb[240].mxu0 %vm3187_vm6, %v9641_v57  ;;  %v24923_v57 = vld [vmem:[%s28744_s12 + $0x58] sm:$0xff]  }
0x1c83   :  { %22892 = vmatprep.mubr.msk.bf16.mxu0 %vm3187_vm6, %v9642_v58 }
0x1c85   :  { %23519 = vmatpush3.bf16.msra.mxu1 %v26933_v15 }
0x1c8a   :  { %22893 = vmatmul.mubr.msk.bf16.gmra.mrb[244].mxu0 %vm3187_vm6, %v9643_v53 }
0x1c8b   :  { %22896 = vmatprep.mubr.msk.bf16.mxu0 %vm3187_vm6, %v9644_v51 }
0x1c92   :  { %22897 = vmatmul.mubr.msk.bf16.gmra.mrb[248].mxu0 %vm3187_vm6, %v9645_v4  ;;  %v24929_v4 = vld [vmem:[%s28744_s12 + $0x60] sm:$0xff]  }
0x1c93   :  { %22904 = vmatprep.mubr.msk.bf16.mxu0 %vm764_vm4, %v24916_v39 }
0x1c9a   :  { %22905 = vmatmul.mubr.msk.bf16.vlgmr.msra.gmra.mrb[252].mxu0 %vm764_vm4, %v24918_v25 }
0x1c9b   :  { %22921 = vmatpush3.bf16.msra.mxu0 %v24917_v46  ;;  %22908 = vmatprep.mubr.msk.bf16.mxu0 %vm764_vm4, %v24920_v44 }
0x1c9c   :  { %22922 = vmatprep.subr.bf16.mxu0 %v24919_v48 }
0x1c9f   :  { %22923 = vmatpush3.bf16.msra.mxu0 %v24919_v48 }
0x1ca0   :  { %22924 = vmatprep.subr.bf16.mxu0 %v24921_v50 }
0x1ca2   :  { %22909 = vmatmul.mubr.msk.bf16.gmra.mrb[0].mxu0 %vm764_vm4, %v24922_v41 }
0x1ca3   :  { %22925 = vmatpush3.bf16.msra.mxu0 %v24921_v50  ;;  %22912 = vmatprep.mubr.msk.bf16.mxu0 %vm764_vm4, %v24924_v43 }
0x1ca4   :  { %22926 = vmatprep.subr.bf16.mxu0 %v24923_v57 }
0x1ca7   :  { %22927 = vmatpush3.bf16.msra.mxu0 %v24923_v57 }
0x1ca8   :  { %22944 = vmatprep.subr.bf16.mxu0 %v26935_v24 }
0x1caa   :  { %22913 = vmatmul.mubr.msk.bf16.gmra.mrb[4].mxu0 %vm764_vm4, %v24925_v47 }
0x1cab   :  { %22916 = vmatprep.mubr.msk.bf16.mxu0 %vm764_vm4, %v24926_v49 }
0x1cb2   :  { %22917 = vmatmul.mubr.msk.bf16.gmra.mrb[8].mxu0 %vm764_vm4, %v24927_v52 }
0x1d6d   :  { %v22906_v61 = vpop.f32.mrb[252].mxu0 }
0x1d6e   :  { %v10253_v23 = vpop.f32.mrb[253].mxu0 }
0x1d6f   :  { %v22907_v53 = vpop.f32.mrb[254].mxu0 }
0x1d70   :  { %v10317_v56 = vpack.c.bf16 %v22907_v53, %v22906_v61  ;;  %v10256_v58 = vpop.f32.mrb[255].mxu0  ;;  %v24940_v61 = vld [vmem:[%s28741_s19 + $0x100] sm:$0xff]   ;;  %v24944_v53 = vld [vmem:[%s28741_s19 + $0x110] sm:$0xff]  }
0x1d71   :  { %v10316_v59 = vpack.c.bf16 %v10256_v58, %v10253_v23  ;;  %v24942_v23 = vld [vmem:[%s28741_s19 + $0x108] sm:$0xff]   ;;  %v24945_v58 = vld [vmem:[%s28744_s12 + $0x90] sm:$0xff]  }
0x1d73   :  { %22928 = vmatprep.mubr.msk.bf16.mxu0 %vm3187_vm6, %v10316_v59  ;;  %v24946_v59 = vld [vmem:[%s28741_s19 + $0x118] sm:$0xff]  }
0x1d74   :  { %22929 = vmatmul.mubr.msk.bf16.vlgmr.msra.gmra.mrb[236].mxu0 %vm3187_vm6, %v10317_v56  ;;  %v24943_v56 = vld [vmem:[%s28744_s12 + $0x88] sm:$0xff]  }
0x1d75   :  { %22945 = vmatpush3.bf16.msra.mxu0 %v26935_v24  ;;  %v22910_v60 = vpop.f32.mrb[0].mxu0 }
0x1d76   :  { %22946 = vmatprep.subr.bf16.mxu0 %v26933_v15  ;;  %v10269_v5 = vpop.f32.mrb[1].mxu0 }
0x1d77   :  { %v22911_v55 = vpop.f32.mrb[2].mxu0 }
0x1d78   :  { %v10319_v51 = vpack.c.bf16 %v22911_v55, %v22910_v60  ;;  %v10272_v6 = vpop.f32.mrb[3].mxu0  ;;  %v24948_v60 = vld [vmem:[%s28741_s19 + $0x120] sm:$0xff]   ;;  %v24950_v55 = vld [vmem:[%s28741_s19 + $0x130] sm:$0xff]  }
0x1d79   :  { %v10318_v40 = vpack.c.bf16 %v10272_v6, %v10269_v5  ;;  %22947 = vmatpush3.bf16.msra.mxu0 %v26933_v15  ;;  %v24947_v5 = vld [vmem:[%s28744_s12 + $0x98] sm:$0xff]  }
0x1d7a   :  { %22964 = vmatprep.subr.bf16.mxu0 %v24929_v4 }
0x1d7b   :  { %22932 = vmatprep.mubr.msk.bf16.mxu0 %vm3187_vm6, %v10318_v40 }
0x1d7c   :  { %22933 = vmatmul.mubr.msk.bf16.gmra.mrb[240].mxu0 %vm3187_vm6, %v10319_v51  ;;  %v24951_v51 = vld [vmem:[%s28741_s19 + $0x138] sm:$0xff]  }
0x1d7d   :  { %v22914_v7 = vpop.f32.mrb[4].mxu0 }
0x1d7e   :  { %v10285_v62 = vpop.f32.mrb[5].mxu0 }
0x1d7f   :  { %v22915_v0 = vpop.f32.mrb[6].mxu0 }
0x1d80   :  { %v10321_v2 = vpack.c.bf16 %v22915_v0, %v22914_v7  ;;  %v10288_v32 = vpop.f32.mrb[7].mxu0 }
0x1d81   :  { %v10320_v12 = vpack.c.bf16 %v10288_v32, %v10285_v62 }
0x1d83   :  { %22936 = vmatprep.mubr.msk.bf16.mxu0 %vm3187_vm6, %v10320_v12 }
0x1d84   :  { %22937 = vmatmul.mubr.msk.bf16.gmra.mrb[244].mxu0 %vm3187_vm6, %v10321_v2 }
0x1d85   :  { %v22918_v14 = vpop.f32.mrb[8].mxu0 }
0x1d86   :  { %v10301_v16 = vpop.f32.mrb[9].mxu0 }
0x1d87   :  { %v22919_v17 = vpop.f32.mrb[10].mxu0 }
0x1d88   :  { %v10323_v18 = vpack.c.bf16 %v22919_v17, %v22918_v14  ;;  %v10304_v19 = vpop.f32.mrb[11].mxu0  ;;  %v24960_v14 = vld [vmem:[%s28744_s12 + $0xa0] sm:$0xff]  }
0x1d89   :  { %v10322_v11 = vpack.c.bf16 %v10304_v19, %v10301_v16 }
0x1d8b   :  { %22940 = vmatprep.mubr.msk.bf16.mxu0 %vm3187_vm6, %v10322_v11 }
0x1d8c   :  { %22941 = vmatmul.mubr.msk.bf16.gmra.mrb[248].mxu0 %vm3187_vm6, %v10323_v18 }
0x1d8d   :  { %22948 = vmatprep.mubr.msk.bf16.mxu0 %vm764_vm4, %v24928_v13 }
0x1d94   :  { %22949 = vmatmul.mubr.msk.bf16.vlgmr.msra.gmra.mrb[12].mxu0 %vm764_vm4, %v24930_v35 }
0x1d95   :  { %22965 = vmatpush3.bf16.msra.mxu0 %v24929_v4  ;;  %22952 = vmatprep.mubr.msk.bf16.mxu0 %vm764_vm4, %v24932_v36  ;;  %v24949_v4 = vld [vmem:[%s28741_s19 + $0x128] sm:$0xff]  }
0x1d96   :  { %22966 = vmatprep.subr.bf16.mxu0 %v24931_v37 }
0x1d99   :  { %22967 = vmatpush3.bf16.msra.mxu0 %v24931_v37 }
0x1d9a   :  { %22968 = vmatprep.subr.bf16.mxu0 %v24933_v38 }
0x1d9c   :  { %22953 = vmatmul.mubr.msk.bf16.gmra.mrb[16].mxu0 %vm764_vm4, %v24934_v9 }
0x1d9d   :  { %22969 = vmatpush3.bf16.msra.mxu0 %v24933_v38  ;;  %22956 = vmatprep.mubr.msk.bf16.mxu0 %vm764_vm4, %v24936_v27 }
0x1d9e   :  { %22970 = vmatprep.subr.bf16.mxu0 %v24935_v30 }
0x1da1   :  { %22971 = vmatpush3.bf16.msra.mxu0 %v24935_v30 }
0x1da2   :  { %22988 = vmatprep.subr.bf16.mxu0 %v26935_v24 }
0x1da4   :  { %22957 = vmatmul.mubr.msk.bf16.gmra.mrb[20].mxu0 %vm764_vm4, %v24937_v8 }
0x1da5   :  { %22960 = vmatprep.mubr.msk.bf16.mxu0 %vm764_vm4, %v24938_v10  ;;  %v24952_v10 = vld [vmem:[%s28741_s19 + $0x140] sm:$0xff]  }
0x1dac   :  { %22961 = vmatmul.mubr.msk.bf16.gmra.mrb[24].mxu0 %vm764_vm4, %v24939_v31  ;;  %v24953_v31 = vld [vmem:[%s28741_s19 + $0x148] sm:$0xff]  }
0x1e67   :  { %v22950_v21 = vpop.f32.mrb[12].mxu0 }
0x1e68   :  { %v10608_v29 = vpop.f32.mrb[13].mxu0 }
0x1e69   :  { %v22951_v33 = vpop.f32.mrb[14].mxu0 }
0x1e6a   :  { %v10672_v34 = vpack.c.bf16 %v22951_v33, %v22950_v21  ;;  %v10611_v22 = vpop.f32.mrb[15].mxu0  ;;  %v24954_v21 = vld [vmem:[%s28741_s19 + $0x150] sm:$0xff]  }
0x1e6b   :  { %v10671_v42 = vpack.c.bf16 %v10611_v22, %v10608_v29  ;;  %v24961_v29 = vld [vmem:[%s28744_s12 + $0xa8] sm:$0xff]   ;;  %v24962_v33 = vld [vmem:[%s28744_s12 + $0xb0] sm:$0xff]   ;;  %v24956_v22 = vld [vmem:[%s28741_s19 + $0x160] sm:$0xff]  }
0x1e6d   :  { %22972 = vmatprep.mubr.msk.bf16.mxu0 %vm3187_vm6, %v10671_v42  ;;  %v24957_v42 = vld [vmem:[%s28741_s19 + $0x168] sm:$0xff]  }
0x1e6e   :  { %22973 = vmatmul.mubr.msk.bf16.vlgmr.msra.gmra.mrb[236].mxu0 %vm3187_vm6, %v10672_v34  ;;  %v24955_v34 = vld [vmem:[%s28741_s19 + $0x158] sm:$0xff]  }
0x1e6f   :  { %22989 = vmatpush3.bf16.msra.mxu0 %v26935_v24  ;;  %v22954_v45 = vpop.f32.mrb[16].mxu0 }
0x1e70   :  { %22990 = vmatprep.subr.bf16.mxu0 %v26933_v15  ;;  %v10624_v54 = vpop.f32.mrb[17].mxu0 }
0x1e71   :  { %v22955_v28 = vpop.f32.mrb[18].mxu0 }
0x1e72   :  { %v10674_v63 = vpack.c.bf16 %v22955_v28, %v22954_v45  ;;  %v10627_v3 = vpop.f32.mrb[19].mxu0  ;;  %v24958_v45 = vld [vmem:[%s28741_s19 + $0x170] sm:$0xff]  }
0x1e73   :  { %v10673_v20 = vpack.c.bf16 %v10627_v3, %v10624_v54  ;;  %22991 = vmatpush3.bf16.msra.mxu0 %v26933_v15  ;;  %v24959_v54 = vld [vmem:[%s28741_s19 + $0x178] sm:$0xff]  }
0x1e74   :  { %23008 = vmatprep.subr.bf16.mxu0 %v24941_v1 }
0x1e75   :  { %22976 = vmatprep.mubr.msk.bf16.mxu0 %vm3187_vm6, %v10673_v20 }
0x1e76   :  { %22977 = vmatmul.mubr.msk.bf16.gmra.mrb[240].mxu0 %vm3187_vm6, %v10674_v63  ;;  %v24963_v63 = vld [vmem:[%s28744_s12 + $0xb8] sm:$0xff]  }
0x1e77   :  { %v22958_v46 = vpop.f32.mrb[20].mxu0 }
0x1e78   :  { %v10640_v39 = vpop.f32.mrb[21].mxu0 }
0x1e79   :  { %v22959_v25 = vpop.f32.mrb[22].mxu0 }
0x1e7a   :  { %v10676_v44 = vpack.c.bf16 %v22959_v25, %v22958_v46  ;;  %v10643_v48 = vpop.f32.mrb[23].mxu0  ;;  %v24986_v46 = vld [vmem:[%s28741_s19 + $0x410] sm:$0xff]  }
0x1e7b   :  { %v10675_v50 = vpack.c.bf16 %v10643_v48, %v10640_v39 }
0x1e7d   :  { %22980 = vmatprep.mubr.msk.bf16.mxu0 %vm3187_vm6, %v10675_v50 }
0x1e7e   :  { %22981 = vmatmul.mubr.msk.bf16.gmra.mrb[244].mxu0 %vm3187_vm6, %v10676_v44 }
0x1e7f   :  { %v22962_v41 = vpop.f32.mrb[24].mxu0 }
0x1e80   :  { %v10656_v43 = vpop.f32.mrb[25].mxu0 }
0x1e81   :  { %v22963_v57 = vpop.f32.mrb[26].mxu0 }
0x1e82   :  { %v10678_v47 = vpack.c.bf16 %v22963_v57, %v22962_v41  ;;  %v10659_v49 = vpop.f32.mrb[27].mxu0  ;;  %v27406_v41 = vld [vmem:[%s28744_s12 + $0xc0] sm:$0xff]  }
0x1e83   :  { %v10677_v52 = vpack.c.bf16 %v10659_v49, %v10656_v43 }
0x1e85   :  { %22984 = vmatprep.mubr.msk.bf16.mxu0 %vm3187_vm6, %v10677_v52 }
0x1e86   :  { %22985 = vmatmul.mubr.msk.bf16.gmra.mrb[248].mxu0 %vm3187_vm6, %v10678_v47 }
0x1e87   :  { %22992 = vmatprep.mubr.msk.bf16.mxu0 %vm764_vm4, %v24940_v61 }
0x1e8e   :  { %22993 = vmatmul.mubr.msk.bf16.vlgmr.msra.gmra.mrb[28].mxu0 %vm764_vm4, %v24942_v23  ;;  %v24984_v23 = vld [vmem:[%s28741_s19 + $0x408] sm:$0xff]  }
0x1e8f   :  { %23009 = vmatpush3.bf16.msra.mxu0 %v24941_v1  ;;  %22996 = vmatprep.mubr.msk.bf16.mxu0 %vm764_vm4, %v24944_v53  ;;  %v27384_v1 = vpop.f32.mrb[156].mxu1 }
0x1e90   :  { %23010 = vmatprep.subr.bf16.mxu0 %v24943_v56  ;;  %v27386_v28 = vpop.f32.mrb[157].mxu1 }
0x1e91   :  { %v27389_v3 = vpop.f32.mrb[158].mxu1 }
0x1e92   :  { %v27391_v20 = vpop.f32.mrb[159].mxu1 }
0x1e93   :  { %23011 = vmatpush3.bf16.msra.mxu0 %v24943_v56  ;;  %v27397_v25 = vpop.f32.mrb[160].mxu1 }
0x1e94   :  { %23012 = vmatprep.subr.bf16.mxu0 %v24945_v58  ;;  %v27399_v44 = vpop.f32.mrb[161].mxu1 }
0x1e95   :  { %v27401_v48 = vpop.f32.mrb[162].mxu1 }
0x1e96   :  { %22997 = vmatmul.mubr.msk.bf16.gmra.mrb[32].mxu0 %vm764_vm4, %v24946_v59  ;;  %v27403_v50 = vpop.f32.mrb[163].mxu1 }
0x1e97   :  { %23013 = vmatpush3.bf16.msra.mxu0 %v24945_v58  ;;  %23000 = vmatprep.mubr.msk.bf16.mxu0 %vm764_vm4, %v24948_v60  ;;  %v27413_v47 = vpop.f32.mrb[164].mxu1 }
0x1e98   :  { %23014 = vmatprep.subr.bf16.mxu0 %v24947_v5  ;;  %v27415_v49 = vpop.f32.mrb[165].mxu1 }
0x1e99   :  { %v27417_v52 = vpop.f32.mrb[166].mxu1 }
0x1e9a   :  { %v27419_v61 = vpop.f32.mrb[167].mxu1 }
0x1e9b   :  { %23015 = vmatpush3.bf16.msra.mxu0 %v24947_v5  ;;  %v27425_v56 = vpop.f32.mrb[168].mxu1 }
0x1e9c   :  { %23032 = vmatprep.subr.bf16.mxu0 %v26935_v24  ;;  %v27427_v58 = vpop.f32.mrb[169].mxu1 }
0x1e9d   :  { %v27429_v59 = vpop.f32.mrb[170].mxu1 }
0x1e9e   :  { %23001 = vmatmul.mubr.msk.bf16.gmra.mrb[36].mxu0 %vm764_vm4, %v24949_v4  ;;  %v27431_v60 = vpop.f32.mrb[171].mxu1  ;;  %v24983_v4 = vld [vmem:[%s28741_s19 + $0x400] sm:$0xff]  }
0x1e9f   :  { %23004 = vmatprep.mubr.msk.bf16.mxu0 %vm764_vm4, %v24950_v55  ;;  %v27437_v55 = vpop.f32.mrb[172].mxu1 }
0x1ea6   :  { %23005 = vmatmul.mubr.msk.bf16.gmra.mrb[40].mxu0 %vm764_vm4, %v24951_v51  ;;  %v27439_v51 = vpop.f32.mrb[173].mxu1 }
0x1f61   :  { %v22994_v6 = vpop.f32.mrb[28].mxu0 }
0x1f62   :  { %v10963_v40 = vpop.f32.mrb[29].mxu0 }
0x1f63   :  { %v22995_v7 = vpop.f32.mrb[30].mxu0 }
0x1f64   :  { %v11027_v62 = vpack.c.bf16 %v22995_v7, %v22994_v6  ;;  %v10966_v0 = vpop.f32.mrb[31].mxu0  ;;  %v27441_v6 = vpop.f32.mrb[174].mxu1 }
0x1f65   :  { %v11026_v2 = vpack.c.bf16 %v10966_v0, %v10963_v40  ;;  %v27445_v7 = vpop.f32.mrb[175].mxu1  ;;  %v24981_v40 = vld [vmem:[%s28741_s19 + $0x3f8] sm:$0xff]  }
0x1f66   :  { %v27449_v0 = vpop.f32.mrb[176].mxu1 }
0x1f67   :  { %23016 = vmatprep.mubr.msk.bf16.mxu0 %vm3187_vm6, %v11026_v2  ;;  %v27451_v2 = vpop.f32.mrb[177].mxu1 }
0x1f68   :  { %23017 = vmatmul.mubr.msk.bf16.vlgmr.msra.gmra.mrb[236].mxu0 %vm3187_vm6, %v11027_v62 }
0x1f69   :  { %23033 = vmatpush3.bf16.msra.mxu0 %v26935_v24  ;;  %v22998_v32 = vpop.f32.mrb[32].mxu0 }
0x1f6a   :  { %23034 = vmatprep.subr.bf16.mxu0 %v26933_v15  ;;  %v10979_v12 = vpop.f32.mrb[33].mxu0 }
0x1f6b   :  { %v22999_v16 = vpop.f32.mrb[34].mxu0 }
0x1f6c   :  { %v11029_v17 = vpack.c.bf16 %v22999_v16, %v22998_v32  ;;  %v10982_v18 = vpop.f32.mrb[35].mxu0  ;;  %v27453_v32 = vpop.f32.mrb[178].mxu1  ;;  %v24980_v16 = vld [vmem:[%s28741_s19 + $0x3f0] sm:$0xff]  }
0x1f6d   :  { %v11028_v19 = vpack.c.bf16 %v10982_v18, %v10979_v12  ;;  %23035 = vmatpush3.bf16.msra.mxu0 %v26933_v15 }
0x1f6e   :  { %23052 = vmatprep.subr.bf16.mxu0 %v24960_v14 }
0x1f6f   :  { %23020 = vmatprep.mubr.msk.bf16.mxu0 %vm3187_vm6, %v11028_v19 }
0x1f70   :  { %23021 = vmatmul.mubr.msk.bf16.gmra.mrb[240].mxu0 %vm3187_vm6, %v11029_v17 }
0x1f71   :  { %v23002_v11 = vpop.f32.mrb[36].mxu0 }
0x1f72   :  { %v10995_v13 = vpop.f32.mrb[37].mxu0 }
0x1f73   :  { %v23003_v24 = vpop.f32.mrb[38].mxu0 }
0x1f74   :  { %v11031_v35 = vpack.c.bf16 %v23003_v24, %v23002_v11  ;;  %v10998_v36 = vpop.f32.mrb[39].mxu0  ;;  %v24978_v11 = vld [vmem:[%s28741_s19 + $0x3e8] sm:$0xff]  }
0x1f75   :  { %v11030_v37 = vpack.c.bf16 %v10998_v36, %v10995_v13 }
0x1f77   :  { %23024 = vmatprep.mubr.msk.bf16.mxu0 %vm3187_vm6, %v11030_v37 }
0x1f78   :  { %23025 = vmatmul.mubr.msk.bf16.gmra.mrb[244].mxu0 %vm3187_vm6, %v11031_v35 }
0x1f79   :  { %v23006_v15 = vpop.f32.mrb[40].mxu0 }
0x1f7a   :  { %v11011_v38 = vpop.f32.mrb[41].mxu0 }
0x1f7b   :  { %v23007_v9 = vpop.f32.mrb[42].mxu0 }
0x1f7c   :  { %v11033_v27 = vpack.c.bf16 %v23007_v9, %v23006_v15  ;;  %v11014_v30 = vpop.f32.mrb[43].mxu0  ;;  %v24977_v9 = vld [vmem:[%s28741_s19 + $0x3e0] sm:$0xff]  }
0x1f7d   :  { %v11032_v8 = vpack.c.bf16 %v11014_v30, %v11011_v38 }
0x1f7f   :  { %23028 = vmatprep.mubr.msk.bf16.mxu0 %vm3187_vm6, %v11032_v8 }
0x1f80   :  { %23029 = vmatmul.mubr.msk.bf16.gmra.mrb[248].mxu0 %vm3187_vm6, %v11033_v27 }
0x1f81   :  { %23036 = vmatprep.mubr.msk.bf16.mxu0 %vm764_vm4, %v24952_v10 }
0x1f88   :  { %23037 = vmatmul.mubr.msk.bf16.vlgmr.msra.gmra.mrb[44].mxu0 %vm764_vm4, %v24953_v31 }
0x1f89   :  { %23040 = vmatprep.mubr.msk.bf16.mxu0 %vm764_vm4, %v24954_v21  ;;  %23053 = vmatpush3.bf16.msra.mxu0 %v24960_v14  ;;  %v27457_v14 = vpop.f32.mrb[179].mxu1 }
0x1f8a   :  { %23054 = vmatprep.subr.bf16.mxu0 %v24961_v29  ;;  %v27461_v17 = vpop.f32.mrb[180].mxu1 }
0x1f8b   :  { %v27463_v18 = vpop.f32.mrb[181].mxu1 }
0x1f8c   :  { %v27465_v19 = vpop.f32.mrb[182].mxu1 }
0x1f8d   :  { %23055 = vmatpush3.bf16.msra.mxu0 %v24961_v29  ;;  %v27469_v13 = vpop.f32.mrb[183].mxu1 }
0x1f8e   :  { %23056 = vmatprep.subr.bf16.mxu0 %v24962_v33  ;;  %v27473_v35 = vpop.f32.mrb[184].mxu1 }
0x1f8f   :  { %v27475_v36 = vpop.f32.mrb[185].mxu1 }
0x1f90   :  { %23041 = vmatmul.mubr.msk.bf16.gmra.mrb[48].mxu0 %vm764_vm4, %v24955_v34  ;;  %v27477_v37 = vpop.f32.mrb[186].mxu1 }
0x1f91   :  { %23044 = vmatprep.mubr.msk.bf16.mxu0 %vm764_vm4, %v24956_v22  ;;  %23057 = vmatpush3.bf16.msra.mxu0 %v24962_v33  ;;  %v27481_v38 = vpop.f32.mrb[187].mxu1 }
0x1f92   :  { %23058 = vmatprep.subr.bf16.mxu0 %v24963_v63  ;;  %v27485_v27 = vpop.f32.mrb[188].mxu1 }
0x1f93   :  { %v27487_v30 = vpop.f32.mrb[189].mxu1 }
0x1f94   :  { %v27489_v8 = vpop.f32.mrb[190].mxu1 }
0x1f95   :  { %23059 = vmatpush3.bf16.msra.mxu0 %v24963_v63  ;;  %v27493_v31 = vpop.f32.mrb[191].mxu1  ;;  %v24975_v63 = vld [vmem:[%s28741_s19 + $0x3d8] sm:$0xff]  }
0x1f96   :  { %23096 = vmatprep.subr.bf16.mxu0 %v27406_v41  ;;  %v27497_v29 = vpop.f32.mrb[192].mxu1 }
0x1f97   :  { %v27499_v33 = vpop.f32.mrb[193].mxu1 }
0x1f98   :  { %23045 = vmatmul.mubr.msk.bf16.gmra.mrb[52].mxu0 %vm764_vm4, %v24957_v42  ;;  %v27501_v34 = vpop.f32.mrb[194].mxu1 }
0x1f99   :  { %23048 = vmatprep.mubr.msk.bf16.mxu0 %vm764_vm4, %v24958_v45  ;;  %v27505_v42 = vpop.f32.mrb[195].mxu1  ;;  %v24987_v45 = vld [vmem:[%s28741_s19 + $0x418] sm:$0xff]  }
0x1f9a   :  { %v27511_v26 = vpop.f32.mrb[196].mxu1 }
0x1f9b   :  { %v27514_v10 = vpop.f32.mrb[197].mxu1 }
0x1f9c   :  { %v27517_v21 = vpop.f32.mrb[198].mxu1 }
0x1f9d   :  { %v27521_v15 = vpop.f32.mrb[199].mxu1 }
0x1f9e   :  { %v27527_v24 = vpop.f32.mrb[200].mxu1 }
0x1f9f   :  { %28745 = vst [vmem:[#allocation24_spill] sm:$0xff] %v27527_v24 }
0x1fa0   :  { %23049 = vmatmul.mubr.msk.bf16.gmra.mrb[56].mxu0 %vm764_vm4, %v24959_v54  ;;  %v24974_v54 = vld [vmem:[%s28741_s19 + $0x3d0] sm:$0xff]  }
0x1fa1   :  { %23480 = vmatprep.mubr.msk.bf16.mxu1 %vm764_vm4, %v24974_v54  ;;  %v27530_v54 = vpop.f32.mrb[201].mxu1 }
0x1fa2   :  { %23481 = vmatmul.mubr.msk.bf16.gmra.mrb[48].mxu1 %vm764_vm4, %v24975_v63  ;;  %v27533_v63 = vpop.f32.mrb[202].mxu1 }
0x1fa3   :  { %23484 = vmatprep.mubr.msk.bf16.mxu1 %vm764_vm4, %v24977_v9  ;;  %v27537_v12 = vpop.f32.mrb[203].mxu1 }
0x1fa4   :  { %v27543_v62 = vpop.f32.mrb[204].mxu1 }
0x1fa5   :  { %28746 = vst [vmem:[#allocation25_spill] sm:$0xff] %v27543_v62  ;;  %v27546_v9 = vpop.f32.mrb[205].mxu1 }
0x1fa6   :  { %28747 = vst [vmem:[#allocation26_spill] sm:$0xff] %v27546_v9 }
0x1faa   :  { %23485 = vmatmul.mubr.msk.bf16.gmra.mrb[52].mxu1 %vm764_vm4, %v24978_v11  ;;  %v27549_v11 = vpop.f32.mrb[206].mxu1 }
0x1fab   :  { %23488 = vmatprep.mubr.msk.bf16.mxu1 %vm764_vm4, %v24980_v16  ;;  %28748 = vst [vmem:[#allocation27_spill] sm:$0xff] %v27549_v11  ;;  %v27553_v5 = vpop.f32.mrb[207].mxu1 }
0x1fac   :  { %28749 = vst [vmem:[#allocation28_spill] sm:$0xff] %v27553_v5  ;;  %v27559_v53 = vpop.f32.mrb[208].mxu1  ;;  %v24993_v5 = vld [vmem:[%s28741_s19 + $0x438] sm:$0xff]  }
0x1fad   :  { %28750 = vst [vmem:[#allocation29_spill] sm:$0xff] %v27559_v53  ;;  %v27562_v16 = vpop.f32.mrb[209].mxu1 }
0x1fae   :  { %28751 = vst [vmem:[#allocation30_spill] sm:$0xff] %v27562_v16 }
0x1fb2   :  { %23489 = vmatmul.mubr.msk.bf16.gmra.mrb[56].mxu1 %vm764_vm4, %v24981_v40  ;;  %v27565_v40 = vpop.f32.mrb[210].mxu1 }
0x1fb3   :  { %23520 = vmatprep.mubr.msk.bf16.mxu1 %vm764_vm4, %v24983_v4  ;;  %28752 = vst [vmem:[#allocation31_spill] sm:$0xff] %v27565_v40  ;;  %v27569_v43 = vpop.f32.mrb[211].mxu1  ;;  %v24989_v40 = vld [vmem:[%s28741_s19 + $0x420] sm:$0xff]  }
0x1fb4   :  { %28753 = vst [vmem:[#allocation32_spill] sm:$0xff] %v27569_v43  ;;  %v27573_v57 = vpop.f32.mrb[212].mxu1 }
0x1fb5   :  { %28754 = vst [vmem:[#allocation33_spill] sm:$0xff] %v27573_v57  ;;  %v27576_v39 = vpop.f32.mrb[213].mxu1  ;;  %v24990_v57 = vld [vmem:[%s28741_s19 + $0x428] sm:$0xff]  }
0x1fb6   :  { %28755 = vst [vmem:[#allocation34_spill] sm:$0xff] %v27576_v39  ;;  %v27578_v4 = vpop.f32.mrb[214].mxu1  ;;  %v24992_v39 = vld [vmem:[%s28741_s19 + $0x430] sm:$0xff]  }
0x1fb7   :  { %28756 = vst [vmem:[#allocation35_spill] sm:$0xff] %v27578_v4  ;;  %v27583_v62 = vpop.f32.mrb[215].mxu1 }
0x1fb8   :  { %28757 = vst [vmem:[#allocation36_spill] sm:$0xff] %v27583_v62  ;;  %v27589_v53 = vpop.f32.mrb[216].mxu1 }
0x1fb9   :  { %28758 = vst [vmem:[#allocation37_spill] sm:$0xff] %v27589_v53  ;;  %v27592_v16 = vpop.f32.mrb[217].mxu1 }
0x1fba   :  { %23521 = vmatmul.mubr.msk.bf16.vlgmr.msra.gmra.mrb[60].mxu1 %vm764_vm4, %v24984_v23  ;;  %28759 = vst [vmem:[#allocation38_spill] sm:$0xff] %v27592_v16  ;;  %v27594_v43 = vpop.f32.mrb[218].mxu1 }
0x1fbb   :  { %23524 = vmatprep.mubr.msk.bf16.mxu1 %vm764_vm4, %v24986_v46  ;;  %28760 = vst [vmem:[#allocation39_spill] sm:$0xff] %v27594_v43  ;;  %v27599_v23 = vpop.f32.mrb[219].mxu1 }
0x1fbc   :  { %28761 = vst [vmem:[#allocation40_spill] sm:$0xff] %v27599_v23  ;;  %v27605_v4 = vpop.f32.mrb[220].mxu1  ;;  %v24965_v23 = vld [vmem:[%s28744_s12 + $0xc8] sm:$0xff]  }
0x1fbd   :  { %28762 = vst [vmem:[#allocation41_spill] sm:$0xff] %v27605_v4  ;;  %v27608_v11 = vpop.f32.mrb[221].mxu1 }
0x1fbe   :  { %28763 = vst [vmem:[#allocation42_spill] sm:$0xff] %v27608_v11  ;;  %v27610_v9 = vpop.f32.mrb[222].mxu1 }
0x1fbf   :  { %28764 = vst [vmem:[#allocation43_spill] sm:$0xff] %v27610_v9  ;;  %v27615_v43 = vpop.f32.mrb[223].mxu1  ;;  %v24967_v9 = vld [vmem:[%s28744_s12 + $0xd8] sm:$0xff]  }
0x1fc0   :  { %28765 = vst [vmem:[#allocation44_spill] sm:$0xff] %v27615_v43 }
0x1fc2   :  { %23525 = vmatmul.mubr.msk.bf16.gmra.mrb[64].mxu1 %vm764_vm4, %v24987_v45 }
0x1fc3   :  { %23528 = vmatprep.mubr.msk.bf16.mxu1 %vm764_vm4, %v24989_v40 }
0x1fca   :  { %23529 = vmatmul.mubr.msk.bf16.gmra.mrb[68].mxu1 %vm764_vm4, %v24990_v57 }
0x1fcb   :  { %23532 = vmatprep.mubr.msk.bf16.mxu1 %vm764_vm4, %v24992_v39  ;;  %v27625_v39 = vpop.f32.mrb[224].mxu1 }
0x1fcc   :  { %28766 = vst [vmem:[#allocation45_spill] sm:$0xff] %v27625_v39 }
0x1fd2   :  { %23533 = vmatmul.mubr.msk.bf16.gmra.mrb[72].mxu1 %vm764_vm4, %v24993_v5 }
0x205b   :  { %v23038_v45 = vpop.f32.mrb[44].mxu0 }
0x205c   :  { %v11318_v62 = vpop.f32.mrb[45].mxu0 }
0x205d   :  { %v23039_v40 = vpop.f32.mrb[46].mxu0 }
0x205e   :  { %v11382_v46 = vpack.c.bf16 %v23039_v40, %v23038_v45  ;;  %v11321_v22 = vpop.f32.mrb[47].mxu0 }
0x205f   :  { %v11381_v57 = vpack.c.bf16 %v11321_v22, %v11318_v62  ;;  %v24966_v62 = vld [vmem:[%s28744_s12 + $0xd0] sm:$0xff]   ;;  %v27628_v22 = vpop.f32.mrb[225].mxu1 }
0x2060   :  { %28767 = vst [vmem:[#allocation46_spill] sm:$0xff] %v27628_v22  ;;  %v27630_v53 = vpop.f32.mrb[226].mxu1 }
0x2061   :  { %23060 = vmatprep.mubr.msk.bf16.mxu0 %vm3187_vm6, %v11381_v57  ;;  %28768 = vst [vmem:[#allocation47_spill] sm:$0xff] %v27630_v53 }
0x2062   :  { %23061 = vmatmul.mubr.msk.bf16.vlgmr.msra.gmra.mrb[236].mxu0 %vm3187_vm6, %v11382_v46  ;;  %v24968_v46 = vld [vmem:[%s28744_s12 + $0xe0] sm:$0xff]  }
0x2063   :  { %v23042_v24 = vpop.f32.mrb[48].mxu0  ;;  %23097 = vmatpush3.bf16.msra.mxu0 %v27406_v41  ;;  %v27634_v41 = vpop.f32.mrb[227].mxu1 }
0x2064   :  { %v11334_v45 = vpop.f32.mrb[49].mxu0  ;;  %23098 = vmatprep.subr.bf16.mxu0 %v24965_v23  ;;  %28769 = vst [vmem:[#allocation48_spill] sm:$0xff] %v27634_v41 }
0x2065   :  { %v23043_v40 = vpop.f32.mrb[50].mxu0 }
0x2066   :  { %v11384_v57 = vpack.c.bf16 %v23043_v40, %v23042_v24  ;;  %v11337_v16 = vpop.f32.mrb[51].mxu0  ;;  %v27641_v24 = vpop.f32.mrb[228].mxu1 }
0x2067   :  { %v11383_v5 = vpack.c.bf16 %v11337_v16, %v11334_v45  ;;  %23099 = vmatpush3.bf16.msra.mxu0 %v24965_v23  ;;  %28770 = vst [vmem:[#allocation49_spill] sm:$0xff] %v27641_v24  ;;  %v27644_v39 = vpop.f32.mrb[229].mxu1  ;;  %v28771_v24 = vpack.c.bf16 %v27391_v20, %v27386_v28  ;;  %v28772_v28 = vpack.c.bf16 %v27389_v3, %v27384_v1 }
0x2068   :  { %23100 = vmatprep.subr.bf16.mxu0 %v24966_v62  ;;  %v27646_v23 = vpop.f32.mrb[230].mxu1  ;;  %v28773_v20 = vpack.c.bf16 %v27403_v50, %v27399_v44  ;;  %v24971_v50 = vld [vmem:[%s28744_s12 + $0xf8] sm:$0xff]  }
0x2069   :  { %23064 = vmatprep.mubr.msk.bf16.mxu0 %vm3187_vm6, %v11383_v5  ;;  %v27650_v5 = vpop.f32.mrb[231].mxu1 }
0x206a   :  { %23065 = vmatmul.mubr.msk.bf16.gmra.mrb[240].mxu0 %vm3187_vm6, %v11384_v57  ;;  %v27656_v41 = vpop.f32.mrb[232].mxu1 }
0x206b   :  { %v23046_v11 = vpop.f32.mrb[52].mxu0  ;;  %23101 = vmatpush3.bf16.msra.mxu0 %v24966_v62 }
0x206c   :  { %v11350_v40 = vpop.f32.mrb[53].mxu0  ;;  %23102 = vmatprep.subr.bf16.mxu0 %v24967_v9 }
0x206d   :  { %v23047_v16 = vpop.f32.mrb[54].mxu0 }
0x206e   :  { %v11386_v45 = vpack.c.bf16 %v23047_v16, %v23046_v11  ;;  %v11353_v4 = vpop.f32.mrb[55].mxu0  ;;  %v27658_v16 = vpop.f32.mrb[233].mxu1 }
0x206f   :  { %v11385_v57 = vpack.c.bf16 %v11353_v4, %v11350_v40  ;;  %23103 = vmatpush3.bf16.msra.mxu0 %v24967_v9  ;;  %v27660_v53 = vpop.f32.mrb[234].mxu1 }
0x2070   :  { %23140 = vmatprep.subr.bf16.mxu0 %v24968_v46  ;;  %v27664_v62 = vpop.f32.mrb[235].mxu1 }
0x2071   :  { %23068 = vmatprep.mubr.msk.bf16.mxu0 %vm3187_vm6, %v11385_v57 }
0x2072   :  { %23069 = vmatmul.mubr.msk.bf16.gmra.mrb[244].mxu0 %vm3187_vm6, %v11386_v45 }
0x2073   :  { %v23050_v22 = vpop.f32.mrb[56].mxu0 }
0x2074   :  { %v11366_v11 = vpop.f32.mrb[57].mxu0 }
0x2075   :  { %v23051_v43 = vpop.f32.mrb[58].mxu0 }
0x2076   :  { %v11388_v4 = vpack.c.bf16 %v23051_v43, %v23050_v22  ;;  %v11369_v9 = vpop.f32.mrb[59].mxu0  ;;  %v27674_v43 = vpop.f32.mrb[236].mxu1 }
0x2077   :  { %v11387_v57 = vpack.c.bf16 %v11369_v9, %v11366_v11  ;;  %v27676_v22 = vpop.f32.mrb[237].mxu1  ;;  %v24970_v11 = vld [vmem:[%s28744_s12 + $0xf0] sm:$0xff]  }
0x2078   :  { %v27678_v40 = vpop.f32.mrb[238].mxu1 }
0x2079   :  { %23072 = vmatprep.mubr.msk.bf16.mxu0 %vm3187_vm6, %v11387_v57  ;;  %v27682_v9 = vpop.f32.mrb[239].mxu1  ;;  %v24969_v57 = vld [vmem:[%s28744_s12 + $0xe8] sm:$0xff]  }
0x207a   :  { %23073 = vmatmul.mubr.msk.bf16.gmra.mrb[248].mxu0 %vm3187_vm6, %v11388_v4 }
0x207b   :  { %23104 = vmatprep.mubr.msk.bf16.mxu0 %vm3187_vm6, %v28771_v24  ;;  %v27695_v24 = vpop.f32.mrb[240].mxu1 }
0x207c   :  { %28774 = vst [vmem:[#allocation50_spill] sm:$0xff] %v27695_v24  ;;  %v27698_v45 = vpop.f32.mrb[241].mxu1 }
0x207d   :  { %v27700_v4 = vpop.f32.mrb[242].mxu1 }
0x207e   :  { %v27704_v3 = vpop.f32.mrb[243].mxu1 }
0x2082   :  { %23105 = vmatmul.mubr.msk.bf16.vlgmr.msra.gmra.mrb[236].mxu0 %vm3187_vm6, %v28772_v28  ;;  %v28776_v28 = vpack.c.bf16 %v27419_v61, %v27415_v49  ;;  %v28777_v49 = vpack.c.bf16 %v27417_v52, %v27413_v47  ;;  %v28778_v61 = vpack.c.bf16 %v27431_v60, %v27427_v58  ;;  %v28779_v52 = vpack.c.bf16 %v27429_v59, %v27425_v56  ;;  %v24973_v59 = vld [vmem:[%s28744_s12 + $0x108] sm:$0xff]  }
0x2083   :  { %23108 = vmatprep.mubr.msk.bf16.mxu0 %vm3187_vm6, %v28773_v20  ;;  %23141 = vmatpush3.bf16.msra.mxu0 %v24968_v46  ;;  %v28775_v46 = vpack.c.bf16 %v27401_v48, %v27397_v25  ;;  %v27717_v20 = vpop.f32.mrb[244].mxu1  ;;  %v28780_v58 = vpack.c.bf16 %v27445_v7, %v27439_v51  ;;  %v28781_v51 = vpack.c.bf16 %v27441_v6, %v27437_v55 }
0x2084   :  { %23142 = vmatprep.subr.bf16.mxu0 %v24969_v57  ;;  %v27720_v1 = vpop.f32.mrb[245].mxu1  ;;  %v28782_v7 = vpack.c.bf16 %v27457_v14, %v27451_v2  ;;  %v24979_v14 = vld [vmem:[%s28744_s12 + $0x118] sm:$0xff]  }
0x2085   :  { %v27722_v44 = vpop.f32.mrb[246].mxu1 }
0x2086   :  { %v27726_v25 = vpop.f32.mrb[247].mxu1 }
0x2087   :  { %23143 = vmatpush3.bf16.msra.mxu0 %v24969_v57  ;;  %v24972_v57 = vld [vmem:[%s28744_s12 + $0x100] sm:$0xff]  }
0x2088   :  { %23144 = vmatprep.subr.bf16.mxu0 %v24970_v11 }
0x208a   :  { %23109 = vmatmul.mubr.msk.bf16.gmra.mrb[240].mxu0 %vm3187_vm6, %v28775_v46 }
0x208b   :  { %23112 = vmatprep.mubr.msk.bf16.mxu0 %vm3187_vm6, %v28776_v28  ;;  %23145 = vmatpush3.bf16.msra.mxu0 %v24970_v11  ;;  %v27738_v11 = vpop.f32.mrb[248].mxu1 }
0x208c   :  { %23146 = vmatprep.subr.bf16.mxu0 %v24971_v50  ;;  %v27740_v46 = vpop.f32.mrb[249].mxu1 }
0x208f   :  { %23147 = vmatpush3.bf16.msra.mxu0 %v24971_v50  ;;  %v27742_v50 = vpop.f32.mrb[250].mxu1 }
0x2090   :  { %23184 = vmatprep.subr.bf16.mxu0 %v24972_v57  ;;  %v27746_v24 = vpop.f32.mrb[251].mxu1 }
0x2091   :  { %v27758_v60 = vpop.f32.mrb[252].mxu1 }
0x2092   :  { %23113 = vmatmul.mubr.msk.bf16.gmra.mrb[244].mxu0 %vm3187_vm6, %v28777_v49  ;;  %v27760_v49 = vpop.f32.mrb[253].mxu1 }
0x2093   :  { %23116 = vmatprep.mubr.msk.bf16.mxu0 %vm3187_vm6, %v28778_v61  ;;  %v27762_v61 = vpop.f32.mrb[254].mxu1 }
0x2094   :  { %v27766_v47 = vpop.f32.mrb[255].mxu1 }
0x209a   :  { %23117 = vmatmul.mubr.msk.bf16.gmra.mrb[248].mxu0 %vm3187_vm6, %v28779_v52  ;;  %v27779_v52 = vpop.f32.mrb[0].mxu1 }
0x209b   :  { %23148 = vmatprep.mubr.msk.bf16.mxu0 %vm3187_vm6, %v28780_v58  ;;  %v24976_v58 = vld [vmem:[%s28744_s12 + $0x110] sm:$0xff]   ;;  %v27782_v28 = vpop.f32.mrb[1].mxu1 }
0x209c   :  { %v27784_v56 = vpop.f32.mrb[2].mxu1 }
0x209d   :  { %v27788_v6 = vpop.f32.mrb[3].mxu1 }
0x20a2   :  { %23149 = vmatmul.mubr.msk.bf16.vlgmr.msra.gmra.mrb[236].mxu0 %vm3187_vm6, %v28781_v51  ;;  %v28784_v51 = vpack.c.bf16 %v27469_v13, %v27463_v18  ;;  %v28785_v18 = vpack.c.bf16 %v27465_v19, %v27461_v17  ;;  %v28786_v13 = vpack.c.bf16 %v27481_v38, %v27475_v36  ;;  %v28787_v19 = vpack.c.bf16 %v27477_v37, %v27473_v35  ;;  %v24985_v37 = vld [vmem:[%s28744_s12 + $0x128] sm:$0xff]  }
0x20a3   :  { %23152 = vmatprep.mubr.msk.bf16.mxu0 %vm3187_vm6, %v28782_v7  ;;  %23185 = vmatpush3.bf16.msra.mxu0 %v24972_v57  ;;  %v28783_v57 = vpack.c.bf16 %v27453_v32, %v27449_v0  ;;  %v27801_v7 = vpop.f32.mrb[4].mxu1  ;;  %v28788_v36 = vpack.c.bf16 %v27493_v31, %v27487_v30  ;;  %v28789_v30 = vpack.c.bf16 %v27489_v8, %v27485_v27 }
0x20a4   :  { %23186 = vmatprep.subr.bf16.mxu0 %v24973_v59  ;;  %v27804_v55 = vpop.f32.mrb[5].mxu1  ;;  %v28790_v31 = vpack.c.bf16 %v27505_v42, %v27499_v33  ;;  %v24991_v42 = vld [vmem:[%s28744_s12 + $0x138] sm:$0xff]  }
0x20a5   :  { %v27806_v2 = vpop.f32.mrb[6].mxu1 }
0x20a6   :  { %v27810_v0 = vpop.f32.mrb[7].mxu1 }
0x20a7   :  { %23187 = vmatpush3.bf16.msra.mxu0 %v24973_v59  ;;  %v24982_v59 = vld [vmem:[%s28744_s12 + $0x120] sm:$0xff]  }
0x20a8   :  { %23188 = vmatprep.subr.bf16.mxu0 %v24976_v58 }
0x20aa   :  { %23153 = vmatmul.mubr.msk.bf16.gmra.mrb[240].mxu0 %vm3187_vm6, %v28783_v57 }
0x20ab   :  { %23156 = vmatprep.mubr.msk.bf16.mxu0 %vm3187_vm6, %v28784_v51  ;;  %23189 = vmatpush3.bf16.msra.mxu0 %v24976_v58  ;;  %v27822_v58 = vpop.f32.mrb[8].mxu1 }
0x20ac   :  { %23190 = vmatprep.subr.bf16.mxu0 %v24979_v14  ;;  %v27824_v57 = vpop.f32.mrb[9].mxu1 }
0x20af   :  { %23191 = vmatpush3.bf16.msra.mxu0 %v24979_v14  ;;  %v27826_v14 = vpop.f32.mrb[10].mxu1 }
0x20b0   :  { %23228 = vmatprep.subr.bf16.mxu0 %v24982_v59  ;;  %v27830_v48 = vpop.f32.mrb[11].mxu1 }
0x20b1   :  { %v27842_v38 = vpop.f32.mrb[12].mxu1 }
0x20b2   :  { %23157 = vmatmul.mubr.msk.bf16.gmra.mrb[244].mxu0 %vm3187_vm6, %v28785_v18  ;;  %v27844_v18 = vpop.f32.mrb[13].mxu1 }
0x20b3   :  { %23160 = vmatprep.mubr.msk.bf16.mxu0 %vm3187_vm6, %v28786_v13  ;;  %v27846_v13 = vpop.f32.mrb[14].mxu1 }
0x20b4   :  { %v27850_v17 = vpop.f32.mrb[15].mxu1 }
0x20ba   :  { %23161 = vmatmul.mubr.msk.bf16.gmra.mrb[248].mxu0 %vm3187_vm6, %v28787_v19  ;;  %v27863_v19 = vpop.f32.mrb[16].mxu1 }
0x20bb   :  { %23192 = vmatprep.mubr.msk.bf16.mxu0 %vm3187_vm6, %v28788_v36  ;;  %v24988_v36 = vld [vmem:[%s28744_s12 + $0x130] sm:$0xff]   ;;  %v27866_v51 = vpop.f32.mrb[17].mxu1 }
0x20bc   :  { %v27868_v35 = vpop.f32.mrb[18].mxu1 }
0x20bd   :  { %v27872_v8 = vpop.f32.mrb[19].mxu1 }
0x20c2   :  { %23193 = vmatmul.mubr.msk.bf16.vlgmr.msra.gmra.mrb[236].mxu0 %vm3187_vm6, %v28789_v30  ;;  %v28792_v30 = vpack.c.bf16 %v27521_v15, %v27514_v10  ;;  %v28794_v10 = vpack.c.bf16 %v27517_v21, %v27511_v26 }
0x20c3   :  { %23196 = vmatprep.mubr.msk.bf16.mxu0 %vm3187_vm6, %v28790_v31  ;;  %23229 = vmatpush3.bf16.msra.mxu0 %v24982_v59  ;;  %v28791_v59 = vpack.c.bf16 %v27501_v34, %v27497_v29  ;;  %v27885_v31 = vpop.f32.mrb[24].mxu1  ;;  %v28795_v34 = vpack.c.bf16 %v27537_v12, %v27530_v54  ;;  %v28800_v12 = vld [vmem:[#allocation24_spill] sm:$0xff] }
0x20c4   :  { %23230 = vmatprep.subr.bf16.mxu0 %v24985_v37  ;;  %28793 = vst [vmem:[#allocation51_spill] sm:$0xff] %v27885_v31  ;;  %v27888_v27 = vpop.f32.mrb[25].mxu1  ;;  %v28801_v21 = vpack.c.bf16 %v27533_v63, %v28800_v12  ;;  %v28802_v54 = vld [vmem:[#allocation28_spill] sm:$0xff] }
0x20c5   :  { %v27890_v33 = vpop.f32.mrb[26].mxu1  ;;  %v24995_v12 = vld [vmem:[%s28744_s12 + $0x148] sm:$0xff]  }
0x20c6   :  { %v27894_v29 = vpop.f32.mrb[27].mxu1 }
0x20c7   :  { %23231 = vmatpush3.bf16.msra.mxu0 %v24985_v37  ;;  %v24994_v37 = vld [vmem:[%s28744_s12 + $0x140] sm:$0xff]  }
0x20c8   :  { %23232 = vmatprep.subr.bf16.mxu0 %v24988_v36 }
0x20ca   :  { %23197 = vmatmul.mubr.msk.bf16.gmra.mrb[240].mxu0 %vm3187_vm6, %v28791_v59 }
0x20cb   :  { %23200 = vmatprep.mubr.msk.bf16.mxu0 %vm3187_vm6, %v28792_v30  ;;  %23233 = vmatpush3.bf16.msra.mxu0 %v24988_v36  ;;  %v27906_v36 = vpop.f32.mrb[28].mxu1 }
0x20cc   :  { %23234 = vmatprep.subr.bf16.mxu0 %v24991_v42  ;;  %28796 = vst [vmem:[#allocation52_spill] sm:$0xff] %v27906_v36  ;;  %v27908_v59 = vpop.f32.mrb[29].mxu1  ;;  %v24996_v36 = vld [vmem:[%s28744_s12 + $0x150] sm:$0xff]  }
0x20cd   :  { %28797 = vst [vmem:[#allocation53_spill] sm:$0xff] %v27908_v59 }
0x20cf   :  { %23235 = vmatpush3.bf16.msra.mxu0 %v24991_v42  ;;  %v27910_v42 = vpop.f32.mrb[30].mxu1 }
0x20d0   :  { %23272 = vmatprep.subr.bf16.mxu0 %v24994_v37  ;;  %28798 = vst [vmem:[#allocation54_spill] sm:$0xff] %v27910_v42  ;;  %v27914_v32 = vpop.f32.mrb[31].mxu1  ;;  %v28813_v42 = vld [vmem:[#allocation30_spill] sm:$0xff] }
0x20d1   :  { %28799 = vst [vmem:[#allocation55_spill] sm:$0xff] %v27914_v32  ;;  %v27926_v15 = vpop.f32.mrb[32].mxu1 }
0x20d2   :  { %23201 = vmatmul.mubr.msk.bf16.gmra.mrb[244].mxu0 %vm3187_vm6, %v28794_v10  ;;  %v28803_v10 = vld [vmem:[#allocation26_spill] sm:$0xff]  ;;  %28805 = vst [vmem:[#allocation24_spill] sm:$0xff] %v27926_v15  ;;  %v27928_v31 = vpop.f32.mrb[33].mxu1 }
0x20d3   :  { %23204 = vmatprep.mubr.msk.bf16.mxu0 %vm3187_vm6, %v28795_v34  ;;  %v28804_v34 = vpack.c.bf16 %v28802_v54, %v28803_v10  ;;  %28806 = vst [vmem:[#allocation28_spill] sm:$0xff] %v27928_v31  ;;  %v27930_v30 = vpop.f32.mrb[34].mxu1  ;;  %v28810_v54 = vld [vmem:[#allocation25_spill] sm:$0xff]  ;;  %v28823_v31 = vld [vmem:[#allocation34_spill] sm:$0xff] }
0x20d4   :  { %28807 = vst [vmem:[#allocation26_spill] sm:$0xff] %v27930_v30  ;;  %v27934_v26 = vpop.f32.mrb[35].mxu1  ;;  %v28822_v30 = vld [vmem:[#allocation36_spill] sm:$0xff] }
0x20d5   :  { %28808 = vst [vmem:[#allocation56_spill] sm:$0xff] %v27934_v26  ;;  %v27947_v32 = vpop.f32.mrb[36].mxu1  ;;  %v28824_v26 = vpack.c.bf16 %v28822_v30, %v28823_v31  ;;  %v28829_v30 = vld [vmem:[#allocation35_spill] sm:$0xff] }
0x20d6   :  { %v27950_v15 = vpop.f32.mrb[37].mxu1 }
0x20d7   :  { %28816 = vst [vmem:[#allocation25_spill] sm:$0xff] %v27950_v15  ;;  %v27952_v63 = vpop.f32.mrb[38].mxu1 }
0x20da   :  { %23205 = vmatmul.mubr.msk.bf16.gmra.mrb[248].mxu0 %vm3187_vm6, %v28801_v21  ;;  %v28809_v21 = vld [vmem:[#allocation27_spill] sm:$0xff] }
0x20db   :  { %23236 = vmatprep.mubr.msk.bf16.mxu0 %vm3187_vm6, %v28804_v34  ;;  %v28811_v10 = vpack.c.bf16 %v28809_v21, %v28810_v54  ;;  %v28812_v34 = vld [vmem:[#allocation32_spill] sm:$0xff]  ;;  %28815 = vst [vmem:[#allocation27_spill] sm:$0xff] %v27947_v32  ;;  %v27956_v54 = vpop.f32.mrb[39].mxu1 }
0x20dc   :  { %v28814_v59 = vpack.c.bf16 %v28812_v34, %v28813_v42  ;;  %28817 = vst [vmem:[#allocation32_spill] sm:$0xff] %v27952_v63  ;;  %28818 = vst [vmem:[#allocation30_spill] sm:$0xff] %v27956_v54  ;;  %v27969_v21 = vpop.f32.mrb[40].mxu1 }
0x20dd   :  { %v27972_v32 = vpop.f32.mrb[41].mxu1 }
0x20de   :  { %v27974_v42 = vpop.f32.mrb[42].mxu1 }
0x20df   :  { %28827 = vst [vmem:[#allocation36_spill] sm:$0xff] %v27974_v42 }
0x20e2   :  { %23237 = vmatmul.mubr.msk.bf16.vlgmr.msra.gmra.mrb[236].mxu0 %vm3187_vm6, %v28811_v10  ;;  %v28820_v10 = vld [vmem:[#allocation29_spill] sm:$0xff] }
0x20e3   :  { %23240 = vmatprep.mubr.msk.bf16.mxu0 %vm3187_vm6, %v28814_v59  ;;  %23273 = vmatpush3.bf16.msra.mxu0 %v24994_v37  ;;  %v24997_v37 = vld [vmem:[%s28744_s12 + $0x158] sm:$0xff]   ;;  %28826 = vst [vmem:[#allocation29_spill] sm:$0xff] %v27972_v32 }
0x20e4   :  { %23274 = vmatprep.subr.bf16.mxu0 %v24995_v12  ;;  %v28819_v59 = vld [vmem:[#allocation31_spill] sm:$0xff] }
0x20e5   :  { %v28821_v34 = vpack.c.bf16 %v28819_v59, %v28820_v10  ;;  %28825 = vst [vmem:[#allocation31_spill] sm:$0xff] %v27969_v21  ;;  %v27978_v59 = vpop.f32.mrb[43].mxu1  ;;  %v28832_v10 = vld [vmem:[#allocation40_spill] sm:$0xff] }
0x20e6   :  { %28828 = vst [vmem:[#allocation34_spill] sm:$0xff] %v27978_v59  ;;  %v27990_v54 = vpop.f32.mrb[20].mxu1 }
0x20e7   :  { %23275 = vmatpush3.bf16.msra.mxu0 %v24995_v12  ;;  %v24998_v12 = vld [vmem:[%s28744_s12 + $0x160] sm:$0xff]   ;;  %28835 = vst [vmem:[#allocation35_spill] sm:$0xff] %v27990_v54  ;;  %v27992_v63 = vpop.f32.mrb[21].mxu1 }
0x20e8   :  { %23276 = vmatprep.subr.bf16.mxu0 %v24996_v36 }
0x20ea   :  { %23241 = vmatmul.mubr.msk.bf16.gmra.mrb[240].mxu0 %vm3187_vm6, %v28821_v34  ;;  %v28833_v34 = vld [vmem:[#allocation38_spill] sm:$0xff] }
0x20eb   :  { %23244 = vmatprep.mubr.msk.bf16.mxu0 %vm3187_vm6, %v28824_v26  ;;  %23277 = vmatpush3.bf16.msra.mxu0 %v24996_v36  ;;  %v28830_v36 = vld [vmem:[#allocation33_spill] sm:$0xff]  ;;  %v28834_v15 = vpack.c.bf16 %v28832_v10, %v28833_v34  ;;  %v28844_v34 = vld [vmem:[#allocation42_spill] sm:$0xff] }
0x20ec   :  { %23278 = vmatprep.subr.bf16.mxu0 %v24997_v37  ;;  %v28831_v26 = vpack.c.bf16 %v28829_v30, %v28830_v36  ;;  %28836 = vst [vmem:[#allocation33_spill] sm:$0xff] %v27992_v63  ;;  %v28840_v36 = vld [vmem:[#allocation39_spill] sm:$0xff]  ;;  %v28850_v63 = vld [vmem:[#allocation41_spill] sm:$0xff] }
0x20ed   :  { %v25015_v30 = vld [vmem:[%s28838_s28] sm:$0xff]  }
0x20ee   :  { %23536 = vmatprep.subr.bf16.mxu1 %v25015_v30 }
0x20ef   :  { %23279 = vmatpush3.bf16.msra.mxu0 %v24997_v37  ;;  %v27994_v37 = vpop.f32.mrb[22].mxu1  ;;  %23537 = vmatpush3.bf16.msra.mxu1 %v25015_v30  ;;  %v25017_v30 = vld [vmem:[%s28838_s28 + $0x8] sm:$0xff]  }
0x20f0   :  { %23316 = vmatprep.subr.bf16.mxu0 %v24998_v12  ;;  %28837 = vst [vmem:[#allocation40_spill] sm:$0xff] %v27994_v37  ;;  %v27998_v21 = vpop.f32.mrb[23].mxu1  ;;  %23538 = vmatprep.subr.bf16.mxu1 %v25017_v30 }
0x20f1   :  { %28839 = vst [vmem:[#allocation38_spill] sm:$0xff] %v27998_v21  ;;  %v28010_v32 = vpop.f32.mrb[44].mxu1 }
0x20f2   :  { %23245 = vmatmul.mubr.msk.bf16.gmra.mrb[244].mxu0 %vm3187_vm6, %v28831_v26  ;;  %v28841_v26 = vld [vmem:[#allocation37_spill] sm:$0xff]  ;;  %28846 = vst [vmem:[#allocation39_spill] sm:$0xff] %v28010_v32  ;;  %v28012_v31 = vpop.f32.mrb[45].mxu1 }
0x20f3   :  { %23248 = vmatprep.mubr.msk.bf16.mxu0 %vm3187_vm6, %v28834_v15  ;;  %v28842_v10 = vpack.c.bf16 %v28840_v36, %v28841_v26  ;;  %v28843_v15 = vld [vmem:[#allocation44_spill] sm:$0xff]  ;;  %28847 = vst [vmem:[#allocation37_spill] sm:$0xff] %v28012_v31  ;;  %v28014_v54 = vpop.f32.mrb[46].mxu1  ;;  %v25000_v32 = vld [vmem:[%s28744_s12 + $0x170] sm:$0xff]   ;;  %v28859_v31 = vpack.c.bf16 %v27650_v5, %v27644_v39  ;;  %23539 = vmatpush3.bf16.msra.mxu1 %v25017_v30 }
0x20f4   :  { %v28845_v42 = vpack.c.bf16 %v28843_v15, %v28844_v34  ;;  %28848 = vst [vmem:[#allocation44_spill] sm:$0xff] %v28014_v54  ;;  %v28018_v37 = vpop.f32.mrb[47].mxu1  ;;  %v24999_v26 = vld [vmem:[%s28744_s12 + $0x168] sm:$0xff]   ;;  %v28853_v34 = vld [vmem:[#allocation46_spill] sm:$0xff]  ;;  %v28867_v39 = vpack.c.bf16 %v27682_v9, %v27676_v22 }
0x20f5   :  { %v28031_v59 = vpop.f32.mrb[48].mxu1  ;;  %v28862_v5 = vld [vmem:[#allocation49_spill] sm:$0xff] }
0x20f6   :  { %28855 = vst [vmem:[#allocation42_spill] sm:$0xff] %v28031_v59  ;;  %v28035_v36 = vpop.f32.mrb[49].mxu1  ;;  %v25004_v22 = vld [vmem:[%s28744_s12 + $0x190] sm:$0xff]  }
0x20f7   :  { %v28037_v54 = vpop.f32.mrb[50].mxu1 }
0x20fa   :  { %23249 = vmatmul.mubr.msk.bf16.gmra.mrb[248].mxu0 %vm3187_vm6, %v28842_v10  ;;  %v28849_v10 = vld [vmem:[#allocation43_spill] sm:$0xff] }
0x20fb   :  { %23280 = vmatprep.mubr.msk.bf16.mxu0 %vm3187_vm6, %v28845_v42  ;;  %v28851_v15 = vpack.c.bf16 %v28849_v10, %v28850_v63  ;;  %v28852_v42 = vld [vmem:[#allocation48_spill] sm:$0xff]  ;;  %v28041_v10 = vpop.f32.mrb[51].mxu1 }
0x20fc   :  { %v28854_v21 = vpack.c.bf16 %v28852_v42, %v28853_v34  ;;  %v28857_v42 = vld [vmem:[#allocation45_spill] sm:$0xff]  ;;  %v28054_v63 = vpop.f32.mrb[52].mxu1 }
0x20fd   :  { %28860 = vst [vmem:[#allocation43_spill] sm:$0xff] %v28054_v63 }
0x2102   :  { %23281 = vmatmul.mubr.msk.bf16.vlgmr.msra.gmra.mrb[236].mxu0 %vm3187_vm6, %v28851_v15  ;;  %v28856_v15 = vld [vmem:[#allocation47_spill] sm:$0xff] }
0x2103   :  { %23284 = vmatprep.mubr.msk.bf16.mxu0 %vm3187_vm6, %v28854_v21  ;;  %23317 = vmatpush3.bf16.msra.mxu0 %v24998_v12  ;;  %v25001_v12 = vld [vmem:[%s28744_s12 + $0x178] sm:$0xff]   ;;  %v28858_v34 = vpack.c.bf16 %v28856_v15, %v28857_v42  ;;  %v28058_v21 = vpop.f32.mrb[53].mxu1  ;;  %v25019_v15 = vld [vmem:[%s28838_s28 + $0x10] sm:$0xff]  }
0x2104   :  { %23318 = vmatprep.subr.bf16.mxu0 %v24999_v26  ;;  %v28060_v59 = vpop.f32.mrb[54].mxu1  ;;  %23540 = vmatprep.subr.bf16.mxu1 %v25019_v15 }
0x2105   :  { %28861 = vst [vmem:[#allocation41_spill] sm:$0xff] %v28060_v59  ;;  %v28064_v42 = vpop.f32.mrb[55].mxu1  ;;  %23541 = vmatpush3.bf16.msra.mxu1 %v25019_v15 }
0x2107   :  { %23319 = vmatpush3.bf16.msra.mxu0 %v24999_v26  ;;  %v25002_v26 = vld [vmem:[%s28744_s12 + $0x180] sm:$0xff]  }
0x2108   :  { %23320 = vmatprep.subr.bf16.mxu0 %v25000_v32 }
0x210a   :  { %23285 = vmatmul.mubr.msk.bf16.gmra.mrb[240].mxu0 %vm3187_vm6, %v28858_v34  ;;  %v28076_v34 = vpop.f32.mrb[56].mxu1 }
0x210b   :  { %23288 = vmatprep.mubr.msk.bf16.mxu0 %vm3187_vm6, %v28859_v31  ;;  %23321 = vmatpush3.bf16.msra.mxu0 %v25000_v32  ;;  %v28863_v32 = vpack.c.bf16 %v27646_v23, %v28862_v5  ;;  %v28864_v31 = vpack.c.bf16 %v27664_v62, %v27658_v16  ;;  %28865 = vst [vmem:[#allocation48_spill] sm:$0xff] %v28076_v34  ;;  %v28079_v30 = vpop.f32.mrb[57].mxu1  ;;  %v25020_v5 = vld [vmem:[%s28838_s28 + $0x18] sm:$0xff]   ;;  %v25003_v34 = vld [vmem:[%s28744_s12 + $0x188] sm:$0xff]  }
0x210c   :  { %23322 = vmatprep.subr.bf16.mxu0 %v25001_v12  ;;  %23542 = vmatprep.subr.bf16.mxu1 %v25020_v5 }
0x210d   :  { %23543 = vmatpush3.bf16.msra.mxu1 %v25020_v5 }
0x210f   :  { %23323 = vmatpush3.bf16.msra.mxu0 %v25001_v12  ;;  %v28081_v12 = vpop.f32.mrb[58].mxu1 }
0x2110   :  { %23360 = vmatprep.subr.bf16.mxu0 %v25002_v26  ;;  %v28085_v63 = vpop.f32.mrb[59].mxu1 }
0x2111   :  { %v23522_v62 = vpop.f32.mrb[60].mxu1 }
0x2112   :  { %23289 = vmatmul.mubr.msk.bf16.gmra.mrb[244].mxu0 %vm3187_vm6, %v28863_v32  ;;  %v15246_v16 = vpop.f32.mrb[61].mxu1 }
0x2113   :  { %23292 = vmatprep.mubr.msk.bf16.mxu0 %vm3187_vm6, %v28864_v31  ;;  %v23523_v32 = vpop.f32.mrb[62].mxu1  ;;  %v28866_v31 = vpack.c.bf16 %v27660_v53, %v27656_v41  ;;  %v28868_v53 = vpack.c.bf16 %v27678_v40, %v27674_v43  ;;  %v28869_v41 = vpack.c.bf16 %v27704_v3, %v27698_v45  ;;  %v28870_v40 = vld [vmem:[#allocation50_spill] sm:$0xff]  ;;  %v28872_v3 = vpack.c.bf16 %v27726_v25, %v27720_v1 }
0x2114   :  { %v15249_v59 = vpop.f32.mrb[63].mxu1  ;;  %v15310_v15 = vpack.c.bf16 %v23523_v32, %v23522_v62  ;;  %v28871_v43 = vpack.c.bf16 %v27700_v4, %v28870_v40  ;;  %v28874_v25 = vpack.c.bf16 %v27746_v24, %v27740_v46  ;;  %v28876_v24 = vpack.c.bf16 %v27766_v47, %v27760_v49  ;;  %v25007_v46 = vld [vmem:[%s28744_s12 + $0x1a8] sm:$0xff]   ;;  %v25009_v47 = vld [vmem:[%s28744_s12 + $0x1b8] sm:$0xff]  }
0x2115   :  { %v15309_v23 = vpack.c.bf16 %v15249_v59, %v15246_v16  ;;  %v23526_v9 = vpop.f32.mrb[64].mxu1  ;;  %v28879_v49 = vpack.c.bf16 %v27784_v56, %v27779_v52  ;;  %v28882_v56 = vpack.c.bf16 %v27830_v48, %v27824_v57  ;;  %v28883_v52 = vpack.c.bf16 %v27826_v14, %v27822_v58  ;;  %v25014_v14 = vld [vmem:[%s28744_s12 + $0x1e0] sm:$0xff]  }
0x2116   :  { %v15262_v59 = vpop.f32.mrb[65].mxu1  ;;  %v28886_v48 = vpack.c.bf16 %v27872_v8, %v27866_v51  ;;  %v28887_v58 = vpack.c.bf16 %v27868_v35, %v27863_v19  ;;  %v28888_v57 = vpack.c.bf16 %v27894_v29, %v27888_v27  ;;  %v28889_v51 = vld [vmem:[#allocation51_spill] sm:$0xff]  ;;  %v28894_v35 = vld [vmem:[#allocation54_spill] sm:$0xff]  ;;  %v28895_v19 = vld [vmem:[#allocation52_spill] sm:$0xff] }
0x2117   :  { %23544 = vmatprep.mubr.msk.bf16.mxu1 %vm3187_vm6, %v15309_v23  ;;  %v23527_v23 = vpop.f32.mrb[66].mxu1  ;;  %v28896_v27 = vpack.c.bf16 %v28894_v35, %v28895_v19  ;;  %v28897_v8 = vld [vmem:[#allocation56_spill] sm:$0xff]  ;;  %v25026_v19 = vld [vmem:[%s28936_s1 + $0x10] sm:$0xff]  }
0x2118   :  { %23545 = vmatmul.mubr.msk.bf16.vlgmr.msra.gmra.mrb[76].mxu1 %vm3187_vm6, %v15310_v15  ;;  %v15312_v62 = vpack.c.bf16 %v23527_v23, %v23526_v9  ;;  %v15265_v16 = vpop.f32.mrb[67].mxu1  ;;  %v28873_v15 = vpack.c.bf16 %v27722_v44, %v27717_v20  ;;  %v28875_v20 = vpack.c.bf16 %v27742_v50, %v27738_v11  ;;  %v28878_v11 = vpack.c.bf16 %v27788_v6, %v27782_v28  ;;  %v25008_v50 = vld [vmem:[%s28744_s12 + $0x1b0] sm:$0xff]   ;;  %v25010_v28 = vld [vmem:[%s28744_s12 + $0x1c0] sm:$0xff]   ;;  %v25011_v6 = vld [vmem:[%s28744_s12 + $0x1c8] sm:$0xff]  }
0x2119   :  { %v15311_v45 = vpack.c.bf16 %v15265_v16, %v15262_v59  ;;  %v28898_v29 = vld [vmem:[#allocation28_spill] sm:$0xff]  ;;  %v28900_v16 = vld [vmem:[#allocation26_spill] sm:$0xff] }
0x211a   :  { %23293 = vmatmul.mubr.msk.bf16.gmra.mrb[248].mxu0 %vm3187_vm6, %v28866_v31  ;;  %v28899_v23 = vpack.c.bf16 %v28897_v8, %v28898_v29  ;;  %v25025_v35 = vld [vmem:[%s28936_s1 + $0x48] sm:$0xff]   ;;  %v25028_v8 = vld [vmem:[%s28936_s1 + $0x18] sm:$0xff]  }
0x211b   :  { %23324 = vmatprep.mubr.msk.bf16.mxu0 %vm3187_vm6, %v28867_v39  ;;  %v25005_v39 = vld [vmem:[%s28744_s12 + $0x198] sm:$0xff]   ;;  %23548 = vmatprep.mubr.msk.bf16.mxu1 %vm3187_vm6, %v15311_v45  ;;  %v28904_v45 = vld [vmem:[#allocation25_spill] sm:$0xff] }
0x211c   :  { %v25029_v29 = vld [vmem:[%s28936_s1 + $0x58] sm:$0xff]  }
0x2120   :  { %23549 = vmatmul.mubr.msk.bf16.gmra.mrb[80].mxu1 %vm3187_vm6, %v15312_v62  ;;  %v25016_v62 = vld [vmem:[%s28744_s12 + $0x1e8] sm:$0xff]  }
0x2122   :  { %23325 = vmatmul.mubr.msk.bf16.vlgmr.msra.gmra.mrb[236].mxu0 %vm3187_vm6, %v28868_v53 }
0x2123   :  { %23328 = vmatprep.mubr.msk.bf16.mxu0 %vm3187_vm6, %v28869_v41  ;;  %23361 = vmatpush3.bf16.msra.mxu0 %v25002_v26  ;;  %v25006_v26 = vld [vmem:[%s28744_s12 + $0x1a0] sm:$0xff]  }
0x2124   :  { %23362 = vmatprep.subr.bf16.mxu0 %v25003_v34 }
0x2127   :  { %23363 = vmatpush3.bf16.msra.mxu0 %v25003_v34  ;;  %v23530_v34 = vpop.f32.mrb[68].mxu1 }
0x2128   :  { %23364 = vmatprep.subr.bf16.mxu0 %v25004_v22  ;;  %v15278_v5 = vpop.f32.mrb[69].mxu1 }
0x2129   :  { %v23531_v4 = vpop.f32.mrb[70].mxu1 }
0x212a   :  { %23329 = vmatmul.mubr.msk.bf16.gmra.mrb[240].mxu0 %vm3187_vm6, %v28871_v43  ;;  %v15314_v32 = vpack.c.bf16 %v23531_v4, %v23530_v34  ;;  %v15281_v31 = vpop.f32.mrb[71].mxu1  ;;  %v28903_v43 = vld [vmem:[#allocation30_spill] sm:$0xff]  ;;  %v28907_v4 = vld [vmem:[#allocation27_spill] sm:$0xff] }
0x212b   :  { %23332 = vmatprep.mubr.msk.bf16.mxu0 %vm3187_vm6, %v28872_v3  ;;  %23365 = vmatpush3.bf16.msra.mxu0 %v25004_v22  ;;  %v15313_v1 = vpack.c.bf16 %v15281_v31, %v15278_v5  ;;  %v23534_v53 = vpop.f32.mrb[72].mxu1  ;;  %v28905_v3 = vpack.c.bf16 %v28903_v43, %v28904_v45  ;;  %v25021_v34 = vld [vmem:[%s28744_s12 + $0x1f8] sm:$0xff]   ;;  %v28906_v5 = vld [vmem:[#allocation32_spill] sm:$0xff] }
0x212c   :  { %23366 = vmatprep.subr.bf16.mxu0 %v25005_v39  ;;  %v15294_v41 = vpop.f32.mrb[73].mxu1  ;;  %v28909_v31 = vld [vmem:[#allocation34_spill] sm:$0xff] }
0x212d   :  { %23552 = vmatprep.mubr.msk.bf16.mxu1 %vm3187_vm6, %v15313_v1  ;;  %v23535_v22 = vpop.f32.mrb[74].mxu1 }
0x212e   :  { %23553 = vmatmul.mubr.msk.bf16.gmra.mrb[84].mxu1 %vm3187_vm6, %v15314_v32  ;;  %v15316_v9 = vpack.c.bf16 %v23535_v22, %v23534_v53  ;;  %v15297_v44 = vpop.f32.mrb[75].mxu1  ;;  %v28908_v32 = vpack.c.bf16 %v28906_v5, %v28907_v4  ;;  %v28913_v53 = vld [vmem:[#allocation31_spill] sm:$0xff]  ;;  %v28915_v22 = vld [vmem:[#allocation38_spill] sm:$0xff] }
0x212f   :  { %23367 = vmatpush3.bf16.msra.mxu0 %v25005_v39  ;;  %v15315_v59 = vpack.c.bf16 %v15297_v44, %v15294_v41  ;;  %v28877_v39 = vpack.c.bf16 %v27762_v61, %v27758_v60  ;;  %v28880_v60 = vpack.c.bf16 %v27810_v0, %v27804_v55  ;;  %v28881_v61 = vpack.c.bf16 %v27806_v2, %v27801_v7  ;;  %v25012_v7 = vld [vmem:[%s28744_s12 + $0x1d0] sm:$0xff]   ;;  %v25013_v0 = vld [vmem:[%s28744_s12 + $0x1d8] sm:$0xff]  }
0x2130   :  { %23404 = vmatprep.subr.bf16.mxu0 %v25006_v26  ;;  %v28884_v55 = vpack.c.bf16 %v27850_v17, %v27844_v18  ;;  %v28885_v2 = vpack.c.bf16 %v27846_v13, %v27842_v38  ;;  %v28890_v17 = vpack.c.bf16 %v27890_v33, %v28889_v51  ;;  %v28891_v38 = vld [vmem:[#allocation55_spill] sm:$0xff]  ;;  %v28892_v18 = vld [vmem:[#allocation53_spill] sm:$0xff]  ;;  %v28901_v33 = vld [vmem:[#allocation24_spill] sm:$0xff] }
0x2131   :  { %23556 = vmatprep.mubr.msk.bf16.mxu1 %vm3187_vm6, %v15315_v59  ;;  %v28893_v13 = vpack.c.bf16 %v28891_v38, %v28892_v18  ;;  %v28902_v40 = vpack.c.bf16 %v28900_v16, %v28901_v33  ;;  %v28919_v59 = vld [vmem:[#allocation35_spill] sm:$0xff] }
0x2132   :  { %23333 = vmatmul.mubr.msk.bf16.gmra.mrb[244].mxu0 %vm3187_vm6, %v28873_v15  ;;  %v28910_v15 = vld [vmem:[#allocation29_spill] sm:$0xff]  ;;  %v25022_v38 = vld [vmem:[%s28936_s1] sm:$0xff]  }
0x2133   :  { %23336 = vmatprep.mubr.msk.bf16.mxu0 %vm3187_vm6, %v28874_v25  ;;  %v28911_v1 = vpack.c.bf16 %v28909_v31, %v28910_v15  ;;  %v28912_v25 = vld [vmem:[#allocation36_spill] sm:$0xff]  ;;  %v28312_v16 = vld [vmem:[%s28937_s2] ss:$0 sm:$0xff] }
0x2134   :  { %v28914_v41 = vpack.c.bf16 %v28912_v25, %v28913_v53  ;;  %v25023_v18 = vld [vmem:[%s28936_s1 + $0x40] sm:$0xff]  }
0x2135   :  { %23580 = vmatprep.subr.bf16.mxu1 %v25023_v18  ;;  %v28315_v33 = vld [vmem:[%s28938_s7] ss:$0 sm:$0xff] }
0x2136   :  { %23557 = vmatmul.mubr.msk.bf16.gmra.mrb[88].mxu1 %vm3187_vm6, %v15316_v9  ;;  %v28916_v9 = vld [vmem:[#allocation33_spill] sm:$0xff] }
0x2137   :  { %v28917_v44 = vpack.c.bf16 %v28915_v22, %v28916_v9  ;;  %23581 = vmatpush3.bf16.msra.mxu1 %v25023_v18 }
0x2138   :  { %23582 = vmatprep.subr.bf16.mxu1 %v25025_v35 }
0x213a   :  { %23337 = vmatmul.mubr.msk.bf16.gmra.mrb[248].mxu0 %vm3187_vm6, %v28875_v20  ;;  %v28918_v20 = vld [vmem:[#allocation40_spill] sm:$0xff] }
0x213b   :  { %23368 = vmatprep.mubr.msk.bf16.mxu0 %vm3187_vm6, %v28876_v24  ;;  %v28920_v24 = vpack.c.bf16 %v28918_v20, %v28919_v59  ;;  %23583 = vmatpush3.bf16.msra.mxu1 %v25025_v35  ;;  %v25037_v35 = vld [vmem:[%s28936_s1 + $0x78] sm:$0xff]  }
0x2142   :  { %23369 = vmatmul.mubr.msk.bf16.vlgmr.msra.gmra.mrb[236].mxu0 %vm3187_vm6, %v28877_v39 }
0x2143   :  { %23372 = vmatprep.mubr.msk.bf16.mxu0 %vm3187_vm6, %v28878_v11  ;;  %23405 = vmatpush3.bf16.msra.mxu0 %v25006_v26  ;;  %v25018_v26 = vld [vmem:[%s28744_s12 + $0x1f0] sm:$0xff]   ;;  %v28923_v11 = vld [vmem:[#allocation44_spill] sm:$0xff] }
0x2144   :  { %23406 = vmatprep.subr.bf16.mxu0 %v25007_v46 }
0x2147   :  { %23407 = vmatpush3.bf16.msra.mxu0 %v25007_v46  ;;  %v28921_v46 = vld [vmem:[#allocation37_spill] sm:$0xff] }
0x2148   :  { %23408 = vmatprep.subr.bf16.mxu0 %v25008_v50  ;;  %v28922_v39 = vpack.c.bf16 %v28018_v37, %v28921_v46  ;;  %v28929_v37 = vpack.c.bf16 %v28064_v42, %v28058_v21  ;;  %v25032_v46 = vld [vmem:[%s28936_s1 + $0x28] sm:$0xff]  }
0x214a   :  { %23373 = vmatmul.mubr.msk.bf16.gmra.mrb[240].mxu0 %vm3187_vm6, %v28879_v49  ;;  %v28926_v49 = vpack.c.bf16 %v28041_v10, %v28035_v36  ;;  %v28933_v36 = vpack.c.bf16 %v28085_v63, %v28079_v30  ;;  %v28934_v10 = vld [vmem:[#allocation48_spill] sm:$0xff] }
0x214b   :  { %23376 = vmatprep.mubr.msk.bf16.mxu0 %vm3187_vm6, %v28880_v60  ;;  %23409 = vmatpush3.bf16.msra.mxu0 %v25008_v50  ;;  %v28924_v50 = vld [vmem:[#allocation39_spill] sm:$0xff]  ;;  %v28927_v60 = vld [vmem:[#allocation42_spill] sm:$0xff] }
0x214c   :  { %23410 = vmatprep.subr.bf16.mxu0 %v25009_v47 }
0x214f   :  { %23411 = vmatpush3.bf16.msra.mxu0 %v25009_v47  ;;  %v28925_v47 = vpack.c.bf16 %v28923_v11, %v28924_v50 }
0x2150   :  { %23448 = vmatprep.subr.bf16.mxu0 %v25010_v28 }
0x2152   :  { %23377 = vmatmul.mubr.msk.bf16.gmra.mrb[244].mxu0 %vm3187_vm6, %v28881_v61  ;;  %v28930_v61 = vld [vmem:[#allocation41_spill] sm:$0xff] }
0x2153   :  { %23380 = vmatprep.mubr.msk.bf16.mxu0 %vm3187_vm6, %v28882_v56  ;;  %v28931_v56 = vld [vmem:[#allocation43_spill] sm:$0xff] }
0x215a   :  { %23381 = vmatmul.mubr.msk.bf16.gmra.mrb[248].mxu0 %vm3187_vm6, %v28883_v52  ;;  %v28932_v52 = vpack.c.bf16 %v28930_v61, %v28931_v56 }
0x215b   :  { %23412 = vmatprep.mubr.msk.bf16.mxu0 %vm3187_vm6, %v28884_v55 }
0x2162   :  { %23413 = vmatmul.mubr.msk.bf16.vlgmr.msra.gmra.mrb[236].mxu0 %vm3187_vm6, %v28885_v2 }
0x2163   :  { %23416 = vmatprep.mubr.msk.bf16.mxu0 %vm3187_vm6, %v28886_v48  ;;  %23449 = vmatpush3.bf16.msra.mxu0 %v25010_v28  ;;  %v28928_v28 = vpack.c.bf16 %v28037_v54, %v28927_v60  ;;  %v28935_v54 = vpack.c.bf16 %v28081_v12, %v28934_v10 }
0x2164   :  { %23450 = vmatprep.subr.bf16.mxu0 %v25011_v6 }
0x2167   :  { %23451 = vmatpush3.bf16.msra.mxu0 %v25011_v6 }
0x2168   :  { %23452 = vmatprep.subr.bf16.mxu0 %v25012_v7 }
0x216a   :  { %23417 = vmatmul.mubr.msk.bf16.gmra.mrb[240].mxu0 %vm3187_vm6, %v28887_v58 }
0x216b   :  { %23420 = vmatprep.mubr.msk.bf16.mxu0 %vm3187_vm6, %v28888_v57  ;;  %23453 = vmatpush3.bf16.msra.mxu0 %v25012_v7 }
0x216c   :  { %23454 = vmatprep.subr.bf16.mxu0 %v25013_v0 }
0x216f   :  { %23455 = vmatpush3.bf16.msra.mxu0 %v25013_v0 }
0x2170   :  { %23492 = vmatprep.subr.bf16.mxu0 %v25014_v14 }
0x2172   :  { %23421 = vmatmul.mubr.msk.bf16.gmra.mrb[244].mxu0 %vm3187_vm6, %v28890_v17 }
0x2173   :  { %23424 = vmatprep.mubr.msk.bf16.mxu0 %vm3187_vm6, %v28893_v13  ;;  %v25024_v13 = vld [vmem:[%s28936_s1 + $0x8] sm:$0xff]  }
0x217a   :  { %23425 = vmatmul.mubr.msk.bf16.gmra.mrb[248].mxu0 %vm3187_vm6, %v28896_v27  ;;  %v25027_v27 = vld [vmem:[%s28936_s1 + $0x50] sm:$0xff]  }
0x217b   :  { %23456 = vmatprep.mubr.msk.bf16.mxu0 %vm3187_vm6, %v28899_v23  ;;  %23584 = vmatprep.subr.bf16.mxu1 %v25027_v27  ;;  %v25030_v23 = vld [vmem:[%s28936_s1 + $0x20] sm:$0xff]  }
0x217c   :  { %23585 = vmatpush3.bf16.msra.mxu1 %v25027_v27 }
0x217d   :  { %23586 = vmatprep.subr.bf16.mxu1 %v25029_v29 }
0x2180   :  { %23587 = vmatpush3.bf16.msra.mxu1 %v25029_v29 }
0x2182   :  { %23457 = vmatmul.mubr.msk.bf16.vlgmr.msra.gmra.mrb[236].mxu0 %vm3187_vm6, %v28902_v40 }
0x2183   :  { %23460 = vmatprep.mubr.msk.bf16.mxu0 %vm3187_vm6, %v28905_v3  ;;  %23493 = vmatpush3.bf16.msra.mxu0 %v25014_v14 }
0x2184   :  { %23494 = vmatprep.subr.bf16.mxu0 %v25016_v62 }
0x2187   :  { %23495 = vmatpush3.bf16.msra.mxu0 %v25016_v62  ;;  %v25031_v62 = vld [vmem:[%s28936_s1 + $0x60] sm:$0xff]  }
0x2188   :  { %23496 = vmatprep.subr.bf16.mxu0 %v25018_v26  ;;  %23588 = vmatprep.subr.bf16.mxu1 %v25031_v62 }
0x2189   :  { %23589 = vmatpush3.bf16.msra.mxu1 %v25031_v62 }
0x218a   :  { %23461 = vmatmul.mubr.msk.bf16.gmra.mrb[240].mxu0 %vm3187_vm6, %v28908_v32 }
0x218b   :  { %23464 = vmatprep.mubr.msk.bf16.mxu0 %vm3187_vm6, %v28911_v1  ;;  %23497 = vmatpush3.bf16.msra.mxu0 %v25018_v26 }
0x218c   :  { %23498 = vmatprep.subr.bf16.mxu0 %v25021_v34 }
0x218f   :  { %23499 = vmatpush3.bf16.msra.mxu0 %v25021_v34 }
0x2190   :  { %23560 = vmatprep.subr.bf16.mxu0 %v25022_v38 }
0x2192   :  { %23465 = vmatmul.mubr.msk.bf16.gmra.mrb[244].mxu0 %vm3187_vm6, %v28914_v41 }
0x2193   :  { %23468 = vmatprep.mubr.msk.bf16.mxu0 %vm3187_vm6, %v28917_v44 }
0x219a   :  { %23469 = vmatmul.mubr.msk.bf16.gmra.mrb[248].mxu0 %vm3187_vm6, %v28920_v24 }
0x219b   :  { %23500 = vmatprep.mubr.msk.bf16.mxu0 %vm3187_vm6, %v28922_v39  ;;  %v25033_v39 = vld [vmem:[%s28936_s1 + $0x68] sm:$0xff]  }
0x219c   :  { %23590 = vmatprep.subr.bf16.mxu1 %v25033_v39 }
0x219d   :  { %23591 = vmatpush3.bf16.msra.mxu1 %v25033_v39 }
0x21a2   :  { %23501 = vmatmul.mubr.msk.bf16.vlgmr.msra.gmra.mrb[236].mxu0 %vm3187_vm6, %v28925_v47 }
0x21a3   :  { %23504 = vmatprep.mubr.msk.bf16.mxu0 %vm3187_vm6, %v28926_v49  ;;  %23561 = vmatpush3.bf16.msra.mxu0 %v25022_v38 }
0x21a4   :  { %23562 = vmatprep.subr.bf16.mxu0 %v25024_v13 }
0x21a7   :  { %23563 = vmatpush3.bf16.msra.mxu0 %v25024_v13  ;;  %v25036_v13 = vld [vmem:[%s28936_s1 + $0x38] sm:$0xff]  }
0x21a8   :  { %23564 = vmatprep.subr.bf16.mxu0 %v25026_v19 }
0x21aa   :  { %23505 = vmatmul.mubr.msk.bf16.gmra.mrb[240].mxu0 %vm3187_vm6, %v28928_v28 }
0x21ab   :  { %23508 = vmatprep.mubr.msk.bf16.mxu0 %vm3187_vm6, %v28929_v37  ;;  %23565 = vmatpush3.bf16.msra.mxu0 %v25026_v19 }
0x21ac   :  { %23566 = vmatprep.subr.bf16.mxu0 %v25028_v8 }
0x21af   :  { %23567 = vmatpush3.bf16.msra.mxu0 %v25028_v8 }
0x21b0   :  { %23568 = vmatprep.subr.bf16.mxu0 %v25030_v23 }
0x21b2   :  { %23509 = vmatmul.mubr.msk.bf16.gmra.mrb[244].mxu0 %vm3187_vm6, %v28932_v52 }
0x21b3   :  { %23512 = vmatprep.mubr.msk.bf16.mxu0 %vm3187_vm6, %v28933_v36  ;;  %23569 = vmatpush3.bf16.msra.mxu0 %v25030_v23 }
0x21b4   :  { %23570 = vmatprep.subr.bf16.mxu0 %v25032_v46 }
0x21b7   :  { %23571 = vmatpush3.bf16.msra.mxu0 %v25032_v46 }
0x21ba   :  { %23513 = vmatmul.mubr.msk.bf16.gmra.mrb[248].mxu0 %vm3187_vm6, %v28935_v54 }
0x21eb   :  { %v23546_v55 = vpop.f32.mrb[76].mxu1 }
0x21ec   :  { %v15414_v21 = vpop.f32.mrb[77].mxu1  ;;  %v15423_v34 = vadd.f32 %v23546_v55, %v28315_v33 }
0x21ed   :  { %v23547_v42 = vpop.f32.mrb[78].mxu1  ;;  %v15415_v31 = vadd.f32 %v28315_v33, %v15414_v21 }
0x21ee   :  { %v15417_v6 = vpop.f32.mrb[79].mxu1  ;;  %v15426_v25 = vadd.f32 %v23547_v42, %v28315_v33  ;;  %v25034_v42 = vld [vmem:[%s28936_s1 + $0x30] sm:$0xff]  }
0x21ef   :  { %v15418_v22 = vadd.f32 %v28315_v33, %v15417_v6  ;;  %23572 = vmatprep.subr.bf16.mxu0 %v25034_v42 }
0x21f0   :  { %23573 = vmatpush3.bf16.msra.mxu0 %v25034_v42 }
0x21f1   :  { %23574 = vmatprep.subr.bf16.mxu0 %v25036_v13 }
0x21f3   :  { %v28277_v2 = vpop.f32.mrb[80].mxu1 }
0x21f4   :  { %v28279_v48 = vpop.f32.mrb[81].mxu1  ;;  %v15439_v47 = vadd.f32 %v28277_v2, %v28315_v33  ;;  %23575 = vmatpush3.bf16.msra.mxu0 %v25036_v13  ;;  %v25040_v13 = vld [vmem:[%s28936_s1 + $0x90] sm:$0xff]  }
0x21f5   :  { %v28281_v63 = vpop.f32.mrb[82].mxu1  ;;  %v15431_v28 = vadd.f32 %v28315_v33, %v28279_v48  ;;  %v25035_v48 = vld [vmem:[%s28936_s1 + $0x70] sm:$0xff]  }
0x21f6   :  { %v28283_v30 = vpop.f32.mrb[83].mxu1  ;;  %v15442_v52 = vadd.f32 %v28281_v63, %v28315_v33  ;;  %23592 = vmatprep.subr.bf16.mxu1 %v25035_v48 }
0x21f7   :  { %v15434_v54 = vadd.f32 %v28315_v33, %v28283_v30  ;;  %23593 = vmatpush3.bf16.msra.mxu1 %v25035_v48  ;;  %v19723_v48 = vld [vmem:[%s25404_s4 + $0xe] sm:$0x3] }
0x21f8   :  { %23594 = vmatprep.subr.bf16.mxu1 %v25037_v35 }
0x21fb   :  { %23595 = vmatpush3.bf16.msra.mxu1 %v25037_v35  ;;  %v25041_v35 = vld [vmem:[%s28936_s1 + $0x98] sm:$0xff]  }
0x2201   :  { %v28285_v7 = vpop.f32.mrb[84].mxu1 }
0x2202   :  { %v28287_v12 = vpop.f32.mrb[85].mxu1  ;;  %v15455_v30 = vadd.f32 %v28285_v7, %v28315_v33 }
0x2203   :  { %v28289_v0 = vpop.f32.mrb[86].mxu1  ;;  %v15447_v23 = vadd.f32 %v28315_v33, %v28287_v12 }
0x2204   :  { %v28291_v58 = vpop.f32.mrb[87].mxu1 }
0x2209   :  { %v28293_v57 = vpop.f32.mrb[88].mxu1 }
0x220a   :  { %v28295_v14 = vpop.f32.mrb[89].mxu1 }
0x220b   :  { %v28297_v51 = vpop.f32.mrb[90].mxu1 }
0x220c   :  { %v28299_v17 = vpop.f32.mrb[91].mxu1 }
0x2275   :  { %v23502_v40 = vpop.f32.mrb[236].mxu0 }
0x2276   :  { %v15117_v43 = vadd.f32 %v23502_v40, %v28312_v16  ;;  %v15029_v45 = vpop.f32.mrb[237].mxu0 }
0x2277   :  { %v15115_v3 = vadd.f32 %v28312_v16, %v15029_v45  ;;  %v23503_v26 = vpop.f32.mrb[238].mxu0  ;;  %v15458_v45 = vadd.f32 %v28289_v0, %v28315_v33 }
0x2278   :  { %v15479_v5 = vmax.f32 %v15117_v43, 0.0  ;;  %v15118_v4 = vadd.f32 %v23503_v26, %v28312_v16  ;;  %v15032_v32 = vpop.f32.mrb[239].mxu0  ;;  %v15450_v26 = vadd.f32 %v28315_v33, %v28291_v58  ;;  %v15471_v58 = vadd.f32 %v28293_v57, %v28315_v33 }
0x2279   :  { %v15477_v15 = vmax.f32 %v15115_v3, 0.0  ;;  %v15116_v1 = vadd.f32 %v28312_v16, %v15032_v32  ;;  %v28939_v32 = vmov 0.0   ;;  %v15466_v57 = vadd.f32 %v28315_v33, %v28299_v17 }
0x227a   :  { %v15480_v53 = vmax.f32 %v15118_v4, 0.0  ;;  %v15495_v41 = vadd.f32 %v15479_v5, %v15423_v34  ;;  %23600 = vmatprep.subr.bf16.mxu0 %v28939_v32  ;;  %23636 = vmatprep.subr.bf16.mxu1 %v28939_v32 }
0x227b   :  { %v15478_v9 = vmax.f32 %v15116_v1, 0.0  ;;  %v15493_v44 = vadd.f32 %v15477_v15, %v15415_v31 }
0x227c   :  { %v15496_v20 = vadd.f32 %v15480_v53, %v15426_v25 }
0x227d   :  { %15509 = vxpose.xlu0.b32.start [1/16] (narrow) %v15493_v44, 32  ;;  %v23506_v59 = vpop.f32.mrb[240].mxu0  ;;  %v15494_v24 = vadd.f32 %v15478_v9, %v15418_v22  ;;  %v15463_v22 = vadd.f32 %v28315_v33, %v28295_v14 }
0x227e   :  { %v15121_v11 = vadd.f32 %v23506_v59, %v28312_v16  ;;  %v15045_v50 = vpop.f32.mrb[241].mxu0  ;;  %v15474_v59 = vadd.f32 %v28297_v51, %v28315_v33 }
0x227f   :  { %v15119_v49 = vadd.f32 %v28312_v16, %v15045_v50  ;;  %v23507_v60 = vpop.f32.mrb[242].mxu0 }
0x2280   :  { %v15483_v37 = vmax.f32 %v15121_v11, 0.0  ;;  %v15122_v61 = vadd.f32 %v23507_v60, %v28312_v16  ;;  %v15048_v56 = vpop.f32.mrb[243].mxu0 }
0x2281   :  { %v15481_v36 = vmax.f32 %v15119_v49, 0.0  ;;  %v15120_v10 = vadd.f32 %v28312_v16, %v15048_v56  ;;  %15510 = vxpose.xlu0.b32.cont [2/16] (narrow) %v15494_v24, 32 }
0x2282   :  { %v15484_v55 = vmax.f32 %v15122_v61, 0.0  ;;  %v15499_v21 = vadd.f32 %v15483_v37, %v15439_v47 }
0x2283   :  { %v15482_v6 = vmax.f32 %v15120_v10, 0.0  ;;  %v15497_v2 = vadd.f32 %v15481_v36, %v15431_v28 }
0x2284   :  { %v15500_v38 = vadd.f32 %v15484_v55, %v15442_v52 }
0x2285   :  { %15511 = vxpose.xlu0.b32.cont [3/16] (narrow) %v15495_v41, 32  ;;  %v23510_v63 = vpop.f32.mrb[244].mxu0  ;;  %v15498_v18 = vadd.f32 %v15482_v6, %v15434_v54 }
0x2286   :  { %v15125_v19 = vadd.f32 %v23510_v63, %v28312_v16  ;;  %v15061_v27 = vpop.f32.mrb[245].mxu0  ;;  %v19698_v63 = vld [vmem:[%s25404_s4 + $0xa] sm:$0x3] }
0x2287   :  { %v15123_v8 = vadd.f32 %v28312_v16, %v15061_v27  ;;  %v23511_v29 = vpop.f32.mrb[246].mxu0  ;;  %v25043_v27 = vld [vmem:[%s28936_s1 + $0xa8] sm:$0xff]  }
0x2288   :  { %v15487_v62 = vmax.f32 %v15125_v19, 0.0  ;;  %v15126_v40 = vadd.f32 %v23511_v29, %v28312_v16  ;;  %v15064_v43 = vpop.f32.mrb[247].mxu0  ;;  %v25042_v19 = vld [vmem:[%s28936_s1 + $0xa0] sm:$0xff]  }
0x2289   :  { %v15485_v3 = vmax.f32 %v15123_v8, 0.0  ;;  %v15124_v7 = vadd.f32 %v28312_v16, %v15064_v43  ;;  %15512 = vxpose.xlu0.b32.cont [4/16] (narrow) %v15496_v20, 32  ;;  %v25045_v8 = vld [vmem:[%s28936_s1 + $0xb8] sm:$0xff]  }
0x228a   :  { %v15488_v34 = vmax.f32 %v15126_v40, 0.0  ;;  %v15503_v5 = vadd.f32 %v15487_v62, %v15455_v30  ;;  %v25044_v30 = vld [vmem:[%s28936_s1 + $0xb0] sm:$0xff]  }
0x228b   :  { %v15486_v12 = vmax.f32 %v15124_v7, 0.0  ;;  %v15501_v4 = vadd.f32 %v15485_v3, %v15447_v23 }
0x228c   :  { %v15504_v31 = vadd.f32 %v15488_v34, %v15458_v45 }
0x228d   :  { %15513 = vxpose.xlu0.b32.cont [5/16] (narrow) %v15497_v2, 32  ;;  %v23514_v0 = vpop.f32.mrb[248].mxu0  ;;  %v15502_v15 = vadd.f32 %v15486_v12, %v15450_v26 }
0x228e   :  { %v15129_v1 = vadd.f32 %v23514_v0, %v28312_v16  ;;  %v15077_v25 = vpop.f32.mrb[249].mxu0 }
0x228f   :  { %v15127_v53 = vadd.f32 %v28312_v16, %v15077_v25  ;;  %v23515_v41 = vpop.f32.mrb[250].mxu0  ;;  %v25047_v25 = vld [vmem:[%s28936_s1 + $0xc8] sm:$0xff]  }
0x2290   :  { %v15491_v9 = vmax.f32 %v15129_v1, 0.0  ;;  %v15130_v44 = vadd.f32 %v23515_v41, %v28312_v16  ;;  %v15080_v20 = vpop.f32.mrb[251].mxu0  ;;  %v19750_v1 = vld [vmem:[%s25404_s4 + $0x1a] sm:$0x3]  ;;  %v25050_v41 = vld [vmem:[%s28936_s1 + $0xe0] sm:$0xff]  }
0x2291   :  { %v15489_v24 = vmax.f32 %v15127_v53, 0.0  ;;  %v15128_v46 = vadd.f32 %v28312_v16, %v15080_v20  ;;  %15514 = vxpose.xlu0.b32.cont [6/16] (narrow) %v15498_v18, 32  ;;  %v25039_v18 = vld [vmem:[%s28936_s1 + $0x88] sm:$0xff]   ;;  %v25049_v53 = vld [vmem:[%s28936_s1 + $0xd8] sm:$0xff]   ;;  %v25054_v20 = vld [vmem:[%s28936_s1 + $0x140] sm:$0xff]  }
0x2292   :  { %v15492_v39 = vmax.f32 %v15130_v44, 0.0  ;;  %v15507_v11 = vadd.f32 %v15491_v9, %v15471_v58  ;;  %v25048_v58 = vld [vmem:[%s28936_s1 + $0xd0] sm:$0xff]   ;;  %v25053_v44 = vld [vmem:[%s28936_s1 + $0xf8] sm:$0xff]  }
0x2293   :  { %v15490_v50 = vmax.f32 %v15128_v46, 0.0  ;;  %v15505_v47 = vadd.f32 %v15489_v24, %v15463_v22  ;;  %v25051_v22 = vld [vmem:[%s28936_s1 + $0xe8] sm:$0xff]   ;;  %v25052_v9 = vld [vmem:[%s28936_s1 + $0xf0] sm:$0xff]   ;;  %v25057_v46 = vld [vmem:[%s28936_s1 + $0x158] sm:$0xff]  }
0x2294   :  { %v15508_v49 = vadd.f32 %v15492_v39, %v15474_v59  ;;  %v25055_v59 = vld [vmem:[%s28936_s1 + $0x148] sm:$0xff]   ;;  %v25056_v24 = vld [vmem:[%s28936_s1 + $0x150] sm:$0xff]  }
0x2295   :  { %15515 = vxpose.xlu0.b32.cont [7/16] (narrow) %v15499_v21, 32  ;;  %v15506_v14 = vadd.f32 %v15490_v50, %v15466_v57  ;;  %v25058_v57 = vld [vmem:[%s28936_s1 + $0x160] sm:$0xff]   ;;  %v25059_v39 = vld [vmem:[%s28936_s1 + $0x168] sm:$0xff]   ;;  %v25061_v50 = vld [vmem:[%s28936_s1 + $0x178] sm:$0xff]  }
0x2299   :  { %15516 = vxpose.xlu0.b32.cont [8/16] (narrow) %v15500_v38, 32  ;;  %v25038_v38 = vld [vmem:[%s28936_s1 + $0x80] sm:$0xff]  }
0x229d   :  { %15517 = vxpose.xlu0.b32.cont [9/16] (narrow) %v15501_v4, 32 }
0x22a1   :  { %15518 = vxpose.xlu0.b32.cont [10/16] (narrow) %v15502_v15, 32  ;;  %v25046_v15 = vld [vmem:[%s28936_s1 + $0xc0] sm:$0xff]  }
0x22a5   :  { %15519 = vxpose.xlu0.b32.cont [11/16] (narrow) %v15503_v5, 32 }
0x22a9   :  { %15520 = vxpose.xlu0.b32.cont [12/16] (narrow) %v15504_v31, 32 }
0x22ad   :  { %15521 = vxpose.xlu0.b32.cont [13/16] (narrow) %v15505_v47, 32  ;;  %v16188_v47 = vld [vmem:[%s25409_s6] sm:$0x7] }
0x22b1   :  { %15522 = vxpose.xlu0.b32.cont [14/16] (narrow) %v15506_v14, 32 }
0x22b5   :  { %15523 = vxpose.xlu0.b32.cont [15/16] (narrow) %v15507_v11, 32  ;;  %v25060_v11 = vld [vmem:[%s28936_s1 + $0x170] sm:$0xff]  }
0x22b9   :  { %15524 = vxpose.xlu0.b32.end [16/16] (narrow) %v15508_v49, 32  ;;  %v25229_v49 = vmov 0  }
0x22ba   :  { %24451 = vset.pattern.permute.xlu1 %v25229_v49 }
0x22bb   :  { %16191 = vperm.xlu1 %24451, %v16188_v47  }
0x22e2   :  { %24452 = vset.pattern.permute.xlu0 %v25229_v49 }
0x22fd   :  { %v15525_v51 = vpop.trf.xlu0 }
0x2301   :  { %v15526_v16 = vpop.trf.xlu0 }
0x2302   :  { %v28369_v60 = vpack.c.bf16 %v15526_v16, %v15525_v51 }
0x2304   :  { %23576 = vmatprep.mubr.bf16.mxu0 %v28369_v60  ;;  %23596 = vmatprep.mubr.bf16.mxu1 %v28369_v60 }
0x2305   :  { %v15527_v17 = vpop.trf.xlu0 }
0x2309   :  { %v15528_v33 = vpop.trf.xlu0 }
0x230a   :  { %v28373_v28 = vpack.c.bf16 %v15528_v33, %v15527_v17 }
0x230c   :  { %23577 = vmatmul.mubr.bf16.vlgmr.msra.gmra.mrb[60].mxu0 %v28373_v28  ;;  %23597 = vmatmul.mubr.bf16.vlgmr.msra.gmra.mrb[92].mxu1 %v28373_v28 }
0x230d   :  { %23604 = vmatprep.mubr.msk.bf16.mxu0 %vm25228_vm5, %v28939_v32  ;;  %23640 = vmatprep.mubr.msk.bf16.mxu1 %vm25228_vm5, %v28939_v32 }
0x23df   :  { %v23578_v37 = vpop.f32.mrb[60].mxu0  ;;  %v23598_v61 = vpop.f32.mrb[92].mxu1 }
0x23e0   :  { %v15641_v56 = vpop.f32.mrb[61].mxu0  ;;  %v15759_v52 = vpop.f32.mrb[93].mxu1 }
0x23e1   :  { %v23579_v36 = vpop.f32.mrb[62].mxu0  ;;  %v23599_v10 = vpop.f32.mrb[94].mxu1 }
0x23e2   :  { %v15657_v54 = vpack.c.bf16 %v23579_v36, %v23578_v37  ;;  %v15775_v55 = vpack.c.bf16 %v23599_v10, %v23598_v61  ;;  %v15644_v21 = vpop.f32.mrb[63].mxu0  ;;  %v15762_v42 = vpop.f32.mrb[95].mxu1 }
0x23e3   :  { %v15656_v6 = vpack.c.bf16 %v15644_v21, %v15641_v56  ;;  %v15774_v2 = vpack.c.bf16 %v15762_v42, %v15759_v52  ;;  %v25063_v21 = vld [vmem:[%s28936_s1 + $0x108] sm:$0xff]   ;;  %v25064_v42 = vld [vmem:[%s28936_s1 + $0x110] sm:$0xff]  }
0x23e5   :  { %23601 = vmatpush3.bf16.msra.mxu0 %v15774_v2  ;;  %v25066_v2 = vld [vmem:[%s28936_s1 + $0x120] sm:$0xff]  }
0x23e6   :  { %23602 = vmatprep.subr.bf16.mxu0 %v28939_v32 }
0x23e9   :  { %23603 = vmatpush3.bf16.msra.mxu0 %v15775_v55  ;;  %v19776_v55 = vld [vmem:[%s25404_s4 + $0x1e] sm:$0x3] }
0x23ea   :  { %23608 = vmatprep.subr.bf16.mxu0 %v28939_v32 }
0x23ec   :  { %23605 = vmatmul.mubr.msk.bf16.vlgmr.msra.gmra.mrb[64].mxu0 %vm764_vm4, %v19723_v48  ;;  %v25067_v48 = vld [vmem:[%s28936_s1 + $0x128] sm:$0xff]  }
0x23ed   :  { %23609 = vmatpush3.bf16.msra.mxu0 %v15656_v6  ;;  %23612 = vmatprep.mubr.msk.bf16.mxu0 %vm25228_vm5, %v28939_v32  ;;  %v25065_v6 = vld [vmem:[%s28936_s1 + $0x118] sm:$0xff]  }
0x23ee   :  { %23610 = vmatprep.subr.bf16.mxu0 %v28939_v32 }
0x23f1   :  { %23611 = vmatpush3.bf16.msra.mxu0 %v15657_v54  ;;  %v25062_v54 = vld [vmem:[%s28936_s1 + $0x100] sm:$0xff]  }
0x23f2   :  { %23616 = vmatprep.subr.bf16.mxu0 %v25038_v38 }
0x23f4   :  { %23613 = vmatmul.mubr.msk.bf16.vlgmr.msra.gmra.mrb[68].mxu0 %vm764_vm4, %v19698_v63 }
0x23f5   :  { %23617 = vmatpush3.bf16.msra.mxu0 %v25038_v38  ;;  %23632 = vmatprep.mubr.bf16.mxu0 %v28369_v60  ;;  %v25068_v38 = vld [vmem:[%s28936_s1 + $0x130] sm:$0xff]  }
0x23f6   :  { %23618 = vmatprep.subr.bf16.mxu0 %v25039_v18 }
0x23f9   :  { %23619 = vmatpush3.bf16.msra.mxu0 %v25039_v18 }
0x23fa   :  { %23620 = vmatprep.subr.bf16.mxu0 %v25040_v13 }
0x23fd   :  { %23621 = vmatpush3.bf16.msra.mxu0 %v25040_v13 }
0x23fe   :  { %23622 = vmatprep.subr.bf16.mxu0 %v25041_v35 }
0x2401   :  { %23623 = vmatpush3.bf16.msra.mxu0 %v25041_v35 }
0x2402   :  { %23624 = vmatprep.subr.bf16.mxu0 %v25042_v19 }
0x2405   :  { %23625 = vmatpush3.bf16.msra.mxu0 %v25042_v19 }
0x2406   :  { %23626 = vmatprep.subr.bf16.mxu0 %v25043_v27 }
0x2409   :  { %23627 = vmatpush3.bf16.msra.mxu0 %v25043_v27  ;;  %v25069_v27 = vld [vmem:[%s28936_s1 + $0x138] sm:$0xff]  }
0x240a   :  { %23628 = vmatprep.subr.bf16.mxu0 %v25044_v30 }
0x240d   :  { %23629 = vmatpush3.bf16.msra.mxu0 %v25044_v30 }
0x240e   :  { %23630 = vmatprep.subr.bf16.mxu0 %v25045_v8 }
0x2411   :  { %23631 = vmatpush3.bf16.msra.mxu0 %v25045_v8  ;;  %v25070_v8 = vld [vmem:[%s28936_s1 + $0x180] sm:$0xff]  }
0x2412   :  { %23664 = vmatprep.subr.bf16.mxu0 %v28939_v32 }
0x2414   :  { %23633 = vmatmul.mubr.bf16.vlgmr.msra.gmra.mrb[72].mxu0 %v28373_v28 }
0x2415   :  { %23668 = vmatprep.mubr.msk.bf16.mxu0 %vm25228_vm5, %v28939_v32 }
0x24bf   :  { %v15815_v29 = vpop.f32.mrb[64].mxu0 }
0x24c0   :  { %v23606_v23 = vpop.f32.mrb[65].mxu0 }
0x24c1   :  { %v15818_v62 = vpop.f32.mrb[66].mxu0  ;;  %v25071_v23 = vld [vmem:[%s28936_s1 + $0x188] sm:$0xff]  }
0x24c2   :  { %v23607_v40 = vpop.f32.mrb[67].mxu0  ;;  %v25072_v62 = vld [vmem:[%s28936_s1 + $0x190] sm:$0xff]  }
0x24c3   :  { %v25073_v40 = vld [vmem:[%s28936_s1 + $0x198] sm:$0xff]  }
0x24c7   :  { %v15858_v43 = vpop.f32.mrb[68].mxu0 }
0x24c8   :  { %v28403_v45 = vadd.f32 %v15858_v43, %v15815_v29  ;;  %v23614_v3 = vpop.f32.mrb[69].mxu0  ;;  %v19828_v29 = vld [vmem:[%s25404_s4 + $0xc] sm:$0x3]  ;;  %v25074_v43 = vld [vmem:[%s28936_s1 + $0x1a0] sm:$0xff]  }
0x24c9   :  { %v15861_v7 = vpop.f32.mrb[70].mxu0  ;;  %v25076_v3 = vld [vmem:[%s28936_s1 + $0x1b0] sm:$0xff]  }
0x24ca   :  { %v23615_v26 = vpop.f32.mrb[71].mxu0  ;;  %v25077_v7 = vld [vmem:[%s28936_s1 + $0x1b8] sm:$0xff]  }
0x24e7   :  { %v23634_v34 = vpop.f32.mrb[72].mxu0 }
0x24e8   :  { %v15963_v5 = vpop.f32.mrb[73].mxu0 }
0x24e9   :  { %v23635_v12 = vpop.f32.mrb[74].mxu0 }
0x24ea   :  { %v15979_v4 = vpack.c.bf16 %v23635_v12, %v23634_v34  ;;  %v15966_v31 = vpop.f32.mrb[75].mxu0  ;;  %v16192_v34 = vpop.permute.xlu1 %16191 }
0x24eb   :  { %v15978_v0 = vpack.c.bf16 %v15966_v31, %v15963_v5 }
0x24ed   :  { %23637 = vmatpush3.bf16.msra.mxu1 %v15978_v0 }
0x24ee   :  { %23638 = vmatprep.subr.bf16.mxu1 %v28939_v32 }
0x24f1   :  { %23639 = vmatpush3.bf16.msra.mxu1 %v15979_v4 }
0x24f2   :  { %23644 = vmatprep.subr.bf16.mxu1 %v25046_v15 }
0x24f4   :  { %23641 = vmatmul.mubr.msk.bf16.vlgmr.msra.gmra.mrb[96].mxu1 %vm764_vm4, %v19750_v1 }
0x24f5   :  { %23645 = vmatpush3.bf16.msra.mxu1 %v25046_v15  ;;  %23660 = vmatprep.mubr.bf16.mxu1 %v28369_v60 }
0x24f6   :  { %23646 = vmatprep.subr.bf16.mxu1 %v25047_v25 }
0x24f9   :  { %23647 = vmatpush3.bf16.msra.mxu1 %v25047_v25 }
0x24fa   :  { %23648 = vmatprep.subr.bf16.mxu1 %v25048_v58 }
0x24fd   :  { %23649 = vmatpush3.bf16.msra.mxu1 %v25048_v58 }
0x24fe   :  { %23650 = vmatprep.subr.bf16.mxu1 %v25049_v53 }
0x2501   :  { %23651 = vmatpush3.bf16.msra.mxu1 %v25049_v53 }
0x2502   :  { %23652 = vmatprep.subr.bf16.mxu1 %v25050_v41 }
0x2505   :  { %23653 = vmatpush3.bf16.msra.mxu1 %v25050_v41 }
0x2506   :  { %23654 = vmatprep.subr.bf16.mxu1 %v25051_v22 }
0x2509   :  { %23655 = vmatpush3.bf16.msra.mxu1 %v25051_v22 }
0x250a   :  { %23656 = vmatprep.subr.bf16.mxu1 %v25052_v9 }
0x250d   :  { %23657 = vmatpush3.bf16.msra.mxu1 %v25052_v9 }
0x250e   :  { %23658 = vmatprep.subr.bf16.mxu1 %v25053_v44 }
0x2511   :  { %23659 = vmatpush3.bf16.msra.mxu1 %v25053_v44 }
0x2512   :  { %23692 = vmatprep.subr.bf16.mxu1 %v25054_v20 }
0x2514   :  { %23661 = vmatmul.mubr.bf16.vlgmr.msra.gmra.mrb[100].mxu1 %v28373_v28 }
0x2515   :  { %23693 = vmatpush3.bf16.msra.mxu1 %v25054_v20  ;;  %23708 = vmatprep.mubr.bf16.mxu1 %v28369_v60 }
0x2516   :  { %23694 = vmatprep.subr.bf16.mxu1 %v25055_v59 }
0x2519   :  { %23695 = vmatpush3.bf16.msra.mxu1 %v25055_v59 }
0x251a   :  { %23696 = vmatprep.subr.bf16.mxu1 %v25056_v24 }
0x251d   :  { %23697 = vmatpush3.bf16.msra.mxu1 %v25056_v24 }
0x251e   :  { %23698 = vmatprep.subr.bf16.mxu1 %v25057_v46 }
0x2521   :  { %23699 = vmatpush3.bf16.msra.mxu1 %v25057_v46 }
0x2522   :  { %23700 = vmatprep.subr.bf16.mxu1 %v25058_v57 }
0x2525   :  { %23701 = vmatpush3.bf16.msra.mxu1 %v25058_v57  ;;  %v19803_v57 = vld [vmem:[%s25404_s4 + $0x8] sm:$0x3] }
0x2526   :  { %23702 = vmatprep.subr.bf16.mxu1 %v25059_v39 }
0x2529   :  { %23703 = vmatpush3.bf16.msra.mxu1 %v25059_v39 }
0x252a   :  { %23704 = vmatprep.subr.bf16.mxu1 %v25060_v11 }
0x252d   :  { %23705 = vmatpush3.bf16.msra.mxu1 %v25060_v11 }
0x252e   :  { %23706 = vmatprep.subr.bf16.mxu1 %v25061_v50 }
0x2531   :  { %23707 = vmatpush3.bf16.msra.mxu1 %v25061_v50 }
0x2532   :  { %23720 = vmatprep.subr.bf16.mxu1 %v28939_v32 }
0x2534   :  { %23709 = vmatmul.mubr.bf16.vlgmr.msra.gmra.mrb[104].mxu1 %v28373_v28 }
0x2535   :  { %23724 = vmatprep.mubr.msk.bf16.mxu1 %vm25228_vm5, %v28939_v32 }
0x25c7   :  { %v16019_v14 = vpop.f32.mrb[96].mxu1 }
0x25c8   :  { %v28433_v51 = vadd.f32 %v16019_v14, %v28403_v45  ;;  %v23642_v16 = vpop.f32.mrb[97].mxu1  ;;  %v25075_v45 = vld [vmem:[%s28936_s1 + $0x1a8] sm:$0xff]  }
0x25c9   :  { %v16022_v17 = vpop.f32.mrb[98].mxu1  ;;  %v25078_v16 = vld [vmem:[%s28936_s1 + $0x1c0] sm:$0xff]  }
0x25ca   :  { %v23643_v33 = vpop.f32.mrb[99].mxu1  ;;  %v19855_v17 = vld [vmem:[%s25404_s4 + $0x18] sm:$0x3] }
0x25cb   :  { %v25079_v33 = vld [vmem:[%s28936_s1 + $0x1c8] sm:$0xff]  }
0x25e7   :  { %v23662_v37 = vpop.f32.mrb[100].mxu1 }
0x25e8   :  { %v16125_v61 = vpop.f32.mrb[101].mxu1 }
0x25e9   :  { %v23663_v56 = vpop.f32.mrb[102].mxu1 }
0x25ea   :  { %v16141_v52 = vpack.c.bf16 %v23663_v56, %v23662_v37  ;;  %v16128_v36 = vpop.f32.mrb[103].mxu1  ;;  %v25080_v37 = vld [vmem:[%s28936_s1 + $0x1d0] sm:$0xff]   ;;  %v25082_v56 = vld [vmem:[%s28936_s1 + $0x1e0] sm:$0xff]  }
0x25eb   :  { %v16140_v10 = vpack.c.bf16 %v16128_v36, %v16125_v61  ;;  %v25081_v61 = vld [vmem:[%s28936_s1 + $0x1d8] sm:$0xff]   ;;  %v25084_v36 = vld [vmem:[%s28936_s1 + $0x1f0] sm:$0xff]  }
0x25ed   :  { %23665 = vmatpush3.bf16.msra.mxu0 %v16140_v10  ;;  %v25085_v10 = vld [vmem:[%s28936_s1 + $0x1f8] sm:$0xff]  }
0x25ee   :  { %23666 = vmatprep.subr.bf16.mxu0 %v28939_v32 }
0x25f1   :  { %23667 = vmatpush3.bf16.msra.mxu0 %v16141_v52  ;;  %v25083_v52 = vld [vmem:[%s28936_s1 + $0x1e8] sm:$0xff]  }
0x25f2   :  { %23672 = vmatprep.subr.bf16.mxu0 %v25062_v54 }
0x25f4   :  { %23669 = vmatmul.mubr.msk.bf16.vlgmr.msra.gmra.mrb[76].mxu0 %vm764_vm4, %v19776_v55  ;;  %v25087_v55 = vld [vmem:[%s28936_s1 + $0x248] sm:$0xff]  }
0x25f5   :  { %23673 = vmatpush3.bf16.msra.mxu0 %v25062_v54  ;;  %23688 = vmatprep.mubr.bf16.mxu0 %v28369_v60  ;;  %v25086_v54 = vld [vmem:[%s28936_s1 + $0x240] sm:$0xff]  }
0x25f6   :  { %23674 = vmatprep.subr.bf16.mxu0 %v25063_v21 }
0x25f9   :  { %23675 = vmatpush3.bf16.msra.mxu0 %v25063_v21  ;;  %v25088_v21 = vld [vmem:[%s28936_s1 + $0x250] sm:$0xff]  }
0x25fa   :  { %23676 = vmatprep.subr.bf16.mxu0 %v25064_v42 }
0x25fd   :  { %23677 = vmatpush3.bf16.msra.mxu0 %v25064_v42  ;;  %v25089_v42 = vld [vmem:[%s28936_s1 + $0x258] sm:$0xff]  }
0x25fe   :  { %23678 = vmatprep.subr.bf16.mxu0 %v25065_v6 }
0x2601   :  { %23679 = vmatpush3.bf16.msra.mxu0 %v25065_v6  ;;  %v25090_v6 = vld [vmem:[%s28936_s1 + $0x260] sm:$0xff]  }
0x2602   :  { %23680 = vmatprep.subr.bf16.mxu0 %v25066_v2 }
0x2605   :  { %23681 = vmatpush3.bf16.msra.mxu0 %v25066_v2  ;;  %v25091_v2 = vld [vmem:[%s28936_s1 + $0x268] sm:$0xff]  }
0x2606   :  { %23682 = vmatprep.subr.bf16.mxu0 %v25067_v48 }
0x2607   :  { %v23710_v63 = vpop.f32.mrb[104].mxu1 }
0x2608   :  { %v16419_v18 = vpop.f32.mrb[105].mxu1 }
0x2609   :  { %23683 = vmatpush3.bf16.msra.mxu0 %v25067_v48  ;;  %v23711_v13 = vpop.f32.mrb[106].mxu1  ;;  %v25092_v48 = vld [vmem:[%s28936_s1 + $0x270] sm:$0xff]  }
0x260a   :  { %v16435_v35 = vpack.c.bf16 %v23711_v13, %v23710_v63  ;;  %v16422_v19 = vpop.f32.mrb[107].mxu1  ;;  %23684 = vmatprep.subr.bf16.mxu0 %v25068_v38 }
0x260b   :  { %v16434_v30 = vpack.c.bf16 %v16422_v19, %v16419_v18 }
0x260d   :  { %23685 = vmatpush3.bf16.msra.mxu0 %v25068_v38  ;;  %v25093_v38 = vld [vmem:[%s28936_s1 + $0x278] sm:$0xff]  }
0x260e   :  { %23686 = vmatprep.subr.bf16.mxu0 %v25069_v27 }
0x2611   :  { %23687 = vmatpush3.bf16.msra.mxu0 %v25069_v27  ;;  %v16848_v27 = vld [vmem:[%s25409_s6] sm:$0x7] }
0x2612   :  { %23712 = vmatprep.subr.bf16.mxu0 %v28939_v32  ;;  %16851 = vperm.xlu1 %24451, %v16848_v27  }
0x2614   :  { %23689 = vmatmul.mubr.bf16.vlgmr.msra.gmra.mrb[80].mxu0 %v28373_v28 }
0x2615   :  { %23713 = vmatpush3.bf16.msra.mxu0 %v16434_v30  ;;  %23716 = vmatprep.mubr.msk.bf16.mxu0 %vm25228_vm5, %v28939_v32 }
0x2616   :  { %23714 = vmatprep.subr.bf16.mxu0 %v28939_v32 }
0x2619   :  { %23715 = vmatpush3.bf16.msra.mxu0 %v16435_v35 }
0x261a   :  { %23728 = vmatprep.subr.bf16.mxu0 %v25070_v8 }
0x261c   :  { %23717 = vmatmul.mubr.msk.bf16.vlgmr.msra.gmra.mrb[84].mxu0 %vm764_vm4, %v19828_v29 }
0x261d   :  { %23729 = vmatpush3.bf16.msra.mxu0 %v25070_v8  ;;  %23744 = vmatprep.mubr.bf16.mxu0 %v28369_v60 }
0x261e   :  { %23730 = vmatprep.subr.bf16.mxu0 %v25071_v23 }
0x2621   :  { %23731 = vmatpush3.bf16.msra.mxu0 %v25071_v23 }
0x2622   :  { %23732 = vmatprep.subr.bf16.mxu0 %v25072_v62 }
0x2625   :  { %23733 = vmatpush3.bf16.msra.mxu0 %v25072_v62 }
0x2626   :  { %23734 = vmatprep.subr.bf16.mxu0 %v25073_v40 }
0x2629   :  { %23735 = vmatpush3.bf16.msra.mxu0 %v25073_v40 }
0x262a   :  { %23736 = vmatprep.subr.bf16.mxu0 %v25074_v43 }
0x262d   :  { %23737 = vmatpush3.bf16.msra.mxu0 %v25074_v43 }
0x262e   :  { %23738 = vmatprep.subr.bf16.mxu0 %v25075_v45 }
0x2631   :  { %23739 = vmatpush3.bf16.msra.mxu0 %v25075_v45 }
0x2632   :  { %23740 = vmatprep.subr.bf16.mxu0 %v25076_v3 }
0x2635   :  { %23741 = vmatpush3.bf16.msra.mxu0 %v25076_v3 }
0x2636   :  { %23742 = vmatprep.subr.bf16.mxu0 %v25077_v7 }
0x2639   :  { %23743 = vmatpush3.bf16.msra.mxu0 %v25077_v7 }
0x263a   :  { %23776 = vmatprep.subr.bf16.mxu0 %v28939_v32 }
0x263c   :  { %23745 = vmatmul.mubr.bf16.vlgmr.msra.gmra.mrb[88].mxu0 %v28373_v28 }
0x263d   :  { %23780 = vmatprep.mubr.msk.bf16.mxu0 %vm25228_vm5, %v28939_v32 }
0x26c7   :  { %v16181_v26 = vpop.f32.mrb[76].mxu0 }
0x26c8   :  { %v16187_v5 = vadd.f32 %v16181_v26, %v28433_v51  ;;  %v23670_v12 = vpop.f32.mrb[77].mxu0 }
0x26c9   :  { %v16184_v4 = vpop.f32.mrb[78].mxu0  ;;  %v25095_v12 = vld [vmem:[%s28936_s1 + $0x208] sm:$0xff]  }
0x26ca   :  { %v16194_v31 = vadd.f32 %v16192_v34, %v16187_v5  ;;  %v23671_v0 = vpop.f32.mrb[79].mxu0  ;;  %v25094_v34 = vld [vmem:[%s28936_s1 + $0x200] sm:$0xff]   ;;  %v19881_v5 = vld [vmem:[%s25404_s4 + $0x1c] sm:$0x3]  ;;  %v25096_v4 = vld [vmem:[%s28936_s1 + $0x210] sm:$0xff]  }
0x26cb   :  { %v25098_v0 = vld [vmem:[%s28936_s1 + $0x220] sm:$0xff]  }
0x26cc   :  { %v19778_v15 = vmul.f32 -1.442695, %v16194_v31  ;;  %v25097_v31 = vld [vmem:[%s28936_s1 + $0x218] sm:$0xff]  }
0x26ce   :  { %25150 = vpow2.f32 %v19778_v15  ;;  %v25099_v15 = vld [vmem:[%s28936_s1 + $0x228] sm:$0xff]  }
0x26d8   :  { %v25151_v1 = vpop.eup %25150 }
0x26d9   :  { %v16198_v25 = vadd.f32 1.0, %v25151_v1  ;;  %v25100_v1 = vld [vmem:[%s28936_s1 + $0x230] sm:$0xff]  }
0x26db   :  { %25152 = vrcp.f32 %v16198_v25 }
0x26e5   :  { %v25153_v58 = vpop.eup %25152 }
0x26e6   :  { %16201 = vst [vmem:[%s25414_s20] sm:$0x7] %v25153_v58 }
0x26e7   :  { %v23690_v53 = vpop.f32.mrb[80].mxu0 }
0x26e8   :  { %v16301_v41 = vpop.f32.mrb[81].mxu0 }
0x26e9   :  { %v23691_v22 = vpop.f32.mrb[82].mxu0 }
0x26ea   :  { %v16317_v9 = vpack.c.bf16 %v23691_v22, %v23690_v53  ;;  %v16304_v44 = vpop.f32.mrb[83].mxu0 }
0x26eb   :  { %v16316_v20 = vpack.c.bf16 %v16304_v44, %v16301_v41 }
0x26ed   :  { %23721 = vmatpush3.bf16.msra.mxu1 %v16316_v20  ;;  %v25102_v20 = vld [vmem:[%s28936_s1 + $0x280] sm:$0xff]  }
0x26ee   :  { %23722 = vmatprep.subr.bf16.mxu1 %v28939_v32 }
0x26ef   :  { %v28470_v59 = vpop.f32.mrb[84].mxu0 }
0x26f0   :  { %v23718_v24 = vpop.f32.mrb[85].mxu0 }
0x26f1   :  { %23723 = vmatpush3.bf16.msra.mxu1 %v16317_v9  ;;  %v16478_v46 = vpop.f32.mrb[86].mxu0  ;;  %v25101_v9 = vld [vmem:[%s28936_s1 + $0x238] sm:$0xff]   ;;  %v25103_v24 = vld [vmem:[%s28936_s1 + $0x288] sm:$0xff]  }
0x26f2   :  { %v23719_v39 = vpop.f32.mrb[87].mxu0  ;;  %23748 = vmatprep.subr.bf16.mxu1 %v28939_v32  ;;  %v25104_v46 = vld [vmem:[%s28936_s1 + $0x290] sm:$0xff]  }
0x26f3   :  { %v25106_v39 = vld [vmem:[%s28936_s1 + $0x2a0] sm:$0xff]  }
0x26f4   :  { %23725 = vmatmul.mubr.msk.bf16.vlgmr.msra.gmra.mrb[108].mxu1 %vm764_vm4, %v19803_v57  ;;  %v25105_v57 = vld [vmem:[%s28936_s1 + $0x298] sm:$0xff]  }
0x26f5   :  { %23752 = vmatprep.mubr.msk.bf16.mxu1 %vm25228_vm5, %v28939_v32 }
0x270f   :  { %v23746_v11 = vpop.f32.mrb[88].mxu0 }
0x2710   :  { %v16623_v50 = vpop.f32.mrb[89].mxu0 }
0x2711   :  { %v23747_v47 = vpop.f32.mrb[90].mxu0 }
0x2712   :  { %v16639_v49 = vpack.c.bf16 %v23747_v47, %v23746_v11  ;;  %v16626_v14 = vpop.f32.mrb[91].mxu0  ;;  %v25107_v11 = vld [vmem:[%s28936_s1 + $0x2a8] sm:$0xff]   ;;  %v25109_v47 = vld [vmem:[%s28936_s1 + $0x2b8] sm:$0xff]  }
0x2713   :  { %v16638_v51 = vpack.c.bf16 %v16626_v14, %v16623_v50  ;;  %v25108_v50 = vld [vmem:[%s28936_s1 + $0x2b0] sm:$0xff]   ;;  %v16852_v14 = vpop.permute.xlu1 %16851 }
0x2715   :  { %23749 = vmatpush3.bf16.msra.mxu1 %v16638_v51 }
0x2716   :  { %23750 = vmatprep.subr.bf16.mxu1 %v28939_v32 }
0x2719   :  { %23751 = vmatpush3.bf16.msra.mxu1 %v16639_v49 }
0x271a   :  { %23756 = vmatprep.subr.bf16.mxu1 %v25078_v16 }
0x271c   :  { %23753 = vmatmul.mubr.msk.bf16.vlgmr.msra.gmra.mrb[112].mxu1 %vm764_vm4, %v19855_v17 }
0x271d   :  { %23757 = vmatpush3.bf16.msra.mxu1 %v25078_v16  ;;  %23772 = vmatprep.mubr.bf16.mxu1 %v28369_v60 }
0x271e   :  { %23758 = vmatprep.subr.bf16.mxu1 %v25079_v33 }
0x2721   :  { %23759 = vmatpush3.bf16.msra.mxu1 %v25079_v33 }
0x2722   :  { %23760 = vmatprep.subr.bf16.mxu1 %v25080_v37 }
0x2725   :  { %23761 = vmatpush3.bf16.msra.mxu1 %v25080_v37 }
0x2726   :  { %23762 = vmatprep.subr.bf16.mxu1 %v25081_v61 }
0x2729   :  { %23763 = vmatpush3.bf16.msra.mxu1 %v25081_v61 }
0x272a   :  { %23764 = vmatprep.subr.bf16.mxu1 %v25082_v56 }
0x272d   :  { %23765 = vmatpush3.bf16.msra.mxu1 %v25082_v56 }
0x272e   :  { %23766 = vmatprep.subr.bf16.mxu1 %v25083_v52 }
0x2731   :  { %23767 = vmatpush3.bf16.msra.mxu1 %v25083_v52 }
0x2732   :  { %23768 = vmatprep.subr.bf16.mxu1 %v25084_v36 }
0x2735   :  { %23769 = vmatpush3.bf16.msra.mxu1 %v25084_v36 }
0x2736   :  { %23770 = vmatprep.subr.bf16.mxu1 %v25085_v10 }
0x2739   :  { %23771 = vmatpush3.bf16.msra.mxu1 %v25085_v10 }
0x273a   :  { %23804 = vmatprep.subr.bf16.mxu1 %v25086_v54 }
0x273c   :  { %23773 = vmatmul.mubr.bf16.vlgmr.msra.gmra.mrb[116].mxu1 %v28373_v28 }
0x273d   :  { %23805 = vmatpush3.bf16.msra.mxu1 %v25086_v54  ;;  %23820 = vmatprep.mubr.bf16.mxu1 %v28369_v60 }
0x273e   :  { %23806 = vmatprep.subr.bf16.mxu1 %v25087_v55 }
0x2741   :  { %23807 = vmatpush3.bf16.msra.mxu1 %v25087_v55 }
0x2742   :  { %23808 = vmatprep.subr.bf16.mxu1 %v25088_v21 }
0x2745   :  { %23809 = vmatpush3.bf16.msra.mxu1 %v25088_v21 }
0x2746   :  { %23810 = vmatprep.subr.bf16.mxu1 %v25089_v42 }
0x2749   :  { %23811 = vmatpush3.bf16.msra.mxu1 %v25089_v42 }
0x274a   :  { %23812 = vmatprep.subr.bf16.mxu1 %v25090_v6 }
0x274d   :  { %23813 = vmatpush3.bf16.msra.mxu1 %v25090_v6 }
0x274e   :  { %23814 = vmatprep.subr.bf16.mxu1 %v25091_v2 }
0x2751   :  { %23815 = vmatpush3.bf16.msra.mxu1 %v25091_v2 }
0x2752   :  { %23816 = vmatprep.subr.bf16.mxu1 %v25092_v48 }
0x2755   :  { %23817 = vmatpush3.bf16.msra.mxu1 %v25092_v48 }
0x2756   :  { %23818 = vmatprep.subr.bf16.mxu1 %v25093_v38 }
0x2759   :  { %23819 = vmatpush3.bf16.msra.mxu1 %v25093_v38 }
0x275a   :  { %23832 = vmatprep.subr.bf16.mxu1 %v28939_v32 }
0x275c   :  { %23821 = vmatmul.mubr.bf16.vlgmr.msra.gmra.mrb[120].mxu1 %v28373_v28 }
0x275d   :  { %23836 = vmatprep.mubr.msk.bf16.mxu1 %vm25228_vm5, %v28939_v32 }
0x27c7   :  { %v16518_v63 = vpop.f32.mrb[108].mxu1 }
0x27c8   :  { %v16519_v18 = vadd.f32 %v16518_v63, %v28470_v59  ;;  %v23726_v13 = vpop.f32.mrb[109].mxu1  ;;  %v19933_v59 = vld [vmem:[%s25404_s4 + $0x6] sm:$0x3]  ;;  %v19908_v63 = vld [vmem:[%s25404_s4 + $0x2] sm:$0x3] }
0x27c9   :  { %v16521_v35 = vpop.f32.mrb[110].mxu1 }
0x27ca   :  { %v23727_v19 = vpop.f32.mrb[111].mxu1 }
0x27ef   :  { %v16679_v30 = vpop.f32.mrb[112].mxu1 }
0x27f0   :  { %v28505_v8 = vadd.f32 %v16679_v30, %v16519_v18  ;;  %v23754_v29 = vpop.f32.mrb[113].mxu1 }
0x27f1   :  { %v16682_v23 = vpop.f32.mrb[114].mxu1  ;;  %v25110_v29 = vld [vmem:[%s28936_s1 + $0x2c0] sm:$0xff]  }
0x27f2   :  { %v23755_v62 = vpop.f32.mrb[115].mxu1  ;;  %v19960_v23 = vld [vmem:[%s25404_s4 + $0x12] sm:$0x3] }
0x27f3   :  { %v25111_v62 = vld [vmem:[%s28936_s1 + $0x2c8] sm:$0xff]  }
0x280f   :  { %v23774_v40 = vpop.f32.mrb[116].mxu1 }
0x2810   :  { %v16785_v43 = vpop.f32.mrb[117].mxu1 }
0x2811   :  { %v23775_v45 = vpop.f32.mrb[118].mxu1 }
0x2812   :  { %v16801_v3 = vpack.c.bf16 %v23775_v45, %v23774_v40  ;;  %v16788_v7 = vpop.f32.mrb[119].mxu1  ;;  %v25112_v40 = vld [vmem:[%s28936_s1 + $0x2d0] sm:$0xff]   ;;  %v25114_v45 = vld [vmem:[%s28936_s1 + $0x2e0] sm:$0xff]  }
0x2813   :  { %v16800_v26 = vpack.c.bf16 %v16788_v7, %v16785_v43  ;;  %v25113_v43 = vld [vmem:[%s28936_s1 + $0x2d8] sm:$0xff]   ;;  %v25116_v7 = vld [vmem:[%s28936_s1 + $0x2f0] sm:$0xff]  }
0x2815   :  { %23777 = vmatpush3.bf16.msra.mxu0 %v16800_v26  ;;  %v25117_v26 = vld [vmem:[%s28936_s1 + $0x2f8] sm:$0xff]  }
0x2816   :  { %23778 = vmatprep.subr.bf16.mxu0 %v28939_v32 }
0x2819   :  { %23779 = vmatpush3.bf16.msra.mxu0 %v16801_v3  ;;  %v25115_v3 = vld [vmem:[%s28936_s1 + $0x2e8] sm:$0xff]  }
0x281a   :  { %23784 = vmatprep.subr.bf16.mxu0 %v25094_v34 }
0x281c   :  { %23781 = vmatmul.mubr.msk.bf16.vlgmr.msra.gmra.mrb[92].mxu0 %vm764_vm4, %v19881_v5  ;;  %v25119_v5 = vld [vmem:[%s28936_s1 + $0x348] sm:$0xff]  }
0x281d   :  { %23785 = vmatpush3.bf16.msra.mxu0 %v25094_v34  ;;  %23800 = vmatprep.mubr.bf16.mxu0 %v28369_v60  ;;  %v25118_v34 = vld [vmem:[%s28936_s1 + $0x340] sm:$0xff]  }
0x281e   :  { %23786 = vmatprep.subr.bf16.mxu0 %v25095_v12 }
0x2821   :  { %23787 = vmatpush3.bf16.msra.mxu0 %v25095_v12  ;;  %v25120_v12 = vld [vmem:[%s28936_s1 + $0x350] sm:$0xff]  }
0x2822   :  { %23788 = vmatprep.subr.bf16.mxu0 %v25096_v4 }
0x2825   :  { %23789 = vmatpush3.bf16.msra.mxu0 %v25096_v4  ;;  %v25121_v4 = vld [vmem:[%s28936_s1 + $0x358] sm:$0xff]  }
0x2826   :  { %23790 = vmatprep.subr.bf16.mxu0 %v25097_v31 }
0x2829   :  { %23791 = vmatpush3.bf16.msra.mxu0 %v25097_v31  ;;  %v25122_v31 = vld [vmem:[%s28936_s1 + $0x360] sm:$0xff]  }
0x282a   :  { %23792 = vmatprep.subr.bf16.mxu0 %v25098_v0 }
0x282d   :  { %23793 = vmatpush3.bf16.msra.mxu0 %v25098_v0  ;;  %v25123_v0 = vld [vmem:[%s28936_s1 + $0x368] sm:$0xff]  }
0x282e   :  { %23794 = vmatprep.subr.bf16.mxu0 %v25099_v15 }
0x282f   :  { %v23822_v25 = vpop.f32.mrb[120].mxu1 }
0x2830   :  { %v17079_v58 = vpop.f32.mrb[121].mxu1 }
0x2831   :  { %23795 = vmatpush3.bf16.msra.mxu0 %v25099_v15  ;;  %v23823_v53 = vpop.f32.mrb[122].mxu1  ;;  %v25124_v15 = vld [vmem:[%s28936_s1 + $0x370] sm:$0xff]  }
0x2832   :  { %v17095_v41 = vpack.c.bf16 %v23823_v53, %v23822_v25  ;;  %v17082_v22 = vpop.f32.mrb[123].mxu1  ;;  %23796 = vmatprep.subr.bf16.mxu0 %v25100_v1 }
0x2833   :  { %v17094_v44 = vpack.c.bf16 %v17082_v22, %v17079_v58 }
0x2835   :  { %23797 = vmatpush3.bf16.msra.mxu0 %v25100_v1  ;;  %v25125_v1 = vld [vmem:[%s28936_s1 + $0x378] sm:$0xff]  }
0x2836   :  { %23798 = vmatprep.subr.bf16.mxu0 %v25101_v9 }
0x2839   :  { %23799 = vmatpush3.bf16.msra.mxu0 %v25101_v9  ;;  %v17508_v9 = vld [vmem:[%s25409_s6] sm:$0x7] }
0x283a   :  { %23824 = vmatprep.subr.bf16.mxu0 %v28939_v32  ;;  %17511 = vperm.xlu1 %24451, %v17508_v9  }
0x283c   :  { %23801 = vmatmul.mubr.bf16.vlgmr.msra.gmra.mrb[96].mxu0 %v28373_v28 }
0x283d   :  { %23825 = vmatpush3.bf16.msra.mxu0 %v17094_v44  ;;  %23828 = vmatprep.mubr.msk.bf16.mxu0 %vm25228_vm5, %v28939_v32 }
0x283e   :  { %23826 = vmatprep.subr.bf16.mxu0 %v28939_v32 }
0x2841   :  { %23827 = vmatpush3.bf16.msra.mxu0 %v17095_v41 }
0x2842   :  { %23840 = vmatprep.subr.bf16.mxu0 %v25102_v20 }
0x2844   :  { %23829 = vmatmul.mubr.msk.bf16.vlgmr.msra.gmra.mrb[100].mxu0 %vm764_vm4, %v19933_v59 }
0x2845   :  { %23841 = vmatpush3.bf16.msra.mxu0 %v25102_v20  ;;  %23856 = vmatprep.mubr.bf16.mxu0 %v28369_v60 }
0x2846   :  { %23842 = vmatprep.subr.bf16.mxu0 %v25103_v24 }
0x2849   :  { %23843 = vmatpush3.bf16.msra.mxu0 %v25103_v24 }
0x284a   :  { %23844 = vmatprep.subr.bf16.mxu0 %v25104_v46 }
0x284d   :  { %23845 = vmatpush3.bf16.msra.mxu0 %v25104_v46 }
0x284e   :  { %23846 = vmatprep.subr.bf16.mxu0 %v25105_v57 }
0x2851   :  { %23847 = vmatpush3.bf16.msra.mxu0 %v25105_v57 }
0x2852   :  { %23848 = vmatprep.subr.bf16.mxu0 %v25106_v39 }
0x2855   :  { %23849 = vmatpush3.bf16.msra.mxu0 %v25106_v39 }
0x2856   :  { %23850 = vmatprep.subr.bf16.mxu0 %v25107_v11 }
0x2859   :  { %23851 = vmatpush3.bf16.msra.mxu0 %v25107_v11 }
0x285a   :  { %23852 = vmatprep.subr.bf16.mxu0 %v25108_v50 }
0x285d   :  { %23853 = vmatpush3.bf16.msra.mxu0 %v25108_v50 }
0x285e   :  { %23854 = vmatprep.subr.bf16.mxu0 %v25109_v47 }
0x2861   :  { %23855 = vmatpush3.bf16.msra.mxu0 %v25109_v47 }
0x2862   :  { %23888 = vmatprep.subr.bf16.mxu0 %v28939_v32 }
0x2864   :  { %23857 = vmatmul.mubr.bf16.vlgmr.msra.gmra.mrb[104].mxu0 %v28373_v28 }
0x2865   :  { %23892 = vmatprep.mubr.msk.bf16.mxu0 %vm25228_vm5, %v28939_v32 }
0x28ef   :  { %v16841_v49 = vpop.f32.mrb[92].mxu0 }
0x28f0   :  { %v16847_v51 = vadd.f32 %v16841_v49, %v28505_v8  ;;  %v23782_v16 = vpop.f32.mrb[93].mxu0 }
0x28f1   :  { %v16844_v17 = vpop.f32.mrb[94].mxu0  ;;  %v25127_v16 = vld [vmem:[%s28936_s1 + $0x308] sm:$0xff]  }
0x28f2   :  { %v16854_v33 = vadd.f32 %v16852_v14, %v16847_v51  ;;  %v23783_v37 = vpop.f32.mrb[95].mxu0  ;;  %v25126_v14 = vld [vmem:[%s28936_s1 + $0x300] sm:$0xff]   ;;  %v19986_v51 = vld [vmem:[%s25404_s4 + $0x16] sm:$0x3] }
0x28f3   :  { %v25128_v17 = vld [vmem:[%s28936_s1 + $0x310] sm:$0xff]   ;;  %v25130_v37 = vld [vmem:[%s28936_s1 + $0x320] sm:$0xff]  }
0x28f4   :  { %v19883_v61 = vmul.f32 -1.442695, %v16854_v33  ;;  %v25129_v33 = vld [vmem:[%s28936_s1 + $0x318] sm:$0xff]  }
0x28f6   :  { %25154 = vpow2.f32 %v19883_v61  ;;  %v25131_v61 = vld [vmem:[%s28936_s1 + $0x328] sm:$0xff]  }
0x2900   :  { %v25155_v56 = vpop.eup %25154 }
0x2901   :  { %v16858_v52 = vadd.f32 1.0, %v25155_v56  ;;  %v25132_v56 = vld [vmem:[%s28936_s1 + $0x330] sm:$0xff]  }
0x2903   :  { %25156 = vrcp.f32 %v16858_v52 }
0x290d   :  { %v25157_v36 = vpop.eup %25156 }
0x290e   :  { %16861 = vst [vmem:[%s25414_s20 + $0x4] sm:$0x7] %v25157_v36 }
0x290f   :  { %v23802_v10 = vpop.f32.mrb[96].mxu0 }
0x2910   :  { %v16961_v54 = vpop.f32.mrb[97].mxu0 }
0x2911   :  { %v23803_v55 = vpop.f32.mrb[98].mxu0 }
0x2912   :  { %v16977_v21 = vpack.c.bf16 %v23803_v55, %v23802_v10  ;;  %v16964_v42 = vpop.f32.mrb[99].mxu0 }
0x2913   :  { %v16976_v6 = vpack.c.bf16 %v16964_v42, %v16961_v54 }
0x2915   :  { %23833 = vmatpush3.bf16.msra.mxu1 %v16976_v6  ;;  %v25134_v6 = vld [vmem:[%s28936_s1 + $0x380] sm:$0xff]  }
0x2916   :  { %23834 = vmatprep.subr.bf16.mxu1 %v28939_v32 }
0x2917   :  { %v28542_v2 = vpop.f32.mrb[100].mxu0 }
0x2918   :  { %v23830_v48 = vpop.f32.mrb[101].mxu0 }
0x2919   :  { %23835 = vmatpush3.bf16.msra.mxu1 %v16977_v21  ;;  %v17138_v38 = vpop.f32.mrb[102].mxu0  ;;  %v25133_v21 = vld [vmem:[%s28936_s1 + $0x338] sm:$0xff]   ;;  %v25135_v48 = vld [vmem:[%s28936_s1 + $0x388] sm:$0xff]  }
0x291a   :  { %v23831_v18 = vpop.f32.mrb[103].mxu0  ;;  %23860 = vmatprep.subr.bf16.mxu1 %v28939_v32  ;;  %v25136_v38 = vld [vmem:[%s28936_s1 + $0x390] sm:$0xff]  }
0x291b   :  { %v25138_v18 = vld [vmem:[%s28936_s1 + $0x3a0] sm:$0xff]  }
0x291c   :  { %23837 = vmatmul.mubr.msk.bf16.vlgmr.msra.gmra.mrb[124].mxu1 %vm764_vm4, %v19908_v63  ;;  %v25137_v63 = vld [vmem:[%s28936_s1 + $0x398] sm:$0xff]  }
0x291d   :  { %23864 = vmatprep.mubr.msk.bf16.mxu1 %vm25228_vm5, %v28939_v32 }
0x2937   :  { %v23858_v13 = vpop.f32.mrb[104].mxu0 }
0x2938   :  { %v17283_v35 = vpop.f32.mrb[105].mxu0 }
0x2939   :  { %v23859_v19 = vpop.f32.mrb[106].mxu0 }
0x293a   :  { %v17299_v27 = vpack.c.bf16 %v23859_v19, %v23858_v13  ;;  %v17286_v30 = vpop.f32.mrb[107].mxu0  ;;  %v25139_v13 = vld [vmem:[%s28936_s1 + $0x3a8] sm:$0xff]   ;;  %v25141_v19 = vld [vmem:[%s28936_s1 + $0x3b8] sm:$0xff]  }
0x293b   :  { %v17298_v8 = vpack.c.bf16 %v17286_v30, %v17283_v35  ;;  %v25140_v35 = vld [vmem:[%s28936_s1 + $0x3b0] sm:$0xff]   ;;  %v17512_v30 = vpop.permute.xlu1 %17511 }
0x293d   :  { %23861 = vmatpush3.bf16.msra.mxu1 %v17298_v8 }
0x293e   :  { %23862 = vmatprep.subr.bf16.mxu1 %v28939_v32 }
0x2941   :  { %23863 = vmatpush3.bf16.msra.mxu1 %v17299_v27 }
0x2942   :  { %23868 = vmatprep.subr.bf16.mxu1 %v25110_v29 }
0x2944   :  { %23865 = vmatmul.mubr.msk.bf16.vlgmr.msra.gmra.mrb[128].mxu1 %vm764_vm4, %v19960_v23 }
0x2945   :  { %23869 = vmatpush3.bf16.msra.mxu1 %v25110_v29  ;;  %23884 = vmatprep.mubr.bf16.mxu1 %v28369_v60 }
0x2946   :  { %23870 = vmatprep.subr.bf16.mxu1 %v25111_v62 }
0x2949   :  { %23871 = vmatpush3.bf16.msra.mxu1 %v25111_v62 }
0x294a   :  { %23872 = vmatprep.subr.bf16.mxu1 %v25112_v40 }
0x294d   :  { %23873 = vmatpush3.bf16.msra.mxu1 %v25112_v40 }
0x294e   :  { %23874 = vmatprep.subr.bf16.mxu1 %v25113_v43 }
0x2951   :  { %23875 = vmatpush3.bf16.msra.mxu1 %v25113_v43 }
0x2952   :  { %23876 = vmatprep.subr.bf16.mxu1 %v25114_v45 }
0x2955   :  { %23877 = vmatpush3.bf16.msra.mxu1 %v25114_v45 }
0x2956   :  { %23878 = vmatprep.subr.bf16.mxu1 %v25115_v3 }
0x2959   :  { %23879 = vmatpush3.bf16.msra.mxu1 %v25115_v3 }
0x295a   :  { %23880 = vmatprep.subr.bf16.mxu1 %v25116_v7 }
0x295d   :  { %23881 = vmatpush3.bf16.msra.mxu1 %v25116_v7 }
0x295e   :  { %23882 = vmatprep.subr.bf16.mxu1 %v25117_v26 }
0x2961   :  { %23883 = vmatpush3.bf16.msra.mxu1 %v25117_v26 }
0x2962   :  { %23916 = vmatprep.subr.bf16.mxu1 %v25118_v34 }
0x2964   :  { %23885 = vmatmul.mubr.bf16.vlgmr.msra.gmra.mrb[136].mxu1 %v28373_v28 }
0x2965   :  { %23917 = vmatpush3.bf16.msra.mxu1 %v25118_v34  ;;  %23932 = vmatprep.mubr.bf16.mxu1 %v28369_v60 }
0x2966   :  { %23918 = vmatprep.subr.bf16.mxu1 %v25119_v5 }
0x2969   :  { %23919 = vmatpush3.bf16.msra.mxu1 %v25119_v5 }
0x296a   :  { %23920 = vmatprep.subr.bf16.mxu1 %v25120_v12 }
0x296d   :  { %23921 = vmatpush3.bf16.msra.mxu1 %v25120_v12 }
0x296e   :  { %23922 = vmatprep.subr.bf16.mxu1 %v25121_v4 }
0x2971   :  { %23923 = vmatpush3.bf16.msra.mxu1 %v25121_v4 }
0x2972   :  { %23924 = vmatprep.subr.bf16.mxu1 %v25122_v31 }
0x2975   :  { %23925 = vmatpush3.bf16.msra.mxu1 %v25122_v31 }
0x2976   :  { %23926 = vmatprep.subr.bf16.mxu1 %v25123_v0 }
0x2979   :  { %23927 = vmatpush3.bf16.msra.mxu1 %v25123_v0 }
0x297a   :  { %23928 = vmatprep.subr.bf16.mxu1 %v25124_v15 }
0x297d   :  { %23929 = vmatpush3.bf16.msra.mxu1 %v25124_v15 }
0x297e   :  { %23930 = vmatprep.subr.bf16.mxu1 %v25125_v1 }
0x2981   :  { %23931 = vmatpush3.bf16.msra.mxu1 %v25125_v1 }
0x2982   :  { %23944 = vmatprep.subr.bf16.mxu1 %v28939_v32 }
0x2984   :  { %23933 = vmatmul.mubr.bf16.vlgmr.msra.gmra.mrb[140].mxu1 %v28373_v28 }
0x2985   :  { %23948 = vmatprep.mubr.msk.bf16.mxu1 %vm25228_vm5, %v28939_v32 }
0x29ef   :  { %v17178_v25 = vpop.f32.mrb[124].mxu1 }
0x29f0   :  { %v17179_v58 = vadd.f32 %v17178_v25, %v28542_v2  ;;  %v23838_v53 = vpop.f32.mrb[125].mxu1  ;;  %v20037_v2 = vld [vmem:[%s25404_s4 + $0x4] sm:$0x3]  ;;  %v17638_v25 = vld [vmem:[%s25404_s4] sm:$0x3] }
0x29f1   :  { %v17181_v41 = vpop.f32.mrb[126].mxu1 }
0x29f2   :  { %v23839_v22 = vpop.f32.mrb[127].mxu1 }
0x2a17   :  { %v17339_v44 = vpop.f32.mrb[128].mxu1 }
0x2a18   :  { %v28577_v20 = vadd.f32 %v17339_v44, %v17179_v58  ;;  %v23866_v59 = vpop.f32.mrb[129].mxu1 }
0x2a19   :  { %v17342_v24 = vpop.f32.mrb[130].mxu1  ;;  %v25142_v59 = vld [vmem:[%s28936_s1 + $0x3c0] sm:$0xff]  }
0x2a1a   :  { %v23867_v46 = vpop.f32.mrb[131].mxu1  ;;  %v20064_v24 = vld [vmem:[%s25404_s4 + $0x10] sm:$0x3] }
0x2a1b   :  { %v25143_v46 = vld [vmem:[%s28936_s1 + $0x3c8] sm:$0xff]  }
0x2a37   :  { %v23886_v57 = vpop.f32.mrb[136].mxu1 }
0x2a38   :  { %v17445_v39 = vpop.f32.mrb[137].mxu1 }
0x2a39   :  { %v23887_v11 = vpop.f32.mrb[138].mxu1 }
0x2a3a   :  { %v17461_v50 = vpack.c.bf16 %v23887_v11, %v23886_v57  ;;  %v17448_v47 = vpop.f32.mrb[139].mxu1  ;;  %v25144_v57 = vld [vmem:[%s28936_s1 + $0x3d0] sm:$0xff]   ;;  %v25146_v11 = vld [vmem:[%s28936_s1 + $0x3e0] sm:$0xff]  }
0x2a3b   :  { %v17460_v49 = vpack.c.bf16 %v17448_v47, %v17445_v39  ;;  %v25145_v39 = vld [vmem:[%s28936_s1 + $0x3d8] sm:$0xff]   ;;  %v25148_v47 = vld [vmem:[%s28936_s1 + $0x3f0] sm:$0xff]  }
0x2a3d   :  { %23889 = vmatpush3.bf16.msra.mxu0 %v17460_v49  ;;  %v25149_v49 = vld [vmem:[%s28936_s1 + $0x3f8] sm:$0xff]  }
0x2a3e   :  { %23890 = vmatprep.subr.bf16.mxu0 %v28939_v32 }
0x2a41   :  { %23891 = vmatpush3.bf16.msra.mxu0 %v17461_v50  ;;  %v25147_v50 = vld [vmem:[%s28936_s1 + $0x3e8] sm:$0xff]  }
0x2a42   :  { %23896 = vmatprep.subr.bf16.mxu0 %v25126_v14 }
0x2a44   :  { %23893 = vmatmul.mubr.msk.bf16.vlgmr.msra.gmra.mrb[108].mxu0 %vm764_vm4, %v19986_v51 }
0x2a45   :  { %23897 = vmatpush3.bf16.msra.mxu0 %v25126_v14  ;;  %23912 = vmatprep.mubr.bf16.mxu0 %v28369_v60 }
0x2a46   :  { %23898 = vmatprep.subr.bf16.mxu0 %v25127_v16 }
0x2a49   :  { %23899 = vmatpush3.bf16.msra.mxu0 %v25127_v16 }
0x2a4a   :  { %23900 = vmatprep.subr.bf16.mxu0 %v25128_v17 }
0x2a4d   :  { %23901 = vmatpush3.bf16.msra.mxu0 %v25128_v17 }
0x2a4e   :  { %23902 = vmatprep.subr.bf16.mxu0 %v25129_v33 }
0x2a51   :  { %23903 = vmatpush3.bf16.msra.mxu0 %v25129_v33 }
0x2a52   :  { %23904 = vmatprep.subr.bf16.mxu0 %v25130_v37 }
0x2a55   :  { %23905 = vmatpush3.bf16.msra.mxu0 %v25130_v37 }
0x2a56   :  { %23906 = vmatprep.subr.bf16.mxu0 %v25131_v61 }
0x2a57   :  { %v23934_v52 = vpop.f32.mrb[140].mxu1 }
0x2a58   :  { %v17738_v36 = vpop.f32.mrb[141].mxu1 }
0x2a59   :  { %23907 = vmatpush3.bf16.msra.mxu0 %v25131_v61  ;;  %v23935_v10 = vpop.f32.mrb[142].mxu1 }
0x2a5a   :  { %v17754_v54 = vpack.c.bf16 %v23935_v10, %v23934_v52  ;;  %v17741_v55 = vpop.f32.mrb[143].mxu1  ;;  %23908 = vmatprep.subr.bf16.mxu0 %v25132_v56 }
0x2a5b   :  { %v17753_v42 = vpack.c.bf16 %v17741_v55, %v17738_v36 }
0x2a5d   :  { %23909 = vmatpush3.bf16.msra.mxu0 %v25132_v56 }
0x2a5e   :  { %23910 = vmatprep.subr.bf16.mxu0 %v25133_v21 }
0x2a61   :  { %23911 = vmatpush3.bf16.msra.mxu0 %v25133_v21 }
0x2a62   :  { %23936 = vmatprep.subr.bf16.mxu0 %v28939_v32 }
0x2a64   :  { %23913 = vmatmul.mubr.bf16.vlgmr.msra.gmra.mrb[112].mxu0 %v28373_v28 }
0x2a65   :  { %23937 = vmatpush3.bf16.msra.mxu0 %v17753_v42  ;;  %23940 = vmatprep.mubr.msk.bf16.mxu0 %vm25228_vm5, %v28939_v32 }
0x2a66   :  { %23938 = vmatprep.subr.bf16.mxu0 %v28939_v32 }
0x2a69   :  { %23939 = vmatpush3.bf16.msra.mxu0 %v17754_v54 }
0x2a6a   :  { %23952 = vmatprep.subr.bf16.mxu0 %v25134_v6 }
0x2a6c   :  { %23941 = vmatmul.mubr.msk.bf16.vlgmr.msra.gmra.mrb[116].mxu0 %vm764_vm4, %v20037_v2 }
0x2a6d   :  { %23953 = vmatpush3.bf16.msra.mxu0 %v25134_v6  ;;  %23968 = vmatprep.mubr.bf16.mxu0 %v28369_v60 }
0x2a6e   :  { %23954 = vmatprep.subr.bf16.mxu0 %v25135_v48 }
0x2a71   :  { %23955 = vmatpush3.bf16.msra.mxu0 %v25135_v48 }
0x2a72   :  { %23956 = vmatprep.subr.bf16.mxu0 %v25136_v38 }
0x2a75   :  { %23957 = vmatpush3.bf16.msra.mxu0 %v25136_v38 }
0x2a76   :  { %23958 = vmatprep.subr.bf16.mxu0 %v25137_v63 }
0x2a79   :  { %23959 = vmatpush3.bf16.msra.mxu0 %v25137_v63 }
0x2a7a   :  { %23960 = vmatprep.subr.bf16.mxu0 %v25138_v18 }
0x2a7d   :  { %23961 = vmatpush3.bf16.msra.mxu0 %v25138_v18 }
0x2a7e   :  { %23962 = vmatprep.subr.bf16.mxu0 %v25139_v13 }
0x2a81   :  { %23963 = vmatpush3.bf16.msra.mxu0 %v25139_v13 }
0x2a82   :  { %23964 = vmatprep.subr.bf16.mxu0 %v25140_v35 }
0x2a85   :  { %23965 = vmatpush3.bf16.msra.mxu0 %v25140_v35 }
0x2a86   :  { %23966 = vmatprep.subr.bf16.mxu0 %v25141_v19 }
0x2a89   :  { %23967 = vmatpush3.bf16.msra.mxu0 %v25141_v19 }
0x2a8a   :  { %24000 = vmatprep.subr.bf16.mxu0 %v28939_v32 }
0x2a8c   :  { %23969 = vmatmul.mubr.bf16.vlgmr.msra.gmra.mrb[120].mxu0 %v28373_v28 }
0x2a8d   :  { %24004 = vmatprep.mubr.msk.bf16.mxu0 %vm25228_vm5, %v28939_v32 }
0x2b17   :  { %v17501_v27 = vpop.f32.mrb[108].mxu0 }
0x2b18   :  { %v17507_v8 = vadd.f32 %v17501_v27, %v28577_v20  ;;  %v23894_v29 = vpop.f32.mrb[109].mxu0 }
0x2b19   :  { %v17504_v23 = vpop.f32.mrb[110].mxu0 }
0x2b1a   :  { %v17514_v62 = vadd.f32 %v17512_v30, %v17507_v8  ;;  %v23895_v40 = vpop.f32.mrb[111].mxu0 }
0x2b1c   :  { %v19988_v43 = vmul.f32 -1.442695, %v17514_v62 }
0x2b1e   :  { %25158 = vpow2.f32 %v19988_v43 }
0x2b28   :  { %v25159_v45 = vpop.eup %25158 }
0x2b29   :  { %v17518_v3 = vadd.f32 1.0, %v25159_v45 }
0x2b2b   :  { %25160 = vrcp.f32 %v17518_v3 }
0x2b35   :  { %v25161_v7 = vpop.eup %25160 }
0x2b36   :  { %17521 = vst [vmem:[%s25414_s20 + $0x8] sm:$0x7] %v25161_v7 }
0x2b37   :  { %v23914_v26 = vpop.f32.mrb[112].mxu0 }
0x2b38   :  { %v17621_v34 = vpop.f32.mrb[113].mxu0 }
0x2b39   :  { %v23915_v5 = vpop.f32.mrb[114].mxu0 }
0x2b3a   :  { %v17637_v12 = vpack.c.bf16 %v23915_v5, %v23914_v26  ;;  %v17624_v4 = vpop.f32.mrb[115].mxu0 }
0x2b3b   :  { %v17636_v31 = vpack.c.bf16 %v17624_v4, %v17621_v34 }
0x2b3d   :  { %23945 = vmatpush3.bf16.msra.mxu1 %v17636_v31 }
0x2b3e   :  { %23946 = vmatprep.subr.bf16.mxu1 %v28939_v32 }
0x2b3f   :  { %v17794_v0 = vpop.f32.mrb[116].mxu0 }
0x2b40   :  { %v23942_v15 = vpop.f32.mrb[117].mxu0 }
0x2b41   :  { %23947 = vmatpush3.bf16.msra.mxu1 %v17637_v12  ;;  %v17797_v1 = vpop.f32.mrb[118].mxu0 }
0x2b42   :  { %v23943_v58 = vpop.f32.mrb[119].mxu0  ;;  %23972 = vmatprep.subr.bf16.mxu1 %v28939_v32 }
0x2b44   :  { %23949 = vmatmul.mubr.msk.bf16.vlgmr.msra.gmra.mrb[132].mxu1 %vm764_vm4, %v17638_v25 }
0x2b45   :  { %23976 = vmatprep.mubr.msk.bf16.mxu1 %vm25228_vm5, %v28939_v32 }
0x2b5f   :  { %v23970_v53 = vpop.f32.mrb[120].mxu0 }
0x2b60   :  { %v17942_v41 = vpop.f32.mrb[121].mxu0 }
0x2b61   :  { %v23971_v22 = vpop.f32.mrb[122].mxu0 }
0x2b62   :  { %v17958_v9 = vpack.c.bf16 %v23971_v22, %v23970_v53  ;;  %v17945_v44 = vpop.f32.mrb[123].mxu0 }
0x2b63   :  { %v17957_v20 = vpack.c.bf16 %v17945_v44, %v17942_v41 }
0x2b65   :  { %23973 = vmatpush3.bf16.msra.mxu1 %v17957_v20 }
0x2b66   :  { %23974 = vmatprep.subr.bf16.mxu1 %v28939_v32 }
0x2b69   :  { %23975 = vmatpush3.bf16.msra.mxu1 %v17958_v9 }
0x2b6a   :  { %23980 = vmatprep.subr.bf16.mxu1 %v25142_v59 }
0x2b6c   :  { %23977 = vmatmul.mubr.msk.bf16.vlgmr.msra.gmra.mrb[144].mxu1 %vm764_vm4, %v20064_v24 }
0x2b6d   :  { %23981 = vmatpush3.bf16.msra.mxu1 %v25142_v59  ;;  %23996 = vmatprep.mubr.bf16.mxu1 %v28369_v60  ;;  %v18167_v60 = vld [vmem:[%s25409_s6] sm:$0x7]  ;;  %s25230_s6 = smov [#allocation2]  }
0x2b6e   :  { %23982 = vmatprep.subr.bf16.mxu1 %v25143_v46  ;;  %18170 = vperm.xlu1 %24451, %v18167_v60   ;;  %s18189_s10 = sshll.u32 %s25230_s6, 4  ;;  %s18190_s10 = int_to_ptr.vmem [resolvable:$true] %s18189_s10 }
0x2b6f   :  { %s25166_s11 = scalar_lea.vmem %s18190_s10, 32  ;;  %p25171_p1 = scmp.lt.s32.totalorder %s18190_s10, %s18190_s10 }
0x2b70   :  { %p25167_p0 = scmp.ne.s32.totalorder %s18190_s10, %s25166_s11  ;;  %p25172_p2 = scmp.lt.s32.totalorder %s25166_s11, %s25166_s11 }
0x2b71   :  { %23983 = vmatpush3.bf16.msra.mxu1 %v25143_v46 }
0x2b72   :  { %23984 = vmatprep.subr.bf16.mxu1 %v25144_v57  ;;  %p25173_p3 = por %p25172_p2, %p25171_p1 }
0x2b74   :  { %p25174_p4 = pnand %p25173_p3, %p25167_p0 }
0x2b75   :  { %23985 = vmatpush3.bf16.msra.mxu1 %v25144_v57 }
0x2b76   :  { %23986 = vmatprep.subr.bf16.mxu1 %v25145_v39 }
0x2b79   :  { %23987 = vmatpush3.bf16.msra.mxu1 %v25145_v39 }
0x2b7a   :  { %23988 = vmatprep.subr.bf16.mxu1 %v25146_v11 }
0x2b7d   :  { %23989 = vmatpush3.bf16.msra.mxu1 %v25146_v11 }
0x2b7e   :  { %23990 = vmatprep.subr.bf16.mxu1 %v25147_v50 }
0x2b81   :  { %23991 = vmatpush3.bf16.msra.mxu1 %v25147_v50 }
0x2b82   :  { %23992 = vmatprep.subr.bf16.mxu1 %v25148_v47 }
0x2b85   :  { %23993 = vmatpush3.bf16.msra.mxu1 %v25148_v47 }
0x2b86   :  { %23994 = vmatprep.subr.bf16.mxu1 %v25149_v49 }
0x2b89   :  { %23995 = vmatpush3.bf16.msra.mxu1 %v25149_v49 }
0x2b8c   :  { %23997 = vmatmul.mubr.bf16.vlgmr.msra.gmra.mrb[148].mxu1 %v28373_v28  ;;  %v20090_v28 = vld [vmem:[%s25404_s4 + $0x14] sm:$0x3] }
0x2c17   :  { %v17837_v14 = vpop.f32.mrb[132].mxu1 }
0x2c18   :  { %v17838_v51 = vadd.f32 %v17837_v14, %v17794_v0  ;;  %v23950_v16 = vpop.f32.mrb[133].mxu1 }
0x2c19   :  { %v17840_v17 = vpop.f32.mrb[134].mxu1 }
0x2c1a   :  { %v23951_v33 = vpop.f32.mrb[135].mxu1 }
0x2c3f   :  { %v17998_v37 = vpop.f32.mrb[144].mxu1 }
0x2c40   :  { %v18004_v61 = vadd.f32 %v17998_v37, %v17838_v51  ;;  %v23978_v56 = vpop.f32.mrb[145].mxu1 }
0x2c41   :  { %v18001_v52 = vpop.f32.mrb[146].mxu1 }
0x2c42   :  { %v23979_v36 = vpop.f32.mrb[147].mxu1 }
0x2c5f   :  { %v23998_v10 = vpop.f32.mrb[148].mxu1 }
0x2c60   :  { %v18104_v54 = vpop.f32.mrb[149].mxu1 }
0x2c61   :  { %v23999_v55 = vpop.f32.mrb[150].mxu1 }
0x2c62   :  { %v18120_v21 = vpack.c.bf16 %v23999_v55, %v23998_v10  ;;  %v18107_v42 = vpop.f32.mrb[151].mxu1 }
0x2c63   :  { %v18119_v6 = vpack.c.bf16 %v18107_v42, %v18104_v54 }
0x2c65   :  { %24001 = vmatpush3.bf16.msra.mxu0 %v18119_v6 }
0x2c66   :  { %24002 = vmatprep.subr.bf16.mxu0 %v28939_v32 }
0x2c69   :  { %24003 = vmatpush3.bf16.msra.mxu0 %v18120_v21 }
0x2c6c   :  { %24005 = vmatmul.mubr.msk.bf16.vlgmr.msra.gmra.mrb[124].mxu0 %vm764_vm4, %v20090_v28 }
0x2c6d   :  { %25177 = shalt.err (!%p25174_p4)
}
0x2c6e   :  { %s25178_s15 = scalar_lea.hbm %s25419_s27, 32 }
0x2c6f   :  { %p25179_p5 = scmp.ne.s32.totalorder %s25419_s27, %s25178_s15  ;;  %p25182_p6 = scmp.lt.u32.totalorder %s25178_s15, %s25419_s27 }
0x2c71   :  { %p25184_p7 = pnand %p25182_p6, %p25179_p5 }
0x2c73   :  { %25187 = shalt.err (!%p25184_p7)
}
0x2c74   :  { %18192 = dma.vmem_to_hbm [thread:$0]  %s18190_s10, 32, %s25419_s27, [#allocation3]   ;;  %v18171_v38 = vpop.permute.xlu1 %18170 }
0x2d3f   :  { %v18160_v32 = vpop.f32.mrb[124].mxu0 }
0x2d40   :  { %v18166_v2 = vadd.f32 %v18160_v32, %v18004_v61  ;;  %v24006_v48 = vpop.f32.mrb[125].mxu0 }
0x2d41   :  { %v18163_v63 = vpop.f32.mrb[126].mxu0 }
0x2d42   :  { %v18173_v18 = vadd.f32 %v18171_v38, %v18166_v2  ;;  %v24007_v13 = vpop.f32.mrb[127].mxu0 }
0x2d44   :  { %v20092_v35 = vmul.f32 -1.442695, %v18173_v18 }
0x2d46   :  { %25162 = vpow2.f32 %v20092_v35 }
0x2d50   :  { %v25163_v19 = vpop.eup %25162 }
0x2d51   :  { %v18177_v27 = vadd.f32 1.0, %v25163_v19 }
0x2d53   :  { %25164 = vrcp.f32 %v18177_v27 }
0x2d5d   :  { %v25165_v30 = vpop.eup %25164 }
0x2d5e   :  { %18180 = vst [vmem:[%s25414_s20 + $0xc] sm:$0x7] %v25165_v30 }
0x2d5f   :  { %25188 = dma.done.wait [#allocation3], 32  }
0x2d60   :  { %25189 = vsyncadd [#allocation3], 4294967264 }
0x2d61   :  { %18198 = vsyncpa [#allocation3], 1 }

</bundles_post_ra>
